<compile_context>
chip_gen: v5e
topology: v5e:2x2
jax: 0.10.0
libtpu: 0.0.40
codegen_flags: <defaults>
</compile_context>

<pallas_src>
import functools
import numpy as np

import jax
import jax.numpy as jnp
from jax.experimental import pallas as pl
from jax.experimental.pallas import tpu as pltpu

# Set to jnp.bfloat16 on v6e/v7x to feed the MXU bf16 operands (accumulation stays
# f32 via preferred_element_type).  None keeps full f32 (bit-compatible with the
# PyTorch module; also the right choice for v5e elementwise math).
MATMUL_DTYPE = None


def _cast(x, dt):
    return x if dt is None else x.astype(dt)


def _row_tile(rows, target=512):
    """Largest row tile <= target that divides `rows` and is a multiple of 8."""
    if rows <= target:
        return rows
    t = target - target % 8
    while t >= 8:
        if rows % t == 0:
            return t
        t -= 8
    return rows  # no multiple-of-8 divisor -> fall back to one full block


def _pick_window_batch(n_windows_total, n_windows_per_image, tokens_per_window,
                       max_rows=512):
    """Windows per grid step: divides the total window count and stays aligned
    with the per-image shift-mask period so one BlockSpec block covers it."""
    cap = max(1, max_rows // tokens_per_window)
    best = 1
    for wb in range(1, min(n_windows_per_image, cap) + 1):      # sub-image batches
        if n_windows_per_image % wb == 0:
            best = wb
    n_img = n_windows_total // n_windows_per_image
    k = 1
    while k <= n_img and n_windows_per_image * k <= cap:        # whole-image batches
        if n_img % k == 0:
            best = max(best, n_windows_per_image * k)
        k += 1
    return best


def _mosaic_params(semantics, vmem_bytes_estimate=None):
    """Only raise the scoped-VMEM limit when the working set actually needs it
    (not triggered at small shapes, so the default compile path is untouched)."""
    limit = None
    if vmem_bytes_estimate is not None and vmem_bytes_estimate > 24 * 1024 * 1024:
        limit = min(int(vmem_bytes_estimate * 5 // 4), 100 * 1024 * 1024)
    return pltpu.CompilerParams(dimension_semantics=semantics,
                                vmem_limit_bytes=limit)


# ---------------------------------------------------------------------------
# Kernel 1: LayerNorm (norm1, padded path only)
# ---------------------------------------------------------------------------
def _layernorm_kernel(x_ref, g_ref, b_ref, o_ref):
    x = x_ref[...]
    mean = jnp.mean(x, axis=-1, keepdims=True)
    var = jnp.mean((x - mean) ** 2, axis=-1, keepdims=True)      # biased (torch LN)
    y = (x - mean) * jax.lax.rsqrt(var + 1e-5)
    o_ref[...] = (y * g_ref[...] + b_ref[...]).astype(o_ref.dtype)


def layernorm(x2d, gamma, beta, *, row_tile=512):
    R, C = x2d.shape
    tr = _row_tile(R, row_tile)
    return pl.pallas_call(
        _layernorm_kernel,
        out_shape=jax.ShapeDtypeStruct((R, C), x2d.dtype),
        grid=(R // tr,),
        in_specs=[
            pl.BlockSpec((tr, C), lambda i: (i, 0)),
            pl.BlockSpec((1, C), lambda i: (0, 0)),
            pl.BlockSpec((1, C), lambda i: (0, 0)),
        ],
        out_specs=pl.BlockSpec((tr, C), lambda i: (i, 0)),
        compiler_params=_mosaic_params(("parallel",)),
    )(x2d, gamma.reshape(1, C), beta.reshape(1, C))


# ---------------------------------------------------------------------------
# Kernel 2: window multi-head attention (Wb windows per grid step),
#           optionally with LN1 fused at the front.
# ---------------------------------------------------------------------------
def _window_attn_kernel(x_ref, g_ref, b_ref, wq_ref, wk_ref, wv_ref,
                        bq_ref, bk_ref, bv_ref, wp_ref, bp_ref, bias_ref, o_ref,
                        *, num_heads, head_dim, apply_ln, matmul_dtype):
    wb, N, C = x_ref.shape
    D = head_dim
    T = wb * N
    x = x_ref[...].reshape(T, C)

    if apply_ln:                       # fused norm1 (no-padding path)
        mean = jnp.mean(x, axis=-1, keepdims=True)
        var = jnp.mean((x - mean) ** 2, axis=-1, keepdims=True)
        x = (x - mean) * jax.lax.rsqrt(var + 1e-5)
        x = x * g_ref[...] + b_ref[...]
    x = _cast(x, matmul_dtype)

    # Three lane-dense (T, C) x (C, C) projections (MXU-friendly, no 3C slicing).
    # Attention scale is pre-folded into Wq / bq outside the kernel.
    q = jnp.dot(x, wq_ref[...], preferred_element_type=jnp.float32) + bq_ref[...]
    k = jnp.dot(x, wk_ref[...], preferred_element_type=jnp.float32) + bk_ref[...]
    v = jnp.dot(x, wv_ref[...], preferred_element_type=jnp.float32) + bv_ref[...]

    out = jnp.zeros((T, C), jnp.float32)
    for h in range(num_heads):         # static unroll; heads accumulate into `out`
        sl = slice(h * D, (h + 1) * D)
        qh = _cast(q[:, sl], matmul_dtype).reshape(wb, N, D)
        kh = _cast(k[:, sl], matmul_dtype).reshape(wb, N, D)
        vh = _cast(v[:, sl], matmul_dtype).reshape(wb, N, D)
        # batched over the Wb windows of this grid step
        s = jnp.einsum("bnd,bmd->bnm", qh, kh,
                       preferred_element_type=jnp.float32)        # (wb, N, N)
        # single add: rel-pos bias (+ shift mask, pre-folded outside the kernel)
        s = s + bias_ref[h]
        s = s - jnp.max(s, axis=-1, keepdims=True)
        p = jnp.exp(s)
        p = p * pl.reciprocal(jnp.sum(p, axis=-1, keepdims=True), approx=True)
        ctx = jnp.einsum("bnm,bmd->bnd", _cast(p, matmul_dtype), vh,
                         preferred_element_type=jnp.float32)      # (wb, N, D)
        # per-head slice of the output projection; accumulation replaces the concat
        out = out + jnp.dot(_cast(ctx.reshape(T, D), matmul_dtype), wp_ref[h],
                            preferred_element_type=jnp.float32)
    o_ref[...] = (out + bp_ref[...]).reshape(wb, N, C).astype(o_ref.dtype)


def window_attention(x_windows, ln_g, ln_b, wqkv, bqkv, wproj, bproj,
                     rel_bias, attn_mask, *, num_heads, apply_ln,
                     matmul_dtype=None, max_rows=512):
    nWtot, N, C = x_windows.shape
    D = C // num_heads
    scale = float(D) ** -0.5

    # split fused qkv weights -> three lane-dense (C, C) matmuls in the kernel;
    # fold the attention scale into the Q projection.
    wq = wqkv[:, :C] * scale
    wk, wv = wqkv[:, C:2 * C], wqkv[:, 2 * C:]
    bq = bqkv[:C] * scale
    bk, bv = bqkv[C:2 * C], bqkv[2 * C:]
    wp3 = wproj.reshape(num_heads, D, C)        # head-major output projection

    if attn_mask is not None:
        nW = attn_mask.shape[0]
        wb = _pick_window_batch(nWtot, nW, N, max_rows)
        # fold relative-position bias + shift mask into one head-major tensor
        bias = rel_bias[:, None, :, :] + attn_mask[None, :, :, :]   # (H, nW, N, N)
        if wb > nW:                              # whole-image window batches
            bias = jnp.tile(bias, (1, wb // nW, 1, 1))
        nblk = bias.shape[1] // wb
        bias_block = (num_heads, wb, N, N)
        if nblk == 1:
            bias_idx = lambda w: (0, 0, 0, 0)
        else:
            bias_idx = lambda w: (0, w % nblk, 0, 0)
    else:
        # shift == 0: specialized path, no mask tensor, bias broadcast over windows
        wb = _pick_window_batch(nWtot, nWtot, N, max_rows)
        bias = rel_bias                          # (H, N, N)
        bias_block = (num_heads, N, N)
        bias_idx = lambda w: (0, 0, 0)

    if matmul_dtype is not None:
        wq, wk, wv, wp3 = (t.astype(matmul_dtype) for t in (wq, wk, wv, wp3))

    # rough VMEM working-set estimate (weights are grid-invariant; in/out tiles
    # are double-buffered; q/k/v/out intermediates are f32)
    wbytes = 4 if matmul_dtype is None else jnp.dtype(matmul_dtype).itemsize
    T = wb * N
    vmem_est = (4 * C * C * wbytes
                + int(np.prod(bias.shape)) * 4
                + 4 * T * C * x_windows.dtype.itemsize
                + 6 * T * C * 4)

    kernel = functools.partial(_window_attn_kernel, num_heads=num_heads,
                               head_dim=D, apply_ln=apply_ln,
                               matmul_dtype=matmul_dtype)
    return pl.pallas_call(
        kernel,
        out_shape=jax.ShapeDtypeStruct((nWtot, N, C), x_windows.dtype),
        grid=(nWtot // wb,),
        in_specs=[
            pl.BlockSpec((wb, N, C), lambda w: (w, 0, 0)),          # window batch
            pl.BlockSpec((1, C), lambda w: (0, 0)),                 # ln1 gamma
            pl.BlockSpec((1, C), lambda w: (0, 0)),                 # ln1 beta
            pl.BlockSpec((C, C), lambda w: (0, 0)),                 # Wq (pre-scaled)
            pl.BlockSpec((C, C), lambda w: (0, 0)),                 # Wk
            pl.BlockSpec((C, C), lambda w: (0, 0)),                 # Wv
            pl.BlockSpec((1, C), lambda w: (0, 0)),                 # bq (pre-scaled)
            pl.BlockSpec((1, C), lambda w: (0, 0)),                 # bk
            pl.BlockSpec((1, C), lambda w: (0, 0)),                 # bv
            pl.BlockSpec((num_heads, D, C), lambda w: (0, 0, 0)),   # Wproj (head-major)
            pl.BlockSpec((1, C), lambda w: (0, 0)),                 # bproj
            pl.BlockSpec(bias_block, bias_idx),                     # bias (+mask)
        ],
        out_specs=pl.BlockSpec((wb, N, C), lambda w: (w, 0, 0)),
        compiler_params=_mosaic_params(("parallel",), vmem_est),
    )(x_windows, ln_g.reshape(1, C), ln_b.reshape(1, C),
      wq, wk, wv, bq.reshape(1, C), bk.reshape(1, C), bv.reshape(1, C),
      wp3, bproj.reshape(1, C), bias)


# ---------------------------------------------------------------------------
# Kernel 3: fused  x = shortcut + attn ; x = x + MLP(LN2(x))
# ---------------------------------------------------------------------------
def _res_ln_mlp_kernel(s_ref, a_ref, g_ref, b_ref, w1_ref, b1_ref, w2_ref, b2_ref,
                       o_ref, *, matmul_dtype):
    x = s_ref[...] + a_ref[...]                                   # fused residual add
    mean = jnp.mean(x, axis=-1, keepdims=True)
    var = jnp.mean((x - mean) ** 2, axis=-1, keepdims=True)
    y = (x - mean) * jax.lax.rsqrt(var + 1e-5)
    y = y * g_ref[...] + b_ref[...]
    h = jnp.dot(_cast(y, matmul_dtype), w1_ref[...],
                preferred_element_type=jnp.float32) + b1_ref[...]
    # exact (erf) GELU, matching torch.nn.GELU() default
    h = 0.5 * h * (1.0 + jax.lax.erf(h * 0.7071067811865476))
    o_ref[...] = (x + (jnp.dot(_cast(h, matmul_dtype), w2_ref[...],
                               preferred_element_type=jnp.float32)
                       + b2_ref[...])).astype(o_ref.dtype)


def res_ln_mlp(shortcut2d, attn2d, gamma, beta, w1, b1, w2, b2,
               *, matmul_dtype=None, row_tile=512):
    R, C = shortcut2d.shape
    Hd = w1.shape[1]
    tr = _row_tile(R, row_tile)
    if matmul_dtype is not None:
        w1 = w1.astype(matmul_dtype)
        w2 = w2.astype(matmul_dtype)
    wbytes = 4 if matmul_dtype is None else jnp.dtype(matmul_dtype).itemsize
    vmem_est = (2 * C * Hd * wbytes
                + 6 * tr * C * shortcut2d.dtype.itemsize
                + 3 * tr * Hd * 4
                + 3 * tr * C * 4)
    kernel = functools.partial(_res_ln_mlp_kernel, matmul_dtype=matmul_dtype)
    return pl.pallas_call(
        kernel,
        out_shape=jax.ShapeDtypeStruct((R, C), shortcut2d.dtype),
        grid=(R // tr,),
        in_specs=[
            pl.BlockSpec((tr, C), lambda i: (i, 0)),
            pl.BlockSpec((tr, C), lambda i: (i, 0)),
            pl.BlockSpec((1, C), lambda i: (0, 0)),
            pl.BlockSpec((1, C), lambda i: (0, 0)),
            pl.BlockSpec((C, Hd), lambda i: (0, 0)),
            pl.BlockSpec((1, Hd), lambda i: (0, 0)),
            pl.BlockSpec((Hd, C), lambda i: (0, 0)),
            pl.BlockSpec((1, C), lambda i: (0, 0)),
        ],
        out_specs=pl.BlockSpec((tr, C), lambda i: (i, 0)),
        compiler_params=_mosaic_params(("parallel",), vmem_est),
    )(shortcut2d, attn2d, gamma.reshape(1, C), beta.reshape(1, C),
      w1, b1.reshape(1, Hd), w2, b2.reshape(1, C))


# ---------------------------------------------------------------------------
# JAX glue (reshape / shift / window partition / mask construction)
# ---------------------------------------------------------------------------
def window_partition(x, ws):
    B, H, W, C = x.shape
    x = x.reshape(B, H // ws, ws, W // ws, ws, C)
    return x.transpose(0, 1, 3, 2, 4, 5).reshape(-1, ws, ws, C)


def window_reverse(windows, ws, H, W):
    B = windows.shape[0] // (H * W // ws // ws)
    x = windows.reshape(B, H // ws, W // ws, ws, ws, -1)
    return x.transpose(0, 1, 3, 2, 4, 5).reshape(B, H, W, -1)


def _relative_position_index(ws):
    coords = np.stack(np.meshgrid(np.arange(ws), np.arange(ws), indexing="ij"))
    coords_flatten = coords.reshape(2, -1)
    rel = coords_flatten[:, :, None] - coords_flatten[:, None, :]
    rel = rel.transpose(1, 2, 0).copy()
    rel[:, :, 0] += ws - 1
    rel[:, :, 1] += ws - 1
    rel[:, :, 0] *= 2 * ws - 1
    return rel.sum(-1).astype(np.int32)


def _attention_mask(Hp, Wp, ws, ss):
    """Pure numpy so it constant-folds under jit (Hp/Wp/ws/ss are static)."""
    img_mask = np.zeros((1, Hp, Wp, 1), np.float32)
    h_slices = (slice(0, -ws), slice(-ws, -ss), slice(-ss, None))
    w_slices = (slice(0, -ws), slice(-ws, -ss), slice(-ss, None))
    cnt = 0
    for h in h_slices:
        for w in w_slices:
            img_mask[:, h, w, :] = cnt
            cnt += 1
    mw = img_mask.reshape(1, Hp // ws, ws, Wp // ws, ws, 1)
    mw = mw.transpose(0, 1, 3, 2, 4, 5).reshape(-1, ws * ws)
    am = mw[:, None, :] - mw[:, :, None]
    am = np.where(am != 0, -100.0, 0.0).astype(np.float32)
    return jnp.asarray(am)


@functools.partial(jax.jit, static_argnums=(1, 2),
                   static_argnames=("num_heads", "window_size", "shift_size",
                                    "matmul_dtype"))
def swin_block_forward(x, H, W, params, *, num_heads, window_size, shift_size,
                       matmul_dtype=None):
    B, L, C = x.shape
    assert L == H * W, "input feature has wrong size"
    ws = window_size
    N = ws * ws
    shortcut = x

    pad_r = (ws - W % ws) % ws
    pad_b = (ws - H % ws) % ws
    fuse_ln = (pad_r == 0 and pad_b == 0)

    if fuse_ln:
        # norm1 is per-token, so it commutes with roll/window-partition; fuse it
        # into the attention kernel and skip a full HBM pass over the activation.
        xn = x.reshape(B, H, W, C)
    else:
        # padded path: padded tokens must be exactly zero AFTER norm1 to match
        # the PyTorch module, so run the standalone norm1 kernel first.
        xn = layernorm(x.reshape(B * L, C),
                       params["ln1_g"], params["ln1_b"]).reshape(B, H, W, C)
        xn = jnp.pad(xn, ((0, 0), (0, pad_b), (0, pad_r), (0, 0)))
    Hp, Wp = H + pad_b, W + pad_r

    # cyclic shift + attention mask (mask only exists on the shifted path)
    if shift_size > 0:
        shifted = jnp.roll(xn, (-shift_size, -shift_size), axis=(1, 2))
        attn_mask = _attention_mask(Hp, Wp, ws, shift_size)          # (nW, N, N)
    else:
        shifted = xn
        attn_mask = None

    x_windows = window_partition(shifted, ws).reshape(-1, N, C)

    # relative position bias gather -> (num_heads, N, N)
    rel_bias = params["rel_table"][params["rel_index"].reshape(-1)]
    rel_bias = rel_bias.reshape(N, N, num_heads).transpose(2, 0, 1)

    attn_windows = window_attention(
        x_windows, params["ln1_g"], params["ln1_b"],
        params["wqkv"], params["bqkv"], params["wproj"], params["bproj"],
        rel_bias, attn_mask, num_heads=num_heads, apply_ln=fuse_ln,
        matmul_dtype=matmul_dtype)

    attn_windows = attn_windows.reshape(-1, ws, ws, C)
    shifted = window_reverse(attn_windows, ws, Hp, Wp)
    if shift_size > 0:
        xo = jnp.roll(shifted, (shift_size, shift_size), axis=(1, 2))
    else:
        xo = shifted
    if pad_r or pad_b:
        xo = xo[:, :H, :W, :]
    xo = xo.reshape(B, L, C)

    # fused: x = shortcut + attn_out ; x = x + MLP(LN2(x))    (drop_path = Identity)
    out = res_ln_mlp(shortcut.reshape(B * L, C), xo.reshape(B * L, C),
                     params["ln2_g"], params["ln2_b"],
                     params["w1"], params["b1"], params["w2"], params["b2"],
                     matmul_dtype=matmul_dtype)
    return out.reshape(B, L, C)


# ---------------------------------------------------------------------------
# Pure-JAX reference (same math, no Pallas) for a sanity check
# ---------------------------------------------------------------------------
def _ln_ref(x, g, b):
    m = jnp.mean(x, -1, keepdims=True)
    v = jnp.mean((x - m) ** 2, -1, keepdims=True)
    return (x - m) / jnp.sqrt(v + 1e-5) * g + b


def _attn_ref(xw, params, rel_bias, mask, num_heads):
    Bw, N, C = xw.shape
    hd = C // num_heads
    qkv = xw @ params["wqkv"] + params["bqkv"]
    qkv = qkv.reshape(Bw, N, 3, num_heads, hd).transpose(2, 0, 3, 1, 4)
    q, k, v = qkv[0] * (float(hd) ** -0.5), qkv[1], qkv[2]
    attn = jnp.einsum("bhnd,bhmd->bhnm", q, k) + rel_bias[None]
    nW = mask.shape[0]
    attn = attn.reshape(Bw // nW, nW, num_heads, N, N) + mask[None, :, None]
    attn = jax.nn.softmax(attn.reshape(Bw, num_heads, N, N), axis=-1)
    out = jnp.einsum("bhnm,bhmd->bhnd", attn, v).transpose(0, 2, 1, 3).reshape(Bw, N, C)
    return out @ params["wproj"] + params["bproj"]


def reference_forward(x, H, W, params, *, num_heads, window_size, shift_size):
    B, L, C = x.shape
    ws = window_size
    N = ws * ws
    shortcut = x
    xn = _ln_ref(x, params["ln1_g"], params["ln1_b"]).reshape(B, H, W, C)
    pad_r = (ws - W % ws) % ws
    pad_b = (ws - H % ws) % ws
    if pad_r or pad_b:
        xn = jnp.pad(xn, ((0, 0), (0, pad_b), (0, pad_r), (0, 0)))
    Hp, Wp = H + pad_b, W + pad_r
    if shift_size > 0:
        shifted = jnp.roll(xn, (-shift_size, -shift_size), axis=(1, 2))
        mask = _attention_mask(Hp, Wp, ws, shift_size)
    else:
        shifted = xn
        mask = jnp.zeros((1, N, N), jnp.float32)
    xw = window_partition(shifted, ws).reshape(-1, N, C)
    rel_bias = params["rel_table"][params["rel_index"].reshape(-1)]
    rel_bias = rel_bias.reshape(N, N, num_heads).transpose(2, 0, 1)
    aw = _attn_ref(xw, params, rel_bias, mask, num_heads).reshape(-1, ws, ws, C)
    shifted = window_reverse(aw, ws, Hp, Wp)
    xo = jnp.roll(shifted, (shift_size, shift_size), axis=(1, 2)) if shift_size > 0 else shifted
    if pad_r or pad_b:
        xo = xo[:, :H, :W, :]
    xo = xo.reshape(B, H * W, C)
    x = shortcut + xo
    y = _ln_ref(x, params["ln2_g"], params["ln2_b"])
    h = y @ params["w1"] + params["b1"]
    h = 0.5 * h * (1.0 + jax.lax.erf(h * 0.7071067811865476))
    return x + (h @ params["w2"] + params["b2"])


# ---------------------------------------------------------------------------
if __name__ == "__main__":
    C, num_heads = 32, 4
    window_size = 4
    mlp_ratio = 4.0
    hidden = int(C * mlp_ratio)
    ws = window_size

    key = jax.random.PRNGKey(0)
    ks = jax.random.split(key, 7)
    params = {
        "ln1_g": jnp.ones((C,), jnp.float32),
        "ln1_b": jnp.zeros((C,), jnp.float32),
        "ln2_g": jnp.ones((C,), jnp.float32),
        "ln2_b": jnp.zeros((C,), jnp.float32),
        "wqkv": 0.02 * jax.random.normal(ks[0], (C, 3 * C), jnp.float32),
        "bqkv": jnp.zeros((3 * C,), jnp.float32),
        "wproj": 0.02 * jax.random.normal(ks[1], (C, C), jnp.float32),
        "bproj": jnp.zeros((C,), jnp.float32),
        "rel_table": 0.02 * jax.random.normal(ks[2], ((2 * ws - 1) ** 2, num_heads), jnp.float32),
        "rel_index": jnp.asarray(_relative_position_index(ws)),
        "w1": 0.02 * jax.random.normal(ks[3], (C, hidden), jnp.float32),
        "b1": jnp.zeros((hidden,), jnp.float32),
        "w2": 0.02 * jax.random.normal(ks[4], (hidden, C), jnp.float32),
        "b2": jnp.zeros((C,), jnp.float32),
    }

    # (B, H, W, shift): shifted+masked (fused LN1), plain (fused LN1), and a
    # non-multiple spatial size that exercises the padded / standalone-LN1 path.
    configs = [(2, 8, 8, 2), (2, 8, 8, 0), (2, 6, 6, 2)]
    for (B, H, W, shift_size) in configs:
        xk = jax.random.fold_in(ks[5], 1000 * H + shift_size)
        x = jax.random.normal(xk, (B, H * W, C), jnp.float32)
        out = swin_block_forward(x, H, W, params, num_heads=num_heads,
                                 window_size=window_size, shift_size=shift_size,
                                 matmul_dtype=MATMUL_DTYPE)
        out = jax.block_until_ready(out)
        ref = reference_forward(x, H, W, params, num_heads=num_heads,
                                window_size=window_size, shift_size=shift_size)
        np.testing.assert_allclose(np.asarray(out), np.asarray(ref), rtol=2e-2, atol=2e-2)

    print("KERNEL_OK")
</pallas_src>

<mosaic_0001>
module attributes {stable_mosaic.version = 11 : i64} {
  func.func @_window_attn_kernel(%arg0: i32, %arg1: memref<8x16x32xf32, #tpu.memory_space<vmem>>, %arg2: memref<1x32xf32, #tpu.memory_space<vmem>>, %arg3: memref<1x32xf32, #tpu.memory_space<vmem>>, %arg4: memref<32x32xf32, #tpu.memory_space<vmem>>, %arg5: memref<32x32xf32, #tpu.memory_space<vmem>>, %arg6: memref<32x32xf32, #tpu.memory_space<vmem>>, %arg7: memref<1x32xf32, #tpu.memory_space<vmem>>, %arg8: memref<1x32xf32, #tpu.memory_space<vmem>>, %arg9: memref<1x32xf32, #tpu.memory_space<vmem>>, %arg10: memref<4x8x32xf32, #tpu.memory_space<vmem>>, %arg11: memref<1x32xf32, #tpu.memory_space<vmem>>, %arg12: memref<4x8x16x16xf32, #tpu.memory_space<vmem>>, %arg13: memref<8x16x32xf32, #tpu.memory_space<vmem>>) attributes {dimension_semantics = [#tpu.dimension_semantics<parallel>], iteration_bounds = array<i64: 1>, scalar_prefetch = 0 : i64, scratch_operands = 0 : i64, tpu.core_type = #tpu.core_type<tc>, window_params = [{transform_indices = @transform_0, window_bounds = array<i64: 8, 16, 32>}, {pipeline_mode = #tpu.pipeline_mode<synchronous>, transform_indices = @transform_1, window_bounds = array<i64: 1, 32>}, {pipeline_mode = #tpu.pipeline_mode<synchronous>, transform_indices = @transform_2, window_bounds = array<i64: 1, 32>}, {pipeline_mode = #tpu.pipeline_mode<synchronous>, transform_indices = @transform_3, window_bounds = array<i64: 32, 32>}, {pipeline_mode = #tpu.pipeline_mode<synchronous>, transform_indices = @transform_4, window_bounds = array<i64: 32, 32>}, {pipeline_mode = #tpu.pipeline_mode<synchronous>, transform_indices = @transform_5, window_bounds = array<i64: 32, 32>}, {pipeline_mode = #tpu.pipeline_mode<synchronous>, transform_indices = @transform_6, window_bounds = array<i64: 1, 32>}, {pipeline_mode = #tpu.pipeline_mode<synchronous>, transform_indices = @transform_7, window_bounds = array<i64: 1, 32>}, {pipeline_mode = #tpu.pipeline_mode<synchronous>, transform_indices = @transform_8, window_bounds = array<i64: 1, 32>}, {pipeline_mode = #tpu.pipeline_mode<synchronous>, transform_indices = @transform_9, window_bounds = array<i64: 4, 8, 32>}, {pipeline_mode = #tpu.pipeline_mode<synchronous>, transform_indices = @transform_10, window_bounds = array<i64: 1, 32>}, {pipeline_mode = #tpu.pipeline_mode<synchronous>, transform_indices = @transform_11, window_bounds = array<i64: 4, 8, 16, 16>}, {transform_indices = @transform_12, window_bounds = array<i64: 8, 16, 32>}]} {
    %c0 = arith.constant 0 : index
    %c0_0 = arith.constant 0 : index
    %c0_1 = arith.constant 0 : index
    %0 = vector.load %arg1[%c0, %c0_0, %c0_1] : memref<8x16x32xf32, #tpu.memory_space<vmem>>, vector<8x16x32xf32>
    %1 = vector.shape_cast %0 : vector<8x16x32xf32> to vector<128x32xf32>
    %cst = arith.constant dense<0.000000e+00> : vector<128xf32>
    %2 = vector.multi_reduction <add>, %1, %cst [1] : vector<128x32xf32> to vector<128xf32>
    %3 = vector.shape_cast %2 : vector<128xf32> to vector<128x1xf32>
    %cst_2 = arith.constant 3.200000e+01 : f32
    %4 = vector.broadcast %cst_2 : f32 to vector<128x1xf32>
    %5 = arith.divf %3, %4 : vector<128x1xf32>
    %6 = vector.broadcast %5 : vector<128x1xf32> to vector<128x32xf32>
    %7 = arith.subf %1, %6 : vector<128x32xf32>
    %8 = arith.mulf %7, %7 : vector<128x32xf32>
    %cst_3 = arith.constant dense<0.000000e+00> : vector<128xf32>
    %9 = vector.multi_reduction <add>, %8, %cst_3 [1] : vector<128x32xf32> to vector<128xf32>
    %10 = vector.shape_cast %9 : vector<128xf32> to vector<128x1xf32>
    %cst_4 = arith.constant 3.200000e+01 : f32
    %11 = vector.broadcast %cst_4 : f32 to vector<128x1xf32>
    %12 = arith.divf %10, %11 : vector<128x1xf32>
    %13 = vector.broadcast %5 : vector<128x1xf32> to vector<128x32xf32>
    %14 = arith.subf %1, %13 : vector<128x32xf32>
    %cst_5 = arith.constant 9.99999974E-6 : f32
    %15 = vector.broadcast %cst_5 : f32 to vector<128x1xf32>
    %16 = arith.addf %12, %15 : vector<128x1xf32>
    %17 = math.rsqrt %16 : vector<128x1xf32>
    %18 = vector.broadcast %17 : vector<128x1xf32> to vector<128x32xf32>
    %19 = arith.mulf %14, %18 : vector<128x32xf32>
    %c0_6 = arith.constant 0 : index
    %c0_7 = arith.constant 0 : index
    %20 = vector.load %arg2[%c0_6, %c0_7] : memref<1x32xf32, #tpu.memory_space<vmem>>, vector<1x32xf32>
    %21 = vector.broadcast %20 : vector<1x32xf32> to vector<128x32xf32>
    %22 = arith.mulf %19, %21 : vector<128x32xf32>
    %c0_8 = arith.constant 0 : index
    %c0_9 = arith.constant 0 : index
    %23 = vector.load %arg3[%c0_8, %c0_9] : memref<1x32xf32, #tpu.memory_space<vmem>>, vector<1x32xf32>
    %24 = vector.broadcast %23 : vector<1x32xf32> to vector<128x32xf32>
    %25 = arith.addf %22, %24 : vector<128x32xf32>
    %c0_10 = arith.constant 0 : index
    %c0_11 = arith.constant 0 : index
    %26 = vector.load %arg4[%c0_10, %c0_11] : memref<32x32xf32, #tpu.memory_space<vmem>>, vector<32x32xf32>
    %cst_12 = arith.constant dense<0.000000e+00> : vector<128x32xf32>
    %27 = tpu.matmul %25, %26, %cst_12 {dimension_numbers = #tpu.dot_dimension_numbers<[1], [0], [0], [1], [0, 0, 1, 1], [], []>} : vector<128x32xf32>, vector<32x32xf32>, vector<128x32xf32> -> vector<128x32xf32>
    %c0_13 = arith.constant 0 : index
    %c0_14 = arith.constant 0 : index
    %28 = vector.load %arg7[%c0_13, %c0_14] : memref<1x32xf32, #tpu.memory_space<vmem>>, vector<1x32xf32>
    %29 = vector.broadcast %28 : vector<1x32xf32> to vector<128x32xf32>
    %30 = arith.addf %27, %29 : vector<128x32xf32>
    %c0_15 = arith.constant 0 : index
    %c0_16 = arith.constant 0 : index
    %31 = vector.load %arg5[%c0_15, %c0_16] : memref<32x32xf32, #tpu.memory_space<vmem>>, vector<32x32xf32>
    %cst_17 = arith.constant dense<0.000000e+00> : vector<128x32xf32>
    %32 = tpu.matmul %25, %31, %cst_17 {dimension_numbers = #tpu.dot_dimension_numbers<[1], [0], [0], [1], [0, 0, 1, 1], [], []>} : vector<128x32xf32>, vector<32x32xf32>, vector<128x32xf32> -> vector<128x32xf32>
    %c0_18 = arith.constant 0 : index
    %c0_19 = arith.constant 0 : index
    %33 = vector.load %arg8[%c0_18, %c0_19] : memref<1x32xf32, #tpu.memory_space<vmem>>, vector<1x32xf32>
    %34 = vector.broadcast %33 : vector<1x32xf32> to vector<128x32xf32>
    %35 = arith.addf %32, %34 : vector<128x32xf32>
    %c0_20 = arith.constant 0 : index
    %c0_21 = arith.constant 0 : index
    %36 = vector.load %arg6[%c0_20, %c0_21] : memref<32x32xf32, #tpu.memory_space<vmem>>, vector<32x32xf32>
    %cst_22 = arith.constant dense<0.000000e+00> : vector<128x32xf32>
    %37 = tpu.matmul %25, %36, %cst_22 {dimension_numbers = #tpu.dot_dimension_numbers<[1], [0], [0], [1], [0, 0, 1, 1], [], []>} : vector<128x32xf32>, vector<32x32xf32>, vector<128x32xf32> -> vector<128x32xf32>
    %c0_23 = arith.constant 0 : index
    %c0_24 = arith.constant 0 : index
    %38 = vector.load %arg9[%c0_23, %c0_24] : memref<1x32xf32, #tpu.memory_space<vmem>>, vector<1x32xf32>
    %39 = vector.broadcast %38 : vector<1x32xf32> to vector<128x32xf32>
    %40 = arith.addf %37, %39 : vector<128x32xf32>
    %cst_25 = arith.constant 0.000000e+00 : f32
    %41 = vector.broadcast %cst_25 : f32 to vector<128x32xf32>
    %42 = vector.extract_strided_slice %30 {offsets = [0, 0], sizes = [128, 8], strides = [1, 1]} : vector<128x32xf32> to vector<128x8xf32>
    %43 = vector.shape_cast %42 : vector<128x8xf32> to vector<8x16x8xf32>
    %44 = vector.extract_strided_slice %35 {offsets = [0, 0], sizes = [128, 8], strides = [1, 1]} : vector<128x32xf32> to vector<128x8xf32>
    %45 = vector.shape_cast %44 : vector<128x8xf32> to vector<8x16x8xf32>
    %46 = vector.extract_strided_slice %40 {offsets = [0, 0], sizes = [128, 8], strides = [1, 1]} : vector<128x32xf32> to vector<128x8xf32>
    %47 = vector.shape_cast %46 : vector<128x8xf32> to vector<8x16x8xf32>
    "tpu.trace_start"() <{level = 10 : i32, message = "bnd,bmd->bnm"}> : () -> ()
    %cst_26 = arith.constant dense<0.000000e+00> : vector<8x16x16xf32>
    %48 = tpu.matmul %43, %45, %cst_26 {dimension_numbers = #tpu.dot_dimension_numbers<[2], [2], [1], [1], [0, 0, 0, 1, 1, 1], [0], [0]>} : vector<8x16x8xf32>, vector<8x16x8xf32>, vector<8x16x16xf32> -> vector<8x16x16xf32>
    "tpu.trace_stop"() : () -> ()
    %c0_27 = arith.constant 0 : index
    %c0_28 = arith.constant 0 : index
    %c0_29 = arith.constant 0 : index
    %c0_30 = arith.constant 0 : index
    %49 = vector.load %arg12[%c0_27, %c0_28, %c0_29, %c0_30] : memref<4x8x16x16xf32, #tpu.memory_space<vmem>>, vector<1x8x16x16xf32>
    %50 = vector.shape_cast %49 : vector<1x8x16x16xf32> to vector<8x16x16xf32>
    %51 = arith.addf %48, %50 : vector<8x16x16xf32>
    %cst_31 = arith.constant dense<0xFF800000> : vector<8x16xf32>
    %52 = vector.multi_reduction <maximumf>, %51, %cst_31 [2] : vector<8x16x16xf32> to vector<8x16xf32>
    %53 = vector.shape_cast %52 : vector<8x16xf32> to vector<8x16x1xf32>
    %54 = vector.broadcast %53 : vector<8x16x1xf32> to vector<8x16x16xf32>
    %55 = arith.subf %51, %54 : vector<8x16x16xf32>
    %56 = math.exp %55 : vector<8x16x16xf32>
    %cst_32 = arith.constant dense<0.000000e+00> : vector<8x16xf32>
    %57 = vector.multi_reduction <add>, %56, %cst_32 [2] : vector<8x16x16xf32> to vector<8x16xf32>
    %58 = vector.shape_cast %57 : vector<8x16xf32> to vector<8x16x1xf32>
    %59 = tpu.reciprocal %58 {approx = true} : vector<8x16x1xf32> -> vector<8x16x1xf32>
    %60 = vector.broadcast %59 : vector<8x16x1xf32> to vector<8x16x16xf32>
    %61 = arith.mulf %56, %60 : vector<8x16x16xf32>
    "tpu.trace_start"() <{level = 10 : i32, message = "bnm,bmd->bnd"}> : () -> ()
    %cst_33 = arith.constant dense<0.000000e+00> : vector<8x16x8xf32>
    %62 = tpu.matmul %61, %47, %cst_33 {dimension_numbers = #tpu.dot_dimension_numbers<[2], [1], [1], [2], [0, 0, 0, 1, 1, 2], [0], [0]>} : vector<8x16x16xf32>, vector<8x16x8xf32>, vector<8x16x8xf32> -> vector<8x16x8xf32>
    "tpu.trace_stop"() : () -> ()
    %63 = vector.shape_cast %62 : vector<8x16x8xf32> to vector<128x8xf32>
    %c0_34 = arith.constant 0 : index
    %c0_35 = arith.constant 0 : index
    %c0_36 = arith.constant 0 : index
    %64 = vector.load %arg10[%c0_34, %c0_35, %c0_36] : memref<4x8x32xf32, #tpu.memory_space<vmem>>, vector<1x8x32xf32>
    %65 = vector.shape_cast %64 : vector<1x8x32xf32> to vector<8x32xf32>
    %cst_37 = arith.constant dense<0.000000e+00> : vector<128x32xf32>
    %66 = tpu.matmul %63, %65, %cst_37 {dimension_numbers = #tpu.dot_dimension_numbers<[1], [0], [0], [1], [0, 0, 1, 1], [], []>} : vector<128x8xf32>, vector<8x32xf32>, vector<128x32xf32> -> vector<128x32xf32>
    %67 = arith.addf %41, %66 : vector<128x32xf32>
    %68 = vector.extract_strided_slice %30 {offsets = [0, 8], sizes = [128, 8], strides = [1, 1]} : vector<128x32xf32> to vector<128x8xf32>
    %69 = vector.shape_cast %68 : vector<128x8xf32> to vector<8x16x8xf32>
    %70 = vector.extract_strided_slice %35 {offsets = [0, 8], sizes = [128, 8], strides = [1, 1]} : vector<128x32xf32> to vector<128x8xf32>
    %71 = vector.shape_cast %70 : vector<128x8xf32> to vector<8x16x8xf32>
    %72 = vector.extract_strided_slice %40 {offsets = [0, 8], sizes = [128, 8], strides = [1, 1]} : vector<128x32xf32> to vector<128x8xf32>
    %73 = vector.shape_cast %72 : vector<128x8xf32> to vector<8x16x8xf32>
    "tpu.trace_start"() <{level = 10 : i32, message = "bnd,bmd->bnm"}> : () -> ()
    %cst_38 = arith.constant dense<0.000000e+00> : vector<8x16x16xf32>
    %74 = tpu.matmul %69, %71, %cst_38 {dimension_numbers = #tpu.dot_dimension_numbers<[2], [2], [1], [1], [0, 0, 0, 1, 1, 1], [0], [0]>} : vector<8x16x8xf32>, vector<8x16x8xf32>, vector<8x16x16xf32> -> vector<8x16x16xf32>
    "tpu.trace_stop"() : () -> ()
    %c1 = arith.constant 1 : index
    %c0_39 = arith.constant 0 : index
    %c0_40 = arith.constant 0 : index
    %c0_41 = arith.constant 0 : index
    %75 = vector.load %arg12[%c1, %c0_39, %c0_40, %c0_41] : memref<4x8x16x16xf32, #tpu.memory_space<vmem>>, vector<1x8x16x16xf32>
    %76 = vector.shape_cast %75 : vector<1x8x16x16xf32> to vector<8x16x16xf32>
    %77 = arith.addf %74, %76 : vector<8x16x16xf32>
    %cst_42 = arith.constant dense<0xFF800000> : vector<8x16xf32>
    %78 = vector.multi_reduction <maximumf>, %77, %cst_42 [2] : vector<8x16x16xf32> to vector<8x16xf32>
    %79 = vector.shape_cast %78 : vector<8x16xf32> to vector<8x16x1xf32>
    %80 = vector.broadcast %79 : vector<8x16x1xf32> to vector<8x16x16xf32>
    %81 = arith.subf %77, %80 : vector<8x16x16xf32>
    %82 = math.exp %81 : vector<8x16x16xf32>
    %cst_43 = arith.constant dense<0.000000e+00> : vector<8x16xf32>
    %83 = vector.multi_reduction <add>, %82, %cst_43 [2] : vector<8x16x16xf32> to vector<8x16xf32>
    %84 = vector.shape_cast %83 : vector<8x16xf32> to vector<8x16x1xf32>
    %85 = tpu.reciprocal %84 {approx = true} : vector<8x16x1xf32> -> vector<8x16x1xf32>
    %86 = vector.broadcast %85 : vector<8x16x1xf32> to vector<8x16x16xf32>
    %87 = arith.mulf %82, %86 : vector<8x16x16xf32>
    "tpu.trace_start"() <{level = 10 : i32, message = "bnm,bmd->bnd"}> : () -> ()
    %cst_44 = arith.constant dense<0.000000e+00> : vector<8x16x8xf32>
    %88 = tpu.matmul %87, %73, %cst_44 {dimension_numbers = #tpu.dot_dimension_numbers<[2], [1], [1], [2], [0, 0, 0, 1, 1, 2], [0], [0]>} : vector<8x16x16xf32>, vector<8x16x8xf32>, vector<8x16x8xf32> -> vector<8x16x8xf32>
    "tpu.trace_stop"() : () -> ()
    %89 = vector.shape_cast %88 : vector<8x16x8xf32> to vector<128x8xf32>
    %c1_45 = arith.constant 1 : index
    %c0_46 = arith.constant 0 : index
    %c0_47 = arith.constant 0 : index
    %90 = vector.load %arg10[%c1_45, %c0_46, %c0_47] : memref<4x8x32xf32, #tpu.memory_space<vmem>>, vector<1x8x32xf32>
    %91 = vector.shape_cast %90 : vector<1x8x32xf32> to vector<8x32xf32>
    %cst_48 = arith.constant dense<0.000000e+00> : vector<128x32xf32>
    %92 = tpu.matmul %89, %91, %cst_48 {dimension_numbers = #tpu.dot_dimension_numbers<[1], [0], [0], [1], [0, 0, 1, 1], [], []>} : vector<128x8xf32>, vector<8x32xf32>, vector<128x32xf32> -> vector<128x32xf32>
    %93 = arith.addf %67, %92 : vector<128x32xf32>
    %94 = vector.extract_strided_slice %30 {offsets = [0, 16], sizes = [128, 8], strides = [1, 1]} : vector<128x32xf32> to vector<128x8xf32>
    %95 = vector.shape_cast %94 : vector<128x8xf32> to vector<8x16x8xf32>
    %96 = vector.extract_strided_slice %35 {offsets = [0, 16], sizes = [128, 8], strides = [1, 1]} : vector<128x32xf32> to vector<128x8xf32>
    %97 = vector.shape_cast %96 : vector<128x8xf32> to vector<8x16x8xf32>
    %98 = vector.extract_strided_slice %40 {offsets = [0, 16], sizes = [128, 8], strides = [1, 1]} : vector<128x32xf32> to vector<128x8xf32>
    %99 = vector.shape_cast %98 : vector<128x8xf32> to vector<8x16x8xf32>
    "tpu.trace_start"() <{level = 10 : i32, message = "bnd,bmd->bnm"}> : () -> ()
    %cst_49 = arith.constant dense<0.000000e+00> : vector<8x16x16xf32>
    %100 = tpu.matmul %95, %97, %cst_49 {dimension_numbers = #tpu.dot_dimension_numbers<[2], [2], [1], [1], [0, 0, 0, 1, 1, 1], [0], [0]>} : vector<8x16x8xf32>, vector<8x16x8xf32>, vector<8x16x16xf32> -> vector<8x16x16xf32>
    "tpu.trace_stop"() : () -> ()
    %c2 = arith.constant 2 : index
    %c0_50 = arith.constant 0 : index
    %c0_51 = arith.constant 0 : index
    %c0_52 = arith.constant 0 : index
    %101 = vector.load %arg12[%c2, %c0_50, %c0_51, %c0_52] : memref<4x8x16x16xf32, #tpu.memory_space<vmem>>, vector<1x8x16x16xf32>
    %102 = vector.shape_cast %101 : vector<1x8x16x16xf32> to vector<8x16x16xf32>
    %103 = arith.addf %100, %102 : vector<8x16x16xf32>
    %cst_53 = arith.constant dense<0xFF800000> : vector<8x16xf32>
    %104 = vector.multi_reduction <maximumf>, %103, %cst_53 [2] : vector<8x16x16xf32> to vector<8x16xf32>
    %105 = vector.shape_cast %104 : vector<8x16xf32> to vector<8x16x1xf32>
    %106 = vector.broadcast %105 : vector<8x16x1xf32> to vector<8x16x16xf32>
    %107 = arith.subf %103, %106 : vector<8x16x16xf32>
    %108 = math.exp %107 : vector<8x16x16xf32>
    %cst_54 = arith.constant dense<0.000000e+00> : vector<8x16xf32>
    %109 = vector.multi_reduction <add>, %108, %cst_54 [2] : vector<8x16x16xf32> to vector<8x16xf32>
    %110 = vector.shape_cast %109 : vector<8x16xf32> to vector<8x16x1xf32>
    %111 = tpu.reciprocal %110 {approx = true} : vector<8x16x1xf32> -> vector<8x16x1xf32>
    %112 = vector.broadcast %111 : vector<8x16x1xf32> to vector<8x16x16xf32>
    %113 = arith.mulf %108, %112 : vector<8x16x16xf32>
    "tpu.trace_start"() <{level = 10 : i32, message = "bnm,bmd->bnd"}> : () -> ()
    %cst_55 = arith.constant dense<0.000000e+00> : vector<8x16x8xf32>
    %114 = tpu.matmul %113, %99, %cst_55 {dimension_numbers = #tpu.dot_dimension_numbers<[2], [1], [1], [2], [0, 0, 0, 1, 1, 2], [0], [0]>} : vector<8x16x16xf32>, vector<8x16x8xf32>, vector<8x16x8xf32> -> vector<8x16x8xf32>
    "tpu.trace_stop"() : () -> ()
    %115 = vector.shape_cast %114 : vector<8x16x8xf32> to vector<128x8xf32>
    %c2_56 = arith.constant 2 : index
    %c0_57 = arith.constant 0 : index
    %c0_58 = arith.constant 0 : index
    %116 = vector.load %arg10[%c2_56, %c0_57, %c0_58] : memref<4x8x32xf32, #tpu.memory_space<vmem>>, vector<1x8x32xf32>
    %117 = vector.shape_cast %116 : vector<1x8x32xf32> to vector<8x32xf32>
    %cst_59 = arith.constant dense<0.000000e+00> : vector<128x32xf32>
    %118 = tpu.matmul %115, %117, %cst_59 {dimension_numbers = #tpu.dot_dimension_numbers<[1], [0], [0], [1], [0, 0, 1, 1], [], []>} : vector<128x8xf32>, vector<8x32xf32>, vector<128x32xf32> -> vector<128x32xf32>
    %119 = arith.addf %93, %118 : vector<128x32xf32>
    %120 = vector.extract_strided_slice %30 {offsets = [0, 24], sizes = [128, 8], strides = [1, 1]} : vector<128x32xf32> to vector<128x8xf32>
    %121 = vector.shape_cast %120 : vector<128x8xf32> to vector<8x16x8xf32>
    %122 = vector.extract_strided_slice %35 {offsets = [0, 24], sizes = [128, 8], strides = [1, 1]} : vector<128x32xf32> to vector<128x8xf32>
    %123 = vector.shape_cast %122 : vector<128x8xf32> to vector<8x16x8xf32>
    %124 = vector.extract_strided_slice %40 {offsets = [0, 24], sizes = [128, 8], strides = [1, 1]} : vector<128x32xf32> to vector<128x8xf32>
    %125 = vector.shape_cast %124 : vector<128x8xf32> to vector<8x16x8xf32>
    "tpu.trace_start"() <{level = 10 : i32, message = "bnd,bmd->bnm"}> : () -> ()
    %cst_60 = arith.constant dense<0.000000e+00> : vector<8x16x16xf32>
    %126 = tpu.matmul %121, %123, %cst_60 {dimension_numbers = #tpu.dot_dimension_numbers<[2], [2], [1], [1], [0, 0, 0, 1, 1, 1], [0], [0]>} : vector<8x16x8xf32>, vector<8x16x8xf32>, vector<8x16x16xf32> -> vector<8x16x16xf32>
    "tpu.trace_stop"() : () -> ()
    %c3 = arith.constant 3 : index
    %c0_61 = arith.constant 0 : index
    %c0_62 = arith.constant 0 : index
    %c0_63 = arith.constant 0 : index
    %127 = vector.load %arg12[%c3, %c0_61, %c0_62, %c0_63] : memref<4x8x16x16xf32, #tpu.memory_space<vmem>>, vector<1x8x16x16xf32>
    %128 = vector.shape_cast %127 : vector<1x8x16x16xf32> to vector<8x16x16xf32>
    %129 = arith.addf %126, %128 : vector<8x16x16xf32>
    %cst_64 = arith.constant dense<0xFF800000> : vector<8x16xf32>
    %130 = vector.multi_reduction <maximumf>, %129, %cst_64 [2] : vector<8x16x16xf32> to vector<8x16xf32>
    %131 = vector.shape_cast %130 : vector<8x16xf32> to vector<8x16x1xf32>
    %132 = vector.broadcast %131 : vector<8x16x1xf32> to vector<8x16x16xf32>
    %133 = arith.subf %129, %132 : vector<8x16x16xf32>
    %134 = math.exp %133 : vector<8x16x16xf32>
    %cst_65 = arith.constant dense<0.000000e+00> : vector<8x16xf32>
    %135 = vector.multi_reduction <add>, %134, %cst_65 [2] : vector<8x16x16xf32> to vector<8x16xf32>
    %136 = vector.shape_cast %135 : vector<8x16xf32> to vector<8x16x1xf32>
    %137 = tpu.reciprocal %136 {approx = true} : vector<8x16x1xf32> -> vector<8x16x1xf32>
    %138 = vector.broadcast %137 : vector<8x16x1xf32> to vector<8x16x16xf32>
    %139 = arith.mulf %134, %138 : vector<8x16x16xf32>
    "tpu.trace_start"() <{level = 10 : i32, message = "bnm,bmd->bnd"}> : () -> ()
    %cst_66 = arith.constant dense<0.000000e+00> : vector<8x16x8xf32>
    %140 = tpu.matmul %139, %125, %cst_66 {dimension_numbers = #tpu.dot_dimension_numbers<[2], [1], [1], [2], [0, 0, 0, 1, 1, 2], [0], [0]>} : vector<8x16x16xf32>, vector<8x16x8xf32>, vector<8x16x8xf32> -> vector<8x16x8xf32>
    "tpu.trace_stop"() : () -> ()
    %141 = vector.shape_cast %140 : vector<8x16x8xf32> to vector<128x8xf32>
    %c3_67 = arith.constant 3 : index
    %c0_68 = arith.constant 0 : index
    %c0_69 = arith.constant 0 : index
    %142 = vector.load %arg10[%c3_67, %c0_68, %c0_69] : memref<4x8x32xf32, #tpu.memory_space<vmem>>, vector<1x8x32xf32>
    %143 = vector.shape_cast %142 : vector<1x8x32xf32> to vector<8x32xf32>
    %cst_70 = arith.constant dense<0.000000e+00> : vector<128x32xf32>
    %144 = tpu.matmul %141, %143, %cst_70 {dimension_numbers = #tpu.dot_dimension_numbers<[1], [0], [0], [1], [0, 0, 1, 1], [], []>} : vector<128x8xf32>, vector<8x32xf32>, vector<128x32xf32> -> vector<128x32xf32>
    %145 = arith.addf %119, %144 : vector<128x32xf32>
    %c0_71 = arith.constant 0 : index
    %c0_72 = arith.constant 0 : index
    %146 = vector.load %arg11[%c0_71, %c0_72] : memref<1x32xf32, #tpu.memory_space<vmem>>, vector<1x32xf32>
    %147 = vector.broadcast %146 : vector<1x32xf32> to vector<128x32xf32>
    %148 = arith.addf %145, %147 : vector<128x32xf32>
    %149 = vector.shape_cast %148 : vector<128x32xf32> to vector<8x16x32xf32>
    %c0_73 = arith.constant 0 : index
    %c0_74 = arith.constant 0 : index
    %c0_75 = arith.constant 0 : index
    %150 = vector.load %arg13[%c0_73, %c0_74, %c0_75] : memref<8x16x32xf32, #tpu.memory_space<vmem>>, vector<8x16x32xf32>
    tpu.vector_store %arg13[%c0_73, %c0_74, %c0_75], %149 {strides = array<i32>} : memref<8x16x32xf32, #tpu.memory_space<vmem>>, vector<8x16x32xf32>,
    return
  }
  func.func @transform_0(%arg0: i32) -> (i32, i32, i32) {
    %c0_i32 = arith.constant 0 : i32
    %c0_i32_0 = arith.constant 0 : i32
    %c0_i32_1 = arith.constant 0 : i32
    return %arg0, %c0_i32, %c0_i32_0 : i32, i32, i32
  }
  func.func @transform_1(%arg0: i32) -> (i32, i32) {
    %c0_i32 = arith.constant 0 : i32
    %c0_i32_0 = arith.constant 0 : i32
    %c0_i32_1 = arith.constant 0 : i32
    return %c0_i32, %c0_i32_0 : i32, i32
  }
  func.func @transform_2(%arg0: i32) -> (i32, i32) {
    %c0_i32 = arith.constant 0 : i32
    %c0_i32_0 = arith.constant 0 : i32
    %c0_i32_1 = arith.constant 0 : i32
    return %c0_i32, %c0_i32_0 : i32, i32
  }
  func.func @transform_3(%arg0: i32) -> (i32, i32) {
    %c0_i32 = arith.constant 0 : i32
    %c0_i32_0 = arith.constant 0 : i32
    %c0_i32_1 = arith.constant 0 : i32
    return %c0_i32, %c0_i32_0 : i32, i32
  }
  func.func @transform_4(%arg0: i32) -> (i32, i32) {
    %c0_i32 = arith.constant 0 : i32
    %c0_i32_0 = arith.constant 0 : i32
    %c0_i32_1 = arith.constant 0 : i32
    return %c0_i32, %c0_i32_0 : i32, i32
  }
  func.func @transform_5(%arg0: i32) -> (i32, i32) {
    %c0_i32 = arith.constant 0 : i32
    %c0_i32_0 = arith.constant 0 : i32
    %c0_i32_1 = arith.constant 0 : i32
    return %c0_i32, %c0_i32_0 : i32, i32
  }
  func.func @transform_6(%arg0: i32) -> (i32, i32) {
    %c0_i32 = arith.constant 0 : i32
    %c0_i32_0 = arith.constant 0 : i32
    %c0_i32_1 = arith.constant 0 : i32
    return %c0_i32, %c0_i32_0 : i32, i32
  }
  func.func @transform_7(%arg0: i32) -> (i32, i32) {
    %c0_i32 = arith.constant 0 : i32
    %c0_i32_0 = arith.constant 0 : i32
    %c0_i32_1 = arith.constant 0 : i32
    return %c0_i32, %c0_i32_0 : i32, i32
  }
  func.func @transform_8(%arg0: i32) -> (i32, i32) {
    %c0_i32 = arith.constant 0 : i32
    %c0_i32_0 = arith.constant 0 : i32
    %c0_i32_1 = arith.constant 0 : i32
    return %c0_i32, %c0_i32_0 : i32, i32
  }
  func.func @transform_9(%arg0: i32) -> (i32, i32, i32) {
    %c0_i32 = arith.constant 0 : i32
    %c0_i32_0 = arith.constant 0 : i32
    %c0_i32_1 = arith.constant 0 : i32
    %c0_i32_2 = arith.constant 0 : i32
    return %c0_i32, %c0_i32_0, %c0_i32_1 : i32, i32, i32
  }
  func.func @transform_10(%arg0: i32) -> (i32, i32) {
    %c0_i32 = arith.constant 0 : i32
    %c0_i32_0 = arith.constant 0 : i32
    %c0_i32_1 = arith.constant 0 : i32
    return %c0_i32, %c0_i32_0 : i32, i32
  }
  func.func @transform_11(%arg0: i32) -> (i32, i32, i32, i32) {
    %c0_i32 = arith.constant 0 : i32
    %c0_i32_0 = arith.constant 0 : i32
    %c0_i32_1 = arith.constant 0 : i32
    %c0_i32_2 = arith.constant 0 : i32
    %c0_i32_3 = arith.constant 0 : i32
    return %c0_i32, %c0_i32_0, %c0_i32_1, %c0_i32_2 : i32, i32, i32, i32
  }
  func.func @transform_12(%arg0: i32) -> (i32, i32, i32) {
    %c0_i32 = arith.constant 0 : i32
    %c0_i32_0 = arith.constant 0 : i32
    %c0_i32_1 = arith.constant 0 : i32
    return %arg0, %c0_i32, %c0_i32_0 : i32, i32, i32
  }
}

module attributes {stable_mosaic.version = 11 : i64} {
  func.func @_res_ln_mlp_kernel(%arg0: i32, %arg1: memref<128x32xf32, #tpu.memory_space<vmem>>, %arg2: memref<128x32xf32, #tpu.memory_space<vmem>>, %arg3: memref<1x32xf32, #tpu.memory_space<vmem>>, %arg4: memref<1x32xf32, #tpu.memory_space<vmem>>, %arg5: memref<32x128xf32, #tpu.memory_space<vmem>>, %arg6: memref<1x128xf32, #tpu.memory_space<vmem>>, %arg7: memref<128x32xf32, #tpu.memory_space<vmem>>, %arg8: memref<1x32xf32, #tpu.memory_space<vmem>>, %arg9: memref<128x32xf32, #tpu.memory_space<vmem>>) attributes {dimension_semantics = [#tpu.dimension_semantics<parallel>], iteration_bounds = array<i64: 1>, scalar_prefetch = 0 : i64, scratch_operands = 0 : i64, tpu.core_type = #tpu.core_type<tc>, window_params = [{transform_indices = @transform_0, window_bounds = array<i64: 128, 32>}, {transform_indices = @transform_1, window_bounds = array<i64: 128, 32>}, {pipeline_mode = #tpu.pipeline_mode<synchronous>, transform_indices = @transform_2, window_bounds = array<i64: 1, 32>}, {pipeline_mode = #tpu.pipeline_mode<synchronous>, transform_indices = @transform_3, window_bounds = array<i64: 1, 32>}, {pipeline_mode = #tpu.pipeline_mode<synchronous>, transform_indices = @transform_4, window_bounds = array<i64: 32, 128>}, {pipeline_mode = #tpu.pipeline_mode<synchronous>, transform_indices = @transform_5, window_bounds = array<i64: 1, 128>}, {pipeline_mode = #tpu.pipeline_mode<synchronous>, transform_indices = @transform_6, window_bounds = array<i64: 128, 32>}, {pipeline_mode = #tpu.pipeline_mode<synchronous>, transform_indices = @transform_7, window_bounds = array<i64: 1, 32>}, {transform_indices = @transform_8, window_bounds = array<i64: 128, 32>}]} {
    %c0 = arith.constant 0 : index
    %c0_0 = arith.constant 0 : index
    %0 = vector.load %arg1[%c0, %c0_0] : memref<128x32xf32, #tpu.memory_space<vmem>>, vector<128x32xf32>
    %c0_1 = arith.constant 0 : index
    %c0_2 = arith.constant 0 : index
    %1 = vector.load %arg2[%c0_1, %c0_2] : memref<128x32xf32, #tpu.memory_space<vmem>>, vector<128x32xf32>
    %2 = arith.addf %0, %1 : vector<128x32xf32>
    %cst = arith.constant dense<0.000000e+00> : vector<128xf32>
    %3 = vector.multi_reduction <add>, %2, %cst [1] : vector<128x32xf32> to vector<128xf32>
    %4 = vector.shape_cast %3 : vector<128xf32> to vector<128x1xf32>
    %cst_3 = arith.constant 3.200000e+01 : f32
    %5 = vector.broadcast %cst_3 : f32 to vector<128x1xf32>
    %6 = arith.divf %4, %5 : vector<128x1xf32>
    %7 = vector.broadcast %6 : vector<128x1xf32> to vector<128x32xf32>
    %8 = arith.subf %2, %7 : vector<128x32xf32>
    %9 = arith.mulf %8, %8 : vector<128x32xf32>
    %cst_4 = arith.constant dense<0.000000e+00> : vector<128xf32>
    %10 = vector.multi_reduction <add>, %9, %cst_4 [1] : vector<128x32xf32> to vector<128xf32>
    %11 = vector.shape_cast %10 : vector<128xf32> to vector<128x1xf32>
    %cst_5 = arith.constant 3.200000e+01 : f32
    %12 = vector.broadcast %cst_5 : f32 to vector<128x1xf32>
    %13 = arith.divf %11, %12 : vector<128x1xf32>
    %14 = vector.broadcast %6 : vector<128x1xf32> to vector<128x32xf32>
    %15 = arith.subf %2, %14 : vector<128x32xf32>
    %cst_6 = arith.constant 9.99999974E-6 : f32
    %16 = vector.broadcast %cst_6 : f32 to vector<128x1xf32>
    %17 = arith.addf %13, %16 : vector<128x1xf32>
    %18 = math.rsqrt %17 : vector<128x1xf32>
    %19 = vector.broadcast %18 : vector<128x1xf32> to vector<128x32xf32>
    %20 = arith.mulf %15, %19 : vector<128x32xf32>
    %c0_7 = arith.constant 0 : index
    %c0_8 = arith.constant 0 : index
    %21 = vector.load %arg3[%c0_7, %c0_8] : memref<1x32xf32, #tpu.memory_space<vmem>>, vector<1x32xf32>
    %22 = vector.broadcast %21 : vector<1x32xf32> to vector<128x32xf32>
    %23 = arith.mulf %20, %22 : vector<128x32xf32>
    %c0_9 = arith.constant 0 : index
    %c0_10 = arith.constant 0 : index
    %24 = vector.load %arg4[%c0_9, %c0_10] : memref<1x32xf32, #tpu.memory_space<vmem>>, vector<1x32xf32>
    %25 = vector.broadcast %24 : vector<1x32xf32> to vector<128x32xf32>
    %26 = arith.addf %23, %25 : vector<128x32xf32>
    %c0_11 = arith.constant 0 : index
    %c0_12 = arith.constant 0 : index
    %27 = vector.load %arg5[%c0_11, %c0_12] : memref<32x128xf32, #tpu.memory_space<vmem>>, vector<32x128xf32>
    %cst_13 = arith.constant dense<0.000000e+00> : vector<128x128xf32>
    %28 = tpu.matmul %26, %27, %cst_13 {dimension_numbers = #tpu.dot_dimension_numbers<[1], [0], [0], [1], [0, 0, 1, 1], [], []>} : vector<128x32xf32>, vector<32x128xf32>, vector<128x128xf32> -> vector<128x128xf32>
    %c0_14 = arith.constant 0 : index
    %c0_15 = arith.constant 0 : index
    %29 = vector.load %arg6[%c0_14, %c0_15] : memref<1x128xf32, #tpu.memory_space<vmem>>, vector<1x128xf32>
    %30 = vector.broadcast %29 : vector<1x128xf32> to vector<128x128xf32>
    %31 = arith.addf %28, %30 : vector<128x128xf32>
    %cst_16 = arith.constant 5.000000e-01 : f32
    %32 = vector.broadcast %cst_16 : f32 to vector<128x128xf32>
    %33 = arith.mulf %32, %31 : vector<128x128xf32>
    %cst_17 = arith.constant 0.707106769 : f32
    %34 = vector.broadcast %cst_17 : f32 to vector<128x128xf32>
    %35 = arith.mulf %31, %34 : vector<128x128xf32>
    %36 = math.erf %35 : vector<128x128xf32>
    %cst_18 = arith.constant 1.000000e+00 : f32
    %37 = vector.broadcast %cst_18 : f32 to vector<128x128xf32>
    %38 = arith.addf %37, %36 : vector<128x128xf32>
    %39 = arith.mulf %33, %38 : vector<128x128xf32>
    %c0_19 = arith.constant 0 : index
    %c0_20 = arith.constant 0 : index
    %40 = vector.load %arg7[%c0_19, %c0_20] : memref<128x32xf32, #tpu.memory_space<vmem>>, vector<128x32xf32>
    %cst_21 = arith.constant dense<0.000000e+00> : vector<128x32xf32>
    %41 = tpu.matmul %39, %40, %cst_21 {dimension_numbers = #tpu.dot_dimension_numbers<[1], [0], [0], [1], [0, 0, 1, 1], [], []>} : vector<128x128xf32>, vector<128x32xf32>, vector<128x32xf32> -> vector<128x32xf32>
    %c0_22 = arith.constant 0 : index
    %c0_23 = arith.constant 0 : index
    %42 = vector.load %arg8[%c0_22, %c0_23] : memref<1x32xf32, #tpu.memory_space<vmem>>, vector<1x32xf32>
    %43 = vector.broadcast %42 : vector<1x32xf32> to vector<128x32xf32>
    %44 = arith.addf %41, %43 : vector<128x32xf32>
    %45 = arith.addf %2, %44 : vector<128x32xf32>
    %c0_24 = arith.constant 0 : index
    %c0_25 = arith.constant 0 : index
    %46 = vector.load %arg9[%c0_24, %c0_25] : memref<128x32xf32, #tpu.memory_space<vmem>>, vector<128x32xf32>
    tpu.vector_store %arg9[%c0_24, %c0_25], %45 {strides = array<i32>} : memref<128x32xf32, #tpu.memory_space<vmem>>, vector<128x32xf32>,
    return
  }
  func.func @transform_0(%arg0: i32) -> (i32, i32) {
    %c0_i32 = arith.constant 0 : i32
    %c0_i32_0 = arith.constant 0 : i32
    return %arg0, %c0_i32 : i32, i32
  }
  func.func @transform_1(%arg0: i32) -> (i32, i32) {
    %c0_i32 = arith.constant 0 : i32
    %c0_i32_0 = arith.constant 0 : i32
    return %arg0, %c0_i32 : i32, i32
  }
  func.func @transform_2(%arg0: i32) -> (i32, i32) {
    %c0_i32 = arith.constant 0 : i32
    %c0_i32_0 = arith.constant 0 : i32
    %c0_i32_1 = arith.constant 0 : i32
    return %c0_i32, %c0_i32_0 : i32, i32
  }
  func.func @transform_3(%arg0: i32) -> (i32, i32) {
    %c0_i32 = arith.constant 0 : i32
    %c0_i32_0 = arith.constant 0 : i32
    %c0_i32_1 = arith.constant 0 : i32
    return %c0_i32, %c0_i32_0 : i32, i32
  }
  func.func @transform_4(%arg0: i32) -> (i32, i32) {
    %c0_i32 = arith.constant 0 : i32
    %c0_i32_0 = arith.constant 0 : i32
    %c0_i32_1 = arith.constant 0 : i32
    return %c0_i32, %c0_i32_0 : i32, i32
  }
  func.func @transform_5(%arg0: i32) -> (i32, i32) {
    %c0_i32 = arith.constant 0 : i32
    %c0_i32_0 = arith.constant 0 : i32
    %c0_i32_1 = arith.constant 0 : i32
    return %c0_i32, %c0_i32_0 : i32, i32
  }
  func.func @transform_6(%arg0: i32) -> (i32, i32) {
    %c0_i32 = arith.constant 0 : i32
    %c0_i32_0 = arith.constant 0 : i32
    %c0_i32_1 = arith.constant 0 : i32
    return %c0_i32, %c0_i32_0 : i32, i32
  }
  func.func @transform_7(%arg0: i32) -> (i32, i32) {
    %c0_i32 = arith.constant 0 : i32
    %c0_i32_0 = arith.constant 0 : i32
    %c0_i32_1 = arith.constant 0 : i32
    return %c0_i32, %c0_i32_0 : i32, i32
  }
  func.func @transform_8(%arg0: i32) -> (i32, i32) {
    %c0_i32 = arith.constant 0 : i32
    %c0_i32_0 = arith.constant 0 : i32
    return %arg0, %c0_i32 : i32, i32
  }
}

</mosaic_0001>

<bundles_post_ra>
// kernel: swin_block_forward.3
= control target key start
LH: loop header
LB: loop body
LE: loop exit
PB: predicated region body
PF: predicated region fallthrough
CT: control target
= control target key end

     0   :  { %vm77_vm0 = vcmask 261120   ;;  %v1563_v38 = vmov 32.0   ;;  %s2795_s0 = inlined_call_operand.vmem [shape: f32[128,32], index: 0, kind: input, shape index: {}]   ;;  %s2796_s1 = inlined_call_operand.vmem [shape: f32[128,32], index: 1, kind: input, shape index: {}]   ;;  %s2797_s2 = inlined_call_operand.vmem [shape: f32[1,32], index: 2, kind: input, shape index: {}]   ;;  %s2798_s3 = inlined_call_operand.vmem [shape: f32[1,32], index: 3, kind: input, shape index: {}]   ;;  %s2799_s4 = inlined_call_operand.vmem [shape: f32[32,128], index: 4, kind: input, shape index: {}]   ;;  %s2800_s5 = inlined_call_operand.vmem [shape: f32[1,128], index: 5, kind: input, shape index: {}]   ;;  %s2801_s6 = inlined_call_operand.vmem [shape: f32[128,32], index: 6, kind: input, shape index: {}]   ;;  %s2802_s7 = inlined_call_operand.vmem [shape: f32[1,32], index: 7, kind: input, shape index: {}]   ;;  %s2803_s8 = inlined_call_operand.vmem [shape: f32[128,32], index: 8, kind: output, shape index: {}]  }
   0x1   :  { %v33_v0 = vld [vmem:[%s2795_s0 + $0x20] sm:$0xff]  ;;  %v34_v6 = vld [vmem:[%s2795_s0 + $0x28] sm:$0xff]  ;;  %v31_v8 = vld [vmem:[%s2795_s0 + $0x10] sm:$0xff]  ;;  %1496 = vrcp.f32 %v1563_v38 }
   0x2   :  { %v49_v1 = vld [vmem:[%s2796_s1 + $0x20] sm:$0xff]  ;;  %v50_v7 = vld [vmem:[%s2796_s1 + $0x28] sm:$0xff]  ;;  %v47_v12 = vld [vmem:[%s2796_s1 + $0x10] sm:$0xff] }
   0x3   :  { %v29_v2 = vld [vmem:[%s2795_s0] sm:$0xff]  ;;  %v1618_v3 = vadd.f32 %v49_v1, %v33_v0  ;;  %v30_v10 = vld [vmem:[%s2795_s0 + $0x8] sm:$0xff]  ;;  %v1647_v14 = vadd.f32 %v47_v12, %v31_v8  ;;  %v1649_v15 = vadd.f32 %v50_v7, %v34_v6  ;;  %v32_v16 = vld [vmem:[%s2795_s0 + $0x18] sm:$0xff] }
   0x4   :  { %v45_v4 = vld [vmem:[%s2796_s1] sm:$0xff]  ;;  %v46_v11 = vld [vmem:[%s2796_s1 + $0x8] sm:$0xff]  ;;  %v48_v17 = vld [vmem:[%s2796_s1 + $0x18] sm:$0xff] }
   0x5   :  { %v1623_v5 = vadd.f32 %v45_v4, %v29_v2  ;;  %v90_v9 = vsel %vm77_vm0, %v1618_v3, 0.0  ;;  %v1657_v18 = vadd.f32 %v46_v11, %v30_v10  ;;  %v84_v19 = vsel %vm77_vm0, %v1647_v14, 0.0  ;;  %v35_v24 = vld [vmem:[%s2795_s0 + $0x30] sm:$0xff]  ;;  %v40_v32 = vld [vmem:[%s2795_s0 + $0x58] sm:$0xff]  ;;  %v41_v36 = vld [vmem:[%s2795_s0 + $0x60] sm:$0xff] }
   0x6   :  { %91 = vadd.xlane.f32.xlu2 %v90_v9  ;;  %85 = vadd.xlane.f32.xlu1 %v84_v19  ;;  %v1661_v20 = vadd.f32 %v48_v17, %v32_v16  ;;  %v93_v21 = vsel %vm77_vm0, %v1649_v15, 0.0  ;;  %v51_v25 = vld [vmem:[%s2796_s1 + $0x30] sm:$0xff]  ;;  %v56_v33 = vld [vmem:[%s2796_s1 + $0x58] sm:$0xff]  ;;  %v57_v37 = vld [vmem:[%s2796_s1 + $0x60] sm:$0xff] }
   0x7   :  { %v78_v13 = vsel %vm77_vm0, %v1623_v5, 0.0  ;;  %v81_v22 = vsel %vm77_vm0, %v1657_v18, 0.0  ;;  %v1675_v26 = vadd.f32 %v51_v25, %v35_v24  ;;  %v39_v28 = vld [vmem:[%s2795_s0 + $0x50] sm:$0xff]  ;;  %v1695_v34 = vadd.f32 %v56_v33, %v40_v32  ;;  %v1497_v41 = vpop.eup %1496  ;;  %v36_v53 = vld [vmem:[%s2795_s0 + $0x38] sm:$0xff]  ;;  %v37_v10 = vld [vmem:[%s2795_s0 + $0x40] sm:$0xff] }
   0x8   :  { %79 = vadd.xlane.f32.xlu0 %v78_v13  ;;  %v87_v23 = vsel %vm77_vm0, %v1661_v20, 0.0  ;;  %v55_v29 = vld [vmem:[%s2796_s1 + $0x50] sm:$0xff]  ;;  %v1705_v39 = vadd.f32 %v57_v37, %v41_v36  ;;  %v127_v42 = vmul.f32 32.0, %v1497_v41  ;;  %vm131_vm1 = vweird.f32 %v1497_v41  ;;  %v52_v54 = vld [vmem:[%s2796_s1 + $0x38] sm:$0xff]  ;;  %v53_v11 = vld [vmem:[%s2796_s1 + $0x40] sm:$0xff] }
   0x9   :  { %v96_v27 = vsel %vm77_vm0, %v1675_v26, 0.0  ;;  %v1685_v30 = vadd.f32 %v55_v29, %v39_v28  ;;  %v111_v35 = vsel %vm77_vm0, %v1695_v34, 0.0  ;;  %v1727_v61 = vadd.f32 %v52_v54, %v36_v53  ;;  %v44_v6 = vld [vmem:[%s2795_s0 + $0x78] sm:$0xff]  ;;  %v38_v25 = vld [vmem:[%s2795_s0 + $0x48] sm:$0xff] }
   0xa   :  { %v114_v40 = vsel %vm77_vm0, %v1705_v39, 0.0  ;;  %v128_v43 = vsub.f32 1.0, %v127_v42  ;;  %v60_v7 = vld [vmem:[%s2796_s1 + $0x78] sm:$0xff]  ;;  %v1761_v17 = vadd.f32 %v53_v11, %v37_v10  ;;  %v42_v37 = vld [vmem:[%s2795_s0 + $0x68] sm:$0xff] }
   0xb   :  { %v108_v31 = vsel %vm77_vm0, %v1685_v30, 0.0  ;;  %v99_v2 = vsel %vm77_vm0, %v1727_v61, 0.0  ;;  %v1758_v13 = vadd.f32 %v60_v7, %v44_v6  ;;  %v58_v38 = vld [vmem:[%s2796_s1 + $0x68] sm:$0xff] }
   0xc   :  { %v129_v44 = vmul.f32 %v1497_v41, %v128_v43 }
   0xe   :  { %94 = vadd.xlane.f32.xlu2 %v93_v21  ;;  %88 = vadd.xlane.f32.xlu1 %v87_v23  ;;  %v130_v45 = vadd.f32 %v1497_v41, %v129_v44  ;;  %v123_v21 = vsel %vm77_vm0, %v1758_v13, 0.0  ;;  %v102_v23 = vsel %vm77_vm0, %v1761_v17, 0.0 }
  0x10   :  { %82 = vadd.xlane.f32.xlu0 %v81_v22  ;;  %v1709_v46 = vsel %vm131_vm1, %v1497_v41, %v130_v45  ;;  %v1797_v41 = vadd.f32 %v58_v38, %v42_v37 }
  0x12   :  { %v117_v44 = vsel %vm77_vm0, %v1797_v41, 0.0 }
  0x16   :  { %97 = vadd.xlane.f32.xlu1 %v96_v27  ;;  %v54_v27 = vld [vmem:[%s2796_s1 + $0x48] sm:$0xff] }
  0x17   :  { %v1780_v29 = vadd.f32 %v54_v27, %v38_v25 }
  0x1e   :  { %109 = vadd.xlane.f32.xlu1 %v108_v31 }
  0x26   :  { %112 = vadd.xlane.f32.xlu1 %v111_v35  ;;  %v105_v35 = vsel %vm77_vm0, %v1780_v29, 0.0 }
  0x2e   :  { %115 = vadd.xlane.f32.xlu1 %v114_v40 }
  0x79   :  { %v92_v47 = vpop.xlane.xlu2 %91  ;;  %v86_v51 = vpop.xlane.xlu1 %85 }
  0x7a   :  { %v135_v60 = vmul.f32 %v1709_v46, %v86_v51  ;;  %v137_v28 = vmul.f32 %v1709_v46, %v92_v47 }
  0x7b   :  { %v80_v48 = vpop.xlane.xlu0 %79 }
  0x7c   :  { %v133_v49 = vmul.f32 %v1709_v46, %v80_v48  ;;  %v1738_v1 = vsub.f32 %v1647_v14, %v135_v60  ;;  %v1785_v33 = vsub.f32 %v1618_v3, %v137_v28  ;;  %v43_v48 = vld [vmem:[%s2795_s0 + $0x70] sm:$0xff] }
  0x7d   :  { %v479_v60 = vld [vmem:[%s2799_s4 + $0x10] sm:$0xff] }
  0x7e   :  { %v1713_v50 = vsub.f32 %v1623_v5, %v133_v49  ;;  %v167_v19 = vmul.f32 %v1738_v1, %v1738_v1  ;;  %v169_v42 = vmul.f32 %v1785_v33, %v1785_v33  ;;  %v59_v49 = vld [vmem:[%s2796_s1 + $0x70] sm:$0xff] }
  0x7f   :  { %v1816_v53 = vadd.f32 %v59_v49, %v43_v48 }
  0x80   :  { %v165_v52 = vmul.f32 %v1713_v50, %v1713_v50  ;;  %v187_v24 = vsel %vm77_vm0, %v167_v19, 0.0  ;;  %v193_v45 = vsel %vm77_vm0, %v169_v42, 0.0 }
  0x81   :  { %v95_v55 = vpop.xlane.xlu2 %94  ;;  %v89_v9 = vpop.xlane.xlu1 %88 }
  0x82   :  { %v181_v56 = vsel %vm77_vm0, %v165_v52, 0.0  ;;  %v138_v57 = vmul.f32 %v1709_v46, %v95_v55  ;;  %v136_v16 = vmul.f32 %v1709_v46, %v89_v9 }
  0x83   :  { %182 = vadd.xlane.f32.xlu0 %v181_v56  ;;  %v83_v58 = vpop.xlane.xlu0 %82  ;;  %v120_v56 = vsel %vm77_vm0, %v1816_v53, 0.0 }
  0x84   :  { %v134_v59 = vmul.f32 %v1709_v46, %v83_v58  ;;  %v1730_v62 = vsub.f32 %v1649_v15, %v138_v57  ;;  %v1768_v22 = vsub.f32 %v1661_v20, %v136_v16 }
  0x86   :  { %v1733_v63 = vsub.f32 %v1657_v18, %v134_v59  ;;  %v170_v0 = vmul.f32 %v1730_v62, %v1730_v62  ;;  %v168_v31 = vmul.f32 %v1768_v22, %v1768_v22  ;;  %v480_v59 = vld [vmem:[%s2799_s4 + $0x18] sm:$0xff] }
  0x87   :  { %545 = vmatpush.msra.mxu0 %v480_v59  ;;  %1455 = vmatpush.msra.mxu3 %v480_v59 }
  0x88   :  { %v166_v4 = vmul.f32 %v1733_v63, %v1733_v63  ;;  %v196_v8 = vsel %vm77_vm0, %v170_v0, 0.0  ;;  %v190_v36 = vsel %vm77_vm0, %v168_v31, 0.0  ;;  %v478_v0 = vld [vmem:[%s2799_s4 + $0x8] sm:$0xff] }
  0x89   :  { %197 = vadd.xlane.f32.xlu1 %v196_v8  ;;  %v98_v32 = vpop.xlane.xlu1 %97  ;;  %546 = vmatpush.msra.mxu0 %v479_v60 }
  0x8a   :  { %v184_v12 = vsel %vm77_vm0, %v166_v4, 0.0  ;;  %v139_v40 = vmul.f32 %v1709_v46, %v98_v32  ;;  %1456 = vmatpush.msra.mxu3 %v479_v60  ;;  %v477_v4 = vld [vmem:[%s2799_s4] sm:$0xff] }
  0x8b   :  { %100 = vadd.xlane.f32.xlu0 %v99_v2  ;;  %185 = vadd.xlane.f32.xlu2 %v184_v12  ;;  %v1873_v60 = vld [vmem:[%s2797_s2] ss:$0 sm:$0xff] }
  0x8c   :  { %v1802_v43 = vsub.f32 %v1675_v26, %v139_v40  ;;  %547 = vmatpush.msra.mxu0 %v478_v0  ;;  %1457 = vmatpush.msra.mxu3 %v478_v0 }
  0x8e   :  { %v171_v52 = vmul.f32 %v1802_v43, %v1802_v43  ;;  %548 = vmatpush.msra.mxu0 %v477_v4  ;;  %1458 = vmatpush.msra.mxu3 %v477_v4 }
  0x90   :  { %v199_v55 = vsel %vm77_vm0, %v171_v52, 0.0 }
  0x91   :  { %124 = vadd.xlane.f32.xlu1 %v123_v21  ;;  %v110_v47 = vpop.xlane.xlu1 %109 }
  0x92   :  { %v143_v51 = vmul.f32 %v1709_v46, %v110_v47 }
  0x93   :  { %103 = vadd.xlane.f32.xlu0 %v102_v23  ;;  %188 = vadd.xlane.f32.xlu2 %v187_v24 }
  0x94   :  { %v1819_v54 = vsub.f32 %v1685_v30, %v143_v51 }
  0x96   :  { %v175_v57 = vmul.f32 %v1819_v54, %v1819_v54 }
  0x98   :  { %v211_v58 = vsel %vm77_vm0, %v175_v57, 0.0 }
  0x99   :  { %v113_v2 = vpop.xlane.xlu1 %112 }
  0x9a   :  { %v144_v12 = vmul.f32 %v1709_v46, %v113_v2 }
  0x9b   :  { %106 = vadd.xlane.f32.xlu0 %v105_v35  ;;  %191 = vadd.xlane.f32.xlu2 %v190_v36 }
  0x9c   :  { %v1847_v27 = vsub.f32 %v1695_v34, %v144_v12 }
  0xa1   :  { %v116_v9 = vpop.xlane.xlu1 %115 }
  0xa2   :  { %v145_v36 = vmul.f32 %v1709_v46, %v116_v9  ;;  %v1882_v9 = vld [vmem:[%s2798_s3] ss:$0 sm:$0xff] }
  0xa3   :  { %118 = vadd.xlane.f32.xlu0 %v117_v44  ;;  %194 = vadd.xlane.f32.xlu2 %v193_v45  ;;  %v176_v45 = vmul.f32 %v1847_v27, %v1847_v27 }
  0xab   :  { %200 = vadd.xlane.f32.xlu0 %v199_v55  ;;  %121 = vadd.xlane.f32.xlu2 %v120_v56  ;;  %v1864_v55 = vsub.f32 %v1705_v39, %v145_v36 }
  0xb3   :  { %212 = vadd.xlane.f32.xlu0 %v211_v58  ;;  %v214_v58 = vsel %vm77_vm0, %v176_v45, 0.0 }
  0xf6   :  { %v183_v6 = vpop.xlane.xlu0 %182 }
  0xf7   :  { %v229_v7 = vmul.f32 %v183_v6, %v1709_v46 }
  0xf9   :  { %v245_v8 = vadd.f32 1e-05, %v229_v7 }
  0xfb   :  { %1498 = vrsqrt.f32 %v245_v8  ;;  %vm267_vm3 = vweird.f32 %v245_v8 }
  0xfc   :  { %v198_v32 = vpop.xlane.xlu1 %197 }
  0xfd   :  { %v234_v49 = vmul.f32 %v198_v32, %v1709_v46 }
  0xfe   :  { %v186_v10 = vpop.xlane.xlu2 %185  ;;  %v101_v11 = vpop.xlane.xlu0 %100 }
  0xff   :  { %v230_v16 = vmul.f32 %v186_v10, %v1709_v46  ;;  %v140_v19 = vmul.f32 %v1709_v46, %v101_v11  ;;  %v1875_v6 = vadd.f32 1e-05, %v234_v49 }
 0x101   :  { %v1499_v21 = vpop.eup %1498  ;;  %v246_v23 = vadd.f32 1e-05, %v230_v16  ;;  %v1844_v24 = vsub.f32 %v1727_v61, %v140_v19  ;;  %v177_v16 = vmul.f32 %v1864_v55, %v1864_v55  ;;  %vm317_vm14 = vweird.f32 %v1875_v6 }
 0x102   :  { %v262_v25 = vmul.f32 %v1499_v21, %v245_v8  ;;  %vm268_vm2 = vweird.f32 %v1499_v21 }
 0x103   :  { %1500 = vrsqrt.f32 %v246_v23  ;;  %v172_v28 = vmul.f32 %v1844_v24, %v1844_v24  ;;  %vm269_vm4 = vmor %vm267_vm3, %vm268_vm2  ;;  %vm277_vm6 = vweird.f32 %v246_v23 }
 0x104   :  { %v263_v31 = vmul.f32 %v1499_v21, %v262_v25  ;;  %v125_v4 = vpop.xlane.xlu1 %124 }
 0x105   :  { %v202_v35 = vsel %vm77_vm0, %v172_v28, 0.0 }
 0x106   :  { %v264_v37 = vmul.f32 0.5, %v263_v31  ;;  %v189_v38 = vpop.xlane.xlu2 %188  ;;  %203 = vadd.xlane.f32.xlu2 %v202_v35  ;;  %v104_v40 = vpop.xlane.xlu0 %103 }
 0x107   :  { %v231_v42 = vmul.f32 %v189_v38, %v1709_v46  ;;  %v141_v44 = vmul.f32 %v1709_v46, %v104_v40 }
 0x108   :  { %v265_v47 = vsub.f32 1.5, %v264_v37 }
 0x109   :  { %v1501_v48 = vpop.eup %1500  ;;  %v1858_v51 = vadd.f32 1e-05, %v231_v42  ;;  %v1861_v52 = vsub.f32 %v1761_v17, %v141_v44  ;;  %v217_v42 = vsel %vm77_vm0, %v177_v16, 0.0 }
 0x10a   :  { %v266_v56 = vmul.f32 %v1499_v21, %v265_v47  ;;  %v272_v57 = vmul.f32 %v1501_v48, %v246_v23  ;;  %vm278_vm5 = vweird.f32 %v1501_v48 }
 0x10b   :  { %1502 = vrsqrt.f32 %v1858_v51  ;;  %v173_v59 = vmul.f32 %v1861_v52, %v1861_v52  ;;  %vm279_vm7 = vmor %vm277_vm6, %vm278_vm5  ;;  %vm287_vm9 = vweird.f32 %v1858_v51 }
 0x10c   :  { %v270_v0 = vsel %vm269_vm4, %v1499_v21, %v266_v56  ;;  %v273_v2 = vmul.f32 %v1501_v48, %v272_v57  ;;  %1504 = vrsqrt.f32 %v1875_v6 }
 0x10d   :  { %v205_v7 = vsel %vm77_vm0, %v173_v59, 0.0  ;;  %v421_v8 = vmul.f32 %v270_v0, %v1713_v50  ;;  %v148_v50 = vmul.f32 %v1709_v46, %v125_v4 }
 0x10e   :  { %v274_v10 = vmul.f32 0.5, %v273_v2  ;;  %v192_v11 = vpop.xlane.xlu2 %191  ;;  %215 = vadd.xlane.f32.xlu2 %v214_v58  ;;  %206 = vadd.xlane.f32.xlu1 %v205_v7  ;;  %v107_v12 = vpop.xlane.xlu0 %106 }
 0x10f   :  { %v232_v19 = vmul.f32 %v192_v11, %v1709_v46  ;;  %v142_v21 = vmul.f32 %v1709_v46, %v107_v12  ;;  %v441_v25 = vmul.f32 %v1873_v60, %v421_v8  ;;  %v1901_v40 = vsub.f32 %v1758_v13, %v148_v50 }
 0x110   :  { %v275_v28 = vsub.f32 1.5, %v274_v10 }
 0x111   :  { %v1503_v31 = vpop.eup %1502  ;;  %v1891_v32 = vadd.f32 1e-05, %v232_v19  ;;  %v1894_v35 = vsub.f32 %v1780_v29, %v142_v21  ;;  %v461_v36 = vadd.f32 %v1882_v9, %v441_v25 }
 0x112   :  { %v276_v37 = vmul.f32 %v1501_v48, %v275_v28  ;;  %v282_v38 = vmul.f32 %v1503_v31, %v1858_v51  ;;  %v1908_v59 = vpop.eup %1504  ;;  %vm288_vm8 = vweird.f32 %v1503_v31 }
 0x113   :  { %1506 = vrsqrt.f32 %v1891_v32  ;;  %1423 = vmatmul.msk.f32.vlgmr.msra.gmra.mxu0 %vm77_vm0, %v461_v36  ;;  %v174_v44 = vmul.f32 %v1894_v35, %v1894_v35  ;;  %v312_v12 = vmul.f32 %v1908_v59, %v1875_v6  ;;  %vm289_vm10 = vmor %vm287_vm9, %vm288_vm8  ;;  %vm297_vm12 = vweird.f32 %v1891_v32 }
 0x114   :  { %v280_v45 = vsel %vm279_vm7, %v1501_v48, %v276_v37  ;;  %v283_v47 = vmul.f32 %v1503_v31, %v282_v38  ;;  %v180_v48 = vmul.f32 %v1901_v40, %v1901_v40  ;;  %vm318_vm15 = vweird.f32 %v1908_v59 }
 0x115   :  { %v208_v49 = vsel %vm77_vm0, %v174_v44, 0.0  ;;  %v422_v23 = vmul.f32 %v280_v45, %v1733_v63  ;;  %v313_v38 = vmul.f32 %v1908_v59, %v312_v12  ;;  %vm1949_vm2 = vmor %vm317_vm14, %vm318_vm15 }
 0x116   :  { %v284_v56 = vmul.f32 0.5, %v283_v47  ;;  %v195_v57 = vpop.xlane.xlu2 %194  ;;  %218 = vadd.xlane.f32.xlu1 %v217_v42  ;;  %209 = vadd.xlane.f32.xlu0 %v208_v49  ;;  %v119_v58 = vpop.xlane.xlu0 %118  ;;  %v226_v21 = vsel %vm77_vm0, %v180_v48, 0.0 }
 0x117   :  { %v233_v0 = vmul.f32 %v195_v57, %v1709_v46  ;;  %v146_v2 = vmul.f32 %v1709_v46, %v119_v58  ;;  %v442_v4 = vmul.f32 %v1873_v60, %v422_v23  ;;  %v314_v58 = vmul.f32 0.5, %v313_v38 }
 0x118   :  { %v285_v7 = vsub.f32 1.5, %v284_v56 }
 0x119   :  { %v1507_v8 = vpop.eup %1506  ;;  %v249_v63 = vadd.f32 1e-05, %v233_v0  ;;  %v1916_v10 = vsub.f32 %v1797_v41, %v146_v2  ;;  %v462_v11 = vadd.f32 %v1882_v9, %v442_v4 }
 0x11a   :  { %v286_v16 = vmul.f32 %v1503_v31, %v285_v7  ;;  %v292_v19 = vmul.f32 %v1507_v8, %v1891_v32  ;;  %vm298_vm11 = vweird.f32 %v1507_v8 }
 0x11b   :  { %1508 = vrsqrt.f32 %v249_v63  ;;  %1424 = vmatmul.msk.f32.gmra.mxu0 %vm77_vm0, %v462_v11  ;;  %v178_v25 = vmul.f32 %v1916_v10, %v1916_v10  ;;  %vm299_vm13 = vmor %vm297_vm12, %vm298_vm11  ;;  %vm307_vm3 = vweird.f32 %v249_v63 }
 0x11c   :  { %v290_v50 = vsel %vm289_vm10, %v1503_v31, %v286_v16  ;;  %v293_v28 = vmul.f32 %v1507_v8, %v292_v19  ;;  %v315_v16 = vsub.f32 1.5, %v314_v58 }
 0x11d   :  { %v220_v36 = vsel %vm77_vm0, %v178_v25, 0.0  ;;  %v423_v37 = vmul.f32 %v290_v50, %v1738_v1 }
 0x11e   :  { %v294_v51 = vmul.f32 0.5, %v293_v28  ;;  %v122_v42 = vpop.xlane.xlu2 %121  ;;  %227 = vadd.xlane.f32.xlu1 %v226_v21  ;;  %221 = vadd.xlane.f32.xlu2 %v220_v36  ;;  %v201_v44 = vpop.xlane.xlu0 %200 }
 0x11f   :  { %v147_v45 = vmul.f32 %v1709_v46, %v122_v42  ;;  %v235_v47 = vmul.f32 %v201_v44, %v1709_v46  ;;  %v443_v49 = vmul.f32 %v1873_v60, %v423_v37 }
 0x120   :  { %v295_v23 = vsub.f32 1.5, %v294_v51 }
 0x121   :  { %v1509_v31 = vpop.eup %1508  ;;  %v1934_v56 = vsub.f32 %v1816_v53, %v147_v45  ;;  %v251_v1 = vadd.f32 1e-05, %v235_v47  ;;  %v463_v57 = vadd.f32 %v1882_v9, %v443_v49 }
 0x122   :  { %v296_v0 = vmul.f32 %v1507_v8, %v295_v23  ;;  %v302_v2 = vmul.f32 %v1509_v31, %v249_v63  ;;  %vm308_vm1 = vweird.f32 %v1509_v31 }
 0x123   :  { %1510 = vrsqrt.f32 %v251_v1  ;;  %1425 = vmatmul.msk.f32.gmra.mxu0 %vm77_vm0, %v463_v57  ;;  %v179_v4 = vmul.f32 %v1934_v56, %v1934_v56  ;;  %vm309_vm4 = vmor %vm307_vm3, %vm308_vm1  ;;  %vm327_vm5 = vweird.f32 %v251_v1 }
 0x124   :  { %v300_v48 = vsel %vm299_vm13, %v1507_v8, %v296_v0  ;;  %v303_v7 = vmul.f32 %v1509_v31, %v302_v2 }
 0x125   :  { %v223_v11 = vsel %vm77_vm0, %v179_v4, 0.0  ;;  %v424_v12 = vmul.f32 %v300_v48, %v1768_v22  ;;  %v316_v22 = vmul.f32 %v1908_v59, %v315_v16 }
 0x126   :  { %v304_v19 = vmul.f32 0.5, %v303_v7  ;;  %224 = vadd.xlane.f32.xlu0 %v223_v11  ;;  %v213_v21 = vpop.xlane.xlu0 %212 }
 0x127   :  { %v239_v32 = vmul.f32 %v213_v21, %v1709_v46  ;;  %v444_v25 = vmul.f32 %v1873_v60, %v424_v12  ;;  %v320_v45 = vsel %vm1949_vm2, %v1908_v59, %v316_v22 }
 0x128   :  { %v305_v50 = vsub.f32 1.5, %v304_v19  ;;  %v426_v58 = vmul.f32 %v320_v45, %v1730_v62 }
 0x129   :  { %v1511_v8 = vpop.eup %1510  ;;  %v255_v28 = vadd.f32 1e-05, %v239_v32  ;;  %v464_v36 = vadd.f32 %v1882_v9, %v444_v25 }
 0x12a   :  { %v306_v38 = vmul.f32 %v1509_v31, %v305_v50  ;;  %v322_v6 = vmul.f32 %v1511_v8, %v251_v1  ;;  %vm328_vm6 = vweird.f32 %v1511_v8  ;;  %v446_v2 = vmul.f32 %v1873_v60, %v426_v58 }
 0x12b   :  { %1512 = vrsqrt.f32 %v255_v28  ;;  %1426 = vmatmul.msk.f32.gmra.mxu0 %vm77_vm0, %v464_v36  ;;  %vm329_vm7 = vmor %vm327_vm5, %vm328_vm6  ;;  %vm367_vm8 = vweird.f32 %v255_v28 }
 0x12c   :  { %v310_v51 = vsel %vm309_vm4, %v1509_v31, %v306_v38  ;;  %v323_v42 = vmul.f32 %v1511_v8, %v322_v6  ;;  %v466_v1 = vadd.f32 %v1882_v9, %v446_v2 }
 0x12d   :  { %v425_v44 = vmul.f32 %v310_v51, %v1785_v33 }
 0x12e   :  { %v324_v47 = vmul.f32 0.5, %v323_v42 }
 0x12f   :  { %v445_v49 = vmul.f32 %v1873_v60, %v425_v44 }
 0x130   :  { %v325_v23 = vsub.f32 1.5, %v324_v47 }
 0x131   :  { %v1513_v63 = vpop.eup %1512  ;;  %v465_v57 = vadd.f32 %v1882_v9, %v445_v49 }
 0x132   :  { %v326_v0 = vmul.f32 %v1511_v8, %v325_v23  ;;  %v362_v31 = vmul.f32 %v1513_v63, %v255_v28  ;;  %vm368_vm9 = vweird.f32 %v1513_v63 }
 0x133   :  { %1427 = vmatmul.msk.f32.gmra.mxu0 %vm77_vm0, %v465_v57  ;;  %vm369_vm10 = vmor %vm367_vm8, %vm368_vm9 }
 0x134   :  { %v363_v33 = vmul.f32 %v1513_v63, %v362_v31  ;;  %v330_v59 = vsel %vm329_vm7, %v1511_v8, %v326_v0  ;;  %v1317_v0 = vld [vmem:[%s2801_s6 + $0x78] sm:$0xff] }
 0x135   :  { %v427_v7 = vmul.f32 %v330_v59, %v1802_v43  ;;  %v2000_v59 = vld [vmem:[%s2800_s5] ss:$0 sm:$0xff]  ;;  %1322 = vmatpush.msra.mxu1 %v1317_v0  ;;  %1459 = vmatpush.msra.mxu2 %v1317_v0 }
 0x136   :  { %v364_v4 = vmul.f32 0.5, %v363_v33  ;;  %1460 = vmatpush.msrb.mxu3 %v1317_v0 }
 0x137   :  { %v447_v12 = vmul.f32 %v1873_v60, %v427_v7 }
 0x138   :  { %v365_v48 = vsub.f32 1.5, %v364_v4 }
 0x139   :  { %v467_v21 = vadd.f32 %v1882_v9, %v447_v12 }
 0x13a   :  { %v366_v11 = vmul.f32 %v1513_v63, %v365_v48  ;;  %v1316_v48 = vld [vmem:[%s2801_s6 + $0x70] sm:$0xff] }
 0x13b   :  { %1428 = vmatmul.msk.f32.gmra.mxu0 %vm77_vm0, %v466_v1  ;;  %1323 = vmatpush.msra.mxu1 %v1316_v48 }
 0x13c   :  { %v370_v62 = vsel %vm369_vm10, %v1513_v63, %v366_v11  ;;  %1461 = vmatpush.msra.mxu2 %v1316_v48  ;;  %1462 = vmatpush.msrb.mxu3 %v1316_v48 }
 0x13d   :  { %v431_v16 = vmul.f32 %v370_v62, %v1819_v54 }
 0x13f   :  { %v451_v19 = vmul.f32 %v1873_v60, %v431_v16  ;;  %v1315_v16 = vld [vmem:[%s2801_s6 + $0x68] sm:$0xff] }
 0x140   :  { %1324 = vmatpush.msra.mxu1 %v1315_v16  ;;  %1463 = vmatpush.msra.mxu2 %v1315_v16 }
 0x141   :  { %v471_v32 = vadd.f32 %v1882_v9, %v451_v19  ;;  %1464 = vmatpush.msrb.mxu3 %v1315_v16 }
 0x143   :  { %1429 = vmatmul.msk.f32.gmra.mxu0 %vm77_vm0, %v467_v21  ;;  %1433 = vmatmul.msk.f32.vlgmr.msra.gmra.mxu3 %vm77_vm0, %v471_v32 }
 0x179   :  { %v204_v25 = vpop.xlane.xlu2 %203 }
 0x17a   :  { %v236_v43 = vmul.f32 %v204_v25, %v1709_v46 }
 0x17c   :  { %v252_v50 = vadd.f32 1e-05, %v236_v43 }
 0x17e   :  { %1514 = vrsqrt.f32 %v252_v50  ;;  %vm337_vm12 = vweird.f32 %v252_v50 }
 0x181   :  { %v216_v8 = vpop.xlane.xlu2 %215  ;;  %v207_v28 = vpop.xlane.xlu1 %206 }
 0x182   :  { %v240_v36 = vmul.f32 %v216_v8, %v1709_v46  ;;  %v237_v54 = vmul.f32 %v207_v28, %v1709_v46  ;;  %v1314_v28 = vld [vmem:[%s2801_s6 + $0x60] sm:$0xff] }
 0x183   :  { %1325 = vmatpush.msra.mxu1 %v1314_v28  ;;  %1465 = vmatpush.msra.mxu2 %v1314_v28 }
 0x184   :  { %v1515_v22 = vpop.eup %1514  ;;  %v1976_v37 = vadd.f32 1e-05, %v240_v36  ;;  %v1978_v38 = vadd.f32 1e-05, %v237_v54  ;;  %1466 = vmatpush.msrb.mxu3 %v1314_v28 }
 0x185   :  { %v332_v6 = vmul.f32 %v1515_v22, %v252_v50  ;;  %vm338_vm11 = vweird.f32 %v1515_v22 }
 0x186   :  { %1516 = vrsqrt.f32 %v1976_v37  ;;  %vm339_vm13 = vmor %vm337_vm12, %vm338_vm11  ;;  %vm377_vm1 = vweird.f32 %v1976_v37  ;;  %vm347_vm3 = vweird.f32 %v1978_v38 }
 0x187   :  { %v333_v51 = vmul.f32 %v1515_v22, %v332_v6  ;;  %1518 = vrsqrt.f32 %v1978_v38 }
 0x189   :  { %v334_v42 = vmul.f32 0.5, %v333_v51  ;;  %v219_v44 = vpop.xlane.xlu1 %218  ;;  %v210_v45 = vpop.xlane.xlu0 %209 }
 0x18a   :  { %v241_v47 = vmul.f32 %v219_v44, %v1709_v46  ;;  %v238_v49 = vmul.f32 %v210_v45, %v1709_v46  ;;  %v1313_v44 = vld [vmem:[%s2801_s6 + $0x58] sm:$0xff] }
 0x18b   :  { %v335_v23 = vsub.f32 1.5, %v334_v42  ;;  %1326 = vmatpush.msra.mxu1 %v1313_v44  ;;  %1467 = vmatpush.msra.mxu2 %v1313_v44 }
 0x18c   :  { %v1984_v63 = vpop.eup %1516  ;;  %v1986_v57 = vadd.f32 1e-05, %v241_v47  ;;  %v1988_v58 = vadd.f32 1e-05, %v238_v49  ;;  %1468 = vmatpush.msrb.mxu3 %v1313_v44 }
 0x18d   :  { %v1993_v31 = vpop.eup %1518  ;;  %v336_v33 = vmul.f32 %v1515_v22, %v335_v23  ;;  %v372_v2 = vmul.f32 %v1984_v63, %v1976_v37  ;;  %vm378_vm14 = vweird.f32 %v1984_v63 }
 0x18e   :  { %v342_v4 = vmul.f32 %v1993_v31, %v1978_v38  ;;  %1520 = vrsqrt.f32 %v1986_v57  ;;  %vm348_vm15 = vweird.f32 %v1993_v31  ;;  %vm2047_vm2 = vmor %vm377_vm1, %vm378_vm14  ;;  %vm357_vm7 = vweird.f32 %v1988_v58 }
 0x18f   :  { %v340_v1 = vsel %vm339_vm13, %v1515_v22, %v336_v33  ;;  %v373_v7 = vmul.f32 %v1984_v63, %v372_v2  ;;  %1522 = vrsqrt.f32 %v1988_v58  ;;  %v1312_v2 = vld [vmem:[%s2801_s6 + $0x50] sm:$0xff]  ;;  %vm349_vm4 = vmor %vm347_vm3, %vm348_vm15  ;;  %vm387_vm8 = vweird.f32 %v1986_v57 }
 0x190   :  { %v343_v11 = vmul.f32 %v1993_v31, %v342_v4  ;;  %v550_v62 = vpop.f32.mrf.mxu0  ;;  %v428_v12 = vmul.f32 %v340_v1, %v1844_v24  ;;  %1327 = vmatpush.msra.mxu1 %v1312_v2  ;;  %1469 = vmatpush.msra.mxu2 %v1312_v2 }
 0x191   :  { %v374_v19 = vmul.f32 0.5, %v373_v7  ;;  %v2016_v21 = vadd.f32 %v2000_v59, %v550_v62  ;;  %v228_v32 = vpop.xlane.xlu1 %227  ;;  %v222_v25 = vpop.xlane.xlu2 %221  ;;  %1470 = vmatpush.msrb.mxu3 %v1312_v2 }
 0x192   :  { %v344_v43 = vmul.f32 0.5, %v343_v11  ;;  %v244_v50 = vmul.f32 %v228_v32, %v1709_v46  ;;  %v242_v8 = vmul.f32 %v222_v25, %v1709_v46  ;;  %v448_v24 = vmul.f32 %v1873_v60, %v428_v12 }
 0x193   :  { %v375_v36 = vsub.f32 1.5, %v374_v19  ;;  %v2026_v54 = vmul.f32 0.70710677, %v2016_v21 }
 0x194   :  { %v2028_v22 = vpop.eup %1520  ;;  %v345_v6 = vsub.f32 1.5, %v344_v43  ;;  %v2031_v51 = vadd.f32 1e-05, %v242_v8  ;;  %v468_v42 = vadd.f32 %v1882_v9, %v448_v24  ;;  %v2043_v23 = vadd.f32 1e-05, %v244_v50  ;;  %v1310_v43 = vld [vmem:[%s2801_s6 + $0x40] sm:$0xff] }
 0x195   :  { %v2037_v45 = vpop.eup %1522  ;;  %v376_v47 = vmul.f32 %v1984_v63, %v375_v36  ;;  %v382_v49 = vmul.f32 %v2028_v22, %v1986_v57  ;;  %v630_v38 = vmul.f32 %v2026_v54, %v2026_v54  ;;  %vm388_vm6 = vweird.f32 %v2028_v22 }
 0x196   :  { %v346_v33 = vmul.f32 %v1993_v31, %v345_v6  ;;  %v352_v37 = vmul.f32 %v2037_v45, %v1988_v58  ;;  %1430 = vmatmul.msk.f32.gmra.mxu0 %vm77_vm0, %v468_v42  ;;  %1524 = vrsqrt.f32 %v2031_v51  ;;  %vm358_vm5 = vweird.f32 %v2037_v45  ;;  %vm2120_vm10 = vmor %vm387_vm8, %vm388_vm6 }
 0x197   :  { %v380_v4 = vsel %vm2047_vm2, %v1984_v63, %v376_v47  ;;  %v383_v48 = vmul.f32 %v2028_v22, %v382_v49  ;;  %v1311_v63 = vld [vmem:[%s2801_s6 + $0x48] sm:$0xff]  ;;  %1526 = vrsqrt.f32 %v2043_v23  ;;  %v2084_v8 = vmin.f32 %v630_v38, 16.0  ;;  %v1308_v47 = vld [vmem:[%s2801_s6 + $0x30] sm:$0xff]  ;;  %vm2111_vm9 = vmor %vm357_vm7, %vm358_vm5 }
 0x198   :  { %v350_v1 = vsel %vm349_vm4, %v1993_v31, %v346_v33  ;;  %v353_v7 = vmul.f32 %v2037_v45, %v352_v37  ;;  %v553_v11 = vpop.f32.mrf.mxu0  ;;  %1328 = vmatpush.msra.mxu1 %v1311_v63  ;;  %1471 = vmatpush.msra.mxu2 %v1311_v63  ;;  %v432_v25 = vmul.f32 %v380_v4, %v1847_v27  ;;  %v1309_v27 = vld [vmem:[%s2801_s6 + $0x38] sm:$0xff]  ;;  %v1307_v38 = vld [vmem:[%s2801_s6 + $0x28] sm:$0xff]  ;;  %vm397_vm12 = vweird.f32 %v2031_v51 }
 0x199   :  { %v384_v62 = vmul.f32 0.5, %v383_v48  ;;  %v2075_v12 = vadd.f32 %v2000_v59, %v553_v11  ;;  %v225_v16 = vpop.xlane.xlu0 %224  ;;  %v429_v19 = vmul.f32 %v350_v1, %v1861_v52  ;;  %1472 = vmatpush.msrb.mxu3 %v1311_v63  ;;  %v632_v33 = vmul.f32 2.1237322e-06, %v2084_v8 }
 0x19a   :  { %v354_v31 = vmul.f32 0.5, %v353_v7  ;;  %v243_v32 = vmul.f32 %v225_v16, %v1709_v46  ;;  %1329 = vmatpush.msra.mxu1 %v1310_v43  ;;  %1473 = vmatpush.msra.mxu2 %v1310_v43  ;;  %v452_v6 = vmul.f32 %v1873_v60, %v432_v25  ;;  %vm417_vm1 = vweird.f32 %v2043_v23 }
 0x19b   :  { %v385_v50 = vsub.f32 1.5, %v384_v62  ;;  %v2087_v24 = vmul.f32 0.70710677, %v2075_v12  ;;  %v449_v46 = vmul.f32 %v1873_v60, %v429_v19  ;;  %1474 = vmatpush.msrb.mxu3 %v1310_v43  ;;  %v633_v16 = vadd.f32 0.00028619796, %v632_v33 }
 0x19c   :  { %v355_v52 = vsub.f32 1.5, %v354_v31  ;;  %v2089_v28 = vadd.f32 1e-05, %v243_v32  ;;  %1330 = vmatpush.msra.mxu1 %v1309_v27  ;;  %1475 = vmatpush.msra.mxu2 %v1309_v27  ;;  %v2098_v42 = vpop.eup %1524  ;;  %v472_v11 = vadd.f32 %v1882_v9, %v452_v6 }
 0x19d   :  { %v386_v36 = vmul.f32 %v2028_v22, %v385_v50  ;;  %1476 = vmatpush.msrb.mxu3 %v1309_v27  ;;  %v2106_v49 = vpop.eup %1526  ;;  %v392_v58 = vmul.f32 %v2098_v42, %v2031_v51  ;;  %v670_v2 = vmul.f32 %v2087_v24, %v2087_v24  ;;  %v469_v4 = vadd.f32 %v1882_v9, %v449_v46  ;;  %v1305_v50 = vld [vmem:[%s2801_s6 + $0x18] sm:$0xff] }
 0x19e   :  { %v356_v44 = vmul.f32 %v2037_v45, %v355_v52  ;;  %1528 = vrsqrt.f32 %v2089_v28  ;;  %1331 = vmatpush.msra.mxu1 %v1308_v47  ;;  %1477 = vmatpush.msra.mxu2 %v1308_v47  ;;  %vm398_vm11 = vweird.f32 %v2098_v42  ;;  %v643_v27 = vmul.f32 3.8918573e-05, %v2084_v8 }
 0x19f   :  { %1478 = vmatpush.msrb.mxu3 %v1308_v47  ;;  %v390_v1 = vsel %vm2120_vm10, %v2028_v22, %v386_v36  ;;  %v393_v7 = vmul.f32 %v2098_v42, %v392_v58  ;;  %1431 = vmatmul.msk.f32.gmra.mxu0 %vm77_vm0, %v469_v4  ;;  %v1306_v22 = vld [vmem:[%s2801_s6 + $0x20] sm:$0xff]  ;;  %v2151_v32 = vmin.f32 %v670_v2, 16.0  ;;  %v634_v47 = vmul.f32 %v633_v16, %v2084_v8  ;;  %vm2178_vm13 = vmor %vm397_vm12, %vm398_vm11  ;;  %v1303_v4 = vld [vmem:[%s2801_s6 + $0x8] sm:$0xff] }
 0x1a0   :  { %v360_v57 = vsel %vm2111_vm9, %v2037_v45, %v356_v44  ;;  %v556_v48 = vpop.f32.mrf.mxu0  ;;  %1332 = vmatpush.msra.mxu1 %v1307_v38  ;;  %1479 = vmatpush.msra.mxu2 %v1307_v38  ;;  %v412_v45 = vmul.f32 %v2106_v49, %v2043_v23  ;;  %v1304_v44 = vld [vmem:[%s2801_s6 + $0x10] sm:$0xff]  ;;  %vm407_vm15 = vweird.f32 %v2089_v28  ;;  %vm418_vm2 = vweird.f32 %v2106_v49 }
 0x1a1   :  { %v2142_v63 = vadd.f32 %v2000_v59, %v556_v48  ;;  %v430_v62 = vmul.f32 %v360_v57, %v1894_v35  ;;  %1480 = vmatpush.msrb.mxu3 %v1307_v38  ;;  %v394_v19 = vmul.f32 0.5, %v393_v7  ;;  %v433_v35 = vmul.f32 %v390_v1, %v1864_v55  ;;  %vm2230_vm4 = vmor %vm417_vm1, %vm418_vm2 }
 0x1a2   :  { %1434 = vmatmul.msk.f32.gmra.mxu3 %vm77_vm0, %v472_v11  ;;  %1333 = vmatpush.msra.mxu1 %v1306_v22  ;;  %v413_v36 = vmul.f32 %v2106_v49, %v412_v45  ;;  %v672_v37 = vmul.f32 2.1237322e-06, %v2151_v32  ;;  %v644_v1 = vadd.f32 0.001143296, %v643_v27 }
 0x1a3   :  { %v2154_v25 = vmul.f32 0.70710677, %v2142_v63  ;;  %v450_v43 = vmul.f32 %v1873_v60, %v430_v62  ;;  %1481 = vmatpush.msra.mxu2 %v1306_v22  ;;  %1482 = vmatpush.msrb.mxu3 %v1306_v22  ;;  %v395_v52 = vsub.f32 1.5, %v394_v19  ;;  %v453_v57 = vmul.f32 %v1873_v60, %v433_v35  ;;  %v1302_v22 = vld [vmem:[%s2801_s6] sm:$0xff] }
 0x1a4   :  { %v2149_v31 = vpop.eup %1528  ;;  %1334 = vmatpush.msra.mxu1 %v1305_v50  ;;  %v414_v7 = vmul.f32 0.5, %v413_v36 }
 0x1a5   :  { %v402_v46 = vmul.f32 %v2149_v31, %v2089_v28  ;;  %v710_v55 = vmul.f32 %v2154_v25, %v2154_v25  ;;  %v470_v6 = vadd.f32 %v1882_v9, %v450_v43  ;;  %1483 = vmatpush.msra.mxu2 %v1305_v50  ;;  %1484 = vmatpush.msrb.mxu3 %v1305_v50  ;;  %vm408_vm14 = vweird.f32 %v2149_v31 }
 0x1a6   :  { %v396_v0 = vmul.f32 %v2098_v42, %v395_v52  ;;  %1335 = vmatpush.msra.mxu1 %v1304_v44  ;;  %v473_v45 = vadd.f32 %v1882_v9, %v453_v57  ;;  %v645_v50 = vmul.f32 %v644_v1, %v2084_v8  ;;  %v415_v52 = vsub.f32 1.5, %v414_v7  ;;  %vm409_vm3 = vmor %vm407_vm15, %vm408_vm14 }
 0x1a7   :  { %v403_v33 = vmul.f32 %v2149_v31, %v402_v46  ;;  %1485 = vmatpush.msra.mxu2 %v1304_v44  ;;  %1486 = vmatpush.msrb.mxu3 %v1304_v44  ;;  %v2193_v11 = vmin.f32 %v710_v55, 16.0  ;;  %v683_v28 = vmul.f32 3.8918573e-05, %v2151_v32 }
 0x1a8   :  { %v559_v2 = vpop.f32.mrf.mxu0  ;;  %v400_v51 = vsel %vm2178_vm13, %v2098_v42, %v396_v0  ;;  %1336 = vmatpush.msra.mxu1 %v1303_v4  ;;  %1432 = vmatmul.msk.f32.gmra.mxu0 %vm77_vm0, %v470_v6  ;;  %v635_v42 = vadd.f32 0.0036580483, %v634_v47  ;;  %v646_v55 = vadd.f32 0.014752088, %v645_v50 }
 0x1a9   :  { %v404_v48 = vmul.f32 0.5, %v403_v33  ;;  %v2191_v38 = vadd.f32 %v2000_v59, %v559_v2  ;;  %v434_v62 = vmul.f32 %v400_v51, %v1916_v10  ;;  %1487 = vmatpush.msra.mxu2 %v1303_v4  ;;  %1488 = vmatpush.msrb.mxu3 %v1303_v4  ;;  %v673_v10 = vadd.f32 0.00028619796, %v672_v37 }
 0x1aa   :  { %1337 = vmatpush.msra.mxu1 %v1302_v22  ;;  %1435 = vmatmul.msk.f32.gmra.mxu3 %vm77_vm0, %v473_v45  ;;  %v712_v46 = vmul.f32 2.1237322e-06, %v2193_v11  ;;  %v636_v27 = vmul.f32 %v635_v42, %v2084_v8  ;;  %v723_v33 = vmul.f32 3.8918573e-05, %v2193_v11  ;;  %v647_v37 = vmul.f32 %v646_v55, %v2084_v8 }
 0x1ab   :  { %v405_v16 = vsub.f32 1.5, %v404_v48  ;;  %v2204_v19 = vmul.f32 0.70710677, %v2191_v38  ;;  %v454_v43 = vmul.f32 %v1873_v60, %v434_v62  ;;  %1489 = vmatpush.msra.mxu2 %v1302_v22  ;;  %1490 = vmatpush.msrb.mxu3 %v1302_v22  ;;  %v674_v58 = vmul.f32 %v673_v10, %v2151_v32 }
 0x1ac   :  { %v684_v57 = vadd.f32 0.001143296, %v683_v28  ;;  %v713_v2 = vadd.f32 0.00028619796, %v712_v46  ;;  %v724_v4 = vadd.f32 0.001143296, %v723_v33 }
 0x1ad   :  { %v406_v35 = vmul.f32 %v2149_v31, %v405_v16  ;;  %v750_v6 = vmul.f32 %v2204_v19, %v2204_v19  ;;  %v474_v44 = vadd.f32 %v1882_v9, %v454_v43  ;;  %v637_v48 = vadd.f32 0.05243302, %v636_v27 }
 0x1ae   :  { %v648_v45 = vadd.f32 0.112945676, %v647_v37  ;;  %v675_v62 = vadd.f32 0.0036580483, %v674_v58  ;;  %v725_v42 = vmul.f32 %v724_v4, %v2193_v11  ;;  %v714_v16 = vmul.f32 %v713_v2, %v2193_v11 }
 0x1af   :  { %v410_v36 = vsel %vm409_vm3, %v2149_v31, %v406_v35  ;;  %v416_v31 = vmul.f32 %v2106_v49, %v415_v52  ;;  %v2235_v1 = vmin.f32 %v750_v6, 16.0  ;;  %v638_v50 = vmul.f32 %v637_v48, %v2084_v8 }
 0x1b0   :  { %v562_v47 = vpop.f32.mrf.mxu0  ;;  %v435_v0 = vmul.f32 %v410_v36, %v1934_v56  ;;  %v685_v56 = vmul.f32 %v684_v57, %v2151_v32  ;;  %v649_v43 = vmul.f32 %v648_v45, %v2084_v8  ;;  %v726_v35 = vadd.f32 0.014752088, %v725_v42 }
 0x1b1   :  { %v420_v23 = vsel %vm2230_vm4, %v2106_v49, %v416_v31  ;;  %v763_v36 = vmul.f32 3.8918573e-05, %v2235_v1  ;;  %v676_v55 = vmul.f32 %v675_v62, %v2151_v32  ;;  %v715_v6 = vadd.f32 0.0036580483, %v714_v16 }
 0x1b2   :  { %1436 = vmatmul.msk.f32.gmra.mxu3 %vm77_vm0, %v474_v44  ;;  %v455_v7 = vmul.f32 %v1873_v60, %v435_v0  ;;  %v686_v22 = vadd.f32 0.014752088, %v685_v56  ;;  %v650_v27 = vadd.f32 0.4994258, %v649_v43  ;;  %v436_v28 = vmul.f32 %v420_v23, %v1901_v40 }
 0x1b3   :  { %v752_v44 = vmul.f32 2.1237322e-06, %v2235_v1  ;;  %v727_v33 = vmul.f32 %v726_v35, %v2193_v11  ;;  %v2255_v58 = vadd.f32 %v2000_v59, %v562_v47  ;;  %v639_v57 = vadd.f32 0.18741608, %v638_v50 }
 0x1b4   :  { %v687_v10 = vmul.f32 %v686_v22, %v2151_v32  ;;  %v475_v52 = vadd.f32 %v1882_v9, %v455_v7  ;;  %v651_v0 = vmul.f32 %v650_v27, %v2084_v8  ;;  %v764_v2 = vadd.f32 0.001143296, %v763_v36 }
 0x1b5   :  { %v677_v40 = vadd.f32 0.05243302, %v676_v55  ;;  %v728_v51 = vadd.f32 0.112945676, %v727_v33  ;;  %v716_v56 = vmul.f32 %v715_v6, %v2193_v11  ;;  %v753_v48 = vadd.f32 0.00028619796, %v752_v44 }
 0x1b6   :  { %v688_v49 = vadd.f32 0.112945676, %v687_v10  ;;  %v2259_v31 = vadd.f32 1.0, %v651_v0  ;;  %v456_v7 = vmul.f32 %v1873_v60, %v436_v28  ;;  %v2265_v47 = vmul.f32 0.70710677, %v2255_v58 }
 0x1b7   :  { %v640_v62 = vmul.f32 %v639_v57, %v2084_v8  ;;  %v729_v42 = vmul.f32 %v728_v51, %v2193_v11  ;;  %v765_v23 = vmul.f32 %v764_v2, %v2235_v1  ;;  %v678_v16 = vmul.f32 %v677_v40, %v2151_v32 }
 0x1b8   :  { %v565_v46 = vpop.f32.mrf.mxu0  ;;  %v689_v37 = vmul.f32 %v688_v49, %v2151_v32  ;;  %1530 = vrcp.f32 %v2259_v31  ;;  %v717_v43 = vadd.f32 0.05243302, %v716_v56  ;;  %v754_v60 = vmul.f32 %v753_v48, %v2235_v1 }
 0x1b9   :  { %v2270_v22 = vadd.f32 %v2000_v59, %v565_v46  ;;  %v476_v10 = vadd.f32 %v1882_v9, %v456_v7  ;;  %v790_v8 = vmul.f32 %v2265_v47, %v2265_v47  ;;  %v641_v27 = vadd.f32 1.1283791, %v640_v62 }
 0x1ba   :  { %1437 = vmatmul.msk.f32.gmra.mxu3 %vm77_vm0, %v475_v52  ;;  %v690_v4 = vadd.f32 0.4994258, %v689_v37  ;;  %v730_v52 = vadd.f32 0.4994258, %v729_v42  ;;  %v766_v55 = vadd.f32 0.014752088, %v765_v23  ;;  %v718_v44 = vmul.f32 %v717_v43, %v2193_v11 }
 0x1bb   :  { %v2282_v36 = vmul.f32 0.70710677, %v2270_v22  ;;  %v2291_v49 = vmul.f32 0.5, %v2016_v21  ;;  %v679_v6 = vadd.f32 0.18741608, %v678_v16  ;;  %v2295_v33 = vmul.f32 0.5, %v2075_v12 }
 0x1bc   :  { %v691_v45 = vmul.f32 %v690_v4, %v2151_v32  ;;  %v755_v0 = vadd.f32 0.0036580483, %v754_v60  ;;  %v2297_v37 = vmin.f32 %v790_v8, 16.0  ;;  %v731_v2 = vmul.f32 %v730_v52, %v2193_v11 }
 0x1bd   :  { %v642_v40 = vmul.f32 %v641_v27, %v2026_v54  ;;  %v830_v4 = vmul.f32 %v2282_v36, %v2282_v36  ;;  %v664_v21 = vand.u32 2147483648, %v2259_v31  ;;  %v767_v51 = vmul.f32 %v766_v55, %v2235_v1 }
 0x1be   :  { %v2277_v50 = vadd.f32 1.0, %v691_v45  ;;  %v1531_v46 = vpop.eup %1530  ;;  %v662_v12 = vand.u32 2147483647, %v2259_v31  ;;  %v680_v45 = vmul.f32 %v679_v6, %v2151_v32  ;;  %v719_v62 = vadd.f32 0.18741608, %v718_v44 }
 0x1bf   :  { %v654_v9 = vmul.f32 %v1531_v46, %v2259_v31  ;;  %vm659_vm5 = vweird.f32 %v1531_v46  ;;  %v756_v54 = vmul.f32 %v755_v0, %v2235_v1  ;;  %v2311_v42 = vadd.f32 1.0, %v731_v2 }
 0x1c0   :  { %v568_v35 = vpop.f32.mrf.mxu0  ;;  %1532 = vrcp.f32 %v2277_v50  ;;  %v792_v23 = vmul.f32 2.1237322e-06, %v2297_v37  ;;  %vm658_vm6 = vweird.f32 %v2259_v31  ;;  %v2316_v60 = vmin.f32 %v830_v4, 16.0 }
 0x1c1   :  { %v2287_v28 = vadd.f32 %v2000_v59, %v568_v35  ;;  %v655_v57 = vsub.f32 1.0, %v654_v9  ;;  %vm660_vm7 = vmor %vm658_vm6, %vm659_vm5  ;;  %1534 = vrcp.f32 %v2311_v42  ;;  %v768_v35 = vadd.f32 0.112945676, %v767_v51 }
 0x1c2   :  { %1438 = vmatmul.msk.f32.gmra.mxu3 %vm77_vm0, %v476_v10  ;;  %v665_v10 = vor.u32 1.1754944e-38, %v664_v21  ;;  %vm663_vm8 = vcmp.eq.f32.partialorder %v662_v12, 8.507059e+37  ;;  %v681_v27 = vadd.f32 1.1283791, %v680_v45  ;;  %v720_v55 = vmul.f32 %v719_v62, %v2193_v11 }
 0x1c3   :  { %v2306_v56 = vmul.f32 0.70710677, %v2287_v28  ;;  %v656_v48 = vmul.f32 %v1531_v46, %v655_v57  ;;  %v704_v31 = vand.u32 2147483648, %v2277_v50  ;;  %v702_v0 = vand.u32 2147483647, %v2277_v50 }
 0x1c4   :  { %v757_v57 = vadd.f32 0.05243302, %v756_v54  ;;  %v793_v2 = vadd.f32 0.00028619796, %v792_v23  ;;  %v832_v4 = vmul.f32 2.1237322e-06, %v2316_v60  ;;  %v769_v21 = vmul.f32 %v768_v35, %v2235_v1 }
 0x1c5   :  { %v657_v16 = vadd.f32 %v1531_v46, %v656_v48  ;;  %v870_v32 = vmul.f32 %v2306_v56, %v2306_v56  ;;  %vm698_vm10 = vweird.f32 %v2277_v50  ;;  %v682_v12 = vmul.f32 %v681_v27, %v2087_v24 }
 0x1c6   :  { %v1533_v7 = vpop.eup %1532  ;;  %v705_v45 = vor.u32 1.1754944e-38, %v704_v31  ;;  %v770_v62 = vadd.f32 0.4994258, %v769_v21  ;;  %vm703_vm12 = vcmp.eq.f32.partialorder %v702_v0, 8.507059e+37  ;;  %v833_v35 = vadd.f32 0.00028619796, %v832_v4 }
 0x1c7   :  { %v694_v43 = vmul.f32 %v1533_v7, %v2277_v50  ;;  %v661_v8 = vsel %vm660_vm7, %v1531_v46, %v657_v16  ;;  %vm699_vm9 = vweird.f32 %v1533_v7  ;;  %v2326_v46 = vmin.f32 %v870_v32, 16.0  ;;  %v1535_v11 = vpop.eup %1534 }
 0x1c8   :  { %v666_v9 = vsel %vm663_vm8, %v665_v10, %v661_v8  ;;  %vm700_vm11 = vmor %vm698_vm10, %vm699_vm9  ;;  %v734_v23 = vmul.f32 %v1535_v11, %v2311_v42  ;;  %v794_v10 = vmul.f32 %v793_v2, %v2297_v37  ;;  %v742_v27 = vand.u32 2147483647, %v2311_v42 }
 0x1c9   :  { %v695_v52 = vsub.f32 1.0, %v694_v43  ;;  %v667_v6 = vmul.f32 %v666_v9, %v642_v40  ;;  %v721_v40 = vadd.f32 1.1283791, %v720_v55  ;;  %v758_v43 = vmul.f32 %v757_v57, %v2235_v1 }
 0x1ca   :  { %v872_v50 = vmul.f32 2.1237322e-06, %v2326_v46  ;;  %v744_v55 = vand.u32 2147483648, %v2311_v42  ;;  %v803_v9 = vmul.f32 3.8918573e-05, %v2297_v37  ;;  %vm739_vm13 = vweird.f32 %v1535_v11 }
 0x1cb   :  { %v696_v44 = vmul.f32 %v1533_v7, %v695_v52  ;;  %v1439_v51 = vclamps-f32 %v667_v6, 1.0  ;;  %v735_v52 = vsub.f32 1.0, %v734_v23  ;;  %v722_v0 = vmul.f32 %v721_v40, %v2154_v25 }
 0x1cc   :  { %v759_v57 = vadd.f32 0.18741608, %v758_v43  ;;  %v804_v2 = vadd.f32 0.001143296, %v803_v9  ;;  %vm738_vm14 = vweird.f32 %v2311_v42  ;;  %vm743_vm1 = vcmp.eq.f32.partialorder %v742_v27, 8.507059e+37 }
 0x1cd   :  { %v697_v48 = vadd.f32 %v1533_v7, %v696_v44  ;;  %v1270_v16 = vadd.f32 1.0, %v1439_v51  ;;  %v736_v6 = vmul.f32 %v1535_v11, %v735_v52  ;;  %v843_v44 = vmul.f32 3.8918573e-05, %v2316_v60  ;;  %vm740_vm15 = vmor %vm738_vm14, %vm739_vm13 }
 0x1ce   :  { %v760_v23 = vmul.f32 %v759_v57, %v2235_v1  ;;  %v600_v27 = vmul.f32 0.5, %v2142_v63 }
 0x1cf   :  { %v701_v54 = vsel %vm700_vm11, %v1533_v7, %v697_v48  ;;  %v1286_v8 = vmul.f32 %v1270_v16, %v2291_v49  ;;  %v771_v7 = vmul.f32 %v770_v62, %v2235_v1  ;;  %v737_v21 = vadd.f32 %v1535_v11, %v736_v6 }
 0x1d0   :  { %v706_v32 = vsel %vm703_vm12, %v705_v45, %v701_v54  ;;  %v844_v51 = vadd.f32 0.001143296, %v843_v44  ;;  %v795_v48 = vadd.f32 0.0036580483, %v794_v10  ;;  %v745_v45 = vor.u32 1.1754944e-38, %v744_v55 }
 0x1d1   :  { %v707_v24 = vmul.f32 %v706_v32, %v682_v12  ;;  %1338 = vmatmul.f32.vlgmr.msra.gmra.mxu1 %v1286_v8  ;;  %v2341_v49 = vadd.f32 1.0, %v771_v7  ;;  %v834_v12 = vmul.f32 %v833_v35, %v2316_v60  ;;  %v873_v62 = vadd.f32 0.00028619796, %v872_v50  ;;  %v580_v35 = vpop.f32.mrf.mxu3 }
 0x1d2   :  { %v741_v25 = vsel %vm740_vm15, %v1535_v11, %v737_v21  ;;  %v805_v54 = vmul.f32 %v804_v2, %v2297_v37  ;;  %v845_v42 = vmul.f32 %v844_v51, %v2316_v60  ;;  %v796_v10 = vmul.f32 %v795_v48, %v2297_v37 }
 0x1d3   :  { %v1440_v31 = vclamps-f32 %v707_v24, 1.0  ;;  %1536 = vrcp.f32 %v2341_v49  ;;  %v746_v40 = vsel %vm743_vm1, %v745_v45, %v741_v25  ;;  %v883_v8 = vmul.f32 3.8918573e-05, %v2326_v46 }
 0x1d4   :  { %v747_v43 = vmul.f32 %v746_v40, %v722_v0  ;;  %v806_v32 = vadd.f32 0.014752088, %v805_v54  ;;  %v835_v24 = vadd.f32 0.0036580483, %v834_v12  ;;  %v874_v50 = vmul.f32 %v873_v62, %v2326_v46 }
 0x1d5   :  { %v1271_v4 = vadd.f32 1.0, %v1440_v31  ;;  %v846_v11 = vadd.f32 0.014752088, %v845_v42  ;;  %v884_v55 = vadd.f32 0.001143296, %v883_v8  ;;  %v2356_v9 = vadd.f32 %v2000_v59, %v580_v35 }
 0x1d6   :  { %v807_v1 = vmul.f32 %v806_v32, %v2297_v37  ;;  %v761_v7 = vadd.f32 1.1283791, %v760_v23  ;;  %v797_v44 = vadd.f32 0.05243302, %v796_v10  ;;  %v875_v21 = vadd.f32 0.0036580483, %v874_v50 }
 0x1d7   :  { %v1287_v16 = vmul.f32 %v1271_v4, %v2295_v33  ;;  %v1441_v33 = vclamps-f32 %v747_v43, 1.0  ;;  %v847_v57 = vmul.f32 %v846_v11, %v2316_v60  ;;  %v885_v2 = vmul.f32 %v884_v55, %v2326_v46 }
 0x1d8   :  { %v808_v0 = vadd.f32 0.112945676, %v807_v1  ;;  %v836_v4 = vmul.f32 %v835_v24, %v2316_v60  ;;  %v784_v48 = vand.u32 2147483648, %v2341_v49  ;;  %v2365_v62 = vmul.f32 0.70710677, %v2356_v9 }
 0x1d9   :  { %1341 = vmatmul.f32.gmra.mxu1 %v1287_v16  ;;  %v1537_v52 = vpop.eup %1536  ;;  %v1272_v31 = vadd.f32 1.0, %v1441_v33  ;;  %v848_v59 = vadd.f32 0.112945676, %v847_v57  ;;  %v886_v45 = vadd.f32 0.014752088, %v885_v2  ;;  %v798_v40 = vmul.f32 %v797_v44, %v2297_v37 }
 0x1da   :  { %v774_v6 = vmul.f32 %v1537_v52, %v2341_v49  ;;  %v809_v12 = vmul.f32 %v808_v0, %v2297_v37  ;;  %vm779_vm2 = vweird.f32 %v1537_v52  ;;  %v782_v25 = vand.u32 2147483647, %v2341_v49 }
 0x1db   :  { %v1288_v63 = vmul.f32 %v1272_v31, %v600_v27  ;;  %v849_v23 = vmul.f32 %v848_v59, %v2316_v60  ;;  %v887_v43 = vmul.f32 %v886_v45, %v2326_v46  ;;  %v837_v42 = vadd.f32 0.05243302, %v836_v4 }
 0x1dc   :  { %v775_v51 = vsub.f32 1.0, %v774_v6  ;;  %v810_v54 = vadd.f32 0.4994258, %v809_v12  ;;  %v876_v10 = vmul.f32 %v875_v21, %v2326_v46  ;;  %vm778_vm3 = vweird.f32 %v2341_v49 }
 0x1dd   :  { %vm780_vm4 = vmor %vm778_vm3, %vm779_vm2  ;;  %v785_v32 = vor.u32 1.1754944e-38, %v784_v48  ;;  %v850_v24 = vadd.f32 0.4994258, %v849_v23  ;;  %v888_v50 = vadd.f32 0.112945676, %v887_v43  ;;  %v762_v33 = vmul.f32 %v761_v7, %v2204_v19 }
 0x1de   :  { %v776_v16 = vmul.f32 %v1537_v52, %v775_v51  ;;  %v811_v8 = vmul.f32 %v810_v54, %v2297_v37  ;;  %v1030_v11 = vmul.f32 %v2365_v62, %v2365_v62  ;;  %vm783_vm5 = vcmp.eq.f32.partialorder %v782_v25, 8.507059e+37 }
 0x1df   :  { %v851_v31 = vmul.f32 %v850_v24, %v2316_v60  ;;  %v889_v6 = vmul.f32 %v888_v50, %v2326_v46  ;;  %v838_v49 = vmul.f32 %v837_v42, %v2316_v60  ;;  %v799_v0 = vadd.f32 0.18741608, %v798_v40 }
 0x1e0   :  { %v777_v35 = vadd.f32 %v1537_v52, %v776_v16  ;;  %v812_v55 = vadd.f32 1.0, %v811_v8  ;;  %v877_v57 = vadd.f32 0.05243302, %v876_v10  ;;  %v2380_v2 = vmin.f32 %v1030_v11, 16.0 }
 0x1e1   :  { %1344 = vmatmul.f32.gmra.mxu1 %v1288_v63  ;;  %v852_v7 = vadd.f32 1.0, %v851_v31  ;;  %v890_v4 = vadd.f32 0.4994258, %v889_v6  ;;  %v839_v21 = vadd.f32 0.18741608, %v838_v49  ;;  %v800_v51 = vmul.f32 %v799_v0, %v2297_v37 }
 0x1e2   :  { %v781_v27 = vsel %vm780_vm4, %v1537_v52, %v777_v35  ;;  %1538 = vrcp.f32 %v812_v55  ;;  %v601_v52 = vmul.f32 0.5, %v2191_v38  ;;  %v878_v48 = vmul.f32 %v877_v57, %v2326_v46 }
 0x1e3   :  { %v786_v1 = vsel %vm783_vm5, %v785_v32, %v781_v27  ;;  %1540 = vrcp.f32 %v852_v7  ;;  %v891_v12 = vmul.f32 %v890_v4, %v2326_v46  ;;  %v1043_v45 = vmul.f32 3.8918573e-05, %v2380_v2 }
 0x1e4   :  { %v787_v44 = vmul.f32 %v786_v1, %v762_v33  ;;  %v840_v40 = vmul.f32 %v839_v21, %v2316_v60  ;;  %v801_v38 = vadd.f32 1.1283791, %v800_v51  ;;  %v879_v23 = vadd.f32 0.18741608, %v878_v48 }
 0x1e5   :  { %v2387_v25 = vadd.f32 1.0, %v891_v12  ;;  %v1044_v42 = vadd.f32 0.001143296, %v1043_v45  ;;  %v824_v10 = vand.u32 2147483648, %v812_v55  ;;  %v822_v24 = vand.u32 2147483647, %v812_v55 }
 0x1e6   :  { %v1442_v19 = vclamps-f32 %v787_v44, 1.0  ;;  %v841_v32 = vadd.f32 1.1283791, %v840_v40  ;;  %v802_v50 = vmul.f32 %v801_v38, %v2265_v47  ;;  %v880_v33 = vmul.f32 %v879_v23, %v2326_v46 }
 0x1e7   :  { %1542 = vrcp.f32 %v2387_v25  ;;  %vm818_vm7 = vweird.f32 %v812_v55  ;;  %v864_v27 = vand.u32 2147483648, %v852_v7  ;;  %v1045_v1 = vmul.f32 %v1044_v42, %v2380_v2 }
 0x1e8   :  { %v1273_v63 = vadd.f32 1.0, %v1442_v19  ;;  %v1539_v16 = vpop.eup %1538  ;;  %v825_v6 = vor.u32 1.1754944e-38, %v824_v10  ;;  %v862_v44 = vand.u32 2147483647, %v852_v7  ;;  %v842_v0 = vmul.f32 %v841_v32, %v2282_v36 }
 0x1e9   :  { %v814_v54 = vmul.f32 %v1539_v16, %v812_v55  ;;  %v1541_v43 = vpop.eup %1540  ;;  %vm819_vm6 = vweird.f32 %v1539_v16  ;;  %vm823_vm10 = vcmp.eq.f32.partialorder %v822_v24, 8.507059e+37  ;;  %v881_v19 = vadd.f32 1.1283791, %v880_v33 }
 0x1ea   :  { %v1289_v59 = vmul.f32 %v1273_v63, %v601_v52  ;;  %v854_v35 = vmul.f32 %v1541_v43, %v852_v7  ;;  %vm820_vm8 = vmor %vm818_vm7, %vm819_vm6  ;;  %vm859_vm9 = vweird.f32 %v1541_v43  ;;  %vm858_vm11 = vweird.f32 %v852_v7 }
 0x1eb   :  { %v815_v37 = vsub.f32 1.0, %v814_v54  ;;  %vm860_vm12 = vmor %vm858_vm11, %vm859_vm9  ;;  %v865_v52 = vor.u32 1.1754944e-38, %v864_v27  ;;  %v1046_v63 = vadd.f32 0.014752088, %v1045_v1  ;;  %vm863_vm13 = vcmp.eq.f32.partialorder %v862_v44, 8.507059e+37 }
 0x1ec   :  { %1347 = vmatmul.f32.gmra.mxu1 %v1289_v59  ;;  %v855_v60 = vsub.f32 1.0, %v854_v35  ;;  %v902_v48 = vand.u32 2147483647, %v2387_v25  ;;  %v904_v12 = vand.u32 2147483648, %v2387_v25  ;;  %v602_v40 = vmul.f32 0.5, %v2255_v58 }
 0x1ed   :  { %v816_v8 = vmul.f32 %v1539_v16, %v815_v37  ;;  %v1543_v31 = vpop.eup %1542  ;;  %vm898_vm15 = vweird.f32 %v2387_v25  ;;  %v882_v37 = vmul.f32 %v881_v19, %v2306_v56  ;;  %v603_v58 = vmul.f32 0.5, %v2270_v22  ;;  %v2410_v22 = vld [vmem:[%s2800_s5] ss:$0 sm:$0xff] }
 0x1ee   :  { %v856_v49 = vmul.f32 %v1541_v43, %v855_v60  ;;  %v894_v47 = vmul.f32 %v1543_v31, %v2387_v25  ;;  %vm899_vm14 = vweird.f32 %v1543_v31  ;;  %v905_v23 = vor.u32 1.1754944e-38, %v904_v12 }
 0x1ef   :  { %v817_v11 = vadd.f32 %v1539_v16, %v816_v8  ;;  %vm900_vm1 = vmor %vm898_vm15, %vm899_vm14  ;;  %vm903_vm2 = vcmp.eq.f32.partialorder %v902_v48, 8.507059e+37  ;;  %v604_v56 = vmul.f32 0.5, %v2287_v28 }
 0x1f0   :  { %v857_v4 = vadd.f32 %v1541_v43, %v856_v49  ;;  %v895_v21 = vsub.f32 1.0, %v894_v47 }
 0x1f1   :  { %v821_v57 = vsel %vm820_vm8, %v1539_v16, %v817_v11  ;;  %v1032_v11 = vmul.f32 2.1237322e-06, %v2380_v2 }
 0x1f2   :  { %v826_v46 = vsel %vm823_vm10, %v825_v6, %v821_v57  ;;  %v861_v51 = vsel %vm860_vm12, %v1541_v43, %v857_v4  ;;  %v896_v45 = vmul.f32 %v1543_v31, %v895_v21  ;;  %v1047_v43 = vmul.f32 %v1046_v63, %v2380_v2 }
 0x1f3   :  { %v827_v55 = vmul.f32 %v826_v46, %v802_v50  ;;  %v866_v59 = vsel %vm863_vm13, %v865_v52, %v861_v51 }
 0x1f4   :  { %v867_v16 = vmul.f32 %v866_v59, %v842_v0  ;;  %v897_v7 = vadd.f32 %v1543_v31, %v896_v45  ;;  %v1048_v24 = vadd.f32 0.112945676, %v1047_v43 }
 0x1f5   :  { %v1443_v36 = vclamps-f32 %v827_v55, 1.0 }
 0x1f6   :  { %v1444_v38 = vclamps-f32 %v867_v16, 1.0  ;;  %v901_v10 = vsel %vm900_vm1, %v1543_v31, %v897_v7  ;;  %v1049_v25 = vmul.f32 %v1048_v24, %v2380_v2  ;;  %v1033_v31 = vadd.f32 0.00028619796, %v1032_v11 }
 0x1f7   :  { %v1274_v54 = vadd.f32 1.0, %v1443_v36  ;;  %v906_v35 = vsel %vm903_vm2, %v905_v23, %v901_v10 }
 0x1f8   :  { %v1275_v32 = vadd.f32 1.0, %v1444_v38  ;;  %v907_v8 = vmul.f32 %v906_v35, %v882_v37  ;;  %v1050_v27 = vadd.f32 0.4994258, %v1049_v25  ;;  %v1034_v0 = vmul.f32 %v1033_v31, %v2380_v2 }
 0x1f9   :  { %v1290_v42 = vmul.f32 %v1274_v54, %v602_v40 }
 0x1fa   :  { %v1291_v50 = vmul.f32 %v1275_v32, %v603_v58  ;;  %v1445_v33 = vclamps-f32 %v907_v8, 1.0  ;;  %v1051_v6 = vmul.f32 %v1050_v27, %v2380_v2  ;;  %v1035_v19 = vadd.f32 0.0036580483, %v1034_v0 }
 0x1fb   :  { %1350 = vmatmul.f32.gmra.mxu1 %v1290_v42 }
 0x1fc   :  { %v1276_v60 = vadd.f32 1.0, %v1445_v33  ;;  %v2419_v28 = vadd.f32 1.0, %v1051_v6  ;;  %v1036_v52 = vmul.f32 %v1035_v19, %v2380_v2 }
 0x1fe   :  { %v1292_v1 = vmul.f32 %v1276_v60, %v604_v56  ;;  %1544 = vrcp.f32 %v2419_v28  ;;  %v1037_v45 = vadd.f32 0.05243302, %v1036_v52  ;;  %vm1058_vm4 = vweird.f32 %v2419_v28 }
 0x200   :  { %v1038_v37 = vmul.f32 %v1037_v45, %v2380_v2 }
 0x202   :  { %v1039_v27 = vadd.f32 0.18741608, %v1038_v37 }
 0x203   :  { %1353 = vmatmul.f32.gmra.mxu1 %v1291_v50 }
 0x204   :  { %v2429_v48 = vpop.eup %1544 }
 0x205   :  { %v1054_v7 = vmul.f32 %v2429_v48, %v2419_v28  ;;  %vm1059_vm3 = vweird.f32 %v2429_v48 }
 0x206   :  { %vm2495_vm5 = vmor %vm1058_vm4, %vm1059_vm3 }
 0x207   :  { %v1055_v24 = vsub.f32 1.0, %v1054_v7 }
 0x209   :  { %v1056_v19 = vmul.f32 %v2429_v48, %v1055_v24 }
 0x20b   :  { %1356 = vmatmul.f32.gmra.mxu1 %v1292_v1 }
 0x213   :  { %v571_v49 = vpop.f32.mrf.mxu0 }
 0x214   :  { %v2413_v44 = vadd.f32 %v2410_v22, %v571_v49 }
 0x216   :  { %v2417_v57 = vmul.f32 0.70710677, %v2413_v44 }
 0x218   :  { %v910_v47 = vmul.f32 %v2417_v57, %v2417_v57 }
 0x21a   :  { %v2423_v46 = vmin.f32 %v910_v47, 16.0 }
 0x21c   :  { %v912_v4 = vmul.f32 2.1237322e-06, %v2423_v46  ;;  %v923_v55 = vmul.f32 3.8918573e-05, %v2423_v46  ;;  %v574_v51 = vpop.f32.mrf.mxu0 }
 0x21d   :  { %v2433_v36 = vadd.f32 %v2410_v22, %v574_v51 }
 0x21e   :  { %v913_v21 = vadd.f32 0.00028619796, %v912_v4  ;;  %v924_v63 = vadd.f32 0.001143296, %v923_v55 }
 0x21f   :  { %v2437_v40 = vmul.f32 0.70710677, %v2433_v36 }
 0x220   :  { %v914_v12 = vmul.f32 %v913_v21, %v2423_v46  ;;  %v925_v59 = vmul.f32 %v924_v63, %v2423_v46  ;;  %v1040_v63 = vmul.f32 %v1039_v27, %v2380_v2 }
 0x221   :  { %v950_v23 = vmul.f32 %v2437_v40, %v2437_v40 }
 0x222   :  { %v915_v16 = vadd.f32 0.0036580483, %v914_v12  ;;  %v926_v54 = vadd.f32 0.014752088, %v925_v59 }
 0x223   :  { %v2446_v42 = vmin.f32 %v950_v23, 16.0  ;;  %v1064_v23 = vand.u32 2147483648, %v2419_v28 }
 0x224   :  { %v916_v38 = vmul.f32 %v915_v16, %v2423_v46  ;;  %v927_v43 = vmul.f32 %v926_v54, %v2423_v46 }
 0x225   :  { %v583_v10 = vpop.f32.mrf.mxu3  ;;  %v577_v32 = vpop.f32.mrf.mxu0  ;;  %v952_v50 = vmul.f32 2.1237322e-06, %v2446_v42  ;;  %v963_v25 = vmul.f32 3.8918573e-05, %v2446_v42 }
 0x226   :  { %v2449_v35 = vadd.f32 %v2410_v22, %v583_v10  ;;  %v928_v8 = vadd.f32 0.112945676, %v927_v43  ;;  %v917_v58 = vadd.f32 0.05243302, %v916_v38  ;;  %v2453_v33 = vadd.f32 %v2410_v22, %v577_v32 }
 0x227   :  { %v953_v56 = vadd.f32 0.00028619796, %v952_v50  ;;  %v964_v49 = vadd.f32 0.001143296, %v963_v25  ;;  %v1057_v38 = vadd.f32 %v2429_v48, %v1056_v19  ;;  %v1062_v32 = vand.u32 2147483647, %v2419_v28 }
 0x228   :  { %v2457_v60 = vmul.f32 0.70710677, %v2449_v35  ;;  %v929_v11 = vmul.f32 %v928_v8, %v2423_v46  ;;  %v2463_v31 = vmul.f32 0.70710677, %v2453_v33  ;;  %v918_v0 = vmul.f32 %v917_v58, %v2423_v46 }
 0x229   :  { %v954_v47 = vmul.f32 %v953_v56, %v2446_v42  ;;  %v965_v21 = vmul.f32 %v964_v49, %v2446_v42  ;;  %v1041_v25 = vadd.f32 1.1283791, %v1040_v63  ;;  %v1061_v27 = vsel %vm2495_vm5, %v2429_v48, %v1057_v38 }
 0x22a   :  { %v1070_v1 = vmul.f32 %v2457_v60, %v2457_v60  ;;  %v930_v6 = vadd.f32 0.4994258, %v929_v11  ;;  %v990_v55 = vmul.f32 %v2463_v31, %v2463_v31  ;;  %v919_v43 = vadd.f32 0.18741608, %v918_v0 }
 0x22b   :  { %v955_v51 = vadd.f32 0.0036580483, %v954_v47  ;;  %v966_v54 = vadd.f32 0.014752088, %v965_v21  ;;  %v1065_v56 = vor.u32 1.1754944e-38, %v1064_v23  ;;  %vm1063_vm6 = vcmp.eq.f32.partialorder %v1062_v32, 8.507059e+37 }
 0x22c   :  { %v2468_v4 = vmin.f32 %v1070_v1, 16.0  ;;  %v931_v52 = vmul.f32 %v930_v6, %v2423_v46  ;;  %v2476_v59 = vmin.f32 %v990_v55, 16.0  ;;  %v920_v1 = vmul.f32 %v919_v43, %v2423_v46 }
 0x22d   :  { %v586_v45 = vpop.f32.mrf.mxu3  ;;  %v956_v37 = vmul.f32 %v955_v51, %v2446_v42  ;;  %v967_v58 = vmul.f32 %v966_v54, %v2446_v42  ;;  %v1066_v63 = vsel %vm1063_vm6, %v1065_v56, %v1061_v27  ;;  %v1042_v48 = vmul.f32 %v1041_v25, %v2365_v62 }
 0x22e   :  { %v1072_v12 = vmul.f32 2.1237322e-06, %v2468_v4  ;;  %v2478_v16 = vadd.f32 1.0, %v931_v52  ;;  %v2481_v7 = vadd.f32 %v2410_v22, %v586_v45  ;;  %v992_v2 = vmul.f32 2.1237322e-06, %v2476_v59 }
 0x22f   :  { %v968_v6 = vadd.f32 0.112945676, %v967_v58  ;;  %v1003_v49 = vmul.f32 3.8918573e-05, %v2476_v59  ;;  %v957_v0 = vadd.f32 0.05243302, %v956_v37  ;;  %v1067_v43 = vmul.f32 %v1066_v63, %v1042_v48 }
 0x230   :  { %1546 = vrcp.f32 %v2478_v16  ;;  %v2490_v10 = vmul.f32 0.70710677, %v2481_v7  ;;  %v1073_v8 = vadd.f32 0.00028619796, %v1072_v12  ;;  %v993_v24 = vadd.f32 0.00028619796, %v992_v2 }
 0x231   :  { %v969_v21 = vmul.f32 %v968_v6, %v2446_v42  ;;  %v921_v12 = vadd.f32 1.1283791, %v920_v1  ;;  %v1004_v54 = vadd.f32 0.001143296, %v1003_v49  ;;  %v958_v38 = vmul.f32 %v957_v0, %v2446_v42 }
 0x232   :  { %v1110_v11 = vmul.f32 %v2490_v10, %v2490_v10  ;;  %v994_v28 = vmul.f32 %v993_v24, %v2476_v59  ;;  %v1074_v19 = vmul.f32 %v1073_v8, %v2468_v4  ;;  %v944_v32 = vand.u32 2147483648, %v2478_v16 }
 0x233   :  { %v970_v45 = vadd.f32 0.4994258, %v969_v21  ;;  %v942_v58 = vand.u32 2147483647, %v2478_v16  ;;  %v922_v50 = vmul.f32 %v921_v12, %v2417_v57  ;;  %v1005_v27 = vmul.f32 %v1004_v54, %v2476_v59 }
 0x234   :  { %v2508_v55 = vmin.f32 %v1110_v11, 16.0  ;;  %v995_v51 = vadd.f32 0.0036580483, %v994_v28  ;;  %v1075_v2 = vadd.f32 0.0036580483, %v1074_v19  ;;  %vm938_vm8 = vweird.f32 %v2478_v16 }
 0x235   :  { %v589_v52 = vpop.f32.mrf.mxu3  ;;  %v971_v8 = vmul.f32 %v970_v45, %v2446_v42  ;;  %v959_v56 = vadd.f32 0.18741608, %v958_v38  ;;  %v1083_v28 = vmul.f32 3.8918573e-05, %v2468_v4  ;;  %v945_v19 = vor.u32 1.1754944e-38, %v944_v32 }
 0x236   :  { %v1547_v47 = vpop.eup %1546  ;;  %v1112_v37 = vmul.f32 2.1237322e-06, %v2508_v55  ;;  %v996_v24 = vmul.f32 %v995_v51, %v2476_v59  ;;  %v2521_v25 = vadd.f32 %v2410_v22, %v589_v52  ;;  %v1076_v6 = vmul.f32 %v1075_v2, %v2468_v4 }
 0x237   :  { %v934_v46 = vmul.f32 %v1547_v47, %v2478_v16  ;;  %vm939_vm7 = vweird.f32 %v1547_v47  ;;  %v2523_v11 = vadd.f32 1.0, %v971_v8  ;;  %vm943_vm10 = vcmp.eq.f32.partialorder %v942_v58, 8.507059e+37 }
 0x238   :  { %v1113_v49 = vadd.f32 0.00028619796, %v1112_v37  ;;  %vm940_vm9 = vmor %vm938_vm8, %vm939_vm7  ;;  %v997_v57 = vadd.f32 0.05243302, %v996_v24  ;;  %v2534_v63 = vmul.f32 0.70710677, %v2521_v25 }
 0x239   :  { %v935_v23 = vsub.f32 1.0, %v934_v46  ;;  %1548 = vrcp.f32 %v2523_v11  ;;  %v1006_v48 = vadd.f32 0.014752088, %v1005_v27  ;;  %v1449_v51 = vclamps-f32 %v1067_v43, 1.0 }
 0x23a   :  { %v960_v46 = vmul.f32 %v959_v56, %v2446_v42  ;;  %v1077_v54 = vadd.f32 0.05243302, %v1076_v6  ;;  %v1114_v38 = vmul.f32 %v1113_v49, %v2508_v55  ;;  %v2542_v2 = vmul.f32 0.5, %v2356_v9 }
 0x23b   :  { %v936_v62 = vmul.f32 %v1547_v47, %v935_v23  ;;  %v1084_v23 = vadd.f32 0.001143296, %v1083_v28  ;;  %v605_v42 = vmul.f32 0.5, %v2413_v44  ;;  %v1150_v8 = vmul.f32 %v2534_v63, %v2534_v63 }
 0x23c   :  { %v1007_v24 = vmul.f32 %v1006_v48, %v2476_v59  ;;  %v961_v58 = vadd.f32 1.1283791, %v960_v46  ;;  %v1078_v56 = vmul.f32 %v1077_v54, %v2468_v4  ;;  %vm978_vm12 = vweird.f32 %v2523_v11 }
 0x23d   :  { %v937_v1 = vadd.f32 %v1547_v47, %v936_v62  ;;  %v592_v0 = vpop.f32.mrf.mxu3  ;;  %v2551_v62 = vadd.f32 1.0, %v1449_v51  ;;  %v1085_v44 = vmul.f32 %v1084_v23, %v2468_v4 }
 0x23e   :  { %v2531_v52 = vadd.f32 %v2410_v22, %v592_v0  ;;  %v1008_v6 = vadd.f32 0.112945676, %v1007_v24  ;;  %v962_v46 = vmul.f32 %v961_v58, %v2437_v40 }
 0x23f   :  { %v941_v21 = vsel %vm940_vm9, %v1547_v47, %v937_v1  ;;  %v998_v47 = vmul.f32 %v997_v57, %v2476_v59  ;;  %v1549_v43 = vpop.eup %1548  ;;  %v1115_v1 = vadd.f32 0.0036580483, %v1114_v38  ;;  %v984_v38 = vand.u32 2147483648, %v2523_v11 }
 0x240   :  { %v946_v16 = vsel %vm943_vm10, %v945_v19, %v941_v21  ;;  %v2538_v12 = vmul.f32 0.70710677, %v2531_v52  ;;  %v974_v27 = vmul.f32 %v1549_v43, %v2523_v11  ;;  %v2563_v21 = vmin.f32 %v1150_v8, 16.0 }
 0x241   :  { %v947_v45 = vmul.f32 %v946_v16, %v922_v50  ;;  %v999_v49 = vadd.f32 0.18741608, %v998_v47  ;;  %v1009_v51 = vmul.f32 %v1008_v6, %v2476_v59  ;;  %vm979_vm11 = vweird.f32 %v1549_v43 }
 0x242   :  { %v1190_v37 = vmul.f32 %v2538_v12, %v2538_v12  ;;  %v975_v48 = vsub.f32 1.0, %v974_v27  ;;  %v1152_v40 = vmul.f32 2.1237322e-06, %v2563_v21  ;;  %v1086_v58 = vadd.f32 0.014752088, %v1085_v44  ;;  %vm980_vm13 = vmor %vm978_vm12, %vm979_vm11 }
 0x243   :  { %v1446_v32 = vclamps-f32 %v947_v45, 1.0 }
 0x244   :  { %v2553_v50 = vmin.f32 %v1190_v37, 16.0  ;;  %v976_v47 = vmul.f32 %v1549_v43, %v975_v48 }
 0x245   :  { %v1277_v9 = vadd.f32 1.0, %v1446_v32  ;;  %v595_v28 = vpop.f32.mrf.mxu3 }
 0x246   :  { %v1192_v0 = vmul.f32 2.1237322e-06, %v2553_v50  ;;  %v1203_v19 = vmul.f32 3.8918573e-05, %v2553_v50  ;;  %v2561_v57 = vadd.f32 %v2410_v22, %v595_v28  ;;  %v982_v22 = vand.u32 2147483647, %v2523_v11 }
 0x247   :  { %v1293_v16 = vmul.f32 %v1277_v9, %v605_v42  ;;  %v1010_v42 = vadd.f32 0.4994258, %v1009_v51  ;;  %v977_v24 = vadd.f32 %v1549_v43, %v976_v47  ;;  %v985_v28 = vor.u32 1.1754944e-38, %v984_v38 }
 0x248   :  { %v1193_v45 = vadd.f32 0.00028619796, %v1192_v0  ;;  %v1204_v54 = vadd.f32 0.001143296, %v1203_v19  ;;  %v2569_v23 = vmul.f32 0.70710677, %v2561_v57  ;;  %v1087_v11 = vmul.f32 %v1086_v58, %v2468_v4 }
 0x249   :  { %1359 = vmatmul.f32.vlgmr.msra.gmra.mxu2 %v1293_v16  ;;  %v1011_v6 = vmul.f32 %v1010_v42, %v2476_v59  ;;  %v981_v19 = vsel %vm980_vm13, %v1549_v43, %v977_v24  ;;  %vm983_vm14 = vcmp.eq.f32.partialorder %v982_v22, 8.507059e+37  ;;  %v1153_v43 = vadd.f32 0.00028619796, %v1152_v40 }
 0x24a   :  { %v1194_v37 = vmul.f32 %v1193_v45, %v2553_v50  ;;  %v1205_v32 = vmul.f32 %v1204_v54, %v2553_v50  ;;  %v1230_v8 = vmul.f32 %v2569_v23, %v2569_v23  ;;  %v986_v51 = vsel %vm983_vm14, %v985_v28, %v981_v19  ;;  %v2590_v54 = vld [vmem:[%s2802_s7] ss:$0 sm:$0xff] }
 0x24b   :  { %v2584_v45 = vadd.f32 1.0, %v1011_v6  ;;  %v987_v38 = vmul.f32 %v986_v51, %v962_v46  ;;  %v1088_v47 = vadd.f32 0.112945676, %v1087_v11  ;;  %v1079_v42 = vadd.f32 0.18741608, %v1078_v56 }
 0x24c   :  { %v1195_v9 = vadd.f32 0.0036580483, %v1194_v37  ;;  %v1206_v27 = vadd.f32 0.014752088, %v1205_v32  ;;  %v2579_v0 = vmin.f32 %v1230_v8, 16.0  ;;  %v606_v32 = vmul.f32 0.5, %v2433_v36 }
 0x24d   :  { %1550 = vrcp.f32 %v2584_v45  ;;  %v1447_v24 = vclamps-f32 %v987_v38, 1.0  ;;  %v1089_v28 = vmul.f32 %v1088_v47, %v2468_v4  ;;  %v1123_v46 = vmul.f32 3.8918573e-05, %v2508_v55 }
 0x24e   :  { %v1196_v16 = vmul.f32 %v1195_v9, %v2553_v50  ;;  %v1207_v48 = vmul.f32 %v1206_v27, %v2553_v50  ;;  %v1232_v44 = vmul.f32 2.1237322e-06, %v2579_v0  ;;  %v1339_v27 = vpop.f32.mrf.mxu1  ;;  %v1116_v40 = vmul.f32 %v1115_v1, %v2508_v55 }
 0x24f   :  { %v1340_v19 = vadd.f32 %v2590_v54, %v1339_v27  ;;  %v1278_v11 = vadd.f32 1.0, %v1447_v24  ;;  %v1000_v36 = vmul.f32 %v999_v49, %v2476_v59  ;;  %v1154_v56 = vmul.f32 %v1153_v43, %v2563_v21 }
 0x250   :  { %v1197_v22 = vadd.f32 0.05243302, %v1196_v16  ;;  %v1208_v37 = vadd.f32 0.112945676, %v1207_v48  ;;  %v1233_v8 = vadd.f32 0.00028619796, %v1232_v44  ;;  %v1080_v59 = vmul.f32 %v1079_v42, %v2468_v4 }
 0x251   :  { %v2604_v51 = vmul.f32 0.5, %v2453_v33  ;;  %v1387_v44 = vadd.f32 %v1340_v19, %v1623_v5  ;;  %v1294_v38 = vmul.f32 %v1278_v11, %v606_v32  ;;  %v1090_v47 = vadd.f32 0.4994258, %v1089_v28 }
 0x252   :  { %v1198_v58 = vmul.f32 %v1197_v22, %v2553_v50  ;;  %v1209_v9 = vmul.f32 %v1208_v37, %v2553_v50  ;;  %v1234_v6 = vmul.f32 %v1233_v8, %v2579_v0  ;;  %v1124_v8 = vadd.f32 0.001143296, %v1123_v46 }
 0x253   :  { %v1551_v22 = vpop.eup %1550  ;;  %v1243_v24 = vmul.f32 3.8918573e-05, %v2579_v0  ;;  %v1117_v49 = vadd.f32 0.05243302, %v1116_v40  ;;  %1403 = vst.msk [vmem:[%s2803_s8] sm:$0xff] %vm77_vm0, %v1387_v44  ;;  %1362 = vmatmul.f32.gmra.mxu2 %v1294_v38  ;;  %v1091_v33 = vmul.f32 %v1090_v47, %v2468_v4  ;;  %v1024_v28 = vand.u32 2147483648, %v2584_v45 }
 0x254   :  { %v1199_v16 = vadd.f32 0.18741608, %v1198_v58  ;;  %v1210_v48 = vadd.f32 0.4994258, %v1209_v9  ;;  %v1235_v37 = vadd.f32 0.0036580483, %v1234_v6  ;;  %v1014_v5 = vmul.f32 %v1551_v22, %v2584_v45 }
 0x255   :  { %v1001_v43 = vadd.f32 1.1283791, %v1000_v36  ;;  %v1155_v32 = vadd.f32 0.0036580483, %v1154_v56  ;;  %v1022_v42 = vand.u32 2147483647, %v2584_v45  ;;  %v1125_v4 = vmul.f32 %v1124_v8, %v2508_v55 }
 0x256   :  { %v1211_v1 = vmul.f32 %v1210_v48, %v2553_v50  ;;  %v1200_v58 = vmul.f32 %v1199_v16, %v2553_v50  ;;  %v1015_v27 = vsub.f32 1.0, %v1014_v5  ;;  %v2621_v46 = vadd.f32 1.0, %v1091_v33  ;;  %v1342_v6 = vpop.f32.mrf.mxu1 }
 0x257   :  { %v1236_v40 = vmul.f32 %v1235_v37, %v2579_v0  ;;  %v1244_v19 = vadd.f32 0.001143296, %v1243_v24  ;;  %v1343_v11 = vadd.f32 %v2590_v54, %v1342_v6  ;;  %vm1019_vm15 = vweird.f32 %v1551_v22 }
 0x258   :  { %v2617_v9 = vadd.f32 1.0, %v1211_v1  ;;  %v1016_v50 = vmul.f32 %v1551_v22, %v1015_v27  ;;  %v1163_v36 = vmul.f32 3.8918573e-05, %v2563_v21  ;;  %v2628_v56 = vadd.f32 1.1283791, %v1080_v59 }
 0x259   :  { %v2631_v16 = vmul.f32 %v1117_v49, %v2508_v55  ;;  %v1201_v48 = vadd.f32 1.1283791, %v1200_v58  ;;  %v1002_v44 = vmul.f32 %v1001_v43, %v2463_v31  ;;  %v1388_v38 = vadd.f32 %v1343_v11, %v1657_v18 }
 0x25a   :  { %1552 = vrcp.f32 %v2617_v9  ;;  %v1017_v47 = vadd.f32 %v1551_v22, %v1016_v50  ;;  %vm1018_vm1 = vweird.f32 %v2584_v45  ;;  %v2638_v1 = vmul.f32 %v1155_v32, %v2563_v21 }
 0x25b   :  { %1554 = vrcp.f32 %v2621_v46  ;;  %vm1020_vm2 = vmor %vm1018_vm1, %vm1019_vm15  ;;  %v1025_v37 = vor.u32 1.1754944e-38, %v1024_v28  ;;  %v1126_v8 = vadd.f32 0.014752088, %v1125_v4  ;;  %v1245_v24 = vmul.f32 %v1244_v19, %v2579_v0  ;;  %1404 = vst.msk [vmem:[%s2803_s8 + $0x8] sm:$0xff] %vm77_vm0, %v1388_v38 }
 0x25c   :  { %v2641_v59 = vadd.f32 0.05243302, %v1236_v40  ;;  %v1021_v31 = vsel %vm1020_vm2, %v1551_v22, %v1017_v47  ;;  %vm1023_vm3 = vcmp.eq.f32.partialorder %v1022_v42, 8.507059e+37  ;;  %v1164_v18 = vadd.f32 0.001143296, %v1163_v36 }
 0x25d   :  { %v1202_v45 = vmul.f32 %v1201_v48, %v2538_v12  ;;  %v1026_v5 = vsel %vm1023_vm3, %v1025_v37, %v1021_v31  ;;  %v1127_v33 = vmul.f32 %v1126_v8, %v2508_v55  ;;  %v1246_v43 = vadd.f32 0.014752088, %v1245_v24 }
 0x25e   :  { %vm1218_vm4 = vweird.f32 %v2617_v9  ;;  %v1222_v58 = vand.u32 2147483647, %v2617_v9  ;;  %v1027_v27 = vmul.f32 %v1026_v5, %v1002_v44  ;;  %v1224_v40 = vand.u32 2147483648, %v2617_v9  ;;  %v1345_v22 = vpop.f32.mrf.mxu1 }
 0x25f   :  { %v1128_v42 = vadd.f32 0.112945676, %v1127_v33  ;;  %v1247_v6 = vmul.f32 %v1246_v43, %v2579_v0  ;;  %v1165_v12 = vmul.f32 %v1164_v18, %v2563_v21  ;;  %v1346_v19 = vadd.f32 %v2590_v54, %v1345_v22 }
 0x260   :  { %v1553_v49 = vpop.eup %1552  ;;  %v1448_v11 = vclamps-f32 %v1027_v27, 1.0  ;;  %v1102_v50 = vand.u32 2147483647, %v2621_v46  ;;  %v1225_v24 = vor.u32 1.1754944e-38, %v1224_v40  ;;  %vm1223_vm8 = vcmp.eq.f32.partialorder %v1222_v58, 8.507059e+37 }
 0x261   :  { %v1214_v32 = vmul.f32 %v1553_v49, %v2617_v9  ;;  %v1555_v28 = vpop.eup %1554  ;;  %vm1219_vm5 = vweird.f32 %v1553_v49  ;;  %v1129_v48 = vmul.f32 %v1128_v42, %v2508_v55  ;;  %v1248_v44 = vadd.f32 0.112945676, %v1247_v6 }
 0x262   :  { %v1094_v36 = vmul.f32 %v1555_v28, %v2621_v46  ;;  %v1389_v47 = vadd.f32 %v1346_v19, %v1647_v14  ;;  %v1279_v37 = vadd.f32 1.0, %v1448_v11  ;;  %v1166_v8 = vadd.f32 0.014752088, %v1165_v12  ;;  %vm1220_vm6 = vmor %vm1218_vm4, %vm1219_vm5 }
 0x263   :  { %v1215_v4 = vsub.f32 1.0, %v1214_v32  ;;  %v1130_v18 = vadd.f32 0.4994258, %v1129_v48  ;;  %v1249_v5 = vmul.f32 %v1248_v44, %v2579_v0  ;;  %v1104_v32 = vand.u32 2147483648, %v2621_v46 }
 0x264   :  { %v1095_v31 = vsub.f32 1.0, %v1094_v36  ;;  %1405 = vst.msk [vmem:[%s2803_s8 + $0x10] sm:$0xff] %vm77_vm0, %v1389_v47  ;;  %v1295_v43 = vmul.f32 %v1279_v37, %v2604_v51  ;;  %v1167_v27 = vmul.f32 %v1166_v8, %v2563_v21  ;;  %vm1099_vm7 = vweird.f32 %v1555_v28 }
 0x265   :  { %v1216_v38 = vmul.f32 %v1553_v49, %v1215_v4  ;;  %v1131_v40 = vmul.f32 %v1130_v18, %v2508_v55  ;;  %v1250_v22 = vadd.f32 0.4994258, %v1249_v5  ;;  %vm1098_vm9 = vweird.f32 %v2621_v46 }
 0x266   :  { %v1096_v14 = vmul.f32 %v1555_v28, %v1095_v31  ;;  %1365 = vmatmul.f32.gmra.mxu2 %v1295_v43  ;;  %v1168_v6 = vadd.f32 0.112945676, %v1167_v27  ;;  %v1296_v9 = vmul.f32 %v2551_v62, %v2542_v2  ;;  %vm1100_vm10 = vmor %vm1098_vm9, %vm1099_vm7  ;;  %v1105_v36 = vor.u32 1.1754944e-38, %v1104_v32 }
 0x267   :  { %v1217_v33 = vadd.f32 %v1553_v49, %v1216_v38  ;;  %v2673_v4 = vadd.f32 1.0, %v1131_v40  ;;  %v1251_v19 = vmul.f32 %v1250_v22, %v2579_v0  ;;  %vm1103_vm11 = vcmp.eq.f32.partialorder %v1102_v50, 8.507059e+37 }
 0x268   :  { %v1097_v12 = vadd.f32 %v1555_v28, %v1096_v14  ;;  %v1169_v48 = vmul.f32 %v1168_v6, %v2563_v21  ;;  %v1238_v46 = vmul.f32 %v2641_v59, %v2579_v0  ;;  %v1119_v2 = vadd.f32 0.18741608, %v2631_v16 }
 0x269   :  { %v1221_v42 = vsel %vm1220_vm6, %v1553_v49, %v1217_v33  ;;  %v1082_v49 = vmul.f32 %v2628_v56, %v2457_v60  ;;  %1556 = vrcp.f32 %v2673_v4  ;;  %v1157_v62 = vadd.f32 0.05243302, %v2638_v1  ;;  %v1348_v47 = vpop.f32.mrf.mxu1 }
 0x26a   :  { %v1226_v51 = vsel %vm1223_vm8, %v1225_v24, %v1221_v42  ;;  %v1101_v58 = vsel %vm1100_vm10, %v1555_v28, %v1097_v12  ;;  %v1170_v8 = vadd.f32 0.4994258, %v1169_v48  ;;  %v612_v60 = vmul.f32 0.5, %v2531_v52 }
 0x26b   :  { %v1227_v11 = vmul.f32 %v1226_v51, %v1202_v45  ;;  %v1106_v44 = vsel %vm1103_vm11, %v1105_v36, %v1101_v58  ;;  %v2684_v45 = vadd.f32 1.0, %v1251_v19  ;;  %v1349_v56 = vadd.f32 %v2590_v54, %v1348_v47 }
 0x26c   :  { %v1107_v37 = vmul.f32 %v1106_v44, %v1082_v49  ;;  %v1239_v59 = vadd.f32 0.18741608, %v1238_v46  ;;  %v1171_v16 = vmul.f32 %v1170_v8, %v2563_v21  ;;  %v1120_v1 = vmul.f32 %v1119_v2, %v2508_v55 }
 0x26d   :  { %v1453_v38 = vclamps-f32 %v1227_v11, 1.0  ;;  %1558 = vrcp.f32 %v2684_v45  ;;  %v1390_v24 = vadd.f32 %v1349_v56, %v1661_v20  ;;  %v1158_v5 = vmul.f32 %v1157_v62, %v2563_v21 }
 0x26e   :  { %v1450_v50 = vclamps-f32 %v1107_v37, 1.0  ;;  %1368 = vmatmul.f32.gmra.mxu2 %v1296_v9  ;;  %v2700_v43 = vadd.f32 1.0, %v1171_v16  ;;  %v609_v32 = vmul.f32 0.5, %v2449_v35  ;;  %v1240_v27 = vmul.f32 %v1239_v59, %v2579_v0 }
 0x26f   :  { %v1284_v28 = vadd.f32 1.0, %v1453_v38  ;;  %v1557_v18 = vpop.eup %1556  ;;  %1406 = vst.msk [vmem:[%s2803_s8 + $0x18] sm:$0xff] %vm77_vm0, %v1390_v24  ;;  %v1121_v55 = vadd.f32 1.1283791, %v1120_v1  ;;  %v1159_v40 = vadd.f32 0.18741608, %v1158_v5  ;;  %vm1138_vm13 = vweird.f32 %v2673_v4 }
 0x270   :  { %v1281_v52 = vadd.f32 1.0, %v1450_v50  ;;  %v1134_v33 = vmul.f32 %v1557_v18, %v2673_v4  ;;  %1560 = vrcp.f32 %v2700_v43  ;;  %v1144_v22 = vand.u32 2147483648, %v2673_v4 }
 0x271   :  { %v1300_v31 = vmul.f32 %v1284_v28, %v612_v60  ;;  %vm1139_vm12 = vweird.f32 %v1557_v18  ;;  %v1142_v12 = vand.u32 2147483647, %v2673_v4  ;;  %v1241_v11 = vadd.f32 1.1283791, %v1240_v27 }
 0x272   :  { %v1135_v14 = vsub.f32 1.0, %v1134_v33  ;;  %v1297_v6 = vmul.f32 %v1281_v52, %v609_v32  ;;  %v1264_v0 = vand.u32 2147483648, %v2684_v45  ;;  %vm1140_vm14 = vmor %vm1138_vm13, %vm1139_vm12  ;;  %v1145_v9 = vor.u32 1.1754944e-38, %v1144_v22 }
 0x273   :  { %1380 = vmatmul.f32.vlgmr.msrb.gmra.mxu3 %v1300_v31  ;;  %v1559_v20 = vpop.eup %1558  ;;  %v1262_v48 = vand.u32 2147483647, %v2684_v45  ;;  %v1122_v58 = vmul.f32 %v1121_v55, %v2490_v10  ;;  %v1160_v46 = vmul.f32 %v1159_v40, %v2563_v21  ;;  %vm1143_vm1 = vcmp.eq.f32.partialorder %v1142_v12, 8.507059e+37 }
 0x274   :  { %v1254_v42 = vmul.f32 %v1559_v20, %v2684_v45  ;;  %v1136_v51 = vmul.f32 %v1557_v18, %v1135_v14  ;;  %vm1259_vm15 = vweird.f32 %v1559_v20  ;;  %vm1258_vm2 = vweird.f32 %v2684_v45 }
 0x275   :  { %vm1260_vm3 = vmor %vm1258_vm2, %vm1259_vm15  ;;  %v1265_v47 = vor.u32 1.1754944e-38, %v1264_v0  ;;  %v1242_v37 = vmul.f32 %v1241_v11, %v2569_v23  ;;  %vm1263_vm4 = vcmp.eq.f32.partialorder %v1262_v48, 8.507059e+37  ;;  %v1161_v56 = vadd.f32 1.1283791, %v1160_v46 }
 0x276   :  { %v1255_v19 = vsub.f32 1.0, %v1254_v42  ;;  %1371 = vmatmul.f32.gmra.mxu2 %v1297_v6  ;;  %v1137_v35 = vadd.f32 %v1557_v18, %v1136_v51  ;;  %v1561_v49 = vpop.eup %1560  ;;  %v1184_v21 = vand.u32 2147483648, %v2700_v43  ;;  %v1182_v45 = vand.u32 2147483647, %v2700_v43 }
 0x277   :  { %v1174_v4 = vmul.f32 %v1561_v49, %v2700_v43  ;;  %vm1179_vm5 = vweird.f32 %v1561_v49  ;;  %v610_v31 = vmul.f32 0.5, %v2481_v7  ;;  %vm1178_vm6 = vweird.f32 %v2700_v43 }
 0x278   :  { %v1256_v36 = vmul.f32 %v1559_v20, %v1255_v19  ;;  %v1141_v44 = vsel %vm1140_vm14, %v1557_v18, %v1137_v35  ;;  %v1351_v50 = vpop.f32.mrf.mxu1  ;;  %v613_v5 = vmul.f32 0.5, %v2561_v57  ;;  %vm1180_vm7 = vmor %vm1178_vm6, %vm1179_vm5  ;;  %v1162_v32 = vmul.f32 %v1161_v56, %v2534_v63 }
 0x279   :  { %v1146_v38 = vsel %vm1143_vm1, %v1145_v9, %v1141_v44  ;;  %v1175_v60 = vsub.f32 1.0, %v1174_v4  ;;  %v1352_v16 = vadd.f32 %v2590_v54, %v1351_v50  ;;  %vm1183_vm8 = vcmp.eq.f32.partialorder %v1182_v45, 8.507059e+37 }
 0x27a   :  { %v1257_v2 = vadd.f32 %v1559_v20, %v1256_v36  ;;  %v1147_v62 = vmul.f32 %v1146_v38, %v1122_v58  ;;  %v611_v22 = vmul.f32 0.5, %v2521_v25 }
 0x27b   :  { %v1176_v24 = vmul.f32 %v1561_v49, %v1175_v60  ;;  %v1391_v52 = vadd.f32 %v1352_v16, %v1618_v3 }
 0x27c   :  { %v1261_v8 = vsel %vm1260_vm3, %v1559_v20, %v1257_v2  ;;  %v1451_v10 = vclamps-f32 %v1147_v62, 1.0  ;;  %v1185_v20 = vor.u32 1.1754944e-38, %v1184_v21 }
 0x27d   :  { %v1266_v28 = vsel %vm1263_vm4, %v1265_v47, %v1261_v8  ;;  %v1177_v1 = vadd.f32 %v1561_v49, %v1176_v24  ;;  %1407 = vst.msk [vmem:[%s2803_s8 + $0x20] sm:$0xff] %vm77_vm0, %v1391_v52 }
 0x27e   :  { %v1267_v59 = vmul.f32 %v1266_v28, %v1242_v37  ;;  %v1282_v18 = vadd.f32 1.0, %v1451_v10 }
 0x27f   :  { %v1181_v14 = vsel %vm1180_vm7, %v1561_v49, %v1177_v1 }
 0x280   :  { %v1454_v23 = vclamps-f32 %v1267_v59, 1.0  ;;  %v1298_v33 = vmul.f32 %v1282_v18, %v610_v31  ;;  %v1186_v7 = vsel %vm1183_vm8, %v1185_v20, %v1181_v14  ;;  %v1354_v57 = vpop.f32.mrf.mxu1 }
 0x281   :  { %v1187_v55 = vmul.f32 %v1186_v7, %v1162_v32  ;;  %v1355_v40 = vadd.f32 %v2590_v54, %v1354_v57 }
 0x282   :  { %v1285_v27 = vadd.f32 1.0, %v1454_v23  ;;  %1374 = vmatmul.f32.gmra.mxu2 %v1298_v33 }
 0x283   :  { %v1452_v3 = vclamps-f32 %v1187_v55, 1.0  ;;  %v1392_v42 = vadd.f32 %v1355_v40, %v1649_v15 }
 0x284   :  { %v1301_v43 = vmul.f32 %v1285_v27, %v613_v5 }
 0x285   :  { %v1283_v63 = vadd.f32 1.0, %v1452_v3  ;;  %1408 = vst.msk [vmem:[%s2803_s8 + $0x28] sm:$0xff] %vm77_vm0, %v1392_v42 }
 0x286   :  { %1383 = vmatmul.f32.gmra.mxu3 %v1301_v43 }
 0x287   :  { %v1299_v6 = vmul.f32 %v1283_v63, %v611_v22 }
 0x288   :  { %v1357_v51 = vpop.f32.mrf.mxu1 }
 0x289   :  { %v1358_v12 = vadd.f32 %v2590_v54, %v1357_v51 }
 0x28a   :  { %1377 = vmatmul.f32.gmra.mxu2 %v1299_v6 }
 0x28b   :  { %v1393_v19 = vadd.f32 %v1358_v12, %v1675_v26 }
 0x28d   :  { %1409 = vst.msk [vmem:[%s2803_s8 + $0x30] sm:$0xff] %vm77_vm0, %v1393_v19 }
 0x2cc   :  { %v1360_v25 = vpop.f32.mrf.mxu2 }
 0x2cd   :  { %v1361_v15 = vadd.f32 %v2590_v54, %v1360_v25 }
 0x2cf   :  { %v1394_v11 = vadd.f32 %v1361_v15, %v1727_v61 }
 0x2d1   :  { %1410 = vst.msk [vmem:[%s2803_s8 + $0x38] sm:$0xff] %vm77_vm0, %v1394_v11 }
 0x2d6   :  { %v1363_v35 = vpop.f32.mrf.mxu2 }
 0x2d7   :  { %v1364_v0 = vadd.f32 %v2590_v54, %v1363_v35 }
 0x2d9   :  { %v1395_v26 = vadd.f32 %v1364_v0, %v1761_v17 }
 0x2db   :  { %1411 = vst.msk [vmem:[%s2803_s8 + $0x40] sm:$0xff] %vm77_vm0, %v1395_v26 }
 0x2e9   :  { %v1366_v9 = vpop.f32.mrf.mxu2 }
 0x2ea   :  { %v1367_v36 = vadd.f32 %v2590_v54, %v1366_v9 }
 0x2ec   :  { %v1396_v61 = vadd.f32 %v1367_v36, %v1780_v29 }
 0x2ee   :  { %1412 = vst.msk [vmem:[%s2803_s8 + $0x48] sm:$0xff] %vm77_vm0, %v1396_v61 }
 0x2f1   :  { %v1369_v48 = vpop.f32.mrf.mxu2 }
 0x2f2   :  { %v1370_v49 = vadd.f32 %v2590_v54, %v1369_v48 }
 0x2f4   :  { %v1397_v17 = vadd.f32 %v1370_v49, %v1685_v30 }
 0x2f6   :  { %v1381_v58 = vpop.f32.mrf.mxu3  ;;  %1413 = vst.msk [vmem:[%s2803_s8 + $0x50] sm:$0xff] %vm77_vm0, %v1397_v17 }
 0x2f7   :  { %v1382_v46 = vadd.f32 %v2590_v54, %v1381_v58 }
 0x2f9   :  { %v1401_v29 = vadd.f32 %v1382_v46, %v1816_v53  ;;  %v1372_v44 = vpop.f32.mrf.mxu2 }
 0x2fa   :  { %v1373_v38 = vadd.f32 %v2590_v54, %v1372_v44 }
 0x2fb   :  { %1417 = vst.msk [vmem:[%s2803_s8 + $0x70] sm:$0xff] %vm77_vm0, %v1401_v29 }
 0x2fc   :  { %v1398_v2 = vadd.f32 %v1373_v38, %v1695_v34 }
 0x2fe   :  { %1414 = vst.msk [vmem:[%s2803_s8 + $0x58] sm:$0xff] %vm77_vm0, %v1398_v2 }
 0x305   :  { %v1375_v30 = vpop.f32.mrf.mxu2 }
 0x306   :  { %v1376_v4 = vadd.f32 %v2590_v54, %v1375_v30 }
 0x308   :  { %v1399_v53 = vadd.f32 %v1376_v4, %v1705_v39 }
 0x309   :  { %v1384_v62 = vpop.f32.mrf.mxu3 }
 0x30a   :  { %v1385_v47 = vadd.f32 %v2590_v54, %v1384_v62  ;;  %1415 = vst.msk [vmem:[%s2803_s8 + $0x60] sm:$0xff] %vm77_vm0, %v1399_v53 }
 0x30c   :  { %v1402_v34 = vadd.f32 %v1385_v47, %v1758_v13 }
 0x30d   :  { %v1378_v37 = vpop.f32.mrf.mxu2 }
 0x30e   :  { %1418 = vst.msk [vmem:[%s2803_s8 + $0x78] sm:$0xff] %vm77_vm0, %v1402_v34  ;;  %v1379_v8 = vadd.f32 %v2590_v54, %v1378_v37 }
 0x310   :  { %v1400_v39 = vadd.f32 %v1379_v8, %v1797_v41 }
 0x312   :  { %1416 = vst.msk [vmem:[%s2803_s8 + $0x68] sm:$0xff] %vm77_vm0, %v1400_v39 }

// kernel: swin_block_forward.2
= control target key start
LH: loop header
LB: loop body
LE: loop exit
PB: predicated region body
PF: predicated region fallthrough
CT: control target
= control target key end

     0   :  { %vm57_vm0 = vcmask 261120   ;;  %v5115_v14 = vmov 32.0   ;;  %s5118_s28 = smov 104   ;;  %s7852_s0 = inlined_call_operand.vmem [shape: f32[8,16,32], index: 0, kind: input, shape index: {}]   ;;  %s7853_s1 = inlined_call_operand.vmem [shape: f32[1,32], index: 1, kind: input, shape index: {}]   ;;  %s7854_s2 = inlined_call_operand.vmem [shape: f32[1,32], index: 2, kind: input, shape index: {}]   ;;  %s7855_s3 = inlined_call_operand.vmem [shape: f32[32,32], index: 3, kind: input, shape index: {}]   ;;  %s7856_s4 = inlined_call_operand.vmem [shape: f32[32,32], index: 4, kind: input, shape index: {}]   ;;  %s7857_s5 = inlined_call_operand.vmem [shape: f32[32,32], index: 5, kind: input, shape index: {}]   ;;  %s7858_s6 = inlined_call_operand.vmem [shape: f32[1,32], index: 6, kind: input, shape index: {}]   ;;  %s7859_s7 = inlined_call_operand.vmem [shape: f32[1,32], index: 7, kind: input, shape index: {}]   ;;  %s7860_s8 = inlined_call_operand.vmem [shape: f32[1,32], index: 8, kind: input, shape index: {}]   ;;  %s7861_s11 = inlined_call_operand.vmem [shape: f32[4,8,16,16], index: 11, kind: input, shape index: {}]   ;;  %s7862_s9 = inlined_call_operand.vmem [shape: f32[4,8,32], index: 9, kind: input, shape index: {}]   ;;  %s7863_s10 = inlined_call_operand.vmem [shape: f32[1,32], index: 10, kind: input, shape index: {}]   ;;  %s7864_s12 = inlined_call_operand.vmem [shape: f32[8,16,32], index: 12, kind: output, shape index: {}]  }
   0x1   :  { %v43_v0 = vld [vmem:[%s7852_s0 + $0x10] sm:$0xff]  ;;  %v41_v1 = vld [vmem:[%s7852_s0] sm:$0xff]  ;;  %v42_v6 = vld [vmem:[%s7852_s0 + $0x8] sm:$0xff]  ;;  %4825 = vrcp.f32 %v5115_v14 }
   0x2   :  { %v5193_v2 = vld [vmem:[%s7852_s0 + $0x20] sm:$0xff]  ;;  %v64_v3 = vsel %vm57_vm0, %v43_v0, 0.0  ;;  %v58_v4 = vsel %vm57_vm0, %v41_v1, 0.0  ;;  %v44_v7 = vld [vmem:[%s7852_s0 + $0x18] sm:$0xff]  ;;  %v46_v8 = vld [vmem:[%s7852_s0 + $0x28] sm:$0xff]  ;;  %v61_v9 = vsel %vm57_vm0, %v42_v6, 0.0 }
   0x3   :  { %v70_v5 = vsel %vm57_vm0, %v5193_v2, 0.0  ;;  %65 = vadd.xlane.f32.xlu1 %v64_v3  ;;  %59 = vadd.xlane.f32.xlu0 %v58_v4  ;;  %v67_v10 = vsel %vm57_vm0, %v44_v7, 0.0  ;;  %v73_v11 = vsel %vm57_vm0, %v46_v8, 0.0  ;;  %v47_v12 = vld [vmem:[%s7852_s0 + $0x30] sm:$0xff]  ;;  %v5233_v36 = vld [vmem:[%s7852_s0 + $0x48] sm:$0xff]  ;;  %v5240_v39 = vld [vmem:[%s7852_s0 + $0x38] sm:$0xff] }
   0x4   :  { %71 = vadd.xlane.f32.xlu2 %v70_v5  ;;  %v76_v13 = vsel %vm57_vm0, %v47_v12, 0.0  ;;  %v85_v41 = vsel %vm57_vm0, %v5233_v36, 0.0  ;;  %v79_v44 = vsel %vm57_vm0, %v5240_v39, 0.0  ;;  %v5263_v50 = vld [vmem:[%s7852_s0 + $0x40] sm:$0xff]  ;;  %v5276_v57 = vld [vmem:[%s7852_s0 + $0x50] sm:$0xff]  ;;  %v5305_v4 = vld [vmem:[%s7852_s0 + $0x68] sm:$0xff] }
   0x5   :  { %v82_v54 = vsel %vm57_vm0, %v5263_v50, 0.0  ;;  %v5283_v59 = vld [vmem:[%s7852_s0 + $0x60] sm:$0xff]  ;;  %v88_v61 = vsel %vm57_vm0, %v5276_v57, 0.0  ;;  %v97_v5 = vsel %vm57_vm0, %v5305_v4, 0.0 }
   0x6   :  { %v94_v62 = vsel %vm57_vm0, %v5283_v59, 0.0 }
   0x7   :  { %v4826_v15 = vpop.eup %4825 }
   0x8   :  { %v107_v16 = vmul.f32 32.0, %v4826_v15  ;;  %vm111_vm1 = vweird.f32 %v4826_v15 }
   0xa   :  { %v108_v17 = vsub.f32 1.0, %v107_v16 }
   0xb   :  { %62 = vadd.xlane.f32.xlu0 %v61_v9  ;;  %68 = vadd.xlane.f32.xlu1 %v67_v10  ;;  %v580_v9 = vld [vmem:[%s7856_s4 + $0x10] sm:$0xff]  ;;  %v458_v10 = vld [vmem:[%s7855_s3 + $0x8] sm:$0xff] }
   0xc   :  { %74 = vadd.xlane.f32.xlu2 %v73_v11  ;;  %v109_v18 = vmul.f32 %v4826_v15, %v108_v17  ;;  %v579_v11 = vld [vmem:[%s7856_s4 + $0x8] sm:$0xff] }
   0xe   :  { %v110_v19 = vadd.f32 %v4826_v15, %v109_v18 }
  0x10   :  { %v5215_v20 = vsel %vm111_vm1, %v4826_v15, %v110_v19 }
  0x13   :  { %77 = vadd.xlane.f32.xlu1 %v76_v13  ;;  %v578_v13 = vld [vmem:[%s7856_s4] sm:$0xff] }
  0x76   :  { %v66_v21 = vpop.xlane.xlu1 %65  ;;  %v60_v22 = vpop.xlane.xlu0 %59 }
  0x77   :  { %v115_v23 = vmul.f32 %v5215_v20, %v66_v21  ;;  %v113_v24 = vmul.f32 %v5215_v20, %v60_v22  ;;  %v72_v25 = vpop.xlane.xlu2 %71 }
  0x78   :  { %v117_v49 = vmul.f32 %v5215_v20, %v72_v25 }
  0x79   :  { %v5219_v26 = vsub.f32 %v43_v0, %v115_v23  ;;  %v5221_v27 = vsub.f32 %v41_v1, %v113_v24  ;;  %v5297_v1 = vld [vmem:[%s7852_s0 + $0x58] sm:$0xff] }
  0x7a   :  { %v5268_v53 = vsub.f32 %v5193_v2, %v117_v49  ;;  %v91_v3 = vsel %vm57_vm0, %v5297_v1, 0.0 }
  0x7b   :  { %v147_v28 = vmul.f32 %v5219_v26, %v5219_v26  ;;  %v145_v29 = vmul.f32 %v5221_v27, %v5221_v27 }
  0x7c   :  { %v149_v58 = vmul.f32 %v5268_v53, %v5268_v53 }
  0x7d   :  { %v167_v30 = vsel %vm57_vm0, %v147_v28, 0.0  ;;  %v161_v31 = vsel %vm57_vm0, %v145_v29, 0.0 }
  0x7e   :  { %168 = vadd.xlane.f32.xlu1 %v167_v30  ;;  %162 = vadd.xlane.f32.xlu0 %v161_v31  ;;  %v63_v32 = vpop.xlane.xlu0 %62  ;;  %v69_v33 = vpop.xlane.xlu1 %68  ;;  %v173_v63 = vsel %vm57_vm0, %v149_v58, 0.0 }
  0x7f   :  { %v114_v34 = vmul.f32 %v5215_v20, %v63_v32  ;;  %v75_v35 = vpop.xlane.xlu2 %74  ;;  %v116_v37 = vmul.f32 %v5215_v20, %v69_v33 }
  0x80   :  { %v118_v38 = vmul.f32 %v5215_v20, %v75_v35 }
  0x81   :  { %v5242_v40 = vsub.f32 %v42_v6, %v114_v34  ;;  %v5248_v43 = vsub.f32 %v44_v7, %v116_v37  ;;  %v460_v6 = vld [vmem:[%s7855_s3 + $0x18] sm:$0xff] }
  0x82   :  { %v5246_v42 = vsub.f32 %v46_v8, %v118_v38  ;;  %v581_v7 = vld [vmem:[%s7856_s4 + $0x18] sm:$0xff]  ;;  %525 = vmatpush.msra.mxu0 %v460_v6  ;;  %v459_v8 = vld [vmem:[%s7855_s3 + $0x10] sm:$0xff] }
  0x83   :  { %v146_v45 = vmul.f32 %v5242_v40, %v5242_v40  ;;  %v148_v48 = vmul.f32 %v5248_v43, %v5248_v43  ;;  %598 = vmatpush.msra.mxu1 %v581_v7 }
  0x84   :  { %v150_v47 = vmul.f32 %v5246_v42, %v5246_v42  ;;  %526 = vmatpush.msra.mxu0 %v459_v8 }
  0x85   :  { %v164_v46 = vsel %vm57_vm0, %v146_v45, 0.0  ;;  %v170_v52 = vsel %vm57_vm0, %v148_v48, 0.0  ;;  %599 = vmatpush.msra.mxu1 %v580_v9  ;;  %v5402_v9 = vld [vmem:[%s7853_s1] ss:$0 sm:$0xff] }
  0x86   :  { %86 = vadd.xlane.f32.xlu1 %v85_v41  ;;  %80 = vadd.xlane.f32.xlu0 %v79_v44  ;;  %v176_v51 = vsel %vm57_vm0, %v150_v47, 0.0  ;;  %v78_v55 = vpop.xlane.xlu1 %77 }
  0x87   :  { %165 = vadd.xlane.f32.xlu2 %v164_v46  ;;  %v119_v56 = vmul.f32 %v5215_v20, %v78_v55  ;;  %527 = vmatpush.msra.mxu0 %v458_v10 }
  0x88   :  { %600 = vmatpush.msra.mxu1 %v579_v11 }
  0x89   :  { %v5285_v60 = vsub.f32 %v47_v12, %v119_v56  ;;  %v457_v12 = vld [vmem:[%s7855_s3] sm:$0xff] }
  0x8a   :  { %528 = vmatpush.msra.mxu0 %v457_v12  ;;  %601 = vmatpush.msra.mxu1 %v578_v13 }
  0x8b   :  { %v151_v0 = vmul.f32 %v5285_v60, %v5285_v60 }
  0x8d   :  { %v179_v2 = vsel %vm57_vm0, %v151_v0, 0.0 }
  0x8e   :  { %177 = vadd.xlane.f32.xlu1 %v176_v51  ;;  %171 = vadd.xlane.f32.xlu0 %v170_v52  ;;  %v5366_v52 = vld [vmem:[%s7852_s0 + $0x70] sm:$0xff] }
  0x8f   :  { %83 = vadd.xlane.f32.xlu2 %v82_v54  ;;  %v654_v54 = vld [vmem:[%s7857_s5 + $0x18] sm:$0xff] }
  0x90   :  { %4687 = vmatpush.msra.mxu2 %v654_v54  ;;  %4688 = vmatpush.msra.mxu3 %v654_v54 }
  0x91   :  { %671 = vmatpush.msrb.mxu1 %v654_v54 }
  0x96   :  { %89 = vadd.xlane.f32.xlu0 %v88_v61  ;;  %95 = vadd.xlane.f32.xlu1 %v94_v62  ;;  %v653_v62 = vld [vmem:[%s7857_s5 + $0x10] sm:$0xff] }
  0x97   :  { %174 = vadd.xlane.f32.xlu2 %v173_v63  ;;  %4689 = vmatpush.msra.mxu2 %v653_v62 }
  0x98   :  { %4690 = vmatpush.msra.mxu3 %v653_v62  ;;  %672 = vmatpush.msrb.mxu1 %v653_v62 }
  0x9e   :  { %180 = vadd.xlane.f32.xlu0 %v179_v2  ;;  %v100_v2 = vsel %vm57_vm0, %v5366_v52, 0.0 }
  0x9f   :  { %92 = vadd.xlane.f32.xlu2 %v91_v3  ;;  %v652_v3 = vld [vmem:[%s7857_s5 + $0x8] sm:$0xff] }
  0xa0   :  { %4691 = vmatpush.msra.mxu2 %v652_v3  ;;  %4692 = vmatpush.msra.mxu3 %v652_v3 }
  0xa1   :  { %673 = vmatpush.msrb.mxu1 %v652_v3 }
  0xa6   :  { %98 = vadd.xlane.f32.xlu0 %v97_v5 }
  0xf1   :  { %v169_v14 = vpop.xlane.xlu1 %168  ;;  %v163_v15 = vpop.xlane.xlu0 %162 }
  0xf2   :  { %v211_v16 = vmul.f32 %v169_v14, %v5215_v20  ;;  %v209_v17 = vmul.f32 %v163_v15, %v5215_v20  ;;  %v5410_v15 = vld [vmem:[%s7854_s2] ss:$0 sm:$0xff] }
  0xf4   :  { %v5335_v18 = vadd.f32 1e-05, %v211_v16  ;;  %v225_v19 = vadd.f32 1e-05, %v209_v17 }
  0xf6   :  { %4827 = vrsqrt.f32 %v5335_v18  ;;  %vm247_vm3 = vweird.f32 %v225_v19  ;;  %vm267_vm5 = vweird.f32 %v5335_v18 }
  0xf7   :  { %4829 = vrsqrt.f32 %v225_v19 }
  0xf9   :  { %v87_v21 = vpop.xlane.xlu1 %86  ;;  %v81_v22 = vpop.xlane.xlu0 %80 }
  0xfa   :  { %v122_v23 = vmul.f32 %v5215_v20, %v87_v21  ;;  %v166_v24 = vpop.xlane.xlu2 %165  ;;  %v120_v25 = vmul.f32 %v5215_v20, %v81_v22 }
  0xfb   :  { %v210_v28 = vmul.f32 %v166_v24, %v5215_v20 }
  0xfc   :  { %v5341_v29 = vpop.eup %4827  ;;  %v5344_v30 = vsub.f32 %v5233_v36, %v122_v23  ;;  %v5347_v31 = vsub.f32 %v5240_v39, %v120_v25 }
  0xfd   :  { %v4830_v32 = vpop.eup %4829  ;;  %v5349_v33 = vadd.f32 1e-05, %v210_v28  ;;  %v262_v34 = vmul.f32 %v5341_v29, %v5335_v18  ;;  %vm268_vm6 = vweird.f32 %v5341_v29 }
  0xfe   :  { %v242_v35 = vmul.f32 %v4830_v32, %v225_v19  ;;  %v154_v37 = vmul.f32 %v5344_v30, %v5344_v30  ;;  %v152_v38 = vmul.f32 %v5347_v31, %v5347_v31  ;;  %vm248_vm2 = vweird.f32 %v4830_v32  ;;  %vm5442_vm9 = vmor %vm267_vm5, %vm268_vm6 }
  0xff   :  { %4831 = vrsqrt.f32 %v5349_v33  ;;  %v263_v46 = vmul.f32 %v5341_v29, %v262_v34  ;;  %vm249_vm4 = vmor %vm247_vm3, %vm248_vm2  ;;  %v5427_v34 = vld [vmem:[%s7852_s0 + $0x78] sm:$0xff]  ;;  %vm257_vm8 = vweird.f32 %v5349_v33 }
 0x100   :  { %v243_v36 = vmul.f32 %v4830_v32, %v242_v35  ;;  %v188_v41 = vsel %vm57_vm0, %v154_v37, 0.0  ;;  %v182_v39 = vsel %vm57_vm0, %v152_v38, 0.0 }
 0x101   :  { %v178_v44 = vpop.xlane.xlu1 %177  ;;  %189 = vadd.xlane.f32.xlu0 %v188_v41  ;;  %183 = vadd.xlane.f32.xlu2 %v182_v39  ;;  %v172_v45 = vpop.xlane.xlu0 %171  ;;  %v264_v5 = vmul.f32 0.5, %v263_v46 }
 0x102   :  { %v244_v47 = vmul.f32 0.5, %v243_v36  ;;  %v214_v48 = vmul.f32 %v178_v44, %v5215_v20  ;;  %v84_v49 = vpop.xlane.xlu2 %83  ;;  %v212_v51 = vmul.f32 %v172_v45, %v5215_v20  ;;  %v103_v45 = vsel %vm57_vm0, %v5427_v34, 0.0 }
 0x103   :  { %v121_v55 = vmul.f32 %v5215_v20, %v84_v49  ;;  %v265_v17 = vsub.f32 1.5, %v264_v5 }
 0x104   :  { %v245_v56 = vsub.f32 1.5, %v244_v47  ;;  %v5372_v58 = vadd.f32 1e-05, %v214_v48  ;;  %v5374_v61 = vadd.f32 1e-05, %v212_v51 }
 0x105   :  { %v5379_v63 = vpop.eup %4831  ;;  %v5382_v0 = vsub.f32 %v5263_v50, %v121_v55  ;;  %v651_v50 = vld [vmem:[%s7857_s5] sm:$0xff]  ;;  %v266_v36 = vmul.f32 %v5341_v29, %v265_v17 }
 0x106   :  { %v246_v6 = vmul.f32 %v4830_v32, %v245_v56  ;;  %v252_v7 = vmul.f32 %v5379_v63, %v5349_v33  ;;  %4833 = vrsqrt.f32 %v5372_v58  ;;  %4693 = vmatpush.msra.mxu2 %v651_v50  ;;  %4694 = vmatpush.msra.mxu3 %v651_v50  ;;  %vm258_vm7 = vweird.f32 %v5379_v63 }
 0x107   :  { %4835 = vrsqrt.f32 %v5374_v61  ;;  %v153_v8 = vmul.f32 %v5382_v0, %v5382_v0  ;;  %674 = vmatpush.msrb.mxu1 %v651_v50  ;;  %vm259_vm10 = vmor %vm257_vm8, %vm258_vm7  ;;  %vm277_vm11 = vweird.f32 %v5374_v61  ;;  %vm297_vm1 = vweird.f32 %v5372_v58 }
 0x108   :  { %v253_v10 = vmul.f32 %v5379_v63, %v252_v7  ;;  %v250_v11 = vsel %vm249_vm4, %v4830_v32, %v246_v6 }
 0x109   :  { %v185_v12 = vsel %vm57_vm0, %v153_v8, 0.0  ;;  %101 = vadd.xlane.f32.xlu2 %v100_v2  ;;  %v90_v13 = vpop.xlane.xlu0 %89  ;;  %v401_v14 = vmul.f32 %v250_v11, %v5221_v27  ;;  %v96_v16 = vpop.xlane.xlu1 %95 }
 0x10a   :  { %v254_v19 = vmul.f32 0.5, %v253_v10  ;;  %186 = vadd.xlane.f32.xlu1 %v185_v12  ;;  %v175_v21 = vpop.xlane.xlu2 %174  ;;  %v123_v22 = vmul.f32 %v5215_v20, %v90_v13  ;;  %v125_v24 = vmul.f32 %v5215_v20, %v96_v16 }
 0x10b   :  { %v213_v27 = vmul.f32 %v175_v21, %v5215_v20  ;;  %v421_v23 = vmul.f32 %v5402_v9, %v401_v14 }
 0x10c   :  { %v5418_v25 = vpop.eup %4833  ;;  %v255_v28 = vsub.f32 1.5, %v254_v19  ;;  %v5422_v32 = vsub.f32 %v5276_v57, %v123_v22  ;;  %v5459_v18 = vsub.f32 %v5283_v59, %v125_v24  ;;  %v270_v59 = vsel %vm5442_vm9, %v5341_v29, %v266_v36 }
 0x10d   :  { %v5429_v35 = vpop.eup %4835  ;;  %v5432_v37 = vadd.f32 1e-05, %v213_v27  ;;  %v5435_v38 = vadd.f32 %v5410_v15, %v421_v23  ;;  %v292_v44 = vmul.f32 %v5418_v25, %v5372_v58  ;;  %v403_v50 = vmul.f32 %v270_v59, %v5219_v26 }
 0x10e   :  { %v256_v41 = vmul.f32 %v5379_v63, %v255_v28  ;;  %v272_v33 = vmul.f32 %v5429_v35, %v5374_v61  ;;  %v155_v39 = vmul.f32 %v5422_v32, %v5422_v32  ;;  %vm278_vm12 = vweird.f32 %v5429_v35 }
 0x10f   :  { %4837 = vrsqrt.f32 %v5432_v37  ;;  %4332 = vmatmul.msk.f32.vlgmr.msra.gmra.mxu0 %vm57_vm0, %v5435_v38  ;;  %4348 = vmatmul.msk.f32.vlgmr.msra.gmra.mxu1 %vm57_vm0, %v5435_v38  ;;  %v293_v62 = vmul.f32 %v5418_v25, %v292_v44  ;;  %vm5487_vm13 = vmor %vm277_vm11, %vm278_vm12  ;;  %vm287_vm14 = vweird.f32 %v5432_v37  ;;  %v423_v16 = vmul.f32 %v5402_v9, %v403_v50 }
 0x110   :  { %v273_v46 = vmul.f32 %v5429_v35, %v272_v33  ;;  %v191_v47 = vsel %vm57_vm0, %v155_v39, 0.0  ;;  %v260_v48 = vsel %vm259_vm10, %v5379_v63, %v256_v41  ;;  %v157_v63 = vmul.f32 %v5459_v18, %v5459_v18 }
 0x111   :  { %192 = vadd.xlane.f32.xlu2 %v191_v47  ;;  %v181_v49 = vpop.xlane.xlu0 %180  ;;  %v402_v51 = vmul.f32 %v260_v48, %v5242_v40  ;;  %v294_v11 = vmul.f32 0.5, %v293_v62  ;;  %vm298_vm2 = vweird.f32 %v5418_v25  ;;  %v5517_v57 = vadd.f32 %v5410_v15, %v423_v16 }
 0x112   :  { %v274_v54 = vmul.f32 0.5, %v273_v46  ;;  %104 = vadd.xlane.f32.xlu1 %v103_v45  ;;  %v93_v55 = vpop.xlane.xlu2 %92  ;;  %v215_v56 = vmul.f32 %v181_v49, %v5215_v20  ;;  %vm299_vm4 = vmor %vm297_vm1, %vm298_vm2  ;;  %vm740_vm2 = vcmask 64512  }
 0x113   :  { %v124_v2 = vmul.f32 %v5215_v20, %v93_v55  ;;  %v422_v3 = vmul.f32 %v5402_v9, %v402_v51  ;;  %v295_v22 = vsub.f32 1.5, %v294_v11 }
 0x114   :  { %v275_v5 = vsub.f32 1.5, %v274_v54  ;;  %v231_v40 = vadd.f32 1e-05, %v215_v56 }
 0x115   :  { %v4838_v6 = vpop.eup %4837  ;;  %v5479_v7 = vsub.f32 %v5297_v1, %v124_v2  ;;  %v5482_v29 = vadd.f32 %v5410_v15, %v422_v3  ;;  %v197_v1 = vsel %vm57_vm0, %v157_v63, 0.0 }
 0x116   :  { %v276_v8 = vmul.f32 %v5429_v35, %v275_v5  ;;  %v282_v10 = vmul.f32 %v4838_v6, %v5432_v37  ;;  %4839 = vrsqrt.f32 %v231_v40  ;;  %vm288_vm15 = vweird.f32 %v4838_v6 }
 0x117   :  { %4333 = vmatmul.msk.f32.gmra.mxu0 %vm57_vm0, %v5482_v29  ;;  %4349 = vmatmul.msk.f32.gmra.mxu1 %vm57_vm0, %v5482_v29  ;;  %v156_v26 = vmul.f32 %v5479_v7, %v5479_v7  ;;  %vm5512_vm3 = vmor %vm287_vm14, %vm288_vm15  ;;  %vm307_vm5 = vweird.f32 %v231_v40 }
 0x118   :  { %v283_v12 = vmul.f32 %v4838_v6, %v282_v10  ;;  %v280_v21 = vsel %vm5487_vm13, %v5429_v35, %v276_v8 }
 0x119   :  { %v194_v13 = vsel %vm57_vm0, %v156_v26, 0.0  ;;  %v99_v14 = vpop.xlane.xlu0 %98  ;;  %v404_v35 = vmul.f32 %v280_v21, %v5248_v43 }
 0x11a   :  { %v284_v17 = vmul.f32 0.5, %v283_v12  ;;  %198 = vadd.xlane.f32.xlu1 %v197_v1  ;;  %195 = vadd.xlane.f32.xlu0 %v194_v13  ;;  %v126_v19 = vmul.f32 %v5215_v20, %v99_v14 }
 0x11b   :  { %v424_v44 = vmul.f32 %v5402_v9, %v404_v35 }
 0x11c   :  { %v4840_v27 = vpop.eup %4839  ;;  %v285_v23 = vsub.f32 1.5, %v284_v17  ;;  %v5507_v24 = vsub.f32 %v5305_v4, %v126_v19  ;;  %v296_v4 = vmul.f32 %v5418_v25, %v295_v22 }
 0x11d   :  { %v302_v36 = vmul.f32 %v4840_v27, %v231_v40  ;;  %vm308_vm6 = vweird.f32 %v4840_v27  ;;  %v5535_v49 = vadd.f32 %v5410_v15, %v424_v44 }
 0x11e   :  { %v286_v41 = vmul.f32 %v4838_v6, %v285_v23  ;;  %v158_v58 = vmul.f32 %v5507_v24, %v5507_v24  ;;  %v300_v48 = vsel %vm299_vm4, %v5418_v25, %v296_v4  ;;  %vm309_vm7 = vmor %vm307_vm5, %vm308_vm6 }
 0x11f   :  { %v303_v33 = vmul.f32 %v4840_v27, %v302_v36  ;;  %4334 = vmatmul.msk.f32.gmra.mxu0 %vm57_vm0, %v5517_v57  ;;  %4350 = vmatmul.msk.f32.gmra.mxu1 %vm57_vm0, %v5517_v57  ;;  %v406_v54 = vmul.f32 %v300_v48, %v5246_v42 }
 0x120   :  { %v200_v37 = vsel %vm57_vm0, %v158_v58, 0.0  ;;  %v290_v39 = vsel %vm5512_vm3, %v4838_v6, %v286_v41 }
 0x121   :  { %v304_v43 = vmul.f32 0.5, %v303_v33  ;;  %201 = vadd.xlane.f32.xlu2 %v200_v37  ;;  %v405_v45 = vmul.f32 %v290_v39, %v5268_v53  ;;  %v426_v53 = vmul.f32 %v5402_v9, %v406_v54  ;;  %v5586_v37 = vld [vmem:[%s7859_s7] ss:$0 sm:$0xff]  ;;  %s5116_s7 = smov 112  }
 0x123   :  { %v305_v46 = vsub.f32 1.5, %v304_v43  ;;  %v425_v47 = vmul.f32 %v5402_v9, %v405_v45  ;;  %v446_v56 = vadd.f32 %v5410_v15, %v426_v53 }
 0x125   :  { %v445_v51 = vadd.f32 %v5410_v15, %v425_v47  ;;  %v306_v55 = vmul.f32 %v4840_v27, %v305_v46 }
 0x127   :  { %4335 = vmatmul.msk.f32.gmra.mxu0 %vm57_vm0, %v5535_v49  ;;  %4351 = vmatmul.msk.f32.gmra.mxu1 %vm57_vm0, %v5535_v49  ;;  %v310_v25 = vsel %vm309_vm7, %v4840_v27, %v306_v55 }
 0x128   :  { %4368 = vmatmul.msk.f32.vlgmr.msra.gmra.mxu2 %vm57_vm0, %v445_v51  ;;  %v407_v59 = vmul.f32 %v310_v25, %v5285_v60 }
 0x12a   :  { %v427_v42 = vmul.f32 %v5402_v9, %v407_v59 }
 0x12c   :  { %v447_v62 = vadd.f32 %v5410_v15, %v427_v42 }
 0x12f   :  { %4336 = vmatmul.msk.f32.gmra.mxu0 %vm57_vm0, %v445_v51  ;;  %4352 = vmatmul.msk.f32.gmra.mxu1 %vm57_vm0, %v445_v51 }
 0x130   :  { %4369 = vmatmul.msk.f32.gmra.mxu2 %vm57_vm0, %v446_v56 }
 0x137   :  { %4337 = vmatmul.msk.f32.gmra.mxu0 %vm57_vm0, %v446_v56  ;;  %4353 = vmatmul.msk.f32.gmra.mxu1 %vm57_vm0, %v446_v56 }
 0x138   :  { %4370 = vmatmul.msk.f32.gmra.mxu2 %vm57_vm0, %v447_v62 }
 0x13f   :  { %4338 = vmatmul.msk.f32.gmra.mxu0 %vm57_vm0, %v447_v62  ;;  %4354 = vmatmul.msk.f32.gmra.mxu1 %vm57_vm0, %v447_v62 }
 0x174   :  { %v184_v60 = vpop.xlane.xlu2 %183  ;;  %v190_v2 = vpop.xlane.xlu0 %189 }
 0x175   :  { %v216_v3 = vmul.f32 %v184_v60, %v5215_v20  ;;  %v218_v63 = vmul.f32 %v190_v2, %v5215_v20 }
 0x177   :  { %v232_v5 = vadd.f32 1e-05, %v216_v3  ;;  %v5559_v40 = vadd.f32 1e-05, %v218_v63 }
 0x179   :  { %4841 = vrsqrt.f32 %v232_v5  ;;  %vm317_vm9 = vweird.f32 %v232_v5  ;;  %vm337_vm11 = vweird.f32 %v5559_v40 }
 0x17a   :  { %4843 = vrsqrt.f32 %v5559_v40 }
 0x17c   :  { %v102_v6 = vpop.xlane.xlu2 %101 }
 0x17d   :  { %v187_v50 = vpop.xlane.xlu1 %186  ;;  %v127_v8 = vmul.f32 %v5215_v20, %v102_v6 }
 0x17e   :  { %v217_v10 = vmul.f32 %v187_v50, %v5215_v20  ;;  %v5616_v50 = vld [vmem:[%s7858_s6] ss:$0 sm:$0xff]  ;;  %s5117_s6 = smov 120  }
 0x17f   :  { %v4842_v11 = vpop.eup %4841  ;;  %v5565_v61 = vsub.f32 %v5366_v52, %v127_v8 }
 0x180   :  { %v5567_v1 = vpop.eup %4843  ;;  %v312_v26 = vmul.f32 %v4842_v11, %v232_v5  ;;  %v233_v12 = vadd.f32 1e-05, %v217_v10  ;;  %vm318_vm8 = vweird.f32 %v4842_v11 }
 0x181   :  { %v332_v13 = vmul.f32 %v5567_v1, %v5559_v40  ;;  %v159_v14 = vmul.f32 %v5565_v61, %v5565_v61  ;;  %vm319_vm10 = vmor %vm317_vm9, %vm318_vm8  ;;  %vm338_vm12 = vweird.f32 %v5567_v1 }
 0x182   :  { %v313_v16 = vmul.f32 %v4842_v11, %v312_v26  ;;  %4845 = vrsqrt.f32 %v233_v12  ;;  %vm5607_vm14 = vmor %vm337_vm11, %vm338_vm12  ;;  %vm327_vm15 = vweird.f32 %v233_v12 }
 0x183   :  { %v203_v17 = vsel %vm57_vm0, %v159_v14, 0.0  ;;  %v333_v21 = vmul.f32 %v5567_v1, %v332_v13 }
 0x184   :  { %v314_v19 = vmul.f32 0.5, %v313_v16  ;;  %204 = vadd.xlane.f32.xlu0 %v203_v17  ;;  %v193_v52 = vpop.xlane.xlu2 %192 }
 0x185   :  { %v105_v22 = vpop.xlane.xlu1 %104  ;;  %v219_v27 = vmul.f32 %v193_v52, %v5215_v20  ;;  %v334_v58 = vmul.f32 0.5, %v333_v21 }
 0x186   :  { %v315_v23 = vsub.f32 1.5, %v314_v19  ;;  %v128_v28 = vmul.f32 %v5215_v20, %v105_v22 }
 0x187   :  { %v5577_v36 = vadd.f32 1e-05, %v219_v27  ;;  %v335_v46 = vsub.f32 1.5, %v334_v58 }
 0x188   :  { %v4846_v35 = vpop.eup %4845  ;;  %v316_v41 = vmul.f32 %v4842_v11, %v315_v23  ;;  %v5580_v4 = vsub.f32 %v5427_v34, %v128_v28 }
 0x189   :  { %v322_v33 = vmul.f32 %v4846_v35, %v233_v12  ;;  %4847 = vrsqrt.f32 %v5577_v36  ;;  %vm328_vm13 = vweird.f32 %v4846_v35  ;;  %v336_v60 = vmul.f32 %v5567_v1, %v335_v46 }
 0x18a   :  { %v160_v39 = vmul.f32 %v5580_v4, %v5580_v4  ;;  %v320_v43 = vsel %vm319_vm10, %v4842_v11, %v316_v41  ;;  %vm329_vm1 = vmor %vm327_vm15, %vm328_vm13  ;;  %vm347_vm3 = vweird.f32 %v5577_v36 }
 0x18b   :  { %v323_v44 = vmul.f32 %v4846_v35, %v322_v33  ;;  %v408_v45 = vmul.f32 %v320_v43, %v5347_v31  ;;  %v340_v12 = vsel %vm5607_vm14, %v5567_v1, %v336_v60 }
 0x18c   :  { %v530_v47 = vpop.f32.mrf.mxu0  ;;  %v603_v34 = vpop.f32.mrf.mxu1  ;;  %v206_v48 = vsel %vm57_vm0, %v160_v39, 0.0  ;;  %v410_v1 = vmul.f32 %v340_v12, %v5344_v30 }
 0x18d   :  { %v324_v51 = vmul.f32 0.5, %v323_v44  ;;  %v5593_v54 = vadd.f32 %v5586_v37, %v603_v34  ;;  %207 = vadd.xlane.f32.xlu1 %v206_v48  ;;  %v199_v55 = vpop.xlane.xlu1 %198  ;;  %v196_v53 = vpop.xlane.xlu0 %195  ;;  %v428_v25 = vmul.f32 %v5402_v9, %v408_v45  ;;  %v5629_v17 = vadd.f32 %v5616_v50, %v530_v47 }
 0x18e   :  { %v221_v31 = vmul.f32 %v199_v55, %v5215_v20  ;;  %v220_v56 = vmul.f32 %v196_v53, %v5215_v20  ;;  %v430_v58 = vmul.f32 %v5402_v9, %v410_v1  ;;  %v5710_v1 = vld [vmem:[%s7860_s8] ss:$0 sm:$0xff] }
 0x18f   :  { %7919 = vst [vmem:[#allocation2_spill] sm:$0xff] %v5593_v54  ;;  %v4848_v59 = vpop.eup %4847  ;;  %v325_v42 = vsub.f32 1.5, %v324_v51  ;;  %2481 = vrot.lane.b32.xlu2 %v5593_v54, %s5116_s7  ;;  %v448_v62 = vadd.f32 %v5410_v15, %v428_v25 }
 0x190   :  { %v342_v2 = vmul.f32 %v4848_v59, %v5577_v36  ;;  %v5605_v3 = vadd.f32 1e-05, %v221_v31  ;;  %v236_v63 = vadd.f32 1e-05, %v220_v56  ;;  %vm348_vm4 = vweird.f32 %v4848_v59  ;;  %7923 = vst [vmem:[#allocation4_spill] sm:$0xff] %v5629_v17 }
 0x191   :  { %v326_v40 = vmul.f32 %v4846_v35, %v325_v42  ;;  %4339 = vmatmul.msk.f32.gmra.mxu0 %vm57_vm0, %v448_v62  ;;  %4355 = vmatmul.msk.f32.gmra.mxu1 %vm57_vm0, %v448_v62  ;;  %vm5638_vm5 = vmor %vm347_vm3, %vm348_vm4  ;;  %v450_v48 = vadd.f32 %v5410_v15, %v430_v58 }
 0x192   :  { %v343_v6 = vmul.f32 %v4848_v59, %v342_v2  ;;  %4849 = vrsqrt.f32 %v5605_v3  ;;  %4371 = vmatmul.msk.f32.gmra.mxu2 %vm57_vm0, %v448_v62  ;;  %vm357_vm6 = vweird.f32 %v236_v63  ;;  %vm367_vm8 = vweird.f32 %v5605_v3 }
 0x193   :  { %4851 = vrsqrt.f32 %v236_v63  ;;  %v330_v8 = vsel %vm329_vm1, %v4846_v35, %v326_v40 }
 0x194   :  { %v344_v10 = vmul.f32 0.5, %v343_v6  ;;  %v606_v11 = vpop.f32.mrf.mxu1  ;;  %v409_v26 = vmul.f32 %v330_v8, %v5382_v0  ;;  %v202_v14 = vpop.xlane.xlu2 %201 }
 0x195   :  { %v5626_v13 = vadd.f32 %v5586_v37, %v606_v11  ;;  %v222_v19 = vmul.f32 %v202_v14, %v5215_v20  ;;  %v5633_v0 = vpop.f32.mrf.mxu0 }
 0x196   :  { %v345_v16 = vsub.f32 1.5, %v344_v10  ;;  %v429_v21 = vmul.f32 %v5402_v9, %v409_v26 }
 0x197   :  { %7922 = vst [vmem:[#allocation3_spill] sm:$0xff] %v5626_v13  ;;  %4380 = vmatpush.xpose.msk.msrb.mxu3 %vm740_vm2, %v5626_v13  ;;  %v238_v23 = vadd.f32 1e-05, %v222_v19 }
 0x198   :  { %v4850_v52 = vpop.eup %4849  ;;  %v346_v22 = vmul.f32 %v4848_v59, %v345_v16  ;;  %2477 = vrot.lane.b32.xlu0 %v5629_v17, %s5116_s7  ;;  %v449_v28 = vadd.f32 %v5410_v15, %v429_v21 }
 0x199   :  { %v4852_v36 = vpop.eup %4851  ;;  %v362_v35 = vmul.f32 %v4850_v52, %v5605_v3  ;;  %4853 = vrsqrt.f32 %v238_v23  ;;  %vm368_vm9 = vweird.f32 %v4850_v52  ;;  %vm377_vm12 = vweird.f32 %v238_v23 }
 0x19a   :  { %v352_v41 = vmul.f32 %v4852_v36, %v236_v63  ;;  %4340 = vmatmul.msk.f32.gmra.mxu0 %vm57_vm0, %v449_v28  ;;  %4356 = vmatmul.msk.f32.gmra.mxu1 %vm57_vm0, %v449_v28  ;;  %v350_v33 = vsel %vm5638_vm5, %v4848_v59, %v346_v22  ;;  %vm358_vm7 = vweird.f32 %v4852_v36  ;;  %vm5667_vm11 = vmor %vm367_vm8, %vm368_vm9 }
 0x19b   :  { %v363_v30 = vmul.f32 %v4850_v52, %v362_v35  ;;  %4372 = vmatmul.msk.f32.gmra.mxu2 %vm57_vm0, %v449_v28  ;;  %4381 = vmatpush.xpose.msk.msrb.mxu3 %vm740_vm2, %v5593_v54  ;;  %v411_v44 = vmul.f32 %v350_v33, %v5422_v32  ;;  %vm5661_vm10 = vmor %vm357_vm6, %vm358_vm7  ;;  %vm1021_vm7 = vcmask 130048  }
 0x19c   :  { %v353_v39 = vmul.f32 %v4852_v36, %v352_v41  ;;  %v609_v43 = vpop.f32.mrf.mxu1 }
 0x19d   :  { %v364_v45 = vmul.f32 0.5, %v363_v30  ;;  %v431_v47 = vmul.f32 %v5402_v9, %v411_v44  ;;  %v536_v31 = vpop.f32.mrf.mxu0  ;;  %v5694_v12 = vadd.f32 %v5586_v37, %v609_v43 }
 0x19e   :  { %v354_v46 = vmul.f32 0.5, %v353_v39  ;;  %v5674_v60 = vadd.f32 %v5616_v50, %v536_v31 }
 0x19f   :  { %v365_v34 = vsub.f32 1.5, %v364_v45  ;;  %v4854_v51 = vpop.eup %4853  ;;  %v451_v53 = vadd.f32 %v5410_v15, %v431_v47  ;;  %7931 = vst [vmem:[#allocation6_spill] sm:$0xff] %v5694_v12 }
 0x1a0   :  { %v355_v55 = vsub.f32 1.5, %v354_v46  ;;  %2483 = vrot.lane.b32.xlu0 %v5626_v13, %s5116_s7  ;;  %v372_v25 = vmul.f32 %v4854_v51, %v238_v23  ;;  %vm378_vm13 = vweird.f32 %v4854_v51  ;;  %v729_v13 = vld [vmem:[%s7861_s11 + $0x28] sm:$0xff] }
 0x1a1   :  { %v366_v56 = vmul.f32 %v4850_v52, %v365_v34  ;;  %4374 = vmatmul.msk.f32.vlgmr.msra.gmra.mxu3 %vm57_vm0, %v451_v53  ;;  %vm379_vm14 = vmor %vm377_vm12, %vm378_vm13 }
 0x1a2   :  { %v356_v59 = vmul.f32 %v4852_v36, %v355_v55  ;;  %4341 = vmatmul.msk.f32.gmra.mxu0 %vm57_vm0, %v450_v48  ;;  %4357 = vmatmul.msk.f32.gmra.mxu1 %vm57_vm0, %v450_v48  ;;  %v373_v62 = vmul.f32 %v4854_v51, %v372_v25 }
 0x1a3   :  { %4373 = vmatmul.msk.f32.gmra.mxu2 %vm57_vm0, %v450_v48  ;;  %v370_v6 = vsel %vm5667_vm11, %v4850_v52, %v366_v56 }
 0x1a4   :  { %v612_v2 = vpop.f32.mrf.mxu1  ;;  %v360_v3 = vsel %vm5661_vm10, %v4852_v36, %v356_v59  ;;  %v374_v63 = vmul.f32 0.5, %v373_v62  ;;  %v413_v11 = vmul.f32 %v370_v6, %v5459_v18 }
 0x1a5   :  { %v5679_v5 = vadd.f32 %v5586_v37, %v612_v2  ;;  %v412_v40 = vmul.f32 %v360_v3, %v5479_v7  ;;  %v539_v14 = vpop.f32.mrf.mxu0 }
 0x1a6   :  { %1487 = vrot.lane.b32.xlu1 %v5674_v60, %s5117_s6  ;;  %v375_v8 = vsub.f32 1.5, %v374_v63  ;;  %v433_v19 = vmul.f32 %v5402_v9, %v413_v11  ;;  %v5703_v18 = vadd.f32 %v5616_v50, %v539_v14 }
 0x1a7   :  { %7930 = vst [vmem:[#allocation5_spill] sm:$0xff] %v5679_v5  ;;  %4384 = vmatpush.xpose.msk.msra.mxu3 %vm740_vm2, %v5679_v5  ;;  %v432_v10 = vmul.f32 %v5402_v9, %v412_v40 }
 0x1a8   :  { %1493 = vrot.lane.b32.xlu0 %v5679_v5, %s5117_s6  ;;  %v376_v26 = vmul.f32 %v4854_v51, %v375_v8  ;;  %v453_v52 = vadd.f32 %v5410_v15, %v433_v19 }
 0x1a9   :  { %v452_v7 = vadd.f32 %v5410_v15, %v432_v10 }
 0x1aa   :  { %4342 = vmatmul.msk.f32.gmra.mxu0 %vm57_vm0, %v451_v53  ;;  %4358 = vmatmul.msk.f32.gmra.mxu1 %vm57_vm0, %v451_v53  ;;  %v380_v21 = vsel %vm379_vm14, %v4854_v51, %v376_v26 }
 0x1ab   :  { %v688_v16 = vpop.f32.mrf.mxu2  ;;  %4375 = vmatmul.msk.f32.gmra.mxu3 %vm57_vm0, %v452_v7  ;;  %v414_v22 = vmul.f32 %v380_v21, %v5507_v24 }
 0x1ac   :  { %4385 = vmatpush.xpose.msk.msra.mxu3 %vm740_vm2, %v5694_v12  ;;  %v689_v23 = vadd.f32 %v5710_v1, %v688_v16  ;;  %v5724_v41 = vpop.f32.mrf.mxu1 }
 0x1ad   :  { %v434_v36 = vmul.f32 %v5402_v9, %v414_v22  ;;  %v542_v30 = vpop.f32.mrf.mxu0 }
 0x1ae   :  { %2520 = vrot.lane.b32.xlu1 %v5694_v12, %s5116_s7  ;;  %v5741_v33 = vadd.f32 %v5616_v50, %v542_v30 }
 0x1af   :  { %v454_v24 = vadd.f32 %v5410_v15, %v434_v36 }
 0x1b0   :  { %1489 = vrot.lane.b32.xlu0 %v5703_v18, %s5117_s6  ;;  %7933 = vst [vmem:[#allocation8_spill] sm:$0xff] %v5741_v33 }
 0x1b2   :  { %4343 = vmatmul.msk.f32.gmra.mxu0 %vm57_vm0, %v452_v7  ;;  %4359 = vmatmul.msk.f32.gmra.mxu1 %vm57_vm0, %v452_v7 }
 0x1b3   :  { %v691_v27 = vpop.f32.mrf.mxu2  ;;  %4376 = vmatmul.msk.f32.gmra.mxu3 %vm57_vm0, %v453_v52 }
 0x1b4   :  { %v692_v28 = vadd.f32 %v5710_v1, %v691_v27  ;;  %v5736_v58 = vpop.f32.mrf.mxu1 }
 0x1b5   :  { %v5745_v39 = vpop.f32.mrf.mxu0 }
 0x1b6   :  { %1276 = vmatpush.msrb.mxu2 %v692_v28  ;;  %v5722_v35 = vpack.i.bf16 %v689_v23, %v692_v28 }
 0x1b8   :  { %7932 = vst [vmem:[#allocation7_spill] sm:$0xff] %v5722_v35  ;;  %1277 = vmatpush.msrb.mxu2 %v689_v23  ;;  %4700 = vrot.lane.b32.xlu2 %v5722_v35, %s5117_s6 }
 0x1b9   :  { %2522 = vrot.lane.b32.xlu0 %v5679_v5, %s5116_s7 }
 0x1ba   :  { %4344 = vmatmul.msk.f32.gmra.mxu0 %vm57_vm0, %v453_v52  ;;  %4360 = vmatmul.msk.f32.gmra.mxu1 %vm57_vm0, %v453_v52 }
 0x1bb   :  { %4377 = vmatmul.msk.f32.gmra.mxu3 %vm57_vm0, %v454_v24  ;;  %v694_v3 = vpop.f32.mrf.mxu2 }
 0x1bc   :  { %v621_v43 = vpop.f32.mrf.mxu1  ;;  %v5771_v19 = vadd.f32 %v5710_v1, %v694_v3 }
 0x1bd   :  { %v5748_v44 = vadd.f32 %v5586_v37, %v621_v43  ;;  %v548_v45 = vpop.f32.mrf.mxu0  ;;  %v5794_v43 = vadd.f32 %v5586_v37, %v5724_v41 }
 0x1be   :  { %v5753_v46 = vadd.f32 %v5616_v50, %v548_v45 }
 0x1bf   :  { %7934 = vst [vmem:[#allocation9_spill] sm:$0xff] %v5748_v44 }
 0x1c0   :  { %1491 = vrot.lane.b32.xlu2 %v5694_v12, %s5117_s6 }
 0x1c2   :  { %4345 = vmatmul.msk.f32.gmra.mxu0 %vm57_vm0, %v454_v24  ;;  %4361 = vmatmul.msk.f32.gmra.mxu1 %vm57_vm0, %v454_v24 }
 0x1c8   :  { %1526 = vrot.lane.b32.xlu2 %v5741_v33, %s5117_s6 }
 0x1d0   :  { %1569 = vrot.lane.b32.xlu2 %v5748_v44, %s5117_s6 }
 0x1d8   :  { %1565 = vrot.lane.b32.xlu2 %v5753_v46, %s5117_s6 }
 0x1f7   :  { %v205_v47 = vpop.xlane.xlu0 %204 }
 0x1f8   :  { %v223_v34 = vmul.f32 %v205_v47, %v5215_v20  ;;  %v5812_v47 = vadd.f32 %v5616_v50, %v5745_v39 }
 0x1fa   :  { %v239_v48 = vadd.f32 1e-05, %v223_v34 }
 0x1fc   :  { %4855 = vrsqrt.f32 %v239_v48  ;;  %vm387_vm1 = vweird.f32 %v239_v48 }
 0x200   :  { %v208_v51 = vpop.xlane.xlu1 %207 }
 0x201   :  { %v224_v55 = vmul.f32 %v208_v51, %v5215_v20 }
 0x202   :  { %v4856_v53 = vpop.eup %4855 }
 0x203   :  { %v382_v32 = vmul.f32 %v4856_v53, %v239_v48  ;;  %v240_v25 = vadd.f32 1e-05, %v224_v55  ;;  %vm388_vm15 = vweird.f32 %v4856_v53 }
 0x204   :  { %vm389_vm3 = vmor %vm387_vm1, %vm388_vm15 }
 0x205   :  { %v383_v31 = vmul.f32 %v4856_v53, %v382_v32  ;;  %4857 = vrsqrt.f32 %v240_v25  ;;  %vm397_vm5 = vweird.f32 %v240_v25 }
 0x207   :  { %v384_v56 = vmul.f32 0.5, %v383_v31 }
 0x209   :  { %v385_v59 = vsub.f32 1.5, %v384_v56 }
 0x20b   :  { %v4858_v42 = vpop.eup %4857  ;;  %v386_v62 = vmul.f32 %v4856_v53, %v385_v59 }
 0x20c   :  { %v392_v2 = vmul.f32 %v4858_v42, %v240_v25  ;;  %vm398_vm4 = vweird.f32 %v4858_v42 }
 0x20d   :  { %v390_v63 = vsel %vm389_vm3, %v4856_v53, %v386_v62  ;;  %vm399_vm6 = vmor %vm397_vm5, %vm398_vm4 }
 0x20e   :  { %v393_v40 = vmul.f32 %v4858_v42, %v392_v2  ;;  %v551_v6 = vpop.f32.mrf.mxu0  ;;  %v624_v8 = vpop.f32.mrf.mxu1  ;;  %v415_v20 = vmul.f32 %v390_v63, %v5565_v61 }
 0x20f   :  { %v5761_v10 = vadd.f32 %v5616_v50, %v551_v6 }
 0x210   :  { %v394_v7 = vmul.f32 0.5, %v393_v40  ;;  %v435_v11 = vmul.f32 %v5402_v9, %v415_v20 }
 0x211   :  { %7935 = vst [vmem:[#allocation10_spill] sm:$0xff] %v5761_v10  ;;  %1567 = vrot.lane.b32.xlu2 %v5761_v10, %s5117_s6 }
 0x212   :  { %v395_v26 = vsub.f32 1.5, %v394_v7  ;;  %v455_v14 = vadd.f32 %v5410_v15, %v435_v11 }
 0x214   :  { %v396_v16 = vmul.f32 %v4858_v42, %v395_v26  ;;  %4346 = vmatmul.msk.f32.gmra.mxu0 %vm57_vm0, %v455_v14  ;;  %4362 = vmatmul.msk.f32.gmra.mxu1 %vm57_vm0, %v455_v14 }
 0x215   :  { %v697_v61 = vpop.f32.mrf.mxu2  ;;  %4378 = vmatmul.msk.f32.gmra.mxu3 %vm57_vm0, %v455_v14 }
 0x216   :  { %v5774_v21 = vadd.f32 %v5710_v1, %v697_v61  ;;  %v400_v52 = vsel %vm399_vm6, %v4858_v42, %v396_v16 }
 0x217   :  { %v5776_v22 = vpop.f32.mrf.mxu0  ;;  %v627_v27 = vpop.f32.mrf.mxu1  ;;  %v416_v23 = vmul.f32 %v400_v52, %v5580_v4 }
 0x218   :  { %v5781_v28 = vpack.i.bf16 %v5771_v19, %v5774_v21  ;;  %v5882_v2 = vadd.f32 %v5586_v37, %v627_v27  ;;  %v5900_v63 = vadd.f32 %v5616_v50, %v5776_v22 }
 0x219   :  { %v436_v36 = vmul.f32 %v5402_v9, %v416_v23  ;;  %v5800_v9 = vadd.f32 %v5586_v37, %v5736_v58 }
 0x21a   :  { %7936 = vst [vmem:[#allocation11_spill] sm:$0xff] %v5781_v28  ;;  %4705 = vrot.lane.b32.xlu1 %v5781_v28, %s5117_s6 }
 0x21b   :  { %v456_v24 = vadd.f32 %v5410_v15, %v436_v36  ;;  %7944 = vst [vmem:[#allocation19_spill] sm:$0xff] %v5882_v2 }
 0x21d   :  { %4347 = vmatmul.msk.f32.gmra.mxu0 %vm57_vm0, %v456_v24  ;;  %4363 = vmatmul.msk.f32.gmra.mxu1 %vm57_vm0, %v456_v24 }
 0x21e   :  { %4379 = vmatmul.msk.f32.gmra.mxu3 %vm57_vm0, %v456_v24  ;;  %v700_v22 = vpop.f32.mrf.mxu2 }
 0x21f   :  { %v5790_v30 = vpop.f32.mrf.mxu0  ;;  %v630_v4 = vpop.f32.mrf.mxu1 }
 0x220   :  { %v5913_v6 = vadd.f32 %v5616_v50, %v5790_v30 }
 0x222   :  { %1530 = vrot.lane.b32.xlu1 %v5794_v43, %s5117_s6 }
 0x224   :  { %v5804_v15 = vpop.f32.mrf.mxu3 }
 0x225   :  { %4364 = vmatmul.msk.f32.vlgmr.msrb.gmra.mxu1 %vm57_vm0, %v5435_v38  ;;  %v5825_v38 = vadd.f32 %v5616_v50, %v5633_v0 }
 0x226   :  { %4382 = vmatmul.msk.f32.vlgmr.msrb.gmra.mxu3 %vm740_vm2, %v5629_v17 }
 0x227   :  { %4388 = vmatpush.xpose.msk.msrb.mxu3 %vm740_vm2, %v5800_v9  ;;  %v560_v41 = vpop.f32.mrf.mxu0  ;;  %v633_v45 = vpop.f32.mrf.mxu1  ;;  %7938 = vst [vmem:[#allocation13_spill] sm:$0xff] %v5825_v38 }
 0x228   :  { %v5815_v58 = vadd.f32 %v5616_v50, %v560_v41  ;;  %v5834_v51 = vadd.f32 %v5586_v37, %v633_v45 }
 0x22a   :  { %7937 = vst [vmem:[#allocation12_spill] sm:$0xff] %v5815_v58  ;;  %1528 = vrot.lane.b32.xlu1 %v5812_v47, %s5117_s6  ;;  %1643 = vrot.lane.b32.xlu2 %v5815_v58, %s5117_s6 }
 0x22b   :  { %4389 = vmatpush.xpose.msk.msrb.mxu3 %vm740_vm2, %v5794_v43  ;;  %7939 = vst [vmem:[#allocation14_spill] sm:$0xff] %v5834_v51 }
 0x22d   :  { %4365 = vmatmul.msk.f32.gmra.mxu1 %vm57_vm0, %v5482_v29  ;;  %v5844_v29 = vadd.f32 %v5586_v37, %v624_v8 }
 0x22e   :  { %v5829_v39 = vpop.f32.mrf.mxu3  ;;  %4383 = vmatmul.msk.f32.gmra.mxu3 %vm740_vm2, %v5825_v38 }
 0x22f   :  { %v563_v34 = vpop.f32.mrf.mxu0  ;;  %v636_v48 = vpop.f32.mrf.mxu1 }
 0x230   :  { %v5837_v55 = vadd.f32 %v5586_v37, %v636_v48  ;;  %v5920_v8 = vadd.f32 %v5616_v50, %v563_v34  ;;  %v703_v34 = vpop.f32.mrf.mxu2 }
 0x232   :  { %7940 = vst [vmem:[#allocation15_spill] sm:$0xff] %v5837_v55  ;;  %1647 = vrot.lane.b32.xlu1 %v5834_v51, %s5117_s6  ;;  %1649 = vrot.lane.b32.xlu2 %v5837_v55, %s5117_s6 }
 0x233   :  { %7946 = vst [vmem:[#allocation21_spill] sm:$0xff] %v5920_v8 }
 0x235   :  { %4366 = vmatmul.msk.f32.gmra.mxu1 %vm57_vm0, %v5517_v57 }
 0x236   :  { %v712_v0 = vpop.f32.mrf.mxu3  ;;  %4386 = vmatmul.msk.f32.vlgmr.msra.gmra.mxu3 %vm740_vm2, %v5674_v60 }
 0x237   :  { %4392 = vmatpush.xpose.msk.msra.mxu3 %vm740_vm2, %v5844_v29  ;;  %v566_v53 = vpop.f32.mrf.mxu0  ;;  %v639_v32 = vpop.f32.mrf.mxu1  ;;  %v713_v31 = vadd.f32 %v5710_v1, %v712_v0  ;;  %v5968_v0 = vadd.f32 %v5710_v1, %v703_v34 }
 0x238   :  { %v5853_v25 = vadd.f32 %v5586_v37, %v639_v32  ;;  %v5925_v20 = vadd.f32 %v5616_v50, %v566_v53 }
 0x239   :  { %7954 = vst [vmem:[#allocation29_spill] sm:$0xff] %v5968_v0 }
 0x23a   :  { %7941 = vst [vmem:[#allocation16_spill] sm:$0xff] %v5853_v25  ;;  %1686 = vrot.lane.b32.xlu1 %v5853_v25, %s5117_s6 }
 0x23b   :  { %4393 = vmatpush.xpose.msk.msra.mxu3 %vm740_vm2, %v5748_v44  ;;  %7947 = vst [vmem:[#allocation22_spill] sm:$0xff] %v5925_v20 }
 0x23d   :  { %4367 = vmatmul.msk.f32.gmra.mxu1 %vm57_vm0, %v5535_v49  ;;  %v5875_v49 = vadd.f32 %v5586_v37, %v630_v4 }
 0x23e   :  { %v715_v57 = vpop.f32.mrf.mxu3  ;;  %4387 = vmatmul.msk.f32.gmra.mxu3 %vm740_vm2, %v5703_v18 }
 0x23f   :  { %v716_v56 = vadd.f32 %v5710_v1, %v715_v57  ;;  %v569_v59 = vpop.f32.mrf.mxu0  ;;  %v642_v3 = vpop.f32.mrf.mxu1  ;;  %v726_v57 = vld [vmem:[%s7861_s11 + $0x10] sm:$0xff] }
 0x240   :  { %v5866_v42 = vadd.f32 %v5616_v50, %v569_v59  ;;  %v5903_v40 = vadd.f32 %v5586_v37, %v642_v3 }
 0x241   :  { %1392 = vmatpush.msra.mxu2 %v716_v56  ;;  %v5868_v62 = vpack.i.bf16 %v713_v31, %v716_v56 }
 0x242   :  { %7942 = vst [vmem:[#allocation17_spill] sm:$0xff] %v5866_v42  ;;  %1684 = vrot.lane.b32.xlu2 %v5866_v42, %s5117_s6 }
 0x243   :  { %7943 = vst [vmem:[#allocation18_spill] sm:$0xff] %v5868_v62  ;;  %4710 = vrot.lane.b32.xlu0 %v5868_v62, %s5117_s6  ;;  %1393 = vmatpush.msra.mxu2 %v713_v31 }
 0x244   :  { %7945 = vst [vmem:[#allocation20_spill] sm:$0xff] %v5903_v40 }
 0x246   :  { %4390 = vmatmul.msk.f32.vlgmr.msrb.gmra.mxu3 %vm740_vm2, %v5741_v33 }
 0x247   :  { %4396 = vmatpush.xpose.msk.msrb.mxu3 %vm740_vm2, %v5875_v49 }
 0x24b   :  { %4397 = vmatpush.xpose.msk.msrb.mxu3 %vm740_vm2, %v5882_v2  ;;  %1532 = vrot.lane.b32.xlu0 %v5800_v9, %s5117_s6 }
 0x24e   :  { %4391 = vmatmul.msk.f32.gmra.mxu3 %vm740_vm2, %v5812_v47 }
 0x256   :  { %4394 = vmatmul.msk.f32.vlgmr.msra.gmra.mxu3 %vm740_vm2, %v5753_v46 }
 0x257   :  { %4400 = vmatpush.xpose.msk.msra.mxu3 %vm740_vm2, %v5837_v55 }
 0x25b   :  { %4401 = vmatpush.xpose.msk.msra.mxu3 %vm740_vm2, %v5834_v51 }
 0x25e   :  { %4395 = vmatmul.msk.f32.gmra.mxu3 %vm740_vm2, %v5761_v10 }
 0x266   :  { %4398 = vmatmul.msk.f32.vlgmr.msrb.gmra.mxu3 %vm740_vm2, %v5900_v63 }
 0x267   :  { %4404 = vmatpush.xpose.msk.msrb.mxu3 %vm740_vm2, %v5903_v40 }
 0x26b   :  { %4405 = vmatpush.xpose.msk.msrb.mxu3 %vm740_vm2, %v5853_v25 }
 0x26e   :  { %4399 = vmatmul.msk.f32.gmra.mxu3 %vm740_vm2, %v5913_v6 }
 0x276   :  { %4402 = vmatmul.msk.f32.vlgmr.msra.gmra.mxu3 %vm740_vm2, %v5815_v58 }
 0x27e   :  { %4403 = vmatmul.msk.f32.gmra.mxu3 %vm740_vm2, %v5920_v8 }
 0x286   :  { %4406 = vmatmul.msk.f32.vlgmr.msrb.gmra.mxu3 %vm740_vm2, %v5925_v20 }
 0x28e   :  { %4407 = vmatmul.msk.f32.gmra.mxu3 %vm740_vm2, %v5866_v42 }
 0x291   :  { %v572_v7 = vpop.f32.mrf.mxu0  ;;  %v645_v11 = vpop.f32.mrf.mxu1 }
 0x292   :  { %v5932_v26 = vadd.f32 %v5616_v50, %v572_v7  ;;  %v5944_v52 = vadd.f32 %v5586_v37, %v645_v11 }
 0x294   :  { %7948 = vst [vmem:[#allocation23_spill] sm:$0xff] %v5932_v26  ;;  %1721 = vrot.lane.b32.xlu1 %v5932_v26, %s5117_s6 }
 0x295   :  { %7950 = vst [vmem:[#allocation25_spill] sm:$0xff] %v5944_v52 }
 0x298   :  { %v718_v14 = vpop.f32.mrf.mxu3 }
 0x299   :  { %v719_v23 = vadd.f32 %v5710_v1, %v718_v14 }
 0x29a   :  { %v648_v16 = vpop.f32.mrf.mxu1 }
 0x29b   :  { %v5937_v61 = vadd.f32 %v5586_v37, %v648_v16  ;;  %v575_v37 = vpop.f32.mrf.mxu0  ;;  %v5992_v16 = vadd.f32 %v5710_v1, %v5829_v39 }
 0x29c   :  { %v5959_v41 = vadd.f32 %v5616_v50, %v575_v37  ;;  %v5973_v50 = vadd.f32 %v5710_v1, %v700_v22  ;;  %v724_v22 = vld [vmem:[%s7861_s11] sm:$0xff] }
 0x29d   :  { %7949 = vst [vmem:[#allocation24_spill] sm:$0xff] %v5937_v61  ;;  %4408 = vmatpush.xpose.msk.msra.mxu3 %vm740_vm2, %v5937_v61  ;;  %1727 = vrot.lane.b32.xlu1 %v5937_v61, %s5117_s6 }
 0x29e   :  { %7952 = vst [vmem:[#allocation27_spill] sm:$0xff] %v5959_v41 }
 0x29f   :  { %7955 = vst [vmem:[#allocation30_spill] sm:$0xff] %v5973_v50 }
 0x2a0   :  { %7957 = vst [vmem:[#allocation32_spill] sm:$0xff] %v5992_v16 }
 0x2a1   :  { %v721_v27 = vpop.f32.mrf.mxu3  ;;  %4409 = vmatpush.xpose.msk.msra.mxu3 %vm740_vm2, %v5944_v52 }
 0x2a2   :  { %v722_v36 = vadd.f32 %v5710_v1, %v721_v27  ;;  %v676_v24 = vpop.f32.mrf.mxu1  ;;  %v6001_v27 = vadd.f32 %v5710_v1, %v5804_v15 }
 0x2a4   :  { %4410 = vmatmul.msk.f32.vlgmr.msra.gmra.mxu3 %vm740_vm2, %v5932_v26  ;;  %v5953_v30 = vpack.i.bf16 %v719_v23, %v722_v36  ;;  %7958 = vst [vmem:[#allocation33_spill] sm:$0xff] %v6001_v27  ;;  %v739_v26 = vld [vmem:[%s7861_s11 + $0x78] sm:$0xff] }
 0x2a5   :  { %1305 = vmatpush.msrb.mxu3 %v5774_v21  ;;  %v677_v21 = vadd.f32 %v5710_v1, %v676_v24  ;;  %v727_v24 = vld [vmem:[%s7861_s11 + $0x18] sm:$0xff] }
 0x2a6   :  { %7951 = vst [vmem:[#allocation26_spill] sm:$0xff] %v5953_v30  ;;  %4715 = vrot.lane.b32.xlu0 %v5953_v30, %s5117_s6 }
 0x2a7   :  { %1306 = vmatpush.msrb.mxu3 %v5771_v19 }
 0x2a9   :  { %1421 = vmatpush.msra.mxu3 %v722_v36  ;;  %v770_v4 = vpop.f32.mrf.mxu3 }
 0x2aa   :  { %v679_v45 = vpop.f32.mrf.mxu1  ;;  %v6004_v36 = vadd.f32 %v770_v4, %v724_v22 }
 0x2ab   :  { %1422 = vmatpush.msra.mxu3 %v719_v23  ;;  %v680_v48 = vadd.f32 %v5710_v1, %v679_v45 }
 0x2ac   :  { %4411 = vmatmul.msk.f32.gmra.mxu3 %vm740_vm2, %v5959_v41  ;;  %v1022_v39 = vsel %vm1021_vm7, %v6004_v36, -inf }
 0x2ad   :  { %1218 = vmatpush.msrb.mxu0 %v680_v48  ;;  %v5965_v19 = vpack.i.bf16 %v677_v21, %v680_v48  ;;  %v6027_v48 = vpop.permute.xlu2 %2481 }
 0x2ae   :  { %1571 = vrot.lane.b32.xlu0 %v5844_v29, %s5117_s6  ;;  %7959 = vst [vmem:[#allocation34_spill] sm:$0xff] %v6027_v48 }
 0x2af   :  { %7953 = vst [vmem:[#allocation28_spill] sm:$0xff] %v5965_v19  ;;  %1219 = vmatpush.msrb.mxu0 %v677_v21  ;;  %v735_v19 = vld [vmem:[%s7861_s11 + $0x58] sm:$0xff] }
 0x2b1   :  { %1334 = vmatpush.msra.mxu0 %v5968_v0  ;;  %v773_v53 = vpop.f32.mrf.mxu3 }
 0x2b2   :  { %v682_v32 = vpop.f32.mrf.mxu1 }
 0x2b3   :  { %1335 = vmatpush.msra.mxu0 %v5973_v50  ;;  %v683_v3 = vadd.f32 %v5710_v1, %v682_v32  ;;  %v730_v32 = vld [vmem:[%s7861_s11 + $0x30] sm:$0xff] }
 0x2b6   :  { %1645 = vrot.lane.b32.xlu0 %v5920_v8, %s5117_s6 }
 0x2b9   :  { %v805_v31 = vpop.f32.mrf.mxu3 }
 0x2ba   :  { %v5982_v56 = vadd.f32 %v805_v31, %v726_v57  ;;  %v685_v59 = vpop.f32.mrf.mxu1 }
 0x2bb   :  { %v686_v7 = vadd.f32 %v5710_v1, %v685_v59  ;;  %v728_v1 = vld [vmem:[%s7861_s11 + $0x20] sm:$0xff] }
 0x2bc   :  { %v1028_v11 = vsel %vm1021_vm7, %v5982_v56, -inf }
 0x2bd   :  { %1029 = vmax.xlane.f32.xlu2 %v1028_v11  ;;  %1247 = vmatpush.msra.mxu1 %v686_v7  ;;  %v5988_v14 = vpack.i.bf16 %v683_v3, %v686_v7  ;;  %v6040_v11 = vpop.permute.xlu1 %1487 }
 0x2be   :  { %1682 = vrot.lane.b32.xlu0 %v5925_v20, %s5117_s6  ;;  %7960 = vst [vmem:[#allocation35_spill] sm:$0xff] %v6040_v11 }
 0x2bf   :  { %7956 = vst [vmem:[#allocation31_spill] sm:$0xff] %v5988_v14  ;;  %1248 = vmatpush.msra.mxu1 %v683_v3  ;;  %v6038_v3 = vpop.permute.xlu2 %4700 }
 0x2c1   :  { %1363 = vmatpush.msrb.mxu1 %v5992_v16  ;;  %v808_v23 = vpop.f32.mrf.mxu3 }
 0x2c2   :  { %v6017_v37 = vadd.f32 %v808_v23, %v727_v24 }
 0x2c3   :  { %1364 = vmatpush.msrb.mxu1 %v6001_v27 }
 0x2c4   :  { %v1031_v34 = vsel %vm1021_vm7, %v6017_v37, -inf }
 0x2c5   :  { %v6048_v24 = vpop.permute.xlu1 %2520 }
 0x2c6   :  { %1688 = vrot.lane.b32.xlu0 %v5903_v40, %s5117_s6  ;;  %7962 = vst [vmem:[#allocation37_spill] sm:$0xff] %v6048_v24 }
 0x2c7   :  { %1023 = vmax.xlane.f32.xlu1 %v1022_v39  ;;  %v6042_v22 = vpop.permute.xlu2 %1491  ;;  %v6046_v39 = vpop.permute.xlu0 %2477 }
 0x2c8   :  { %7961 = vst [vmem:[#allocation36_spill] sm:$0xff] %v6046_v39 }
 0x2c9   :  { %v840_v15 = vpop.f32.mrf.mxu3 }
 0x2ca   :  { %v6019_v4 = vadd.f32 %v840_v15, %v728_v1 }
 0x2cc   :  { %v1034_v45 = vsel %vm1021_vm7, %v6019_v4, -inf }
 0x2cd   :  { %1035 = vmax.xlane.f32.xlu2 %v1034_v45 }
 0x2ce   :  { %1725 = vrot.lane.b32.xlu0 %v5944_v52, %s5117_s6 }
 0x2cf   :  { %1032 = vmax.xlane.f32.xlu1 %v1031_v34  ;;  %v6052_v15 = vpop.permute.xlu2 %1526  ;;  %v6054_v45 = vpop.permute.xlu0 %2483 }
 0x2d0   :  { %7963 = vst [vmem:[#allocation38_spill] sm:$0xff] %v6054_v45  ;;  %v6056_v34 = vpop.permute.xlu1 %4705 }
 0x2d1   :  { %v843_v21 = vpop.f32.mrf.mxu3  ;;  %7964 = vst [vmem:[#allocation39_spill] sm:$0xff] %v6056_v34 }
 0x2d6   :  { %1723 = vrot.lane.b32.xlu0 %v5959_v41, %s5117_s6 }
 0x2d7   :  { %v6063_v12 = vpop.permute.xlu2 %1569  ;;  %v6073_v28 = vpop.permute.xlu0 %1493 }
 0x2d8   :  { %v6075_v27 = vpop.permute.xlu1 %1530 }
 0x2d9   :  { %v875_v57 = vpop.f32.mrf.mxu3 }
 0x2da   :  { %v6034_v31 = vadd.f32 %v875_v57, %v730_v32  ;;  %v725_v32 = vld [vmem:[%s7861_s11 + $0x8] sm:$0xff] }
 0x2dc   :  { %v1040_v59 = vsel %vm1021_vm7, %v6034_v31, -inf }
 0x2dd   :  { %1041 = vmax.xlane.f32.xlu1 %v1040_v59  ;;  %v6061_v59 = vadd.f32 %v773_v53, %v725_v32  ;;  %v6079_v32 = vadd.f32 %v843_v21, %v729_v13 }
 0x2df   :  { %v1025_v62 = vsel %vm1021_vm7, %v6061_v59, -inf  ;;  %v6083_v39 = vpop.permute.xlu2 %1565  ;;  %v1037_v24 = vsel %vm1021_vm7, %v6079_v32, -inf  ;;  %v6095_v21 = vpop.permute.xlu0 %1489 }
 0x2e0   :  { %7965 = vst [vmem:[#allocation40_spill] sm:$0xff] %v6083_v39  ;;  %v6099_v41 = vpop.permute.xlu1 %1528 }
 0x2e1   :  { %v878_v7 = vpop.f32.mrf.mxu3  ;;  %7966 = vst [vmem:[#allocation41_spill] sm:$0xff] %v6095_v21 }
 0x2e7   :  { %v6103_v30 = vpop.permute.xlu2 %1567  ;;  %v6119_v0 = vpop.permute.xlu0 %2522 }
 0x2e8   :  { %7967 = vst [vmem:[#allocation42_spill] sm:$0xff] %v6103_v30  ;;  %v6123_v48 = vpop.permute.xlu1 %1647 }
 0x2e9   :  { %v6044_v23 = vpop.f32.mrf.mxu3  ;;  %7968 = vst [vmem:[#allocation43_spill] sm:$0xff] %v6119_v0 }
 0x2ea   :  { %7970 = vst [vmem:[#allocation45_spill] sm:$0xff] %v6123_v48 }
 0x2ef   :  { %v6121_v35 = vpop.permute.xlu2 %1643 }
 0x2f0   :  { %7969 = vst [vmem:[#allocation44_spill] sm:$0xff] %v6121_v35 }
 0x2f1   :  { %v6050_v1 = vpop.f32.mrf.mxu3 }
 0x2f9   :  { %v945_v57 = vpop.f32.mrf.mxu3 }
 0x300   :  { %1026 = vmax.xlane.f32.xlu0 %v1025_v62  ;;  %v736_v62 = vld [vmem:[%s7861_s11 + $0x60] sm:$0xff] }
 0x301   :  { %v948_v17 = vpop.f32.mrf.mxu3 }
 0x302   :  { %v6077_v53 = vadd.f32 %v948_v17, %v735_v19  ;;  %v731_v17 = vld [vmem:[%s7861_s11 + $0x38] sm:$0xff] }
 0x304   :  { %v1055_v16 = vsel %vm1021_vm7, %v6077_v53, -inf }
 0x305   :  { %1056 = vmax.xlane.f32.xlu2 %v1055_v16  ;;  %v6097_v16 = vadd.f32 %v878_v7, %v731_v17  ;;  %v734_v7 = vld [vmem:[%s7861_s11 + $0x50] sm:$0xff] }
 0x307   :  { %v1043_v50 = vsel %vm1021_vm7, %v6097_v16, -inf }
 0x308   :  { %1038 = vmax.xlane.f32.xlu0 %v1037_v24  ;;  %v737_v24 = vld [vmem:[%s7861_s11 + $0x68] sm:$0xff] }
 0x309   :  { %v980_v13 = vpop.f32.mrf.mxu3 }
 0x30a   :  { %v6093_v19 = vadd.f32 %v980_v13, %v736_v62  ;;  %v6115_v13 = vadd.f32 %v945_v57, %v734_v7  ;;  %v6131_v57 = vpop.permute.xlu1 %1686  ;;  %v738_v7 = vld [vmem:[%s7861_s11 + $0x70] sm:$0xff] }
 0x30c   :  { %v1058_v5 = vsel %vm1021_vm7, %v6093_v19, -inf  ;;  %v1052_v45 = vsel %vm1021_vm7, %v6115_v13, -inf }
 0x30d   :  { %1059 = vmax.xlane.f32.xlu2 %v1058_v5 }
 0x310   :  { %1044 = vmax.xlane.f32.xlu0 %v1043_v50  ;;  %v6127_v50 = vpop.permute.xlu0 %4710 }
 0x311   :  { %v983_v62 = vpop.f32.mrf.mxu3 }
 0x312   :  { %v6113_v17 = vadd.f32 %v983_v62, %v737_v24  ;;  %v6129_v24 = vpop.permute.xlu2 %1649  ;;  %v6140_v54 = vpop.permute.xlu1 %1721 }
 0x313   :  { %7971 = vst [vmem:[#allocation46_spill] sm:$0xff] %v6129_v24 }
 0x314   :  { %v1061_v5 = vsel %vm1021_vm7, %v6113_v17, -inf  ;;  %7972 = vst [vmem:[#allocation47_spill] sm:$0xff] %v6140_v54 }
 0x315   :  { %1062 = vmax.xlane.f32.xlu1 %v1061_v5 }
 0x318   :  { %1053 = vmax.xlane.f32.xlu0 %v1052_v45  ;;  %v6136_v62 = vpop.permute.xlu0 %1532 }
 0x31a   :  { %v6138_v0 = vpop.permute.xlu2 %1684  ;;  %v6154_v52 = vpop.permute.xlu1 %1727 }
 0x31b   :  { %7974 = vst [vmem:[#allocation49_spill] sm:$0xff] %v6154_v52 }
 0x320   :  { %v6149_v30 = vpop.permute.xlu0 %4715 }
 0x321   :  { %7973 = vst [vmem:[#allocation48_spill] sm:$0xff] %v6149_v30 }
 0x327   :  { %v1015_v5 = vpop.f32.mrf.mxu3 }
 0x328   :  { %v6142_v14 = vadd.f32 %v1015_v5, %v738_v7 }
 0x32a   :  { %v1064_v45 = vsel %vm1021_vm7, %v6142_v14, -inf }
 0x32b   :  { %1065 = vmax.xlane.f32.xlu2 %v1064_v45  ;;  %v6158_v45 = vpop.permute.xlu0 %1571 }
 0x32f   :  { %v1018_v39 = vpop.f32.mrf.mxu3 }
 0x330   :  { %v1030_v34 = vpop.xlane.xlu2 %1029  ;;  %v6151_v35 = vadd.f32 %v1018_v39, %v739_v26 }
 0x331   :  { %v1072_v21 = vsub.f32 %v5982_v56, %v1030_v34 }
 0x332   :  { %v1067_v7 = vsel %vm1021_vm7, %v6151_v35, -inf }
 0x333   :  { %v1090_v5 = vmul.f32 1.442695, %v1072_v21  ;;  %1068 = vmax.xlane.f32.xlu0 %v1067_v7  ;;  %v6167_v30 = vpop.permute.xlu0 %1645 }
 0x334   :  { %7975 = vst [vmem:[#allocation50_spill] sm:$0xff] %v6167_v30 }
 0x335   :  { %4859 = vpow2.f32 %v1090_v5 }
 0x33a   :  { %v6160_v54 = vpop.xlane.xlu1 %1023 }
 0x33b   :  { %v6162_v11 = vpop.eup %4859 }
 0x33c   :  { %v1124_v26 = vsel %vm1021_vm7, %v6162_v11, 0.0 }
 0x33d   :  { %1125 = vadd.xlane.f32.xlu1 %v1124_v26  ;;  %v6176_v26 = vpop.permute.xlu0 %1682 }
 0x340   :  { %v1036_v39 = vpop.xlane.xlu2 %1035 }
 0x341   :  { %v1074_v56 = vsub.f32 %v6019_v4, %v1036_v39 }
 0x342   :  { %v1033_v34 = vpop.xlane.xlu1 %1032 }
 0x343   :  { %v1094_v40 = vmul.f32 1.442695, %v1074_v56  ;;  %v1073_v21 = vsub.f32 %v6017_v37, %v1033_v34 }
 0x345   :  { %4861 = vpow2.f32 %v1094_v40  ;;  %v1092_v7 = vmul.f32 1.442695, %v1073_v21  ;;  %v6181_v56 = vpop.permute.xlu0 %1688 }
 0x347   :  { %4863 = vpow2.f32 %v1092_v7 }
 0x34b   :  { %v6170_v5 = vpop.eup %4861 }
 0x34c   :  { %v1130_v48 = vsel %vm1021_vm7, %v6170_v5, 0.0 }
 0x34d   :  { %v6174_v52 = vpop.eup %4863  ;;  %1131 = vadd.xlane.f32.xlu1 %v1130_v48  ;;  %v6187_v7 = vpop.permute.xlu0 %1725 }
 0x34e   :  { %v1127_v4 = vsel %vm1021_vm7, %v6174_v52, 0.0  ;;  %7976 = vst [vmem:[#allocation51_spill] sm:$0xff] %v6187_v7 }
 0x34f   :  { %1128 = vadd.xlane.f32.xlu0 %v1127_v4 }
 0x350   :  { %v1042_v39 = vpop.xlane.xlu1 %1041 }
 0x351   :  { %v1076_v37 = vsub.f32 %v6034_v31, %v1042_v39 }
 0x353   :  { %v1098_v40 = vmul.f32 1.442695, %v1076_v37 }
 0x355   :  { %4865 = vpow2.f32 %v1098_v40  ;;  %v6189_v48 = vpop.permute.xlu0 %1723 }
 0x356   :  { %7977 = vst [vmem:[#allocation52_spill] sm:$0xff] %v6189_v48 }
 0x35b   :  { %v6183_v34 = vpop.eup %4865 }
 0x35c   :  { %v1136_v21 = vsel %vm1021_vm7, %v6183_v34, 0.0 }
 0x35d   :  { %1137 = vadd.xlane.f32.xlu0 %v1136_v21 }
 0x371   :  { %2479 = vrot.lane.b32.xlu0 %v5825_v38, %s5116_s7 }
 0x373   :  { %v6193_v4 = vpop.xlane.xlu0 %1026 }
 0x378   :  { %v1057_v31 = vpop.xlane.xlu2 %1056 }
 0x379   :  { %v1081_v39 = vsub.f32 %v6077_v53, %v1057_v31 }
 0x37b   :  { %v1108_v37 = vmul.f32 1.442695, %v1081_v39  ;;  %v1039_v40 = vpop.xlane.xlu0 %1038 }
 0x37c   :  { %v1075_v30 = vsub.f32 %v6079_v32, %v1039_v40 }
 0x37d   :  { %4867 = vpow2.f32 %v1108_v37 }
 0x37e   :  { %v1096_v24 = vmul.f32 1.442695, %v1075_v30 }
 0x380   :  { %4869 = vpow2.f32 %v1096_v24  ;;  %v1060_v21 = vpop.xlane.xlu2 %1059 }
 0x381   :  { %v1082_v7 = vsub.f32 %v6093_v19, %v1060_v21 }
 0x383   :  { %v6198_v42 = vpop.eup %4867  ;;  %v1110_v48 = vmul.f32 1.442695, %v1082_v7 }
 0x384   :  { %v1151_v38 = vsel %vm1021_vm7, %v6198_v42, 0.0 }
 0x385   :  { %4871 = vpow2.f32 %v1110_v48  ;;  %1152 = vadd.xlane.f32.xlu1 %v1151_v38 }
 0x386   :  { %v6202_v8 = vpop.eup %4869 }
 0x387   :  { %v1133_v53 = vsel %vm1021_vm7, %v6202_v8, 0.0 }
 0x388   :  { %v1063_v32 = vpop.xlane.xlu1 %1062  ;;  %1134 = vadd.xlane.f32.xlu2 %v1133_v53 }
 0x389   :  { %v1083_v30 = vsub.f32 %v6113_v17, %v1063_v32  ;;  %v1045_v17 = vpop.xlane.xlu0 %1044 }
 0x38a   :  { %v1077_v40 = vsub.f32 %v6097_v16, %v1045_v17 }
 0x38b   :  { %v6207_v24 = vpop.eup %4871  ;;  %v1112_v7 = vmul.f32 1.442695, %v1083_v30 }
 0x38c   :  { %v1154_v19 = vsel %vm1021_vm7, %v6207_v24, 0.0  ;;  %v1100_v32 = vmul.f32 1.442695, %v1077_v40 }
 0x38d   :  { %1155 = vadd.xlane.f32.xlu1 %v1154_v19  ;;  %4873 = vpow2.f32 %v1112_v7 }
 0x391   :  { %v1054_v39 = vpop.xlane.xlu0 %1053 }
 0x392   :  { %v1080_v7 = vsub.f32 %v6115_v13, %v1054_v39 }
 0x393   :  { %v6211_v31 = vpop.eup %4873 }
 0x394   :  { %v1157_v38 = vsel %vm1021_vm7, %v6211_v31, 0.0  ;;  %v1106_v17 = vmul.f32 1.442695, %v1080_v7 }
 0x39b   :  { %1158 = vadd.xlane.f32.xlu0 %v1157_v38 }
 0x39e   :  { %v1066_v30 = vpop.xlane.xlu2 %1065 }
 0x39f   :  { %v1084_v19 = vsub.f32 %v6142_v14, %v1066_v30 }
 0x3a0   :  { %2561 = vrot.lane.b32.xlu2 %v5800_v9, %s5116_s7 }
 0x3a6   :  { %2518 = vrot.lane.b32.xlu1 %v5703_v18, %s5116_s7  ;;  %v6225_v53 = vpop.xlane.xlu0 %1068 }
 0x3af   :  { %2516 = vrot.lane.b32.xlu0 %v5674_v60, %s5116_s7 }
 0x3b0   :  { %v1126_v48 = vpop.xlane.xlu1 %1125 }
 0x3b1   :  { %4875 = vrcp.f32 %v1126_v48 }
 0x3b2   :  { %4877 = vpow2.f32 %v1100_v32 }
 0x3b7   :  { %v4876_v37 = vpop.eup %4875  ;;  %2555 = vrot.lane.b32.xlu0 %v5741_v33, %s5116_s7 }
 0x3b8   :  { %v1184_v21 = vmul.f32 %v4876_v37, %v6162_v11  ;;  %v1114_v11 = vmul.f32 1.442695, %v1084_v19  ;;  %v6234_v48 = vpop.eup %4877 }
 0x3ba   :  { %4414 = vmatmul.msk.f32.vlgmr.msra.gmra.mxu1 %vm1021_vm7, %v1184_v21  ;;  %v1070_v21 = vsub.f32 %v6004_v36, %v6160_v54 }
 0x3bb   :  { %4448 = vmatpush.xpose.msk.msra.mxu1 %vm740_vm2, %v6073_v28  ;;  %v1139_v28 = vsel %vm1021_vm7, %v6234_v48, 0.0 }
 0x3bc   :  { %v1086_v32 = vmul.f32 1.442695, %v1070_v21 }
 0x3bf   :  { %4449 = vmatpush.xpose.msk.msra.mxu1 %vm740_vm2, %v6042_v22 }
 0x3c0   :  { %v1132_v16 = vpop.xlane.xlu1 %1131 }
 0x3c1   :  { %4879 = vrcp.f32 %v1132_v16 }
 0x3c2   :  { %v1129_v38 = vpop.xlane.xlu0 %1128 }
 0x3c3   :  { %4881 = vrcp.f32 %v1129_v38  ;;  %v1071_v38 = vsub.f32 %v6061_v59, %v6193_v4 }
 0x3c4   :  { %4883 = vpow2.f32 %v1114_v11 }
 0x3c5   :  { %4885 = vpow2.f32 %v1106_v17 }
 0x3c7   :  { %v4880_v37 = vpop.eup %4879 }
 0x3c8   :  { %v1186_v14 = vmul.f32 %v4880_v37, %v6170_v5  ;;  %v1088_v37 = vmul.f32 1.442695, %v1071_v38  ;;  %v7981_v38 = vld [vmem:[#allocation49_spill] sm:$0xff] }
 0x3c9   :  { %v4882_v13 = vpop.eup %4881  ;;  %1140 = vadd.xlane.f32.xlu2 %v1139_v28 }
 0x3ca   :  { %4416 = vmatmul.msk.f32.vlgmr.msrb.gmra.mxu2 %vm1021_vm7, %v1186_v14  ;;  %v1185_v22 = vmul.f32 %v4882_v13, %v6174_v52  ;;  %v6243_v39 = vpop.eup %4883  ;;  %v4712_v13 = vunpack.i.l.bf16 %v6127_v50 }
 0x3cb   :  { %4452 = vmatpush.xpose.msk.msrb.mxu2 %vm740_vm2, %v6136_v62  ;;  %v6246_v40 = vpop.eup %4885  ;;  %v1160_v5 = vsel %vm1021_vm7, %v6243_v39, 0.0 }
 0x3cc   :  { %4415 = vmatmul.msk.f32.gmra.mxu1 %vm1021_vm7, %v1185_v22  ;;  %v1148_v62 = vsel %vm1021_vm7, %v6246_v40, 0.0  ;;  %v733_v22 = vld [vmem:[%s7861_s11 + $0x48] sm:$0xff] }
 0x3cf   :  { %4453 = vmatpush.xpose.msk.msrb.mxu2 %vm740_vm2, %v6075_v27 }
 0x3d0   :  { %1161 = vadd.xlane.f32.xlu1 %v1160_v5  ;;  %v1138_v52 = vpop.xlane.xlu0 %1137 }
 0x3d1   :  { %4887 = vrcp.f32 %v1138_v52  ;;  %1149 = vadd.xlane.f32.xlu2 %v1148_v62 }
 0x3d2   :  { %4889 = vpow2.f32 %v1086_v32  ;;  %v7978_v32 = vld [vmem:[#allocation21_spill] sm:$0xff] }
 0x3d7   :  { %v4888_v30 = vpop.eup %4887 }
 0x3d8   :  { %v1188_v19 = vmul.f32 %v4888_v30, %v6183_v34  ;;  %v6260_v54 = vpop.eup %4889 }
 0x3d9   :  { %v1118_v27 = vsel %vm1021_vm7, %v6260_v54, 0.0 }
 0x3da   :  { %4418 = vmatmul.msk.f32.vlgmr.msrb.gmra.mxu3 %vm1021_vm7, %v1188_v19 }
 0x3db   :  { %4456 = vmatpush.xpose.msk.msrb.mxu3 %vm740_vm2, %v6158_v45 }
 0x3df   :  { %4457 = vmatpush.xpose.msk.msrb.mxu3 %vm740_vm2, %v6063_v12 }
 0x3e1   :  { %1119 = vadd.xlane.f32.xlu0 %v1118_v27 }
 0x3e3   :  { %v6288_v16 = vpop.permute.xlu0 %2479 }
 0x3e9   :  { %2598 = vrot.lane.b32.xlu1 %v5748_v44, %s5116_s7  ;;  %2559 = vrot.lane.b32.xlu2 %v5794_v43, %s5116_s7 }
 0x3f1   :  { %2639 = vrot.lane.b32.xlu1 %v5875_v49, %s5116_s7  ;;  %2600 = vrot.lane.b32.xlu2 %v5844_v29, %s5116_s7 }
 0x3f5   :  { %2633 = vrot.lane.b32.xlu0 %v5900_v63, %s5116_s7 }
 0x3f8   :  { %v6276_v12 = vpop.xlane.xlu1 %1152 }
 0x3f9   :  { %2557 = vrot.lane.b32.xlu2 %v5812_v47, %s5116_s7 }
 0x3fb   :  { %v1135_v36 = vpop.xlane.xlu2 %1134 }
 0x3fc   :  { %4891 = vrcp.f32 %v1135_v36 }
 0x3fd   :  { %2596 = vrot.lane.b32.xlu0 %v5761_v10, %s5116_s7 }
 0x400   :  { %v1156_v45 = vpop.xlane.xlu1 %1155 }
 0x401   :  { %2594 = vrot.lane.b32.xlu2 %v5753_v46, %s5116_s7  ;;  %4893 = vrcp.f32 %v1156_v45 }
 0x402   :  { %v4892_v34 = vpop.eup %4891 }
 0x403   :  { %v1187_v7 = vmul.f32 %v4892_v34, %v6202_v8  ;;  %v6337_v21 = vpop.permute.xlu2 %2561 }
 0x405   :  { %2676 = vrot.lane.b32.xlu0 %v5834_v51, %s5116_s7  ;;  %4417 = vmatmul.msk.f32.gmra.mxu2 %vm1021_vm7, %v1187_v7 }
 0x407   :  { %v4894_v11 = vpop.eup %4893 }
 0x408   :  { %v1194_v17 = vmul.f32 %v4894_v11, %v6207_v24  ;;  %v7979_v11 = vld [vmem:[#allocation17_spill] sm:$0xff] }
 0x409   :  { %2637 = vrot.lane.b32.xlu2 %v5882_v2, %s5116_s7 }
 0x40d   :  { %2635 = vrot.lane.b32.xlu0 %v5913_v6, %s5116_s7  ;;  %4424 = vmatmul.msk.f32.vlgmr.msra.gmra.mxu2 %vm1021_vm7, %v1194_v17  ;;  %v7982_v17 = vld [vmem:[#allocation45_spill] sm:$0xff] }
 0x40e   :  { %4468 = vmatpush.xpose.msk.msra.mxu2 %vm740_vm2, %v6181_v56  ;;  %v1159_v8 = vpop.xlane.xlu0 %1158  ;;  %v4702_v56 = vunpack.i.l.bf16 %v6038_v3 }
 0x40f   :  { %4895 = vrcp.f32 %v1159_v8  ;;  %v7984_v8 = vld [vmem:[#allocation20_spill] sm:$0xff] }
 0x410   :  { %4897 = vpow2.f32 %v1088_v37 }
 0x412   :  { %4469 = vmatpush.xpose.msk.msra.mxu2 %vm740_vm2, %v6131_v57  ;;  %v4703_v57 = vunpack.i.h.bf16 %v6038_v3  ;;  %v1085_v3 = vsub.f32 %v6151_v35, %v6225_v53  ;;  %v6342_v35 = vadd.f32 %v6050_v1, %v733_v22 }
 0x415   :  { %v4896_v59 = vpop.eup %4895  ;;  %2672 = vrot.lane.b32.xlu0 %v5815_v58, %s5116_s7  ;;  %v4435_v58 = vld [vmem:[%s7861_s11 + $0xb8] sm:$0xff] }
 0x416   :  { %v1195_v4 = vmul.f32 %v4896_v59, %v6211_v31  ;;  %v6305_v24 = vpop.eup %4897  ;;  %v732_v31 = vld [vmem:[%s7861_s11 + $0x40] sm:$0xff] }
 0x417   :  { %v1121_v28 = vsel %vm1021_vm7, %v6305_v24, 0.0  ;;  %v6324_v14 = vadd.f32 %v6044_v23, %v732_v31  ;;  %v1116_v23 = vmul.f32 1.442695, %v1085_v3 }
 0x418   :  { %4425 = vmatmul.msk.f32.gmra.mxu2 %vm1021_vm7, %v1195_v4 }
 0x419   :  { %4899 = vpow2.f32 %v1116_v23 }
 0x41b   :  { %1122 = vadd.xlane.f32.xlu1 %v1121_v28  ;;  %v7985_v28 = vld [vmem:[#allocation35_spill] sm:$0xff] }
 0x41d   :  { %2711 = vrot.lane.b32.xlu0 %v5925_v20, %s5116_s7 }
 0x41f   :  { %v6352_v5 = vpop.eup %4899 }
 0x420   :  { %4454 = vmatmul.msk.f32.vlgmr.msrb.gmra.mxu2 %vm740_vm2, %v6052_v15  ;;  %v4713_v15 = vunpack.i.h.bf16 %v6127_v50  ;;  %v1049_v50 = vsel %vm1021_vm7, %v6342_v35, -inf  ;;  %v1163_v1 = vsel %vm1021_vm7, %v6352_v5, 0.0 }
 0x421   :  { %2038 = vmatpush.msrb.mxu2 %v4702_v56  ;;  %v6356_v52 = vpop.permute.xlu0 %2516  ;;  %v7986_v56 = vld [vmem:[#allocation25_spill] sm:$0xff] }
 0x423   :  { %2039 = vmatpush.msrb.mxu2 %v4703_v57  ;;  %v7987_v57 = vld [vmem:[#allocation41_spill] sm:$0xff] }
 0x425   :  { %2756 = vrot.lane.b32.xlu0 %v5937_v61, %s5116_s7 }
 0x428   :  { %4455 = vmatmul.msk.f32.gmra.mxu2 %vm740_vm2, %v6099_v41  ;;  %v1046_v41 = vsel %vm1021_vm7, %v6324_v14, -inf }
 0x429   :  { %v6364_v34 = vpop.permute.xlu0 %2555 }
 0x430   :  { %4470 = vmatmul.msk.f32.vlgmr.msra.gmra.mxu2 %vm740_vm2, %v6176_v26  ;;  %v6348_v26 = vpop.permute.xlu1 %2518 }
 0x431   :  { %2186 = vmatpush.msra.mxu2 %v4712_v13  ;;  %v7989_v13 = vld [vmem:[#allocation50_spill] sm:$0xff] }
 0x432   :  { %1047 = vmax.xlane.f32.xlu2 %v1046_v41 }
 0x433   :  { %2187 = vmatpush.msra.mxu2 %v4713_v15 }
 0x434   :  { %2678 = vrot.lane.b32.xlu1 %v5837_v55, %s5116_s7 }
 0x438   :  { %4471 = vmatmul.msk.f32.gmra.mxu2 %vm740_vm2, %v6138_v0 }
 0x43a   :  { %1050 = vmax.xlane.f32.xlu2 %v1049_v50 }
 0x43c   :  { %2715 = vrot.lane.b32.xlu1 %v5853_v25, %s5116_s7  ;;  %v1141_v53 = vpop.xlane.xlu2 %1140 }
 0x43d   :  { %4901 = vrcp.f32 %v1141_v53 }
 0x442   :  { %1164 = vadd.xlane.f32.xlu2 %v1163_v1 }
 0x443   :  { %v4902_v0 = vpop.eup %4901  ;;  %v1162_v62 = vpop.xlane.xlu1 %1161 }
 0x444   :  { %4903 = vrcp.f32 %v1162_v62  ;;  %2674 = vrot.lane.b32.xlu1 %v7978_v32, %s5116_s7  ;;  %v1150_v30 = vpop.xlane.xlu2 %1149  ;;  %v1189_v19 = vmul.f32 %v4902_v0, %v6234_v48  ;;  %v7980_v48 = vld [vmem:[#allocation46_spill] sm:$0xff] }
 0x445   :  { %4905 = vrcp.f32 %v1150_v30 }
 0x446   :  { %4419 = vmatmul.msk.f32.gmra.mxu3 %vm1021_vm7, %v1189_v19  ;;  %4907 = vrcp.f32 %v6276_v12 }
 0x44a   :  { %v4904_v27 = vpop.eup %4903 }
 0x44b   :  { %v4906_v36 = vpop.eup %4905  ;;  %v1196_v45 = vmul.f32 %v4904_v27, %v6243_v39  ;;  %v7983_v39 = vld [vmem:[#allocation51_spill] sm:$0xff]  ;;  %v4432_v27 = vld [vmem:[%s7861_s11 + $0xa0] sm:$0xff] }
 0x44c   :  { %v1192_v7 = vmul.f32 %v4906_v36, %v6246_v40  ;;  %2713 = vrot.lane.b32.xlu1 %v7979_v11, %s5116_s7  ;;  %v4908_v12 = vpop.eup %4907  ;;  %v6393_v31 = vpop.permute.xlu2 %2559 }
 0x44d   :  { %v1193_v37 = vmul.f32 %v4908_v12, %v6198_v42  ;;  %v7988_v42 = vld [vmem:[#allocation44_spill] sm:$0xff]  ;;  %v6401_v15 = vpop.f32.mrf.mxu2 }
 0x44e   :  { %4422 = vmatmul.msk.f32.vlgmr.msrb.gmra.mxu1 %vm1021_vm7, %v1192_v7  ;;  %4426 = vmatmul.msk.f32.vlgmr.msra.gmra.mxu3 %vm1021_vm7, %v1196_v45  ;;  %7990 = vst [vmem:[#allocation46_spill] sm:$0xff] %v6401_v15 }
 0x44f   :  { %4464 = vmatpush.xpose.msk.msrb.mxu1 %vm740_vm2, %v7980_v48  ;;  %4472 = vmatpush.xpose.msk.msra.mxu3 %vm740_vm2, %v7981_v38 }
 0x453   :  { %4465 = vmatpush.xpose.msk.msrb.mxu1 %vm740_vm2, %v7982_v17  ;;  %4473 = vmatpush.xpose.msk.msra.mxu3 %vm740_vm2, %v7983_v39 }
 0x454   :  { %v1120_v40 = vpop.xlane.xlu0 %1119  ;;  %v6399_v3 = vpop.permute.xlu2 %2600 }
 0x455   :  { %4909 = vrcp.f32 %v1120_v40  ;;  %v4440_v40 = vld [vmem:[%s7861_s11 + $0xe0] sm:$0xff] }
 0x456   :  { %4423 = vmatmul.msk.f32.gmra.mxu1 %vm1021_vm7, %v1193_v37 }
 0x45a   :  { %2717 = vrot.lane.b32.xlu2 %v7984_v8, %s5116_s7 }
 0x45b   :  { %v4910_v59 = vpop.eup %4909 }
 0x45c   :  { %v1182_v4 = vmul.f32 %v4910_v59, %v6260_v54  ;;  %v6397_v54 = vpop.permute.xlu1 %2598  ;;  %v6405_v22 = vpop.permute.xlu2 %2557 }
 0x45d   :  { %v6485_v61 = vpop.f32.mrf.mxu3 }
 0x45e   :  { %4412 = vmatmul.msk.f32.vlgmr.msrb.gmra.mxu0 %vm1021_vm7, %v1182_v4  ;;  %4450 = vmatmul.msk.f32.vlgmr.msra.gmra.mxu1 %vm740_vm2, %v7985_v28  ;;  %8000 = vst [vmem:[#allocation35_spill] sm:$0xff] %v6485_v61 }
 0x462   :  { %2754 = vrot.lane.b32.xlu2 %v7986_v56, %s5116_s7 }
 0x464   :  { %v6403_v41 = vpop.permute.xlu1 %2639  ;;  %v6409_v53 = vpop.permute.xlu2 %2594 }
 0x466   :  { %4451 = vmatmul.msk.f32.gmra.mxu1 %vm740_vm2, %v7987_v57  ;;  %v4441_v57 = vld [vmem:[%s7861_s11 + $0xe8] sm:$0xff] }
 0x46c   :  { %v6417_v19 = vpop.permute.xlu2 %2637 }
 0x46e   :  { %4466 = vmatmul.msk.f32.vlgmr.msrb.gmra.mxu1 %vm740_vm2, %v7988_v42 }
 0x476   :  { %4467 = vmatmul.msk.f32.gmra.mxu1 %vm740_vm2, %v7989_v13 }
 0x488   :  { %v6407_v23 = vpop.f32.mrf.mxu2 }
 0x489   :  { %7991 = vst [vmem:[#allocation49_spill] sm:$0xff] %v6407_v23 }
 0x48e   :  { %v1123_v50 = vpop.xlane.xlu1 %1122 }
 0x48f   :  { %4911 = vrcp.f32 %v1123_v50 }
 0x490   :  { %v6411_v1 = vpop.f32.mrf.mxu2 }
 0x491   :  { %7992 = vst [vmem:[#allocation45_spill] sm:$0xff] %v6411_v1 }
 0x495   :  { %v4912_v0 = vpop.eup %4911 }
 0x496   :  { %v1183_v62 = vmul.f32 %v4912_v0, %v6305_v24  ;;  %v4433_v24 = vld [vmem:[%s7861_s11 + $0xa8] sm:$0xff] }
 0x498   :  { %4413 = vmatmul.msk.f32.gmra.mxu0 %vm1021_vm7, %v1183_v62 }
 0x49b   :  { %v6415_v30 = vpop.f32.mrf.mxu2 }
 0x49c   :  { %7993 = vst [vmem:[#allocation51_spill] sm:$0xff] %v6415_v30 }
 0x4a3   :  { %v1559_v36 = vpop.f32.mrf.mxu2 }
 0x4a4   :  { %v1560_v45 = vadd.f32 %v4432_v27, %v1559_v36  ;;  %v7994_v27 = vld [vmem:[#allocation39_spill] sm:$0xff] }
 0x4a5   :  { %v6422_v7 = vpop.xlane.xlu2 %1047  ;;  %v4707_v36 = vunpack.i.l.bf16 %v7994_v27 }
 0x4a6   :  { %v1772_v48 = vsel %vm1021_vm7, %v1560_v45, -inf }
 0x4a7   :  { %1773 = vmax.xlane.f32.xlu0 %v1772_v48  ;;  %v7995_v48 = vld [vmem:[#allocation40_spill] sm:$0xff] }
 0x4ab   :  { %v1562_v38 = vpop.f32.mrf.mxu2 }
 0x4ac   :  { %v1563_v12 = vadd.f32 %v4433_v24, %v1562_v38  ;;  %v4708_v24 = vunpack.i.h.bf16 %v7994_v27  ;;  %v7996_v38 = vld [vmem:[#allocation42_spill] sm:$0xff] }
 0x4ad   :  { %v6428_v17 = vpop.xlane.xlu2 %1050 }
 0x4ae   :  { %v1775_v39 = vsel %vm1021_vm7, %v1563_v12, -inf }
 0x4af   :  { %1776 = vmax.xlane.f32.xlu1 %v1775_v39  ;;  %v7997_v39 = vld [vmem:[#allocation48_spill] sm:$0xff] }
 0x4b3   :  { %v1715_v37 = vpop.f32.mrf.mxu2 }
 0x4b4   :  { %v6434_v59 = vadd.f32 %v4440_v40, %v1715_v37  ;;  %v6454_v40 = vpop.permute.xlu0 %2633  ;;  %v7998_v37 = vld [vmem:[#allocation47_spill] sm:$0xff] }
 0x4b5   :  { %v1165_v4 = vpop.xlane.xlu2 %1164 }
 0x4b6   :  { %4913 = vrcp.f32 %v1165_v4  ;;  %v1796_v28 = vsel %vm1021_vm7, %v6434_v59, -inf  ;;  %v4718_v4 = vunpack.i.h.bf16 %v7997_v39 }
 0x4b7   :  { %1797 = vmax.xlane.f32.xlu1 %v1796_v28  ;;  %v7999_v28 = vld [vmem:[#allocation52_spill] sm:$0xff] }
 0x4bb   :  { %v1718_v42 = vpop.f32.mrf.mxu2 }
 0x4bc   :  { %v4914_v13 = vpop.eup %4913  ;;  %v6441_v50 = vadd.f32 %v4441_v57, %v1718_v42  ;;  %v6461_v57 = vpop.permute.xlu0 %2596 }
 0x4bd   :  { %v1197_v0 = vmul.f32 %v4914_v13, %v6352_v5  ;;  %v4717_v5 = vunpack.i.l.bf16 %v7997_v39 }
 0x4be   :  { %v1799_v62 = vsel %vm1021_vm7, %v6441_v50, -inf }
 0x4bf   :  { %4427 = vmatmul.msk.f32.gmra.mxu3 %vm1021_vm7, %v1197_v0  ;;  %1800 = vmax.xlane.f32.xlu1 %v1799_v62  ;;  %v6467_v0 = vpop.permute.xlu1 %2678 }
 0x4c4   :  { %v6463_v42 = vpop.permute.xlu0 %2676 }
 0x4c7   :  { %4458 = vmatmul.msk.f32.vlgmr.msrb.gmra.mxu3 %vm740_vm2, %v7995_v48  ;;  %v6471_v27 = vpop.permute.xlu1 %2715 }
 0x4c8   :  { %2075 = vmatpush.msrb.mxu3 %v4707_v36 }
 0x4ca   :  { %2076 = vmatpush.msrb.mxu3 %v4708_v24 }
 0x4cc   :  { %v6465_v13 = vpop.permute.xlu0 %2635 }
 0x4cf   :  { %4459 = vmatmul.msk.f32.gmra.mxu3 %vm740_vm2, %v7996_v38  ;;  %v6475_v48 = vpop.permute.xlu1 %2674 }
 0x4d4   :  { %v6469_v62 = vpop.permute.xlu0 %2672 }
 0x4d7   :  { %4474 = vmatmul.msk.f32.vlgmr.msra.gmra.mxu3 %vm740_vm2, %v7998_v37  ;;  %v6479_v38 = vpop.permute.xlu1 %2713 }
 0x4d8   :  { %2223 = vmatpush.msra.mxu3 %v4717_v5 }
 0x4da   :  { %2224 = vmatpush.msra.mxu3 %v4718_v4 }
 0x4dc   :  { %v6473_v36 = vpop.permute.xlu0 %2711 }
 0x4df   :  { %4475 = vmatmul.msk.f32.gmra.mxu3 %vm740_vm2, %v7999_v28 }
 0x4e4   :  { %v6477_v24 = vpop.permute.xlu0 %2756 }
 0x51a   :  { %v1774_v39 = vpop.xlane.xlu0 %1773 }
 0x51b   :  { %v1812_v5 = vsub.f32 %v1560_v45, %v1774_v39  ;;  %v6491_v45 = vpop.f32.mrf.mxu3  ;;  %v6493_v39 = vpop.f32.mrf.mxu1 }
 0x51c   :  { %8001 = vst [vmem:[#allocation41_spill] sm:$0xff] %v6491_v45  ;;  %v8010_v45 = vld [vmem:[#allocation2_spill] sm:$0xff] }
 0x51d   :  { %v1832_v37 = vmul.f32 1.442695, %v1812_v5  ;;  %8002 = vst [vmem:[#allocation44_spill] sm:$0xff] %v6493_v39 }
 0x51f   :  { %4915 = vpow2.f32 %v1832_v37 }
 0x522   :  { %v1777_v4 = vpop.xlane.xlu1 %1776 }
 0x523   :  { %v1813_v28 = vsub.f32 %v1563_v12, %v1777_v4  ;;  %v6495_v12 = vpop.f32.mrf.mxu1  ;;  %v6497_v5 = vpop.f32.mrf.mxu3 }
 0x524   :  { %8003 = vst [vmem:[#allocation50_spill] sm:$0xff] %v6495_v12 }
 0x525   :  { %v6481_v25 = vpop.eup %4915  ;;  %v1834_v56 = vmul.f32 1.442695, %v1813_v28  ;;  %8004 = vst [vmem:[#allocation39_spill] sm:$0xff] %v6497_v5 }
 0x526   :  { %v1868_v8 = vsel %vm1021_vm7, %v6481_v25, 0.0 }
 0x527   :  { %4917 = vpow2.f32 %v1834_v56  ;;  %1869 = vadd.xlane.f32.xlu1 %v1868_v8  ;;  %v4434_v8 = vld [vmem:[%s7861_s11 + $0xb0] sm:$0xff] }
 0x52a   :  { %v1798_v5 = vpop.xlane.xlu1 %1797 }
 0x52b   :  { %v6499_v37 = vpop.f32.mrf.mxu1 }
 0x52c   :  { %8005 = vst [vmem:[#allocation40_spill] sm:$0xff] %v6499_v37 }
 0x52d   :  { %v6487_v32 = vpop.eup %4917 }
 0x52e   :  { %v1871_v11 = vsel %vm1021_vm7, %v6487_v32, 0.0 }
 0x52f   :  { %1872 = vadd.xlane.f32.xlu1 %v1871_v11 }
 0x533   :  { %v6508_v11 = vpop.f32.mrf.mxu1 }
 0x534   :  { %8007 = vst [vmem:[#allocation48_spill] sm:$0xff] %v6508_v11 }
 0x542   :  { %v6501_v56 = vpop.f32.mrf.mxu3 }
 0x543   :  { %8006 = vst [vmem:[#allocation42_spill] sm:$0xff] %v6501_v56 }
 0x54a   :  { %v1598_v4 = vpop.f32.mrf.mxu3 }
 0x54b   :  { %v6506_v28 = vadd.f32 %v4434_v8, %v1598_v4  ;;  %v4430_v8 = vld [vmem:[%s7861_s11 + $0x90] sm:$0xff]  ;;  %v1520_v4 = vpop.f32.mrf.mxu1 }
 0x54c   :  { %v6525_v56 = vadd.f32 %v4430_v8, %v1520_v4  ;;  %v4443_v8 = vld [vmem:[%s7861_s11 + $0xf8] sm:$0xff] }
 0x54d   :  { %v1778_v20 = vsel %vm1021_vm7, %v6506_v28, -inf }
 0x54e   :  { %1779 = vmax.xlane.f32.xlu2 %v1778_v20  ;;  %v4442_v20 = vld [vmem:[%s7861_s11 + $0xf0] sm:$0xff] }
 0x552   :  { %v1601_v51 = vpop.f32.mrf.mxu3 }
 0x553   :  { %v6515_v55 = vadd.f32 %v4435_v58, %v1601_v51  ;;  %v1820_v58 = vsub.f32 %v6434_v59, %v1798_v5  ;;  %v1766_v51 = vsel %vm1021_vm7, %v6525_v56, -inf  ;;  %v6537_v4 = vpop.f32.mrf.mxu1  ;;  %v1078_v59 = vsub.f32 %v6324_v14, %v6422_v7  ;;  %v4439_v7 = vld [vmem:[%s7861_s11 + $0xd8] sm:$0xff] }
 0x555   :  { %v1781_v10 = vsel %vm1021_vm7, %v6515_v55, -inf }
 0x556   :  { %1782 = vmax.xlane.f32.xlu2 %v1781_v10  ;;  %v1848_v10 = vmul.f32 1.442695, %v1820_v58 }
 0x558   :  { %4919 = vpow2.f32 %v1848_v10 }
 0x55a   :  { %v1754_v30 = vpop.f32.mrf.mxu3 }
 0x55b   :  { %v6527_v1 = vadd.f32 %v4442_v20, %v1754_v30  ;;  %v1102_v20 = vmul.f32 1.442695, %v1078_v59  ;;  %v6547_v58 = vpop.f32.mrf.mxu1 }
 0x55d   :  { %v1802_v11 = vsel %vm1021_vm7, %v6527_v1, -inf  ;;  %4921 = vpow2.f32 %v1102_v20  ;;  %v1801_v20 = vpop.xlane.xlu1 %1800 }
 0x55e   :  { %1767 = vmax.xlane.f32.xlu2 %v1766_v51  ;;  %1803 = vmax.xlane.f32.xlu0 %v1802_v11  ;;  %v6545_v11 = vpop.eup %4919 }
 0x55f   :  { %v1892_v51 = vsel %vm1021_vm7, %v6545_v11, 0.0 }
 0x562   :  { %v1757_v37 = vpop.f32.mrf.mxu3 }
 0x563   :  { %v6539_v30 = vadd.f32 %v4443_v8, %v1757_v37  ;;  %v6551_v37 = vpop.eup %4921  ;;  %v8008_v8 = vld [vmem:[#allocation23_spill] sm:$0xff]  ;;  %v1679_v10 = vpop.f32.mrf.mxu1 }
 0x564   :  { %v1142_v14 = vsel %vm1021_vm7, %v6551_v37, 0.0  ;;  %v6560_v59 = vadd.f32 %v4439_v7, %v1679_v10  ;;  %v8012_v7 = vld [vmem:[#allocation13_spill] sm:$0xff] }
 0x565   :  { %v1805_v5 = vsel %vm1021_vm7, %v6539_v30, -inf }
 0x566   :  { %1806 = vmax.xlane.f32.xlu2 %v1805_v5  ;;  %v1793_v5 = vsel %vm1021_vm7, %v6560_v59, -inf }
 0x56e   :  { %1893 = vadd.xlane.f32.xlu2 %v1892_v51  ;;  %v8009_v51 = vld [vmem:[#allocation31_spill] sm:$0xff] }
 0x572   :  { %2750 = vrot.lane.b32.xlu0 %v8008_v8, %s5116_s7 }
 0x576   :  { %1143 = vadd.xlane.f32.xlu2 %v1142_v14  ;;  %v8011_v14 = vld [vmem:[#allocation38_spill] sm:$0xff] }
 0x57e   :  { %1794 = vmax.xlane.f32.xlu2 %v1793_v5  ;;  %v8013_v5 = vld [vmem:[#allocation34_spill] sm:$0xff] }
 0x596   :  { %4720 = vrot.lane.b32.xlu2 %v8009_v51, %s5117_s6 }
 0x59a   :  { %v1870_v8 = vpop.xlane.xlu1 %1869 }
 0x59b   :  { %4923 = vrcp.f32 %v1870_v8 }
 0x59e   :  { %1452 = vrot.lane.b32.xlu2 %v8010_v45, %s5117_s6 }
 0x5a1   :  { %v4924_v61 = vpop.eup %4923 }
 0x5a2   :  { %v1924_v23 = vmul.f32 %v4924_v61, %v6481_v25  ;;  %v1873_v15 = vpop.xlane.xlu1 %1872  ;;  %v6580_v25 = vpop.permute.xlu2 %2717  ;;  %v8014_v61 = vld [vmem:[#allocation7_spill] sm:$0xff] }
 0x5a3   :  { %4925 = vrcp.f32 %v1873_v15 }
 0x5a4   :  { %4480 = vmatmul.msk.f32.vlgmr.msrb.gmra.mxu2 %vm1021_vm7, %v1924_v23  ;;  %v8015_v23 = vld [vmem:[#allocation29_spill] sm:$0xff] }
 0x5a5   :  { %4541 = vmatpush.xpose.msk.msrb.mxu2 %vm740_vm2, %v8011_v14  ;;  %v8016_v14 = vld [vmem:[#allocation30_spill] sm:$0xff] }
 0x5a6   :  { %1450 = vrot.lane.b32.xlu2 %v8012_v7, %s5117_s6  ;;  %v6588_v12 = vpack.i.bf16 %v8016_v14, %v8015_v23 }
 0x5a9   :  { %v4926_v10 = vpop.eup %4925  ;;  %4542 = vmatpush.xpose.msk.msrb.mxu2 %vm740_vm2, %v8013_v5 }
 0x5aa   :  { %v1925_v8 = vmul.f32 %v4926_v10, %v6487_v32  ;;  %v6584_v15 = vpop.permute.xlu2 %2754 }
 0x5ac   :  { %4481 = vmatmul.msk.f32.gmra.mxu2 %vm1021_vm7, %v1925_v8  ;;  %v1821_v8 = vsub.f32 %v6441_v50, %v1801_v20 }
 0x5ae   :  { %1608 = vrot.lane.b32.xlu2 %v5882_v2, %s5117_s6  ;;  %v8017_v2 = vld [vmem:[#allocation26_spill] sm:$0xff] }
 0x5b6   :  { %4740 = vrot.lane.b32.xlu2 %v8014_v61, %s5116_s7  ;;  %v1850_v61 = vmul.f32 1.442695, %v1821_v8 }
 0x5be   :  { %4750 = vrot.lane.b32.xlu2 %v6588_v12, %s5116_s7 }
 0x5c1   :  { %v1780_v32 = vpop.xlane.xlu2 %1779 }
 0x5c2   :  { %v1814_v10 = vsub.f32 %v6506_v28, %v1780_v32 }
 0x5c4   :  { %v1836_v5 = vmul.f32 1.442695, %v1814_v10 }
 0x5c6   :  { %4927 = vpow2.f32 %v1836_v5  ;;  %4765 = vrot.lane.b32.xlu2 %v8017_v2, %s5116_s7 }
 0x5c7   :  { %4929 = vpow2.f32 %v1850_v61  ;;  %v8018_v61 = vld [vmem:[#allocation5_spill] sm:$0xff] }
 0x5c9   :  { %v1783_v39 = vpop.xlane.xlu2 %1782 }
 0x5ca   :  { %v1815_v44 = vsub.f32 %v6515_v55, %v1783_v39  ;;  %v1079_v55 = vsub.f32 %v6342_v35, %v6428_v17  ;;  %v4431_v39 = vld [vmem:[%s7861_s11 + $0x98] sm:$0xff] }
 0x5cb   :  { %v6619_v10 = vadd.f32 %v4431_v39, %v6537_v4 }
 0x5cc   :  { %v6597_v33 = vpop.eup %4927  ;;  %v1838_v23 = vmul.f32 1.442695, %v1815_v44  ;;  %v1104_v32 = vmul.f32 1.442695, %v1079_v55 }
 0x5cd   :  { %v1874_v14 = vsel %vm1021_vm7, %v6597_v33, 0.0  ;;  %v6603_v28 = vpop.eup %4929  ;;  %v1769_v17 = vsel %vm1021_vm7, %v6619_v10, -inf }
 0x5ce   :  { %4931 = vpow2.f32 %v1838_v23  ;;  %3395 = vrot.lane.b32.xlu2 %v8012_v7, %s5118_s28  ;;  %1875 = vadd.xlane.f32.xlu1 %v1874_v14  ;;  %v1895_v7 = vsel %vm1021_vm7, %v6603_v28, 0.0 }
 0x5cf   :  { %4933 = vpow2.f32 %v1104_v32 }
 0x5d1   :  { %v1768_v50 = vpop.xlane.xlu2 %1767 }
 0x5d4   :  { %v6605_v20 = vpop.eup %4931 }
 0x5d5   :  { %v1877_v44 = vsel %vm1021_vm7, %v6605_v20, 0.0  ;;  %v6625_v8 = vpop.eup %4933 }
 0x5d6   :  { %3438 = vrot.lane.b32.xlu2 %v8018_v61, %s5118_s28  ;;  %1878 = vadd.xlane.f32.xlu0 %v1877_v44  ;;  %v1145_v23 = vsel %vm1021_vm7, %v6625_v8, 0.0  ;;  %v8019_v44 = vld [vmem:[#allocation27_spill] sm:$0xff] }
 0x5d7   :  { %1896 = vadd.xlane.f32.xlu1 %v1895_v7  ;;  %v1804_v7 = vpop.xlane.xlu0 %1803 }
 0x5d9   :  { %v1807_v35 = vpop.xlane.xlu2 %1806 }
 0x5de   :  { %3432 = vrot.lane.b32.xlu2 %v5674_v60, %s5118_s28  ;;  %1770 = vmax.xlane.f32.xlu0 %v1769_v17 }
 0x5e1   :  { %v1894_v5 = vpop.xlane.xlu2 %1893 }
 0x5e2   :  { %4935 = vrcp.f32 %v1894_v5 }
 0x5e6   :  { %1146 = vadd.xlane.f32.xlu0 %v1145_v23  ;;  %v1823_v23 = vsub.f32 %v6539_v30, %v1807_v35  ;;  %v4438_v30 = vld [vmem:[%s7861_s11 + $0xd0] sm:$0xff] }
 0x5e8   :  { %v4936_v14 = vpop.eup %4935 }
 0x5e9   :  { %v1932_v4 = vmul.f32 %v4936_v14, %v6545_v11  ;;  %v1144_v55 = vpop.xlane.xlu2 %1143  ;;  %v1822_v11 = vsub.f32 %v6527_v1, %v1804_v7  ;;  %v1854_v14 = vmul.f32 1.442695, %v1823_v23 }
 0x5ea   :  { %4937 = vrcp.f32 %v1144_v55  ;;  %v1810_v55 = vsub.f32 %v6525_v56, %v1768_v50 }
 0x5eb   :  { %4488 = vmatmul.msk.f32.vlgmr.msra.gmra.mxu2 %vm1021_vm7, %v1932_v4  ;;  %v1852_v32 = vmul.f32 1.442695, %v1822_v11 }
 0x5ec   :  { %4549 = vmatpush.xpose.msk.msra.mxu2 %vm740_vm2, %v6337_v21  ;;  %v1828_v35 = vmul.f32 1.442695, %v1810_v55 }
 0x5ed   :  { %4939 = vpow2.f32 %v1852_v32 }
 0x5ee   :  { %4941 = vpow2.f32 %v1854_v14 }
 0x5ef   :  { %4943 = vpow2.f32 %v1828_v35 }
 0x5f0   :  { %v4938_v60 = vpop.eup %4937  ;;  %2752 = vrot.lane.b32.xlu1 %v8019_v44, %s5116_s7  ;;  %4550 = vmatpush.xpose.msk.msra.mxu2 %vm740_vm2, %v6393_v31 }
 0x5f1   :  { %v1190_v39 = vmul.f32 %v4938_v60, %v6551_v37  ;;  %v6638_v61 = vpop.xlane.xlu2 %1794  ;;  %v6656_v60 = vadd.f32 %v4438_v30, %v6547_v58 }
 0x5f3   :  { %4420 = vmatmul.msk.f32.vlgmr.msra.gmra.mxu0 %vm1021_vm7, %v1190_v39  ;;  %v6643_v31 = vpop.eup %4939  ;;  %v1790_v39 = vsel %vm1021_vm7, %v6656_v60, -inf }
 0x5f4   :  { %v1898_v37 = vsel %vm1021_vm7, %v6643_v31, 0.0  ;;  %v6647_v4 = vpop.eup %4941 }
 0x5f5   :  { %v1901_v1 = vsel %vm1021_vm7, %v6647_v4, 0.0  ;;  %v6660_v7 = vpop.eup %4943 }
 0x5f6   :  { %v1862_v11 = vsel %vm1021_vm7, %v6660_v7, 0.0 }
 0x5f9   :  { %v4721_v17 = vpop.permute.xlu2 %4720 }
 0x5fa   :  { %v4722_v5 = vunpack.i.l.bf16 %v4721_v17  ;;  %v4723_v21 = vunpack.i.h.bf16 %v4721_v17  ;;  %v6678_v17 = vpop.permute.xlu0 %2750 }
 0x5fc   :  { %2001 = vmatpush.msra.mxu1 %v4722_v5 }
 0x5fe   :  { %2002 = vmatpush.msra.mxu1 %v4723_v21 }
 0x601   :  { %v6664_v32 = vpop.permute.xlu2 %1452 }
 0x607   :  { %1899 = vadd.xlane.f32.xlu2 %v1898_v37 }
 0x609   :  { %v6668_v56 = vpop.permute.xlu2 %1450 }
 0x60f   :  { %1902 = vadd.xlane.f32.xlu2 %v1901_v1  ;;  %v8021_v1 = vld [vmem:[#allocation37_spill] sm:$0xff] }
 0x611   :  { %v6672_v58 = vpop.permute.xlu2 %1608 }
 0x619   :  { %v6676_v50 = vpop.permute.xlu2 %4740 }
 0x61a   :  { %1791 = vmax.xlane.f32.xlu1 %v1790_v39 }
 0x621   :  { %v6681_v14 = vpop.permute.xlu2 %4750 }
 0x622   :  { %1863 = vadd.xlane.f32.xlu1 %v1862_v11 }
 0x627   :  { %3475 = vrot.lane.b32.xlu2 %v5794_v43, %s5118_s28 }
 0x629   :  { %v6692_v11 = vpop.permute.xlu2 %4765 }
 0x62f   :  { %3434 = vrot.lane.b32.xlu2 %v5703_v18, %s5118_s28  ;;  %v8020_v18 = vld [vmem:[#allocation43_spill] sm:$0xff] }
 0x637   :  { %3516 = vrot.lane.b32.xlu2 %v5844_v29, %s5118_s28 }
 0x641   :  { %v1876_v5 = vpop.xlane.xlu1 %1875 }
 0x642   :  { %4945 = vrcp.f32 %v1876_v5 }
 0x648   :  { %v4946_v21 = vpop.eup %4945 }
 0x649   :  { %v1926_v23 = vmul.f32 %v4946_v21, %v6597_v33  ;;  %v1879_v43 = vpop.xlane.xlu0 %1878 }
 0x64a   :  { %v1897_v37 = vpop.xlane.xlu1 %1896  ;;  %4947 = vrcp.f32 %v1879_v43  ;;  %v8022_v43 = vld [vmem:[#allocation36_spill] sm:$0xff] }
 0x64b   :  { %4949 = vrcp.f32 %v1897_v37  ;;  %4482 = vmatmul.msk.f32.vlgmr.msrb.gmra.mxu3 %vm1021_vm7, %v1926_v23 }
 0x64c   :  { %4545 = vmatpush.xpose.msk.msrb.mxu3 %vm740_vm2, %v8020_v18 }
 0x650   :  { %v4948_v29 = vpop.eup %4947  ;;  %4546 = vmatpush.xpose.msk.msrb.mxu3 %vm740_vm2, %v8021_v1 }
 0x651   :  { %v4950_v55 = vpop.eup %4949  ;;  %v1771_v30 = vpop.xlane.xlu0 %1770  ;;  %v1927_v35 = vmul.f32 %v4948_v29, %v6605_v20  ;;  %v8024_v29 = vld [vmem:[#allocation33_spill] sm:$0xff] }
 0x652   :  { %v1811_v33 = vsub.f32 %v6619_v10, %v1771_v30  ;;  %v1933_v39 = vmul.f32 %v4950_v55, %v6603_v28  ;;  %v6703_v20 = vpop.permute.xlu2 %3395 }
 0x653   :  { %4483 = vmatmul.msk.f32.gmra.mxu3 %vm1021_vm7, %v1927_v35 }
 0x654   :  { %v1830_v5 = vmul.f32 1.442695, %v1811_v33  ;;  %4489 = vmatmul.msk.f32.gmra.mxu2 %vm1021_vm7, %v1933_v39 }
 0x656   :  { %4951 = vpow2.f32 %v1830_v5 }
 0x659   :  { %v1147_v21 = vpop.xlane.xlu0 %1146 }
 0x65a   :  { %4953 = vrcp.f32 %v1147_v21  ;;  %v6711_v18 = vpop.permute.xlu2 %3438 }
 0x65c   :  { %v6695_v23 = vpop.eup %4951  ;;  %4543 = vmatmul.msk.f32.vlgmr.msrb.gmra.mxu2 %vm740_vm2, %v8022_v43 }
 0x65d   :  { %4557 = vmatpush.xpose.msk.msrb.mxu2 %vm740_vm2, %v6403_v41  ;;  %v1865_v28 = vsel %vm1021_vm7, %v6695_v23, 0.0  ;;  %v8023_v41 = vld [vmem:[#allocation32_spill] sm:$0xff] }
 0x65e   :  { %1866 = vadd.xlane.f32.xlu0 %v1865_v28  ;;  %v6719_v1 = vpack.i.bf16 %v8024_v29, %v8023_v41  ;;  %v8030_v41 = vld [vmem:[#allocation6_spill] sm:$0xff] }
 0x660   :  { %v4954_v10 = vpop.eup %4953 }
 0x661   :  { %4558 = vmatpush.xpose.msk.msrb.mxu2 %vm740_vm2, %v6417_v19  ;;  %v1191_v37 = vmul.f32 %v4954_v10, %v6625_v8 }
 0x662   :  { %v6723_v19 = vpop.permute.xlu2 %3432 }
 0x663   :  { %4421 = vmatmul.msk.f32.gmra.mxu0 %vm1021_vm7, %v1191_v37 }
 0x664   :  { %4544 = vmatmul.msk.f32.gmra.mxu2 %vm740_vm2, %v6288_v16 }
 0x66c   :  { %4551 = vmatmul.msk.f32.vlgmr.msra.gmra.mxu2 %vm740_vm2, %v6364_v34  ;;  %v8025_v34 = vld [vmem:[#allocation4_spill] sm:$0xff] }
 0x66d   :  { %4565 = vmatpush.xpose.msk.msra.mxu2 %vm740_vm2, %v6580_v25 }
 0x671   :  { %4566 = vmatpush.xpose.msk.msra.mxu2 %vm740_vm2, %v6471_v27 }
 0x672   :  { %4725 = vrot.lane.b32.xlu0 %v6719_v1, %s5117_s6 }
 0x674   :  { %4552 = vmatmul.msk.f32.gmra.mxu2 %vm740_vm2, %v6405_v22  ;;  %v2753_v22 = vpop.permute.xlu1 %2752 }
 0x67a   :  { %v1900_v16 = vpop.xlane.xlu2 %1899  ;;  %1448 = vrot.lane.b32.xlu0 %v8025_v34, %s5117_s6 }
 0x67b   :  { %4955 = vrcp.f32 %v1900_v16 }
 0x67c   :  { %4559 = vmatmul.msk.f32.vlgmr.msrb.gmra.mxu2 %vm740_vm2, %v6454_v40 }
 0x681   :  { %v4956_v25 = vpop.eup %4955 }
 0x682   :  { %v1934_v8 = vmul.f32 %v4956_v25, %v6643_v31  ;;  %v1903_v27 = vpop.xlane.xlu2 %1902  ;;  %1610 = vrot.lane.b32.xlu0 %v5875_v49, %s5117_s6 }
 0x683   :  { %4957 = vrcp.f32 %v1903_v27  ;;  %v8032_v27 = vld [vmem:[#allocation9_spill] sm:$0xff] }
 0x684   :  { %4560 = vmatmul.msk.f32.gmra.mxu2 %vm740_vm2, %v6465_v13  ;;  %4490 = vmatmul.msk.f32.vlgmr.msra.gmra.mxu3 %vm1021_vm7, %v1934_v8 }
 0x685   :  { %4553 = vmatpush.xpose.msk.msra.mxu3 %vm740_vm2, %v6399_v3  ;;  %v1819_v3 = vsub.f32 %v6560_v59, %v6638_v61 }
 0x687   :  { %v1846_v35 = vmul.f32 1.442695, %v1819_v3 }
 0x689   :  { %v4958_v55 = vpop.eup %4957  ;;  %4554 = vmatpush.xpose.msk.msra.mxu3 %vm740_vm2, %v6397_v54  ;;  %v8026_v54 = vld [vmem:[#allocation11_spill] sm:$0xff] }
 0x68a   :  { %1606 = vrot.lane.b32.xlu0 %v5913_v6, %s5117_s6  ;;  %v1935_v40 = vmul.f32 %v4958_v55, %v6647_v4 }
 0x68c   :  { %4567 = vmatmul.msk.f32.vlgmr.msra.gmra.mxu2 %vm740_vm2, %v6473_v36  ;;  %4491 = vmatmul.msk.f32.gmra.mxu3 %vm1021_vm7, %v1935_v40 }
 0x68d   :  { %v1792_v13 = vpop.xlane.xlu1 %1791 }
 0x68e   :  { %v1818_v31 = vsub.f32 %v6656_v60, %v1792_v13 }
 0x690   :  { %v1844_v30 = vmul.f32 1.442695, %v1818_v31 }
 0x692   :  { %4959 = vpow2.f32 %v1844_v30  ;;  %4745 = vrot.lane.b32.xlu0 %v8026_v54, %s5116_s7 }
 0x694   :  { %4568 = vmatmul.msk.f32.gmra.mxu2 %vm740_vm2, %v6479_v38  ;;  %4547 = vmatmul.msk.f32.vlgmr.msrb.gmra.mxu3 %vm740_vm2, %v6356_v52  ;;  %v8027_v38 = vld [vmem:[#allocation3_spill] sm:$0xff] }
 0x695   :  { %v1864_v36 = vpop.xlane.xlu1 %1863  ;;  %4561 = vmatpush.xpose.msk.msrb.mxu3 %vm740_vm2, %v6467_v0 }
 0x696   :  { %4961 = vrcp.f32 %v1864_v36 }
 0x697   :  { %4963 = vpow2.f32 %v1846_v35 }
 0x698   :  { %v6760_v4 = vpop.eup %4959 }
 0x699   :  { %4562 = vmatpush.xpose.msk.msrb.mxu3 %vm740_vm2, %v6463_v42  ;;  %v1886_v59 = vsel %vm1021_vm7, %v6760_v4, 0.0 }
 0x69a   :  { %1887 = vadd.xlane.f32.xlu1 %v1886_v59  ;;  %3399 = vrot.lane.b32.xlu0 %v8027_v38, %s5118_s28 }
 0x69c   :  { %v4962_v61 = vpop.eup %4961  ;;  %4548 = vmatmul.msk.f32.gmra.mxu3 %vm740_vm2, %v6348_v26  ;;  %v6798_v26 = vpop.f32.mrf.mxu2 }
 0x69d   :  { %v1922_v52 = vmul.f32 %v4962_v61, %v6660_v7  ;;  %v6771_v0 = vpop.eup %4963  ;;  %v8029_v7 = vld [vmem:[#allocation18_spill] sm:$0xff] }
 0x69e   :  { %v1889_v42 = vsel %vm1021_vm7, %v6771_v0, 0.0 }
 0x69f   :  { %4478 = vmatmul.msk.f32.vlgmr.msra.gmra.mxu1 %vm1021_vm7, %v1922_v52 }
 0x6a2   :  { %1890 = vadd.xlane.f32.xlu1 %v1889_v42  ;;  %3393 = vrot.lane.b32.xlu0 %v8025_v34, %s5118_s28  ;;  %v8031_v34 = vld [vmem:[#allocation8_spill] sm:$0xff] }
 0x6a4   :  { %4555 = vmatmul.msk.f32.vlgmr.msra.gmra.mxu3 %vm740_vm2, %v6409_v53 }
 0x6a5   :  { %4569 = vmatpush.xpose.msk.msra.mxu3 %vm740_vm2, %v6477_v24  ;;  %v4525_v24 = vld [vmem:[%s7861_s11 + $0x100] sm:$0xff] }
 0x6a9   :  { %4570 = vmatpush.xpose.msk.msra.mxu3 %vm740_vm2, %v6584_v15 }
 0x6aa   :  { %3477 = vrot.lane.b32.xlu0 %v5800_v9, %s5118_s28  ;;  %v6804_v9 = vpop.f32.mrf.mxu2 }
 0x6ac   :  { %4556 = vmatmul.msk.f32.gmra.mxu3 %vm740_vm2, %v6461_v57 }
 0x6b2   :  { %3473 = vrot.lane.b32.xlu0 %v5812_v47, %s5118_s28  ;;  %v8028_v47 = vld [vmem:[#allocation28_spill] sm:$0xff] }
 0x6b4   :  { %4563 = vmatmul.msk.f32.vlgmr.msrb.gmra.mxu3 %vm740_vm2, %v6469_v62 }
 0x6ba   :  { %3510 = vrot.lane.b32.xlu0 %v5753_v46, %s5118_s28  ;;  %v6809_v46 = vpop.f32.mrf.mxu2 }
 0x6bb   :  { %1454 = vrot.lane.b32.xlu1 %v8027_v38, %s5117_s6 }
 0x6bc   :  { %4564 = vmatmul.msk.f32.gmra.mxu3 %vm740_vm2, %v6475_v48 }
 0x6c3   :  { %1604 = vrot.lane.b32.xlu1 %v5900_v63, %s5117_s6 }
 0x6c4   :  { %4571 = vmatmul.msk.f32.vlgmr.msra.gmra.mxu3 %vm740_vm2, %v6678_v17 }
 0x6cb   :  { %4730 = vrot.lane.b32.xlu1 %v8028_v47, %s5116_s7 }
 0x6cc   :  { %4572 = vmatmul.msk.f32.gmra.mxu3 %vm740_vm2, %v2753_v22 }
 0x6ce   :  { %v6843_v29 = vpop.f32.mrf.mxu3 }
 0x6d1   :  { %v1867_v53 = vpop.xlane.xlu0 %1866 }
 0x6d2   :  { %4965 = vrcp.f32 %v1867_v53 }
 0x6d3   :  { %4735 = vrot.lane.b32.xlu1 %v8009_v51, %s5116_s7 }
 0x6d6   :  { %v6850_v25 = vpop.f32.mrf.mxu3 }
 0x6d7   :  { %v6813_v57 = vpop.f32.mrf.mxu2 }
 0x6d8   :  { %v4966_v62 = vpop.eup %4965 }
 0x6d9   :  { %v1923_v48 = vmul.f32 %v4966_v62, %v6695_v23  ;;  %v4529_v23 = vld [vmem:[%s7861_s11 + $0x120] sm:$0xff]  ;;  %v4531_v62 = vld [vmem:[%s7861_s11 + $0x130] sm:$0xff] }
 0x6db   :  { %4755 = vrot.lane.b32.xlu1 %v6719_v1, %s5116_s7  ;;  %4479 = vmatmul.msk.f32.gmra.mxu1 %vm1021_vm7, %v1923_v48  ;;  %v1221_v48 = vpop.f32.mrf.mxu0 }
 0x6df   :  { %v2510_v15 = vpop.f32.mrf.mxu2 }
 0x6e0   :  { %v6822_v60 = vadd.f32 %v4525_v24, %v2510_v15 }
 0x6e2   :  { %v2789_v17 = vsel %vm1021_vm7, %v6822_v60, -inf }
 0x6e3   :  { %4760 = vrot.lane.b32.xlu1 %v8029_v7, %s5116_s7 }
 0x6e4   :  { %v4726_v33 = vpop.permute.xlu0 %4725  ;;  %2790 = vmax.xlane.f32.xlu0 %v2789_v17 }
 0x6e5   :  { %v4727_v39 = vunpack.i.l.bf16 %v4726_v33  ;;  %v4728_v5 = vunpack.i.h.bf16 %v4726_v33 }
 0x6e7   :  { %v6828_v21 = vpop.f32.mrf.mxu2  ;;  %2149 = vmatpush.msrb.mxu1 %v4727_v39  ;;  %v4534_v39 = vld [vmem:[%s7861_s11 + $0x148] sm:$0xff] }
 0x6e9   :  { %2150 = vmatpush.msrb.mxu1 %v4728_v5 }
 0x6eb   :  { %3397 = vrot.lane.b32.xlu1 %v8010_v45, %s5118_s28  ;;  %v1430_v45 = vld [vmem:[%s7862_s9] sm:$0xff] }
 0x6ec   :  { %v6835_v43 = vpop.permute.xlu0 %1448  ;;  %2410 = vmatpush.msra.mxu1 %v1430_v45 }
 0x6ef   :  { %v2588_v28 = vpop.f32.mrf.mxu2 }
 0x6f0   :  { %v6837_v10 = vadd.f32 %v4529_v23, %v2588_v28  ;;  %v4530_v23 = vld [vmem:[%s7861_s11 + $0x128] sm:$0xff] }
 0x6f2   :  { %v2801_v37 = vsel %vm1021_vm7, %v6837_v10, -inf }
 0x6f3   :  { %3436 = vrot.lane.b32.xlu1 %v8030_v41, %s5118_s28  ;;  %2802 = vmax.xlane.f32.xlu0 %v2801_v37  ;;  %v1224_v37 = vpop.f32.mrf.mxu0 }
 0x6f4   :  { %v1611_v16 = vpop.permute.xlu0 %1610 }
 0x6f7   :  { %v2591_v55 = vpop.f32.mrf.mxu2 }
 0x6f8   :  { %v6896_v45 = vadd.f32 %v4530_v23, %v2591_v55 }
 0x6fa   :  { %v2804_v55 = vsel %vm1021_vm7, %v6896_v45, -inf }
 0x6fb   :  { %3471 = vrot.lane.b32.xlu1 %v8031_v34, %s5118_s28 }
 0x6fc   :  { %v6852_v8 = vpop.permute.xlu0 %1606 }
 0x6ff   :  { %v6862_v30 = vpop.f32.mrf.mxu2 }
 0x703   :  { %3514 = vrot.lane.b32.xlu1 %v8032_v27, %s5118_s28 }
 0x704   :  { %v6858_v40 = vpop.permute.xlu0 %4745 }
 0x707   :  { %v6856_v22 = vpop.f32.mrf.mxu3  ;;  %v2669_v42 = vpop.f32.mrf.mxu2 }
 0x708   :  { %v6892_v41 = vadd.f32 %v4534_v39, %v2669_v42  ;;  %v4743_v39 = vunpack.i.h.bf16 %v6676_v50 }
 0x70a   :  { %v2816_v27 = vsel %vm1021_vm7, %v6892_v41, -inf }
 0x70c   :  { %v3400_v59 = vpop.permute.xlu0 %3399 }
 0x70d   :  { %v1888_v13 = vpop.xlane.xlu1 %1887 }
 0x70e   :  { %4967 = vrcp.f32 %v1888_v13  ;;  %v4538_v13 = vld [vmem:[%s7861_s11 + $0x168] sm:$0xff] }
 0x70f   :  { %v6860_v31 = vpop.f32.mrf.mxu3  ;;  %v2744_v17 = vpop.f32.mrf.mxu2 }
 0x714   :  { %v4968_v3 = vpop.eup %4967  ;;  %v6898_v34 = vpop.permute.xlu0 %3393 }
 0x715   :  { %v1930_v35 = vmul.f32 %v4968_v3, %v6760_v4  ;;  %v1891_v36 = vpop.xlane.xlu1 %1890  ;;  %v4527_v4 = vld [vmem:[%s7861_s11 + $0x110] sm:$0xff] }
 0x716   :  { %4969 = vrcp.f32 %v1891_v36 }
 0x717   :  { %4486 = vmatmul.msk.f32.vlgmr.msrb.gmra.mxu1 %vm1021_vm7, %v1930_v35  ;;  %v2549_v38 = vpop.f32.mrf.mxu3  ;;  %v2747_v3 = vpop.f32.mrf.mxu2  ;;  %v4532_v35 = vld [vmem:[%s7861_s11 + $0x138] sm:$0xff] }
 0x718   :  { %4622 = vmatpush.xpose.msk.msrb.mxu1 %vm740_vm2, %v3400_v59  ;;  %v6878_v15 = vadd.f32 %v4527_v4, %v2549_v38  ;;  %v6915_v59 = vadd.f32 %v4538_v13, %v2747_v3  ;;  %v4748_v13 = vunpack.i.h.bf16 %v6858_v40 }
 0x71a   :  { %v2795_v5 = vsel %vm1021_vm7, %v6878_v15, -inf }
 0x71c   :  { %v4970_v61 = vpop.eup %4969 }
 0x71d   :  { %v1931_v52 = vmul.f32 %v4970_v61, %v6771_v0  ;;  %v2828_v61 = vsel %vm1021_vm7, %v6915_v59, -inf }
 0x71f   :  { %4487 = vmatmul.msk.f32.gmra.mxu1 %vm1021_vm7, %v1931_v52  ;;  %v6869_v53 = vpop.f32.mrf.mxu3  ;;  %v6925_v52 = vpop.permute.xlu0 %3477 }
 0x727   :  { %4509 = vmatmul.msk.f32.vlgmr.msra.gmra.mxu1 %vm740_vm2, %v1221_v48  ;;  %v2627_v24 = vpop.f32.mrf.mxu3 }
 0x728   :  { %v6880_v0 = vadd.f32 %v4531_v62, %v2627_v24  ;;  %v8034_v62 = vld [vmem:[#allocation50_spill] sm:$0xff]  ;;  %v4742_v24 = vunpack.i.l.bf16 %v6676_v50  ;;  %v6948_v50 = vpop.permute.xlu2 %3475 }
 0x72a   :  { %v2807_v33 = vsel %vm1021_vm7, %v6880_v0, -inf }
 0x72b   :  { %2808 = vmax.xlane.f32.xlu0 %v2807_v33 }
 0x72d   :  { %v1455_v28 = vpop.permute.xlu1 %1454  ;;  %2796 = vmax.xlane.f32.xlu1 %v2795_v5 }
 0x72e   :  { %4444 = vmatpush.xpose.msk.msrb.mxu0 %vm740_vm2, %v1455_v28 }
 0x72f   :  { %4510 = vmatmul.msk.f32.gmra.mxu1 %vm740_vm2, %v1224_v37  ;;  %v2630_v36 = vpop.f32.mrf.mxu3  ;;  %v8035_v37 = vld [vmem:[#allocation46_spill] sm:$0xff] }
 0x730   :  { %v6921_v38 = vadd.f32 %v4532_v35, %v2630_v36  ;;  %v8036_v35 = vld [vmem:[#allocation49_spill] sm:$0xff]  ;;  %v6957_v36 = vpop.permute.xlu2 %3434 }
 0x732   :  { %4445 = vmatpush.xpose.msk.msrb.mxu0 %vm740_vm2, %v6664_v32 }
 0x733   :  { %2817 = vmax.xlane.f32.xlu0 %v2816_v27  ;;  %v4747_v27 = vunpack.i.l.bf16 %v6858_v40 }
 0x735   :  { %v1605_v32 = vpop.permute.xlu1 %1604  ;;  %4446 = vmatmul.msk.f32.vlgmr.msrb.gmra.mxu0 %vm740_vm2, %v6835_v43  ;;  %2805 = vmax.xlane.f32.xlu1 %v2804_v55  ;;  %v2810_v43 = vsel %vm1021_vm7, %v6921_v38, -inf }
 0x736   :  { %4460 = vmatpush.xpose.msk.msra.mxu0 %vm740_vm2, %v1611_v16  ;;  %v8033_v16 = vld [vmem:[#allocation44_spill] sm:$0xff] }
 0x737   :  { %4511 = vmatmul.msk.f32.gmra.mxu1 %vm740_vm2, %v8033_v16  ;;  %v8037_v16 = vld [vmem:[#allocation35_spill] sm:$0xff] }
 0x73a   :  { %4461 = vmatpush.xpose.msk.msra.mxu0 %vm740_vm2, %v6672_v58  ;;  %v4537_v58 = vld [vmem:[%s7861_s11 + $0x160] sm:$0xff] }
 0x73b   :  { %2829 = vmax.xlane.f32.xlu0 %v2828_v61  ;;  %v6937_v33 = vadd.f32 %v4537_v58, %v2744_v17  ;;  %v8038_v58 = vld [vmem:[#allocation41_spill] sm:$0xff] }
 0x73d   :  { %v4731_v42 = vpop.permute.xlu1 %4730  ;;  %4447 = vmatmul.msk.f32.gmra.mxu0 %vm740_vm2, %v6668_v56  ;;  %2811 = vmax.xlane.f32.xlu1 %v2810_v43  ;;  %v6940_v56 = vpop.permute.xlu0 %3473  ;;  %v2825_v23 = vsel %vm1021_vm7, %v6937_v33, -inf }
 0x73e   :  { %v4732_v4 = vunpack.i.l.bf16 %v4731_v42  ;;  %v4733_v48 = vunpack.i.h.bf16 %v4731_v42 }
 0x73f   :  { %4512 = vmatmul.msk.f32.gmra.mxu1 %vm740_vm2, %v8034_v62 }
 0x740   :  { %2991 = vmatpush.msrb.mxu2 %v4732_v4 }
 0x742   :  { %2992 = vmatpush.msrb.mxu2 %v4733_v48 }
 0x744   :  { %3061 = vmatpush.msra.mxu2 %v4742_v24  ;;  %v1337_v24 = vpop.f32.mrf.mxu0 }
 0x745   :  { %v4736_v5 = vpop.permute.xlu1 %4735  ;;  %4462 = vmatmul.msk.f32.vlgmr.msra.gmra.mxu0 %vm740_vm2, %v1605_v32  ;;  %2826 = vmax.xlane.f32.xlu1 %v2825_v23  ;;  %v3511_v55 = vpop.permute.xlu0 %3510  ;;  %v8039_v23 = vld [vmem:[#allocation40_spill] sm:$0xff] }
 0x746   :  { %3062 = vmatpush.msra.mxu2 %v4743_v39  ;;  %v4737_v28 = vunpack.i.l.bf16 %v4736_v5  ;;  %v4738_v17 = vunpack.i.h.bf16 %v4736_v5 }
 0x747   :  { %4513 = vmatmul.msk.f32.gmra.mxu1 %vm740_vm2, %v8035_v37  ;;  %v8041_v37 = vld [vmem:[#allocation45_spill] sm:$0xff] }
 0x748   :  { %3026 = vmatpush.msrb.mxu3 %v4737_v28  ;;  %v8040_v28 = vld [vmem:[#allocation48_spill] sm:$0xff] }
 0x74a   :  { %3027 = vmatpush.msrb.mxu3 %v4738_v17  ;;  %v8042_v17 = vld [vmem:[#allocation51_spill] sm:$0xff] }
 0x74c   :  { %3096 = vmatpush.msra.mxu3 %v4747_v27  ;;  %v1340_v39 = vpop.f32.mrf.mxu0  ;;  %v8043_v27 = vld [vmem:[#allocation39_spill] sm:$0xff] }
 0x74d   :  { %v6951_v3 = vpop.permute.xlu1 %4755  ;;  %4463 = vmatmul.msk.f32.gmra.mxu0 %vm740_vm2, %v6852_v8  ;;  %v3517_v8 = vpop.permute.xlu2 %3516 }
 0x74e   :  { %3097 = vmatpush.msra.mxu3 %v4748_v13  ;;  %v8044_v13 = vld [vmem:[#allocation42_spill] sm:$0xff] }
 0x74f   :  { %4514 = vmatmul.msk.f32.gmra.mxu1 %vm740_vm2, %v8036_v35 }
 0x755   :  { %v6959_v32 = vpop.permute.xlu1 %4760 }
 0x757   :  { %4515 = vmatmul.msk.f32.gmra.mxu1 %vm740_vm2, %v8037_v16  ;;  %v2791_v61 = vpop.xlane.xlu0 %2790 }
 0x758   :  { %v2837_v40 = vsub.f32 %v6822_v60, %v2791_v61 }
 0x75a   :  { %v2853_v43 = vmul.f32 1.442695, %v2837_v40 }
 0x75c   :  { %4971 = vpow2.f32 %v2853_v43 }
 0x75d   :  { %v3398_v42 = vpop.permute.xlu1 %3397 }
 0x75e   :  { %4623 = vmatpush.xpose.msk.msrb.mxu1 %vm740_vm2, %v3398_v42  ;;  %v4428_v42 = vld [vmem:[%s7861_s11 + $0x80] sm:$0xff] }
 0x75f   :  { %4516 = vmatmul.msk.f32.gmra.mxu1 %vm740_vm2, %v8038_v58 }
 0x762   :  { %4634 = vmatpush.xpose.msk.msra.mxu1 %vm740_vm2, %v3517_v8  ;;  %v4972_v4 = vpop.eup %4971 }
 0x763   :  { %v2885_v62 = vsel %vm1021_vm7, %v4972_v4, 0.0 }
 0x764   :  { %2886 = vadd.xlane.f32.xlu1 %v2885_v62 }
 0x765   :  { %v6969_v48 = vpop.permute.xlu1 %3436 }
 0x767   :  { %4517 = vmatmul.msk.f32.gmra.mxu1 %vm740_vm2, %v1337_v24 }
 0x76d   :  { %v6972_v60 = vpop.permute.xlu1 %3471 }
 0x76f   :  { %4518 = vmatmul.msk.f32.gmra.mxu1 %vm740_vm2, %v1340_v39  ;;  %v4528_v39 = vld [vmem:[%s7861_s11 + $0x118] sm:$0xff] }
 0x775   :  { %v3515_v5 = vpop.permute.xlu1 %3514 }
 0x776   :  { %4635 = vmatpush.xpose.msk.msra.mxu1 %vm740_vm2, %v3515_v5  ;;  %v7019_v5 = vadd.f32 %v4528_v39, %v6869_v53  ;;  %v4535_v53 = vld [vmem:[%s7861_s11 + $0x150] sm:$0xff]  ;;  %v4752_v39 = vunpack.i.l.bf16 %v6681_v14 }
 0x777   :  { %4519 = vmatmul.msk.f32.gmra.mxu1 %vm740_vm2, %v8039_v23 }
 0x77f   :  { %4520 = vmatmul.msk.f32.gmra.mxu1 %vm740_vm2, %v8040_v28  ;;  %v2705_v28 = vpop.f32.mrf.mxu3 }
 0x787   :  { %4521 = vmatmul.msk.f32.gmra.mxu1 %vm740_vm2, %v8041_v37 }
 0x78f   :  { %4522 = vmatmul.msk.f32.gmra.mxu1 %vm740_vm2, %v8042_v17 }
 0x797   :  { %4523 = vmatmul.msk.f32.gmra.mxu1 %vm740_vm2, %v8043_v27 }
 0x79f   :  { %4524 = vmatmul.msk.f32.gmra.mxu1 %vm740_vm2, %v8044_v13  ;;  %v7038_v13 = vadd.f32 %v4535_v53, %v2705_v28  ;;  %v4753_v28 = vunpack.i.h.bf16 %v6681_v14 }
 0x7a0   :  { %v2797_v35 = vpop.xlane.xlu1 %2796 }
 0x7a1   :  { %v2839_v16 = vsub.f32 %v6878_v15, %v2797_v35  ;;  %v2708_v35 = vpop.f32.mrf.mxu3 }
 0x7a3   :  { %v2857_v61 = vmul.f32 1.442695, %v2839_v16  ;;  %v2819_v16 = vsel %vm1021_vm7, %v7038_v13, -inf }
 0x7a5   :  { %4973 = vpow2.f32 %v2857_v61 }
 0x7a7   :  { %4624 = vmatmul.msk.f32.vlgmr.msrb.gmra.mxu1 %vm740_vm2, %v6898_v34  ;;  %v4526_v34 = vld [vmem:[%s7861_s11 + $0x108] sm:$0xff] }
 0x7a8   :  { %v7009_v62 = vadd.f32 %v4526_v34, %v6828_v21  ;;  %v4533_v21 = vld [vmem:[%s7861_s11 + $0x140] sm:$0xff]  ;;  %v4539_v34 = vld [vmem:[%s7861_s11 + $0x170] sm:$0xff] }
 0x7a9   :  { %v7029_v37 = vadd.f32 %v4533_v21, %v6862_v30  ;;  %v4536_v30 = vld [vmem:[%s7861_s11 + $0x158] sm:$0xff]  ;;  %v2803_v21 = vpop.xlane.xlu0 %2802 }
 0x7aa   :  { %v2792_v24 = vsel %vm1021_vm7, %v7009_v62, -inf }
 0x7ab   :  { %v6991_v40 = vpop.eup %4973  ;;  %v2813_v17 = vsel %vm1021_vm7, %v7029_v37, -inf }
 0x7ac   :  { %v2891_v43 = vsel %vm1021_vm7, %v6991_v40, 0.0 }
 0x7ad   :  { %2892 = vadd.xlane.f32.xlu0 %v2891_v43  ;;  %v7045_v43 = vadd.f32 %v4536_v30, %v2708_v35 }
 0x7af   :  { %4625 = vmatmul.msk.f32.gmra.mxu1 %vm740_vm2, %v6703_v20  ;;  %v7011_v20 = vpop.xlane.xlu1 %2805 }
 0x7b2   :  { %v1481_v8 = vpop.f32.mrf.mxu0 }
 0x7b3   :  { %v7000_v15 = vadd.f32 %v4428_v42, %v1481_v8  ;;  %v2783_v42 = vpop.f32.mrf.mxu3  ;;  %v2822_v8 = vsel %vm1021_vm7, %v7045_v43, -inf }
 0x7b5   :  { %v1760_v58 = vsel %vm1021_vm7, %v7000_v15, -inf }
 0x7b6   :  { %1761 = vmax.xlane.f32.xlu2 %v1760_v58 }
 0x7b7   :  { %4636 = vmatmul.msk.f32.vlgmr.msra.gmra.mxu1 %vm740_vm2, %v3511_v55  ;;  %v7021_v23 = vpop.xlane.xlu1 %2811  ;;  %v2798_v55 = vsel %vm1021_vm7, %v7019_v5, -inf }
 0x7bb   :  { %v2786_v35 = vpop.f32.mrf.mxu3 }
 0x7be   :  { %2793 = vmax.xlane.f32.xlu2 %v2792_v24 }
 0x7bf   :  { %v7036_v27 = vpop.xlane.xlu1 %2826 }
 0x7c6   :  { %2799 = vmax.xlane.f32.xlu2 %v2798_v55  ;;  %v7053_v55 = vadd.f32 %v4539_v34, %v2783_v42 }
 0x7c8   :  { %v2831_v53 = vsel %vm1021_vm7, %v7053_v55, -inf }
 0x7ce   :  { %2814 = vmax.xlane.f32.xlu2 %v2813_v17  ;;  %v2841_v17 = vsub.f32 %v6837_v10, %v2803_v21 }
 0x7d6   :  { %2820 = vmax.xlane.f32.xlu2 %v2819_v16  ;;  %v2861_v16 = vmul.f32 1.442695, %v2841_v17 }
 0x7d7   :  { %v2887_v61 = vpop.xlane.xlu1 %2886 }
 0x7d8   :  { %4975 = vrcp.f32 %v2887_v61  ;;  %v2809_v61 = vpop.xlane.xlu0 %2808 }
 0x7d9   :  { %4977 = vpow2.f32 %v2861_v16  ;;  %v2843_v14 = vsub.f32 %v6880_v0, %v2809_v61 }
 0x7db   :  { %v2865_v42 = vmul.f32 1.442695, %v2843_v14  ;;  %v2842_v14 = vsub.f32 %v6896_v45, %v7011_v20 }
 0x7dd   :  { %4979 = vpow2.f32 %v2865_v42  ;;  %v2863_v42 = vmul.f32 1.442695, %v2842_v14 }
 0x7de   :  { %v4976_v58 = vpop.eup %4975  ;;  %2823 = vmax.xlane.f32.xlu2 %v2822_v8 }
 0x7df   :  { %v2949_v24 = vmul.f32 %v4976_v58, %v4972_v4  ;;  %v4540_v4 = vld [vmem:[%s7861_s11 + $0x178] sm:$0xff]  ;;  %v7068_v8 = vpop.eup %4977 }
 0x7e0   :  { %v7063_v30 = vadd.f32 %v4540_v4, %v2786_v35  ;;  %v2897_v58 = vsel %vm1021_vm7, %v7068_v8, 0.0  ;;  %v4758_v35 = vunpack.i.h.bf16 %v6951_v3 }
 0x7e1   :  { %4573 = vmatmul.msk.f32.vlgmr.msrb.gmra.mxu2 %vm1021_vm7, %v2949_v24 }
 0x7e2   :  { %3131 = vmatpush.msrb.mxu2 %v4752_v39  ;;  %v2834_v10 = vsel %vm1021_vm7, %v7063_v30, -inf  ;;  %v2818_v39 = vpop.xlane.xlu0 %2817 }
 0x7e3   :  { %v7072_v34 = vpop.eup %4979 }
 0x7e4   :  { %3132 = vmatpush.msrb.mxu2 %v4753_v28  ;;  %v2903_v24 = vsel %vm1021_vm7, %v7072_v34, 0.0 }
 0x7e6   :  { %2832 = vmax.xlane.f32.xlu2 %v2831_v53  ;;  %v4757_v53 = vunpack.i.l.bf16 %v6951_v3  ;;  %v2844_v3 = vsub.f32 %v6921_v38, %v7021_v23 }
 0x7ea   :  { %v7076_v0 = vpop.xlane.xlu0 %2829 }
 0x7ee   :  { %2835 = vmax.xlane.f32.xlu2 %v2834_v10 }
 0x7f6   :  { %2898 = vadd.xlane.f32.xlu2 %v2897_v58 }
 0x7fe   :  { %2904 = vadd.xlane.f32.xlu2 %v2903_v24 }
 0x820   :  { %v2893_v21 = vpop.xlane.xlu0 %2892 }
 0x821   :  { %4981 = vrcp.f32 %v2893_v21 }
 0x827   :  { %v4982_v28 = vpop.eup %4981 }
 0x828   :  { %v2951_v17 = vmul.f32 %v4982_v28, %v6991_v40 }
 0x829   :  { %v7080_v4 = vpop.xlane.xlu2 %1761 }
 0x82a   :  { %4575 = vmatmul.msk.f32.vlgmr.msrb.gmra.mxu3 %vm1021_vm7, %v2951_v17 }
 0x82b   :  { %3166 = vmatpush.msrb.mxu3 %v4757_v53 }
 0x82d   :  { %3167 = vmatpush.msrb.mxu3 %v4758_v35 }
 0x831   :  { %v2794_v16 = vpop.xlane.xlu2 %2793 }
 0x832   :  { %v2838_v61 = vsub.f32 %v7009_v62, %v2794_v16  ;;  %v2867_v62 = vmul.f32 1.442695, %v2844_v3 }
 0x834   :  { %v2855_v10 = vmul.f32 1.442695, %v2838_v61 }
 0x836   :  { %4983 = vpow2.f32 %v2855_v10 }
 0x837   :  { %4985 = vpow2.f32 %v2863_v42 }
 0x839   :  { %v2800_v40 = vpop.xlane.xlu2 %2799 }
 0x83a   :  { %v2840_v58 = vsub.f32 %v7019_v5, %v2800_v40  ;;  %v2846_v5 = vsub.f32 %v6892_v41, %v2818_v39  ;;  %v2849_v41 = vsub.f32 %v6937_v33, %v7036_v27  ;;  %v2850_v33 = vsub.f32 %v6915_v59, %v7076_v0 }
 0x83c   :  { %v7088_v24 = vpop.eup %4983  ;;  %v2859_v21 = vmul.f32 1.442695, %v2840_v58  ;;  %v2871_v16 = vmul.f32 1.442695, %v2846_v5  ;;  %v2877_v58 = vmul.f32 1.442695, %v2849_v41 }
 0x83d   :  { %v2888_v28 = vsel %vm1021_vm7, %v7088_v24, 0.0  ;;  %v7094_v20 = vpop.eup %4985  ;;  %v8046_v41 = vld [vmem:[#allocation10_spill] sm:$0xff] }
 0x83e   :  { %4987 = vpow2.f32 %v2859_v21  ;;  %2889 = vadd.xlane.f32.xlu1 %v2888_v28  ;;  %v2900_v23 = vsel %vm1021_vm7, %v7094_v20, 0.0 }
 0x83f   :  { %4989 = vpow2.f32 %v2867_v62 }
 0x841   :  { %v2815_v45 = vpop.xlane.xlu2 %2814 }
 0x842   :  { %v2845_v17 = vsub.f32 %v7029_v37, %v2815_v45 }
 0x844   :  { %v7097_v53 = vpop.eup %4987  ;;  %v2869_v35 = vmul.f32 1.442695, %v2845_v17  ;;  %v2879_v17 = vmul.f32 1.442695, %v2850_v33 }
 0x845   :  { %v2894_v38 = vsel %vm1021_vm7, %v7097_v53, 0.0  ;;  %v7104_v14 = vpop.eup %4989 }
 0x846   :  { %4991 = vpow2.f32 %v2869_v35  ;;  %2895 = vadd.xlane.f32.xlu0 %v2894_v38  ;;  %2901 = vadd.xlane.f32.xlu1 %v2900_v23  ;;  %v2906_v40 = vsel %vm1021_vm7, %v7104_v14, 0.0  ;;  %v7140_v23 = vpop.f32.mrf.mxu1 }
 0x847   :  { %4993 = vpow2.f32 %v2871_v16  ;;  %v8045_v16 = vld [vmem:[#allocation19_spill] sm:$0xff] }
 0x849   :  { %v2821_v61 = vpop.xlane.xlu2 %2820 }
 0x84a   :  { %v2847_v37 = vsub.f32 %v7038_v13, %v2821_v61 }
 0x84c   :  { %v7107_v10 = vpop.eup %4991  ;;  %v2873_v39 = vmul.f32 1.442695, %v2847_v37 }
 0x84d   :  { %v2909_v42 = vsel %vm1021_vm7, %v7107_v10, 0.0  ;;  %v7115_v21 = vpop.eup %4993 }
 0x84e   :  { %4995 = vpow2.f32 %v2873_v39  ;;  %2910 = vadd.xlane.f32.xlu0 %v2909_v42  ;;  %2907 = vadd.xlane.f32.xlu1 %v2906_v40  ;;  %v2912_v45 = vsel %vm1021_vm7, %v7115_v21, 0.0  ;;  %v7144_v61 = vpop.f32.mrf.mxu1  ;;  %v8048_v40 = vld [vmem:[#allocation14_spill] sm:$0xff] }
 0x84f   :  { %4997 = vpow2.f32 %v2877_v58 }
 0x851   :  { %v2824_v3 = vpop.xlane.xlu2 %2823 }
 0x852   :  { %v2848_v13 = vsub.f32 %v7045_v43, %v2824_v3 }
 0x854   :  { %v7118_v28 = vpop.eup %4995  ;;  %v2875_v27 = vmul.f32 1.442695, %v2848_v13 }
 0x855   :  { %v2915_v62 = vsel %vm1021_vm7, %v7118_v28, 0.0  ;;  %v7126_v5 = vpop.eup %4997 }
 0x856   :  { %4999 = vpow2.f32 %v2875_v27  ;;  %2916 = vadd.xlane.f32.xlu1 %v2915_v62  ;;  %2913 = vadd.xlane.f32.xlu0 %v2912_v45  ;;  %v2921_v59 = vsel %vm1021_vm7, %v7126_v5, 0.0  ;;  %v7150_v37 = vpop.f32.mrf.mxu1  ;;  %v4429_v62 = vld [vmem:[%s7861_s11 + $0x88] sm:$0xff] }
 0x857   :  { %5001 = vpow2.f32 %v2879_v17 }
 0x859   :  { %v2833_v42 = vpop.xlane.xlu2 %2832 }
 0x85a   :  { %v2851_v58 = vsub.f32 %v7053_v55, %v2833_v42  ;;  %v1484_v55 = vpop.f32.mrf.mxu0 }
 0x85b   :  { %v7176_v17 = vadd.f32 %v4429_v62, %v1484_v55 }
 0x85c   :  { %v7128_v43 = vpop.eup %4999  ;;  %v2881_v3 = vmul.f32 1.442695, %v2851_v58  ;;  %v8050_v58 = vld [vmem:[#allocation22_spill] sm:$0xff] }
 0x85d   :  { %v2918_v0 = vsel %vm1021_vm7, %v7128_v43, 0.0  ;;  %v7134_v35 = vpop.eup %5001 }
 0x85e   :  { %2922 = vadd.xlane.f32.xlu1 %v2921_v59  ;;  %2919 = vadd.xlane.f32.xlu2 %v2918_v0  ;;  %v2924_v38 = vsel %vm1021_vm7, %v7134_v35, 0.0  ;;  %v7156_v39 = vpop.f32.mrf.mxu1  ;;  %5003 = vpow2.f32 %v2881_v3  ;;  %v1763_v0 = vsel %vm1021_vm7, %v7176_v17, -inf }
 0x861   :  { %v2836_v59 = vpop.xlane.xlu2 %2835 }
 0x864   :  { %v7167_v33 = vpop.eup %5003 }
 0x865   :  { %v2927_v27 = vsel %vm1021_vm7, %v7167_v33, 0.0 }
 0x866   :  { %2925 = vadd.xlane.f32.xlu1 %v2924_v38  ;;  %v2852_v38 = vsub.f32 %v7063_v30, %v2836_v59 }
 0x869   :  { %v2899_v42 = vpop.xlane.xlu2 %2898 }
 0x86a   :  { %3555 = vrot.lane.b32.xlu0 %v5875_v49, %s5118_s28  ;;  %v8047_v49 = vld [vmem:[#allocation15_spill] sm:$0xff] }
 0x872   :  { %3553 = vrot.lane.b32.xlu0 %v8045_v16, %s5118_s28  ;;  %v2883_v16 = vmul.f32 1.442695, %v2852_v38  ;;  %v8051_v38 = vld [vmem:[#allocation17_spill] sm:$0xff] }
 0x874   :  { %5005 = vpow2.f32 %v2883_v16 }
 0x876   :  { %3551 = vrot.lane.b32.xlu2 %v5913_v6, %s5118_s28  ;;  %v7161_v6 = vpop.f32.mrf.mxu1 }
 0x87a   :  { %3549 = vrot.lane.b32.xlu0 %v5900_v63, %s5118_s28  ;;  %v8049_v63 = vld [vmem:[#allocation12_spill] sm:$0xff] }
 0x87e   :  { %v7165_v13 = vpop.f32.mrf.mxu1 }
 0x87f   :  { %3512 = vrot.lane.b32.xlu1 %v8046_v41, %s5118_s28 }
 0x882   :  { %3594 = vrot.lane.b32.xlu0 %v8047_v49, %s5118_s28 }
 0x886   :  { %v7174_v45 = vpop.f32.mrf.mxu1 }
 0x88a   :  { %3592 = vrot.lane.b32.xlu0 %v8048_v40, %s5118_s28  ;;  %v7183_v40 = vpop.eup %5005 }
 0x88b   :  { %v2930_v55 = vsel %vm1021_vm7, %v7183_v40, 0.0 }
 0x88e   :  { %v7181_v41 = vpop.f32.mrf.mxu1 }
 0x892   :  { %3588 = vrot.lane.b32.xlu0 %v8049_v63, %s5118_s28 }
 0x896   :  { %v7187_v63 = vpop.f32.mrf.mxu1 }
 0x89f   :  { %2928 = vadd.xlane.f32.xlu2 %v2927_v27 }
 0x8a9   :  { %1764 = vmax.xlane.f32.xlu1 %v1763_v0  ;;  %v2905_v0 = vpop.xlane.xlu2 %2904 }
 0x8b1   :  { %v2890_v49 = vpop.xlane.xlu1 %2889 }
 0x8b2   :  { %5007 = vrcp.f32 %v2890_v49 }
 0x8b3   :  { %5009 = vrcp.f32 %v2899_v42 }
 0x8b7   :  { %3627 = vrot.lane.b32.xlu2 %v8050_v58, %s5118_s28  ;;  %v8052_v58 = vld [vmem:[#allocation21_spill] sm:$0xff] }
 0x8b8   :  { %v5008_v3 = vpop.eup %5007 }
 0x8b9   :  { %v2902_v27 = vpop.xlane.xlu1 %2901  ;;  %v2896_v62 = vpop.xlane.xlu0 %2895  ;;  %v2950_v30 = vmul.f32 %v5008_v3, %v7088_v24  ;;  %v4762_v24 = vunpack.i.l.bf16 %v6959_v32 }
 0x8ba   :  { %5011 = vrcp.f32 %v2896_v62  ;;  %v5010_v59 = vpop.eup %5009  ;;  %v7200_v62 = vpop.f32.mrf.mxu1 }
 0x8bb   :  { %4574 = vmatmul.msk.f32.gmra.mxu2 %vm1021_vm7, %v2950_v30  ;;  %5013 = vrcp.f32 %v2902_v27  ;;  %v2953_v49 = vmul.f32 %v5010_v59, %v7068_v8 }
 0x8bc   :  { %2931 = vadd.xlane.f32.xlu0 %v2930_v55  ;;  %5015 = vrcp.f32 %v2905_v0  ;;  %v4763_v55 = vunpack.i.h.bf16 %v6959_v32  ;;  %v4767_v32 = vunpack.i.l.bf16 %v6692_v11 }
 0x8bf   :  { %3629 = vrot.lane.b32.xlu2 %v8051_v38, %s5118_s28  ;;  %v8053_v38 = vld [vmem:[#allocation24_spill] sm:$0xff] }
 0x8c0   :  { %v5012_v16 = vpop.eup %5011 }
 0x8c1   :  { %v2908_v42 = vpop.xlane.xlu1 %2907  ;;  %v2952_v3 = vmul.f32 %v5012_v16, %v7097_v53  ;;  %v2911_v30 = vpop.xlane.xlu0 %2910  ;;  %v4768_v16 = vunpack.i.h.bf16 %v6692_v11 }
 0x8c2   :  { %3590 = vrot.lane.b32.xlu1 %v8052_v58, %s5118_s28  ;;  %v5014_v8 = vpop.eup %5013  ;;  %5017 = vrcp.f32 %v2911_v30 }
 0x8c3   :  { %4577 = vmatmul.msk.f32.vlgmr.msra.gmra.mxu2 %vm1021_vm7, %v2953_v49  ;;  %4576 = vmatmul.msk.f32.gmra.mxu3 %vm1021_vm7, %v2952_v3  ;;  %v5016_v27 = vpop.eup %5015  ;;  %5019 = vrcp.f32 %v2908_v42  ;;  %v2954_v53 = vmul.f32 %v5014_v8, %v7094_v20  ;;  %v7215_v49 = vpop.f32.mrf.mxu1  ;;  %v8056_v3 = vld [vmem:[#allocation25_spill] sm:$0xff] }
 0x8c4   :  { %3201 = vmatpush.msra.mxu2 %v4762_v24  ;;  %v2955_v0 = vmul.f32 %v5016_v27, %v7072_v34  ;;  %8054 = vst [vmem:[#allocation47_spill] sm:$0xff] %v7215_v49  ;;  %v8055_v34 = vld [vmem:[#allocation20_spill] sm:$0xff] }
 0x8c6   :  { %3202 = vmatpush.msra.mxu2 %v4763_v55 }
 0x8c7   :  { %4770 = vrot.lane.b32.xlu2 %v8028_v47, %s5117_s6 }
 0x8c8   :  { %v5018_v42 = vpop.eup %5017 }
 0x8c9   :  { %v2917_v59 = vpop.xlane.xlu1 %2916  ;;  %v2914_v24 = vpop.xlane.xlu0 %2913  ;;  %v2957_v20 = vmul.f32 %v5018_v42, %v7107_v10  ;;  %v8058_v10 = vld [vmem:[#allocation16_spill] sm:$0xff] }
 0x8ca   :  { %3672 = vrot.lane.b32.xlu1 %v8053_v38, %s5118_s28  ;;  %v5020_v58 = vpop.eup %5019  ;;  %5021 = vrcp.f32 %v2914_v24 }
 0x8cb   :  { %4578 = vmatmul.msk.f32.gmra.mxu2 %vm1021_vm7, %v2954_v53  ;;  %4579 = vmatmul.msk.f32.vlgmr.msra.gmra.mxu3 %vm1021_vm7, %v2955_v0  ;;  %5023 = vrcp.f32 %v2917_v59  ;;  %v2956_v30 = vmul.f32 %v5020_v58, %v7104_v14  ;;  %v7227_v53 = vpop.f32.mrf.mxu1  ;;  %v8059_v0 = vld [vmem:[#allocation23_spill] sm:$0xff] }
 0x8cc   :  { %3236 = vmatpush.msra.mxu3 %v4767_v32  ;;  %8057 = vst [vmem:[#allocation52_spill] sm:$0xff] %v7227_v53 }
 0x8ce   :  { %3237 = vmatpush.msra.mxu3 %v4768_v16 }
 0x8d0   :  { %3633 = vrot.lane.b32.xlu0 %v8055_v34, %s5118_s28  ;;  %v5022_v55 = vpop.eup %5021 }
 0x8d1   :  { %v2923_v11 = vpop.xlane.xlu1 %2922  ;;  %v2920_v8 = vpop.xlane.xlu2 %2919  ;;  %v2958_v14 = vmul.f32 %v5022_v55, %v7115_v21 }
 0x8d2   :  { %3670 = vrot.lane.b32.xlu1 %v8056_v3, %s5118_s28  ;;  %v5024_v27 = vpop.eup %5023  ;;  %5025 = vrcp.f32 %v2923_v11 }
 0x8d3   :  { %4581 = vmatmul.msk.f32.vlgmr.msrb.gmra.mxu2 %vm1021_vm7, %v2957_v20  ;;  %4580 = vmatmul.msk.f32.gmra.mxu3 %vm1021_vm7, %v2956_v30  ;;  %5027 = vrcp.f32 %v2920_v8  ;;  %v2959_v59 = vmul.f32 %v5024_v27, %v7118_v28  ;;  %v7241_v16 = vpop.f32.mrf.mxu1  ;;  %v1637_v20 = vpop.f32.mrf.mxu0 }
 0x8d4   :  { %4626 = vmatpush.xpose.msk.msrb.mxu2 %vm740_vm2, %v6711_v18  ;;  %8060 = vst [vmem:[#allocation31_spill] sm:$0xff] %v7241_v16 }
 0x8d8   :  { %4627 = vmatpush.xpose.msk.msrb.mxu2 %vm740_vm2, %v6969_v48  ;;  %3631 = vrot.lane.b32.xlu0 %v8058_v10, %s5118_s28  ;;  %v5026_v38 = vpop.eup %5025 }
 0x8d9   :  { %v2926_v18 = vpop.xlane.xlu1 %2925  ;;  %v5028_v32 = vpop.eup %5027  ;;  %v2961_v21 = vmul.f32 %v5026_v38, %v7126_v5 }
 0x8da   :  { %3666 = vrot.lane.b32.xlu1 %v8059_v0, %s5118_s28  ;;  %5029 = vrcp.f32 %v2926_v18  ;;  %v2960_v28 = vmul.f32 %v5028_v32, %v7128_v43  ;;  %v3552_v55 = vpop.permute.xlu2 %3551 }
 0x8db   :  { %4582 = vmatmul.msk.f32.gmra.mxu2 %vm1021_vm7, %v2958_v14  ;;  %4583 = vmatmul.msk.f32.vlgmr.msrb.gmra.mxu3 %vm1021_vm7, %v2959_v59  ;;  %v7252_v58 = vpop.f32.mrf.mxu1 }
 0x8dc   :  { %4630 = vmatpush.xpose.msk.msrb.mxu3 %vm740_vm2, %v6925_v52  ;;  %v3556_v48 = vpop.permute.xlu0 %3555  ;;  %8061 = vst [vmem:[#allocation2_spill] sm:$0xff] %v7252_v58 }
 0x8e0   :  { %4631 = vmatpush.xpose.msk.msrb.mxu3 %vm740_vm2, %v6948_v50  ;;  %v5030_v52 = vpop.eup %5029  ;;  %v1808_v50 = vsub.f32 %v7000_v15, %v7080_v4 }
 0x8e1   :  { %v2962_v42 = vmul.f32 %v5030_v52, %v7134_v35  ;;  %v4436_v35 = vld [vmem:[%s7861_s11 + $0xc0] sm:$0xff] }
 0x8e2   :  { %v1824_v43 = vmul.f32 1.442695, %v1808_v50  ;;  %v7269_v15 = vadd.f32 %v4436_v35, %v1637_v20 }
 0x8e3   :  { %4585 = vmatmul.msk.f32.vlgmr.msra.gmra.mxu2 %vm1021_vm7, %v2961_v21  ;;  %4584 = vmatmul.msk.f32.gmra.mxu3 %vm1021_vm7, %v2960_v28  ;;  %v7260_v34 = vpop.f32.mrf.mxu1 }
 0x8e4   :  { %4638 = vmatpush.xpose.msk.msra.mxu2 %vm740_vm2, %v3556_v48  ;;  %v3554_v24 = vpop.permute.xlu0 %3553  ;;  %8062 = vst [vmem:[#allocation38_spill] sm:$0xff] %v7260_v34  ;;  %5031 = vpow2.f32 %v1824_v43 }
 0x8e8   :  { %4639 = vmatpush.xpose.msk.msra.mxu2 %vm740_vm2, %v3554_v24 }
 0x8ea   :  { %v7267_v3 = vpop.eup %5031 }
 0x8eb   :  { %4586 = vmatmul.msk.f32.gmra.mxu2 %vm1021_vm7, %v2962_v42  ;;  %v7271_v4 = vpop.f32.mrf.mxu1  ;;  %v1640_v42 = vpop.f32.mrf.mxu0 }
 0x8ec   :  { %8063 = vst [vmem:[#allocation13_spill] sm:$0xff] %v7271_v4  ;;  %v3550_v30 = vpop.permute.xlu0 %3549 }
 0x8f1   :  { %v3513_v5 = vpop.permute.xlu1 %3512 }
 0x8f2   :  { %4637 = vmatmul.msk.f32.gmra.mxu1 %vm740_vm2, %v3513_v5 }
 0x8f3   :  { %4628 = vmatmul.msk.f32.vlgmr.msrb.gmra.mxu2 %vm740_vm2, %v6723_v19  ;;  %v1856_v19 = vsel %vm1021_vm7, %v7267_v3, 0.0  ;;  %v7278_v11 = vpop.f32.mrf.mxu1 }
 0x8f4   :  { %8064 = vst [vmem:[#allocation34_spill] sm:$0xff] %v7278_v11  ;;  %v3595_v10 = vpop.permute.xlu0 %3594 }
 0x8fb   :  { %4629 = vmatmul.msk.f32.gmra.mxu2 %vm740_vm2, %v6957_v36  ;;  %v1784_v36 = vsel %vm1021_vm7, %v7269_v15, -inf  ;;  %v7281_v27 = vpop.f32.mrf.mxu1 }
 0x8fc   :  { %8065 = vst [vmem:[#allocation29_spill] sm:$0xff] %v7281_v27  ;;  %v3593_v38 = vpop.permute.xlu0 %3592 }
 0x902   :  { %1857 = vadd.xlane.f32.xlu0 %v1856_v19 }
 0x903   :  { %4640 = vmatmul.msk.f32.vlgmr.msra.gmra.mxu2 %vm740_vm2, %v3550_v30  ;;  %v7287_v48 = vpop.f32.mrf.mxu1  ;;  %v4606_v30 = vld [vmem:[%s7861_s11 + $0x180] sm:$0xff] }
 0x904   :  { %1785 = vmax.xlane.f32.xlu1 %v1784_v36  ;;  %8066 = vst [vmem:[#allocation30_spill] sm:$0xff] %v7287_v48  ;;  %v3589_v52 = vpop.permute.xlu0 %3588 }
 0x90b   :  { %4641 = vmatmul.msk.f32.gmra.mxu2 %vm740_vm2, %v3552_v55  ;;  %v7296_v28 = vpop.f32.mrf.mxu1 }
 0x90c   :  { %8067 = vst [vmem:[#allocation26_spill] sm:$0xff] %v7296_v28  ;;  %v4607_v28 = vld [vmem:[%s7861_s11 + $0x188] sm:$0xff] }
 0x912   :  { %v2929_v8 = vpop.xlane.xlu2 %2928 }
 0x913   :  { %5033 = vrcp.f32 %v2929_v8  ;;  %v3426_v36 = vpop.f32.mrf.mxu1 }
 0x914   :  { %v7310_v55 = vadd.f32 %v4606_v30, %v3426_v36 }
 0x916   :  { %3668 = vrot.lane.b32.xlu0 %v8019_v44, %s5118_s28 }
 0x919   :  { %v5034_v14 = vpop.eup %5033 }
 0x91a   :  { %v2963_v59 = vmul.f32 %v5034_v14, %v7167_v33  ;;  %v3628_v0 = vpop.permute.xlu2 %3627  ;;  %v7312_v14 = vpop.f32.mrf.mxu2 }
 0x91c   :  { %v1765_v18 = vpop.xlane.xlu1 %1764  ;;  %4587 = vmatmul.msk.f32.vlgmr.msra.gmra.mxu3 %vm1021_vm7, %v2963_v59 }
 0x91d   :  { %v1809_v32 = vsub.f32 %v7176_v17, %v1765_v18  ;;  %4642 = vmatpush.xpose.msk.msra.mxu3 %vm740_vm2, %v3595_v10  ;;  %4775 = vrot.lane.b32.xlu1 %v6588_v12, %s5117_s6  ;;  %v4437_v17 = vld [vmem:[%s7861_s11 + $0xc8] sm:$0xff]  ;;  %v3705_v18 = vsel %vm1021_vm7, %v7310_v55, -inf }
 0x91e   :  { %v7303_v43 = vadd.f32 %v4437_v17, %v1640_v42 }
 0x91f   :  { %v1826_v21 = vmul.f32 1.442695, %v1809_v32 }
 0x920   :  { %v1787_v19 = vsel %vm1021_vm7, %v7303_v43, -inf }
 0x921   :  { %5035 = vpow2.f32 %v1826_v21  ;;  %4643 = vmatpush.xpose.msk.msra.mxu3 %vm740_vm2, %v3593_v38 }
 0x922   :  { %v3630_v44 = vpop.permute.xlu2 %3629 }
 0x927   :  { %v7294_v33 = vpop.eup %5035 }
 0x928   :  { %v1859_v24 = vsel %vm1021_vm7, %v7294_v33, 0.0 }
 0x929   :  { %1860 = vadd.xlane.f32.xlu2 %v1859_v24 }
 0x92a   :  { %v4771_v50 = vpop.permute.xlu2 %4770 }
 0x92b   :  { %v4772_v5 = vunpack.i.l.bf16 %v4771_v50  ;;  %v4773_v35 = vunpack.i.h.bf16 %v4771_v50 }
 0x92d   :  { %1964 = vmatpush.msrb.mxu0 %v4772_v5 }
 0x92f   :  { %1965 = vmatpush.msrb.mxu0 %v4773_v35  ;;  %v2932_v20 = vpop.xlane.xlu0 %2931 }
 0x930   :  { %5037 = vrcp.f32 %v2932_v20 }
 0x931   :  { %1788 = vmax.xlane.f32.xlu2 %v1787_v19 }
 0x934   :  { %v3591_v8 = vpop.permute.xlu1 %3590 }
 0x936   :  { %v5038_v10 = vpop.eup %5037 }
 0x937   :  { %v2964_v59 = vmul.f32 %v5038_v10, %v7183_v40  ;;  %v7348_v10 = vpop.f32.mrf.mxu3 }
 0x939   :  { %3706 = vmax.xlane.f32.xlu2 %v3705_v18  ;;  %4588 = vmatmul.msk.f32.gmra.mxu3 %vm1021_vm7, %v2964_v59 }
 0x93c   :  { %v3673_v38 = vpop.permute.xlu1 %3672 }
 0x93d   :  { %4650 = vmatpush.xpose.msk.msrb.mxu2 %vm740_vm2, %v3673_v38 }
 0x93e   :  { %v7319_v32 = vpop.f32.mrf.mxu2 }
 0x941   :  { %4632 = vmatmul.msk.f32.vlgmr.msrb.gmra.mxu3 %vm740_vm2, %v6972_v60 }
 0x942   :  { %v3634_v21 = vpop.permute.xlu0 %3633 }
 0x943   :  { %4646 = vmatpush.xpose.msk.msrb.mxu1 %vm740_vm2, %v3634_v21 }
 0x944   :  { %v3671_v24 = vpop.permute.xlu1 %3670 }
 0x945   :  { %4651 = vmatpush.xpose.msk.msrb.mxu2 %vm740_vm2, %v3671_v24 }
 0x946   :  { %v7325_v40 = vpop.f32.mrf.mxu2  ;;  %v7363_v24 = vpop.f32.mrf.mxu3 }
 0x949   :  { %4633 = vmatmul.msk.f32.gmra.mxu3 %vm740_vm2, %v6940_v56 }
 0x94a   :  { %v3632_v17 = vpop.permute.xlu0 %3631 }
 0x94b   :  { %4647 = vmatpush.xpose.msk.msrb.mxu1 %vm740_vm2, %v3632_v17 }
 0x94c   :  { %v3667_v42 = vpop.permute.xlu1 %3666 }
 0x94d   :  { %4652 = vmatmul.msk.f32.vlgmr.msrb.gmra.mxu2 %vm740_vm2, %v3667_v42 }
 0x94e   :  { %v7331_v50 = vpop.f32.mrf.mxu2  ;;  %4648 = vmatmul.msk.f32.vlgmr.msrb.gmra.mxu1 %vm740_vm2, %v3628_v0 }
 0x951   :  { %4644 = vmatmul.msk.f32.vlgmr.msra.gmra.mxu3 %vm740_vm2, %v3589_v52 }
 0x956   :  { %v7335_v60 = vpop.f32.mrf.mxu2  ;;  %4649 = vmatmul.msk.f32.gmra.mxu1 %vm740_vm2, %v3630_v44  ;;  %v4609_v44 = vld [vmem:[%s7861_s11 + $0x198] sm:$0xff] }
 0x959   :  { %4645 = vmatmul.msk.f32.gmra.mxu3 %vm740_vm2, %v3591_v8 }
 0x95e   :  { %v7339_v5 = vpop.f32.mrf.mxu2 }
 0x966   :  { %v7341_v56 = vpop.f32.mrf.mxu2 }
 0x96e   :  { %v7343_v35 = vpop.f32.mrf.mxu2 }
 0x975   :  { %v1858_v20 = vpop.xlane.xlu0 %1857 }
 0x976   :  { %5039 = vrcp.f32 %v1858_v20  ;;  %v7345_v19 = vpop.f32.mrf.mxu2 }
 0x977   :  { %v1786_v30 = vpop.xlane.xlu1 %1785 }
 0x978   :  { %v1816_v0 = vsub.f32 %v7269_v15, %v1786_v30 }
 0x97a   :  { %v1840_v52 = vmul.f32 1.442695, %v1816_v0 }
 0x97c   :  { %v5040_v36 = vpop.eup %5039  ;;  %5041 = vpow2.f32 %v1840_v52 }
 0x97d   :  { %v1920_v8 = vmul.f32 %v5040_v36, %v7267_v3  ;;  %v7366_v3 = vpop.f32.mrf.mxu3 }
 0x97e   :  { %v3468_v59 = vpop.f32.mrf.mxu2 }
 0x97f   :  { %v7354_v18 = vadd.f32 %v4609_v44, %v3468_v59  ;;  %4476 = vmatmul.msk.f32.vlgmr.msrb.gmra.mxu0 %vm1021_vm7, %v1920_v8 }
 0x981   :  { %v3714_v38 = vsel %vm1021_vm7, %v7354_v18, -inf }
 0x982   :  { %v7359_v15 = vpop.eup %5041  ;;  %3715 = vmax.xlane.f32.xlu1 %v3714_v38 }
 0x983   :  { %v1880_v21 = vsel %vm1021_vm7, %v7359_v15, 0.0 }
 0x984   :  { %1881 = vadd.xlane.f32.xlu0 %v1880_v21 }
 0x985   :  { %v7368_v0 = vpop.f32.mrf.mxu3 }
 0x986   :  { %v7413_v11 = vpop.f32.mrf.mxu2 }
 0x988   :  { %v3669_v17 = vpop.permute.xlu0 %3668 }
 0x989   :  { %4653 = vmatmul.msk.f32.gmra.mxu2 %vm740_vm2, %v3669_v17 }
 0x98d   :  { %v7372_v36 = vpop.f32.mrf.mxu3 }
 0x98f   :  { %v4776_v42 = vpop.permute.xlu1 %4775 }
 0x990   :  { %v4777_v20 = vunpack.i.l.bf16 %v4776_v42  ;;  %v4778_v30 = vunpack.i.h.bf16 %v4776_v42 }
 0x992   :  { %2112 = vmatpush.msra.mxu0 %v4777_v20 }
 0x994   :  { %2113 = vmatpush.msra.mxu0 %v4778_v30  ;;  %v3429_v30 = vpop.f32.mrf.mxu1 }
 0x995   :  { %v7377_v17 = vpop.f32.mrf.mxu3 }
 0x998   :  { %4780 = vrot.lane.b32.xlu0 %v8028_v47, %s5118_s28 }
 0x99c   :  { %v1861_v52 = vpop.xlane.xlu2 %1860 }
 0x99d   :  { %5043 = vrcp.f32 %v1861_v52 }
 0x9a3   :  { %v5044_v44 = vpop.eup %5043 }
 0x9a4   :  { %v1789_v8 = vpop.xlane.xlu2 %1788  ;;  %v1921_v59 = vmul.f32 %v5044_v44, %v7294_v33  ;;  %v3430_v33 = vadd.f32 %v4607_v28, %v3429_v30  ;;  %v4613_v28 = vld [vmem:[%s7861_s11 + $0x1b8] sm:$0xff] }
 0x9a5   :  { %v1817_v38 = vsub.f32 %v7303_v43, %v1789_v8  ;;  %v7384_v43 = vpop.f32.mrf.mxu3 }
 0x9a6   :  { %4477 = vmatmul.msk.f32.gmra.mxu0 %vm1021_vm7, %v1921_v59  ;;  %v3708_v8 = vsel %vm1021_vm7, %v3430_v33, -inf  ;;  %v4612_v59 = vld [vmem:[%s7861_s11 + $0x1b0] sm:$0xff] }
 0x9a7   :  { %v1842_v21 = vmul.f32 1.442695, %v1817_v38  ;;  %v3543_v38 = vpop.f32.mrf.mxu1 }
 0x9a9   :  { %5045 = vpow2.f32 %v1842_v21 }
 0x9ac   :  { %v3707_v42 = vpop.xlane.xlu2 %3706 }
 0x9ad   :  { %v3753_v47 = vsub.f32 %v7310_v55, %v3707_v42  ;;  %v3544_v55 = vadd.f32 %v4612_v59, %v3543_v38  ;;  %v4611_v38 = vld [vmem:[%s7861_s11 + $0x1a8] sm:$0xff] }
 0x9af   :  { %v5046_v20 = vpop.eup %5045  ;;  %v3769_v44 = vmul.f32 1.442695, %v3753_v47  ;;  %v3546_v30 = vpop.f32.mrf.mxu1 }
 0x9b0   :  { %v1883_v52 = vsel %vm1021_vm7, %v5046_v20, 0.0 }
 0x9b1   :  { %1884 = vadd.xlane.f32.xlu2 %v1883_v52  ;;  %5047 = vpow2.f32 %v3769_v44  ;;  %v3723_v52 = vsel %vm1021_vm7, %v3544_v55, -inf  ;;  %v7400_v44 = vadd.f32 %v4613_v28, %v3546_v30  ;;  %v4619_v30 = vld [vmem:[%s7861_s11 + $0x1e8] sm:$0xff] }
 0x9b3   :  { %v3726_v59 = vsel %vm1021_vm7, %v7400_v44, -inf }
 0x9b7   :  { %v7392_v42 = vpop.eup %5047 }
 0x9b8   :  { %v3801_v47 = vsel %vm1021_vm7, %v7392_v42, 0.0 }
 0x9b9   :  { %3709 = vmax.xlane.f32.xlu2 %v3708_v8 }
 0x9bc   :  { %v7390_v21 = vpop.f32.mrf.mxu3 }
 0x9c1   :  { %3724 = vmax.xlane.f32.xlu2 %v3723_v52 }
 0x9c2   :  { %3802 = vadd.xlane.f32.xlu0 %v3801_v47 }
 0x9c4   :  { %v7402_v8 = vpop.f32.mrf.mxu3 }
 0x9c9   :  { %3727 = vmax.xlane.f32.xlu2 %v3726_v59 }
 0x9cb   :  { %v7409_v48 = vpop.f32.mrf.mxu1 }
 0x9cc   :  { %v3507_v27 = vpop.f32.mrf.mxu3 }
 0x9cd   :  { %v7411_v52 = vadd.f32 %v4611_v38, %v3507_v27  ;;  %v4615_v27 = vld [vmem:[%s7861_s11 + $0x1c8] sm:$0xff]  ;;  %v3585_v38 = vpop.f32.mrf.mxu2 }
 0x9ce   :  { %v7427_v34 = vadd.f32 %v4615_v27, %v3585_v38 }
 0x9cf   :  { %v3720_v28 = vsel %vm1021_vm7, %v7411_v52, -inf }
 0x9d0   :  { %3721 = vmax.xlane.f32.xlu0 %v3720_v28  ;;  %v3732_v28 = vsel %vm1021_vm7, %v7427_v34, -inf }
 0x9d3   :  { %v3663_v47 = vpop.f32.mrf.mxu1 }
 0x9d4   :  { %v7420_v59 = vadd.f32 %v4619_v30, %v3663_v47 }
 0x9d6   :  { %v3744_v4 = vsel %vm1021_vm7, %v7420_v59, -inf }
 0x9d8   :  { %3745 = vmax.xlane.f32.xlu0 %v3744_v4  ;;  %v4492_v4 = vld [vmem:[%s7862_s9 + $0x8] sm:$0xff] }
 0x9d9   :  { %2297 = vmatpush.msrb.mxu0 %v4492_v4 }
 0x9e0   :  { %3733 = vmax.xlane.f32.xlu0 %v3732_v28 }
 0x9e1   :  { %4785 = vrot.lane.b32.xlu2 %v8009_v51, %s5118_s28 }
 0x9f7   :  { %v1882_v30 = vpop.xlane.xlu0 %1881 }
 0x9f8   :  { %5049 = vrcp.f32 %v1882_v30 }
 0x9fe   :  { %v5050_v47 = vpop.eup %5049 }
 0x9ff   :  { %v1928_v58 = vmul.f32 %v5050_v47, %v7359_v15  ;;  %v1967_v47 = vpop.f32.mrf.mxu0 }
 0xa01   :  { %4484 = vmatmul.msk.f32.vlgmr.msra.gmra.mxu0 %vm1021_vm7, %v1928_v58 }
 0xa0a   :  { %v4781_v16 = vpop.permute.xlu0 %4780 }
 0xa0b   :  { %v4782_v53 = vunpack.i.l.bf16 %v4781_v16  ;;  %v4783_v49 = vunpack.i.h.bf16 %v4781_v16 }
 0xa0d   :  { %3907 = vmatpush.msrb.mxu3 %v4782_v53 }
 0xa0f   :  { %3908 = vmatpush.msrb.mxu3 %v4783_v49 }
 0xa24   :  { %v1885_v27 = vpop.xlane.xlu2 %1884 }
 0xa25   :  { %5051 = vrcp.f32 %v1885_v27 }
 0xa2b   :  { %v5052_v51 = vpop.eup %5051 }
 0xa2c   :  { %v3710_v38 = vpop.xlane.xlu2 %3709  ;;  %v1929_v28 = vmul.f32 %v5052_v51, %v5046_v20  ;;  %v4608_v20 = vld [vmem:[%s7861_s11 + $0x190] sm:$0xff] }
 0xa2d   :  { %v3754_v30 = vsub.f32 %v3430_v33, %v3710_v38  ;;  %v7448_v51 = vadd.f32 %v4608_v20, %v7345_v19  ;;  %v1970_v38 = vpop.f32.mrf.mxu0 }
 0xa2e   :  { %4485 = vmatmul.msk.f32.gmra.mxu0 %vm1021_vm7, %v1929_v28 }
 0xa2f   :  { %v3771_v15 = vmul.f32 1.442695, %v3754_v30  ;;  %v3711_v19 = vsel %vm1021_vm7, %v7448_v51, -inf }
 0xa31   :  { %5053 = vpow2.f32 %v3771_v15 }
 0xa34   :  { %v3725_v58 = vpop.xlane.xlu2 %3724 }
 0xa35   :  { %v3759_v16 = vsub.f32 %v3544_v55, %v3725_v58  ;;  %v3803_v53 = vpop.xlane.xlu0 %3802  ;;  %v3621_v58 = vpop.f32.mrf.mxu3 }
 0xa36   :  { %5055 = vrcp.f32 %v3803_v53  ;;  %4493 = vmatmul.msk.f32.vlgmr.msrb.gmra.mxu0 %vm740_vm2, %v1967_v47  ;;  %v3716_v53 = vpop.xlane.xlu1 %3715 }
 0xa37   :  { %v7440_v49 = vpop.eup %5053  ;;  %v3781_v4 = vmul.f32 1.442695, %v3759_v16 }
 0xa38   :  { %v3804_v27 = vsel %vm1021_vm7, %v7440_v49, 0.0 }
 0xa39   :  { %5057 = vpow2.f32 %v3781_v4  ;;  %3805 = vadd.xlane.f32.xlu2 %v3804_v27 }
 0xa3c   :  { %v5056_v33 = vpop.eup %5055  ;;  %v3728_v55 = vpop.xlane.xlu2 %3727 }
 0xa3d   :  { %v3865_v28 = vmul.f32 %v5056_v33, %v7392_v42  ;;  %v3760_v30 = vsub.f32 %v7400_v44, %v3728_v55  ;;  %v4616_v42 = vld [vmem:[%s7861_s11 + $0x1d0] sm:$0xff]  ;;  %v3756_v33 = vsub.f32 %v7354_v18, %v3716_v53  ;;  %v3699_v18 = vpop.f32.mrf.mxu2 }
 0xa3e   :  { %4494 = vmatmul.msk.f32.gmra.mxu0 %vm740_vm2, %v1970_v38  ;;  %v7463_v44 = vadd.f32 %v4616_v42, %v3621_v58  ;;  %v3624_v58 = vpop.f32.mrf.mxu3 }
 0xa3f   :  { %v7453_v15 = vpop.eup %5057  ;;  %v3783_v47 = vmul.f32 1.442695, %v3760_v30  ;;  %4654 = vmatmul.msk.f32.vlgmr.msrb.gmra.mxu3 %vm1021_vm7, %v3865_v28  ;;  %v4617_v30 = vld [vmem:[%s7861_s11 + $0x1d8] sm:$0xff] }
 0xa40   :  { %v3819_v16 = vsel %vm1021_vm7, %v7453_v15, 0.0  ;;  %v3735_v38 = vsel %vm1021_vm7, %v7463_v44, -inf }
 0xa41   :  { %5059 = vpow2.f32 %v3783_v47  ;;  %3820 = vadd.xlane.f32.xlu1 %v3819_v16  ;;  %3712 = vmax.xlane.f32.xlu2 %v3711_v19  ;;  %v3775_v47 = vmul.f32 1.442695, %v3756_v33  ;;  %v7480_v16 = vadd.f32 %v4617_v30, %v3624_v58  ;;  %v8068_v33 = vld [vmem:[#allocation7_spill] sm:$0xff] }
 0xa43   :  { %5061 = vpow2.f32 %v3775_v47  ;;  %v3738_v42 = vsel %vm1021_vm7, %v7480_v16, -inf }
 0xa44   :  { %v4786_v4 = vpop.permute.xlu2 %4785 }
 0xa45   :  { %v4787_v27 = vunpack.i.l.bf16 %v4786_v4  ;;  %v4788_v55 = vunpack.i.h.bf16 %v4786_v4 }
 0xa46   :  { %4495 = vmatmul.msk.f32.gmra.mxu0 %vm740_vm2, %v7140_v23  ;;  %v4620_v23 = vld [vmem:[%s7861_s11 + $0x1f0] sm:$0xff] }
 0xa47   :  { %v7467_v20 = vpop.eup %5059  ;;  %3942 = vmatpush.msra.mxu1 %v4787_v27  ;;  %v7482_v19 = vadd.f32 %v4620_v23, %v3699_v18 }
 0xa48   :  { %v3822_v28 = vsel %vm1021_vm7, %v7467_v20, 0.0 }
 0xa49   :  { %3736 = vmax.xlane.f32.xlu1 %v3735_v38  ;;  %3943 = vmatpush.msra.mxu1 %v4788_v55  ;;  %v3747_v53 = vsel %vm1021_vm7, %v7482_v19, -inf  ;;  %v7490_v4 = vpop.eup %5061 }
 0xa4a   :  { %3823 = vadd.xlane.f32.xlu0 %v3822_v28  ;;  %v3810_v27 = vsel %vm1021_vm7, %v7490_v4, 0.0 }
 0xa4e   :  { %4496 = vmatmul.msk.f32.gmra.mxu0 %vm740_vm2, %v7144_v61 }
 0xa51   :  { %3739 = vmax.xlane.f32.xlu1 %v3738_v42 }
 0xa52   :  { %3748 = vmax.xlane.f32.xlu0 %v3747_v53 }
 0xa56   :  { %4497 = vmatmul.msk.f32.gmra.mxu0 %vm740_vm2, %v6798_v26  ;;  %v4610_v26 = vld [vmem:[%s7861_s11 + $0x1a0] sm:$0xff] }
 0xa57   :  { %v3505_v61 = vadd.f32 %v4610_v26, %v7402_v8  ;;  %v4614_v8 = vld [vmem:[%s7861_s11 + $0x1c0] sm:$0xff] }
 0xa58   :  { %v7522_v28 = vadd.f32 %v4614_v8, %v7413_v11 }
 0xa59   :  { %4790 = vrot.lane.b32.xlu2 %v8068_v33, %s5118_s28  ;;  %3811 = vadd.xlane.f32.xlu1 %v3810_v27  ;;  %v3717_v38 = vsel %vm1021_vm7, %v3505_v61, -inf }
 0xa5a   :  { %v3729_v30 = vsel %vm1021_vm7, %v7522_v28, -inf }
 0xa5e   :  { %4498 = vmatmul.msk.f32.gmra.mxu0 %vm740_vm2, %v6804_v9  ;;  %v4618_v9 = vld [vmem:[%s7861_s11 + $0x1e0] sm:$0xff] }
 0xa66   :  { %4499 = vmatmul.msk.f32.gmra.mxu0 %vm740_vm2, %v6843_v29  ;;  %v7514_v29 = vadd.f32 %v4618_v9, %v7409_v48 }
 0xa6e   :  { %4500 = vmatmul.msk.f32.gmra.mxu0 %vm740_vm2, %v6850_v25  ;;  %v3741_v25 = vsel %vm1021_vm7, %v7514_v29, -inf }
 0xa7e   :  { %v2115_v55 = vpop.f32.mrf.mxu0 }
 0xa7f   :  { %4501 = vmatmul.msk.f32.gmra.mxu0 %vm740_vm2, %v2115_v55 }
 0xa82   :  { %3718 = vmax.xlane.f32.xlu2 %v3717_v38 }
 0xa8a   :  { %3742 = vmax.xlane.f32.xlu2 %v3741_v25 }
 0xa92   :  { %3730 = vmax.xlane.f32.xlu2 %v3729_v30 }
 0xaab   :  { %v2118_v58 = vpop.f32.mrf.mxu0 }
 0xaac   :  { %v3806_v23 = vpop.xlane.xlu2 %3805  ;;  %4502 = vmatmul.msk.f32.gmra.mxu0 %vm740_vm2, %v2118_v58 }
 0xaad   :  { %5063 = vrcp.f32 %v3806_v23 }
 0xab3   :  { %v5064_v48 = vpop.eup %5063 }
 0xab4   :  { %v3713_v18 = vpop.xlane.xlu2 %3712  ;;  %4503 = vmatmul.msk.f32.gmra.mxu0 %vm740_vm2, %v7150_v37  ;;  %v3866_v47 = vmul.f32 %v5064_v48, %v7440_v49  ;;  %v4589_v49 = vld [vmem:[%s7862_s9 + $0x10] sm:$0xff] }
 0xab5   :  { %v3755_v42 = vsub.f32 %v7448_v51, %v3713_v18  ;;  %3310 = vmatpush.msra.mxu0 %v4589_v49 }
 0xab6   :  { %4655 = vmatmul.msk.f32.gmra.mxu3 %vm1021_vm7, %v3866_v47 }
 0xab7   :  { %v3773_v11 = vmul.f32 1.442695, %v3755_v42 }
 0xab9   :  { %5065 = vpow2.f32 %v3773_v11 }
 0xabc   :  { %v4791_v53 = vpop.permute.xlu2 %4790  ;;  %4504 = vmatmul.msk.f32.gmra.mxu0 %vm740_vm2, %v7156_v39  ;;  %v3722_v39 = vpop.xlane.xlu0 %3721 }
 0xabd   :  { %v4792_v27 = vunpack.i.l.bf16 %v4791_v53  ;;  %v4793_v26 = vunpack.i.h.bf16 %v4791_v53  ;;  %v3758_v9 = vsub.f32 %v7411_v52, %v3722_v39  ;;  %v3702_v39 = vpop.f32.mrf.mxu2 }
 0xabf   :  { %v7534_v33 = vpop.eup %5065  ;;  %3977 = vmatpush.msra.mxu2 %v4792_v27  ;;  %v3779_v8 = vmul.f32 1.442695, %v3758_v9 }
 0xac0   :  { %v3807_v37 = vsel %vm1021_vm7, %v7534_v33, 0.0 }
 0xac1   :  { %3978 = vmatpush.msra.mxu2 %v4793_v26  ;;  %3808 = vadd.xlane.f32.xlu2 %v3807_v37  ;;  %v7600_v26 = vpop.f32.mrf.mxu0 }
 0xac4   :  { %4505 = vmatmul.msk.f32.gmra.mxu0 %vm740_vm2, %v6809_v46  ;;  %v7551_v51 = vpop.xlane.xlu0 %3745  ;;  %v7555_v46 = vpop.xlane.xlu1 %3820 }
 0xac5   :  { %v3766_v49 = vsub.f32 %v7420_v59, %v7551_v51 }
 0xacc   :  { %4506 = vmatmul.msk.f32.gmra.mxu0 %vm740_vm2, %v6813_v57  ;;  %v3734_v57 = vpop.xlane.xlu0 %3733  ;;  %v3737_v55 = vpop.xlane.xlu1 %3736 }
 0xad4   :  { %4507 = vmatmul.msk.f32.gmra.mxu0 %vm740_vm2, %v6856_v22  ;;  %v3762_v22 = vsub.f32 %v7427_v34, %v3734_v57  ;;  %v3740_v34 = vpop.xlane.xlu1 %3739  ;;  %v3795_v57 = vmul.f32 1.442695, %v3766_v49 }
 0xad5   :  { %v3764_v52 = vsub.f32 %v7480_v16, %v3740_v34 }
 0xad6   :  { %v3787_v38 = vmul.f32 1.442695, %v3762_v22 }
 0xad8   :  { %5067 = vpow2.f32 %v3787_v38 }
 0xad9   :  { %4810 = vrot.lane.b32.xlu2 %v8029_v7, %s5118_s28 }
 0xadc   :  { %4508 = vmatmul.msk.f32.gmra.mxu0 %vm740_vm2, %v6860_v31 }
 0xade   :  { %v7568_v58 = vpop.eup %5067 }
 0xae4   :  { %4590 = vmatmul.msk.f32.vlgmr.msra.gmra.mxu0 %vm740_vm2, %v7312_v14  ;;  %v3763_v14 = vsub.f32 %v7463_v44, %v3737_v55 }
 0xae6   :  { %v3789_v30 = vmul.f32 1.442695, %v3763_v14 }
 0xaec   :  { %4591 = vmatmul.msk.f32.gmra.mxu0 %vm740_vm2, %v7319_v32 }
 0xaf4   :  { %4592 = vmatmul.msk.f32.gmra.mxu0 %vm740_vm2, %v7348_v10 }
 0xaf5   :  { %v3719_v7 = vpop.xlane.xlu2 %3718 }
 0xaf6   :  { %v3757_v31 = vsub.f32 %v3505_v61, %v3719_v7  ;;  %v3828_v61 = vsel %vm1021_vm7, %v7568_v58, 0.0 }
 0xaf8   :  { %v3777_v25 = vmul.f32 1.442695, %v3757_v31 }
 0xafa   :  { %5069 = vpow2.f32 %v3777_v25 }
 0xafb   :  { %5071 = vpow2.f32 %v3779_v8 }
 0xafc   :  { %4593 = vmatmul.msk.f32.gmra.mxu0 %vm740_vm2, %v7363_v24  ;;  %5073 = vpow2.f32 %v3789_v30  ;;  %v3791_v24 = vmul.f32 1.442695, %v3764_v52 }
 0xafd   :  { %v7566_v32 = vpop.xlane.xlu2 %3742 }
 0xafe   :  { %5075 = vpow2.f32 %v3791_v24 }
 0xb00   :  { %v7570_v10 = vpop.eup %5069 }
 0xb01   :  { %v3813_v44 = vsel %vm1021_vm7, %v7570_v10, 0.0  ;;  %v7579_v23 = vpop.eup %5071 }
 0xb02   :  { %3814 = vadd.xlane.f32.xlu1 %v3813_v44  ;;  %3829 = vadd.xlane.f32.xlu2 %v3828_v61  ;;  %v7581_v18 = vpop.eup %5073  ;;  %v3816_v42 = vsel %vm1021_vm7, %v7579_v23, 0.0 }
 0xb03   :  { %v3831_v11 = vsel %vm1021_vm7, %v7581_v18, 0.0 }
 0xb04   :  { %4594 = vmatmul.msk.f32.gmra.mxu0 %vm740_vm2, %v7325_v40  ;;  %v7590_v40 = vpop.eup %5075 }
 0xb05   :  { %v3731_v48 = vpop.xlane.xlu2 %3730  ;;  %v3834_v27 = vsel %vm1021_vm7, %v7590_v40, 0.0 }
 0xb06   :  { %v3761_v47 = vsub.f32 %v7522_v28, %v3731_v48 }
 0xb08   :  { %v3785_v16 = vmul.f32 1.442695, %v3761_v47 }
 0xb0a   :  { %5077 = vpow2.f32 %v3785_v16  ;;  %3817 = vadd.xlane.f32.xlu1 %v3816_v42  ;;  %3832 = vadd.xlane.f32.xlu2 %v3831_v11 }
 0xb0c   :  { %4595 = vmatmul.msk.f32.gmra.mxu0 %vm740_vm2, %v7331_v50  ;;  %v7604_v50 = vpop.f32.mrf.mxu0 }
 0xb10   :  { %v7592_v53 = vpop.eup %5077 }
 0xb11   :  { %v3825_v28 = vsel %vm1021_vm7, %v7592_v53, 0.0 }
 0xb12   :  { %3826 = vadd.xlane.f32.xlu0 %v3825_v28  ;;  %3835 = vadd.xlane.f32.xlu2 %v3834_v27 }
 0xb14   :  { %4596 = vmatmul.msk.f32.gmra.mxu0 %vm740_vm2, %v7366_v3  ;;  %v7612_v37 = vpop.f32.mrf.mxu0 }
 0xb1c   :  { %4597 = vmatmul.msk.f32.gmra.mxu0 %vm740_vm2, %v7368_v0  ;;  %v7620_v3 = vpop.f32.mrf.mxu0 }
 0xb23   :  { %4795 = vrot.lane.b32.xlu1 %v8026_v54, %s5118_s28 }
 0xb24   :  { %4598 = vmatmul.msk.f32.gmra.mxu0 %vm740_vm2, %v7335_v60  ;;  %v3812_v60 = vpop.xlane.xlu1 %3811 }
 0xb26   :  { %4800 = vrot.lane.b32.xlu0 %v6588_v12, %s5118_s28 }
 0xb2a   :  { %4815 = vrot.lane.b32.xlu2 %v8017_v2, %s5118_s28  ;;  %v3824_v2 = vpop.xlane.xlu0 %3823 }
 0xb2c   :  { %4599 = vmatmul.msk.f32.gmra.mxu0 %vm740_vm2, %v7339_v5  ;;  %v7627_v5 = vpop.f32.mrf.mxu0 }
 0xb2e   :  { %4805 = vrot.lane.b32.xlu0 %v6719_v1, %s5118_s28 }
 0xb32   :  { %v3749_v55 = vpop.xlane.xlu0 %3748 }
 0xb34   :  { %v3809_v54 = vpop.xlane.xlu2 %3808  ;;  %4600 = vmatmul.msk.f32.gmra.mxu0 %vm740_vm2, %v7372_v36  ;;  %v7643_v59 = vpop.f32.mrf.mxu0 }
 0xb35   :  { %5079 = vrcp.f32 %v3809_v54 }
 0xb36   :  { %5081 = vrcp.f32 %v3812_v60 }
 0xb37   :  { %5083 = vpow2.f32 %v3795_v57 }
 0xb3b   :  { %v5080_v12 = vpop.eup %5079 }
 0xb3c   :  { %v3867_v0 = vmul.f32 %v5080_v12, %v7534_v33  ;;  %4601 = vmatmul.msk.f32.gmra.mxu0 %vm740_vm2, %v7377_v17  ;;  %v5082_v1 = vpop.eup %5081  ;;  %v4621_v33 = vld [vmem:[%s7861_s11 + $0x1f8] sm:$0xff]  ;;  %v3765_v17 = vsub.f32 %v7514_v29, %v7566_v32  ;;  %v7652_v7 = vpop.f32.mrf.mxu0 }
 0xb3d   :  { %v3868_v36 = vmul.f32 %v5082_v1, %v7490_v4  ;;  %v7641_v22 = vadd.f32 %v4621_v33, %v3702_v39  ;;  %v7650_v38 = vpop.eup %5083 }
 0xb3e   :  { %4656 = vmatmul.msk.f32.vlgmr.msra.gmra.mxu1 %vm1021_vm7, %v3867_v0  ;;  %v3793_v51 = vmul.f32 1.442695, %v3765_v17 }
 0xb3f   :  { %v3750_v4 = vsel %vm1021_vm7, %v7641_v22, -inf }
 0xb40   :  { %5085 = vpow2.f32 %v3793_v51  ;;  %v4670_v51 = vld [vmem:[%s7862_s9 + $0x18] sm:$0xff] }
 0xb44   :  { %4602 = vmatmul.msk.f32.gmra.mxu0 %vm740_vm2, %v7341_v56  ;;  %v3767_v56 = vsub.f32 %v7482_v19, %v3749_v55  ;;  %v3840_v19 = vsel %vm1021_vm7, %v7650_v38, 0.0  ;;  %v7664_v14 = vpop.f32.mrf.mxu0 }
 0xb46   :  { %4657 = vmatmul.msk.f32.gmra.mxu1 %vm1021_vm7, %v3868_v36  ;;  %v3797_v29 = vmul.f32 1.442695, %v3767_v56  ;;  %v7654_v31 = vpop.eup %5085 }
 0xb48   :  { %5087 = vpow2.f32 %v3797_v29 }
 0xb4c   :  { %4603 = vmatmul.msk.f32.gmra.mxu0 %vm740_vm2, %v7343_v35  ;;  %v3837_v35 = vsel %vm1021_vm7, %v7654_v31, 0.0 }
 0xb4d   :  { %3751 = vmax.xlane.f32.xlu1 %v3750_v4  ;;  %v3910_v4 = vpop.f32.mrf.mxu3 }
 0xb4e   :  { %v7662_v9 = vpop.eup %5087 }
 0xb4f   :  { %v3843_v25 = vsel %vm1021_vm7, %v7662_v9, 0.0 }
 0xb54   :  { %4604 = vmatmul.msk.f32.gmra.mxu0 %vm740_vm2, %v7384_v43  ;;  %v4811_v43 = vpop.permute.xlu2 %4810 }
 0xb55   :  { %3841 = vadd.xlane.f32.xlu1 %v3840_v19  ;;  %v4813_v12 = vunpack.i.h.bf16 %v4811_v43 }
 0xb58   :  { %3838 = vadd.xlane.f32.xlu0 %v3837_v35 }
 0xb5c   :  { %4605 = vmatmul.msk.f32.gmra.mxu0 %vm740_vm2, %v7390_v21 }
 0xb5d   :  { %3844 = vadd.xlane.f32.xlu1 %v3843_v25 }
 0xb75   :  { %v3815_v8 = vpop.xlane.xlu1 %3814  ;;  %v3830_v34 = vpop.xlane.xlu2 %3829 }
 0xb76   :  { %5089 = vrcp.f32 %v3815_v8 }
 0xb7c   :  { %v5090_v30 = vpop.eup %5089 }
 0xb7d   :  { %v3869_v32 = vmul.f32 %v5090_v30, %v7570_v10  ;;  %v3818_v52 = vpop.xlane.xlu1 %3817  ;;  %v3833_v24 = vpop.xlane.xlu2 %3832 }
 0xb7e   :  { %5091 = vrcp.f32 %v3818_v52 }
 0xb7f   :  { %4658 = vmatmul.msk.f32.vlgmr.msra.gmra.mxu2 %vm1021_vm7, %v3869_v32  ;;  %5093 = vrcp.f32 %v7555_v46 }
 0xb84   :  { %v5092_v44 = vpop.eup %5091 }
 0xb85   :  { %v3870_v61 = vmul.f32 %v5092_v44, %v7579_v23  ;;  %v3836_v21 = vpop.xlane.xlu2 %3835  ;;  %v3827_v48 = vpop.xlane.xlu0 %3826  ;;  %v4812_v23 = vunpack.i.l.bf16 %v4811_v43 }
 0xb86   :  { %5095 = vrcp.f32 %v3827_v48  ;;  %v5094_v16 = vpop.eup %5093 }
 0xb87   :  { %4659 = vmatmul.msk.f32.gmra.mxu2 %vm1021_vm7, %v3870_v61  ;;  %5097 = vrcp.f32 %v3824_v2  ;;  %v3871_v27 = vmul.f32 %v5094_v16, %v7453_v15 }
 0xb88   :  { %5099 = vrcp.f32 %v3830_v34 }
 0xb89   :  { %5101 = vrcp.f32 %v3833_v24 }
 0xb8a   :  { %5103 = vrcp.f32 %v3836_v21  ;;  %v7705_v21 = vpop.f32.mrf.mxu0 }
 0xb8c   :  { %v5096_v28 = vpop.eup %5095 }
 0xb8d   :  { %v4816_v60 = vpop.permute.xlu2 %4815  ;;  %v3873_v0 = vmul.f32 %v5096_v28, %v7592_v53  ;;  %v5098_v1 = vpop.eup %5097 }
 0xb8e   :  { %v4817_v2 = vunpack.i.l.bf16 %v4816_v60  ;;  %v4818_v15 = vunpack.i.h.bf16 %v4816_v60  ;;  %v5100_v49 = vpop.eup %5099  ;;  %v3872_v17 = vmul.f32 %v5098_v1, %v7467_v20  ;;  %v7732_v1 = vld [vmem:[%s7863_s10] ss:$0 sm:$0xff] }
 0xb8f   :  { %v5102_v33 = vpop.eup %5101  ;;  %v3874_v55 = vmul.f32 %v5100_v49, %v7568_v58 }
 0xb90   :  { %v3875_v53 = vmul.f32 %v5102_v33, %v7581_v18  ;;  %v5104_v20 = vpop.eup %5103  ;;  %v3913_v18 = vpop.f32.mrf.mxu3 }
 0xb91   :  { %v3876_v56 = vmul.f32 %v5104_v20, %v7590_v40 }
 0xb92   :  { %v7707_v48 = vpop.f32.mrf.mxu0 }
 0xb95   :  { %v4796_v47 = vpop.permute.xlu1 %4795 }
 0xb96   :  { %v4797_v42 = vunpack.i.l.bf16 %v4796_v47  ;;  %v4798_v10 = vunpack.i.h.bf16 %v4796_v47 }
 0xb98   :  { %v4801_v11 = vpop.permute.xlu0 %4800  ;;  %4012 = vmatpush.msra.mxu3 %v4797_v42 }
 0xb99   :  { %v4802_v54 = vunpack.i.l.bf16 %v4801_v11  ;;  %v4803_v46 = vunpack.i.h.bf16 %v4801_v11 }
 0xb9a   :  { %4013 = vmatpush.msra.mxu3 %v4798_v10  ;;  %v7709_v47 = vpop.f32.mrf.mxu0 }
 0xb9b   :  { %4660 = vmatmul.msk.f32.vlgmr.msra.gmra.mxu3 %vm1021_vm7, %v3871_v27  ;;  %4047 = vmatpush.msrb.mxu1 %v4802_v54 }
 0xb9c   :  { %4117 = vmatpush.msrb.mxu3 %v4812_v23 }
 0xb9d   :  { %4048 = vmatpush.msrb.mxu1 %v4803_v46 }
 0xb9e   :  { %4118 = vmatpush.msrb.mxu3 %v4813_v12  ;;  %4662 = vmatmul.msk.f32.vlgmr.msrb.gmra.mxu1 %vm1021_vm7, %v3873_v0  ;;  %v2413_v12 = vadd.f32 %v7161_v6, %v7600_v26 }
 0xb9f   :  { %4152 = vmatpush.msra.mxu1 %v4817_v2 }
 0xba0   :  { %v4806_v36 = vpop.permute.xlu0 %4805 }
 0xba1   :  { %v4807_v39 = vunpack.i.l.bf16 %v4806_v36  ;;  %4153 = vmatpush.msra.mxu1 %v4818_v15  ;;  %v4808_v57 = vunpack.i.h.bf16 %v4806_v36 }
 0xba2   :  { %v7711_v16 = vpop.f32.mrf.mxu0 }
 0xba3   :  { %4661 = vmatmul.msk.f32.gmra.mxu3 %vm1021_vm7, %v3872_v17  ;;  %4082 = vmatpush.msrb.mxu2 %v4807_v39  ;;  %v2416_v39 = vadd.f32 %v7165_v13, %v7604_v50 }
 0xba5   :  { %4083 = vmatpush.msrb.mxu2 %v4808_v57 }
 0xba6   :  { %4663 = vmatmul.msk.f32.gmra.mxu1 %vm1021_vm7, %v3874_v55  ;;  %4664 = vmatmul.msk.f32.vlgmr.msrb.gmra.mxu2 %vm1021_vm7, %v3875_v53 }
 0xba7   :  { %4226 = vmatpush.msra.mxu2 %v4670_v51  ;;  %v2419_v51 = vadd.f32 %v7174_v45, %v7612_v37  ;;  %v2422_v45 = vadd.f32 %v7181_v41, %v7620_v3 }
 0xbaa   :  { %v7714_v42 = vpop.f32.mrf.mxu0 }
 0xbae   :  { %4665 = vmatmul.msk.f32.gmra.mxu2 %vm1021_vm7, %v3876_v56 }
 0xbb2   :  { %v7717_v10 = vpop.f32.mrf.mxu0 }
 0xbb6   :  { %4671 = vmatmul.msk.f32.vlgmr.msra.gmra.mxu2 %vm740_vm2, %v3910_v4 }
 0xbbb   :  { %v3945_v19 = vpop.f32.mrf.mxu1 }
 0xbbe   :  { %4672 = vmatmul.msk.f32.gmra.mxu2 %vm740_vm2, %v3913_v18 }
 0xbc0   :  { %v3752_v58 = vpop.xlane.xlu1 %3751 }
 0xbc1   :  { %v3768_v29 = vsub.f32 %v7641_v22, %v3752_v58 }
 0xbc3   :  { %v3799_v35 = vmul.f32 1.442695, %v3768_v29  ;;  %v3948_v30 = vpop.f32.mrf.mxu1 }
 0xbc5   :  { %5105 = vpow2.f32 %v3799_v35 }
 0xbc6   :  { %4673 = vmatmul.msk.f32.gmra.mxu2 %vm740_vm2, %v3945_v19 }
 0xbc8   :  { %v3842_v25 = vpop.xlane.xlu1 %3841 }
 0xbcb   :  { %v7694_v43 = vpop.eup %5105  ;;  %v3839_v40 = vpop.xlane.xlu0 %3838 }
 0xbcc   :  { %5107 = vrcp.f32 %v3839_v40  ;;  %v3846_v8 = vsel %vm1021_vm7, %v7694_v43, 0.0  ;;  %v2425_v40 = vadd.f32 %v7187_v63, %v7627_v5 }
 0xbcd   :  { %3847 = vadd.xlane.f32.xlu1 %v3846_v8 }
 0xbce   :  { %4674 = vmatmul.msk.f32.gmra.mxu2 %vm740_vm2, %v3948_v30 }
 0xbd0   :  { %v3845_v34 = vpop.xlane.xlu1 %3844 }
 0xbd1   :  { %5109 = vrcp.f32 %v3845_v34 }
 0xbd2   :  { %v5108_v22 = vpop.eup %5107  ;;  %5111 = vrcp.f32 %v3842_v25 }
 0xbd3   :  { %v3877_v32 = vmul.f32 %v5108_v22, %v7654_v31 }
 0xbd5   :  { %4666 = vmatmul.msk.f32.vlgmr.msrb.gmra.mxu3 %vm1021_vm7, %v3877_v32 }
 0xbd7   :  { %v5110_v52 = vpop.eup %5109 }
 0xbd8   :  { %v5112_v44 = vpop.eup %5111  ;;  %v3879_v61 = vmul.f32 %v5110_v52, %v7662_v9  ;;  %v2428_v52 = vadd.f32 %v7200_v62, %v7643_v59 }
 0xbd9   :  { %v3878_v24 = vmul.f32 %v5112_v44, %v7650_v38  ;;  %v7719_v38 = vpop.f32.mrf.mxu0 }
 0xbda   :  { %4668 = vmatmul.msk.f32.vlgmr.msra.gmra.mxu1 %vm1021_vm7, %v3879_v61 }
 0xbdd   :  { %4667 = vmatmul.msk.f32.gmra.mxu3 %vm1021_vm7, %v3878_v24 }
 0xbe1   :  { %v7722_v28 = vpop.f32.mrf.mxu0 }
 0xbe9   :  { %v3312_v60 = vpop.f32.mrf.mxu0 }
 0xbea   :  { %v3360_v2 = vadd.f32 %v3312_v60, %v2413_v12 }
 0xbf1   :  { %v3315_v15 = vpop.f32.mrf.mxu0 }
 0xbf2   :  { %v3361_v6 = vadd.f32 %v3315_v15, %v2416_v39 }
 0xbf9   :  { %v3318_v53 = vpop.f32.mrf.mxu0 }
 0xbfa   :  { %v3362_v50 = vadd.f32 %v3318_v53, %v2419_v51 }
 0xc01   :  { %v3321_v58 = vpop.f32.mrf.mxu0 }
 0xc02   :  { %v3980_v31 = vpop.f32.mrf.mxu2  ;;  %v3363_v37 = vadd.f32 %v3321_v58, %v2422_v45  ;;  %v8074_v58 = vld [vmem:[#allocation13_spill] sm:$0xff] }
 0xc03   :  { %4675 = vmatmul.msk.f32.gmra.mxu2 %vm740_vm2, %v3980_v31  ;;  %v2446_v45 = vadd.f32 %v8074_v58, %v7711_v16  ;;  %v8075_v16 = vld [vmem:[#allocation34_spill] sm:$0xff] }
 0xc09   :  { %v3324_v3 = vpop.f32.mrf.mxu0 }
 0xc0a   :  { %v3983_v9 = vpop.f32.mrf.mxu2  ;;  %v3364_v8 = vadd.f32 %v3324_v3, %v2425_v40 }
 0xc0b   :  { %4676 = vmatmul.msk.f32.gmra.mxu2 %vm740_vm2, %v3983_v9  ;;  %v8069_v9 = vld [vmem:[#allocation47_spill] sm:$0xff] }
 0xc0c   :  { %v2431_v62 = vadd.f32 %v8069_v9, %v7652_v7  ;;  %v8071_v7 = vld [vmem:[#allocation31_spill] sm:$0xff] }
 0xc11   :  { %v3327_v32 = vpop.f32.mrf.mxu0 }
 0xc12   :  { %v3365_v44 = vadd.f32 %v3327_v32, %v2428_v52 }
 0xc19   :  { %v3330_v63 = vpop.f32.mrf.mxu0 }
 0xc1a   :  { %v3366_v59 = vadd.f32 %v3330_v63, %v2431_v62 }
 0xc1b   :  { %v4050_v23 = vpop.f32.mrf.mxu1 }
 0xc1e   :  { %v4015_v11 = vpop.f32.mrf.mxu3 }
 0xc1f   :  { %4677 = vmatmul.msk.f32.gmra.mxu2 %vm740_vm2, %v4015_v11 }
 0xc21   :  { %v3333_v5 = vpop.f32.mrf.mxu0 }
 0xc23   :  { %v4053_v0 = vpop.f32.mrf.mxu1 }
 0xc26   :  { %v4018_v27 = vpop.f32.mrf.mxu3 }
 0xc27   :  { %4678 = vmatmul.msk.f32.gmra.mxu2 %vm740_vm2, %v4018_v27 }
 0xc29   :  { %v4085_v54 = vpop.f32.mrf.mxu2 }
 0xc2f   :  { %4679 = vmatmul.msk.f32.gmra.mxu2 %vm740_vm2, %v4050_v23  ;;  %v8070_v23 = vld [vmem:[#allocation52_spill] sm:$0xff] }
 0xc30   :  { %v2434_v60 = vadd.f32 %v8070_v23, %v7664_v14 }
 0xc31   :  { %v4088_v46 = vpop.f32.mrf.mxu2 }
 0xc32   :  { %v3367_v12 = vadd.f32 %v3333_v5, %v2434_v60 }
 0xc37   :  { %4680 = vmatmul.msk.f32.gmra.mxu2 %vm740_vm2, %v4053_v0 }
 0xc39   :  { %v4228_v49 = vpop.f32.mrf.mxu2 }
 0xc3a   :  { %v4276_v36 = vadd.f32 %v4228_v49, %v3360_v2  ;;  %v2437_v49 = vadd.f32 %v8071_v7, %v7705_v21 }
 0xc3c   :  { %v4296_v33 = vadd.f32 %v7732_v1, %v4276_v36 }
 0xc3e   :  { %4312 = vst.msk [vmem:[%s7864_s12] sm:$0xff] %vm57_vm0, %v4296_v33 }
 0xc3f   :  { %4681 = vmatmul.msk.f32.gmra.mxu2 %vm740_vm2, %v4085_v54 }
 0xc40   :  { %v3848_v26 = vpop.xlane.xlu1 %3847 }
 0xc41   :  { %5113 = vrcp.f32 %v3848_v26  ;;  %v4231_v17 = vpop.f32.mrf.mxu2  ;;  %v8072_v26 = vld [vmem:[#allocation2_spill] sm:$0xff] }
 0xc42   :  { %v4277_v57 = vadd.f32 %v4231_v17, %v3361_v6  ;;  %v2440_v17 = vadd.f32 %v8072_v26, %v7707_v48 }
 0xc44   :  { %v4297_v55 = vadd.f32 %v7732_v1, %v4277_v57 }
 0xc46   :  { %4313 = vst.msk [vmem:[%s7864_s12 + $0x8] sm:$0xff] %vm57_vm0, %v4297_v55 }
 0xc47   :  { %v5114_v13 = vpop.eup %5113  ;;  %4682 = vmatmul.msk.f32.gmra.mxu2 %vm740_vm2, %v4088_v46  ;;  %v3336_v46 = vpop.f32.mrf.mxu0 }
 0xc48   :  { %v3880_v20 = vmul.f32 %v5114_v13, %v7694_v43  ;;  %v3368_v14 = vadd.f32 %v3336_v46, %v2437_v49  ;;  %v8073_v13 = vld [vmem:[#allocation38_spill] sm:$0xff] }
 0xc49   :  { %v4234_v56 = vpop.f32.mrf.mxu2 }
 0xc4a   :  { %v4278_v4 = vadd.f32 %v4234_v56, %v3362_v50  ;;  %4669 = vmatmul.msk.f32.gmra.mxu1 %vm1021_vm7, %v3880_v20  ;;  %v2443_v50 = vadd.f32 %v8073_v13, %v7709_v47 }
 0xc4c   :  { %v4298_v18 = vadd.f32 %v7732_v1, %v4278_v4 }
 0xc4e   :  { %4314 = vst.msk [vmem:[%s7864_s12 + $0x10] sm:$0xff] %vm57_vm0, %v4298_v18 }
 0xc4f   :  { %v3339_v36 = vpop.f32.mrf.mxu0 }
 0xc50   :  { %v3369_v21 = vadd.f32 %v3339_v36, %v2440_v17 }
 0xc51   :  { %v4237_v29 = vpop.f32.mrf.mxu2 }
 0xc52   :  { %v4279_v19 = vadd.f32 %v4237_v29, %v3363_v37 }
 0xc54   :  { %v4299_v35 = vadd.f32 %v7732_v1, %v4279_v19 }
 0xc56   :  { %4315 = vst.msk [vmem:[%s7864_s12 + $0x18] sm:$0xff] %vm57_vm0, %v4299_v35 }
 0xc57   :  { %v4155_v41 = vpop.f32.mrf.mxu1  ;;  %v3342_v55 = vpop.f32.mrf.mxu0 }
 0xc58   :  { %v4120_v25 = vpop.f32.mrf.mxu3  ;;  %v3370_v48 = vadd.f32 %v3342_v55, %v2443_v50 }
 0xc59   :  { %4683 = vmatmul.msk.f32.gmra.mxu2 %vm740_vm2, %v4120_v25 }
 0xc5f   :  { %v3345_v18 = vpop.f32.mrf.mxu0 }
 0xc60   :  { %v4123_v43 = vpop.f32.mrf.mxu3  ;;  %v3371_v37 = vadd.f32 %v3345_v18, %v2446_v45 }
 0xc61   :  { %4684 = vmatmul.msk.f32.gmra.mxu2 %vm740_vm2, %v4123_v43  ;;  %v2449_v43 = vadd.f32 %v8075_v16, %v7714_v42 }
 0xc67   :  { %v3348_v25 = vpop.f32.mrf.mxu0 }
 0xc69   :  { %4685 = vmatmul.msk.f32.gmra.mxu2 %vm740_vm2, %v4155_v41  ;;  %v3372_v41 = vadd.f32 %v3348_v25, %v2449_v43 }
 0xc86   :  { %v4240_v30 = vpop.f32.mrf.mxu2 }
 0xc87   :  { %v4280_v34 = vadd.f32 %v4240_v30, %v3364_v8  ;;  %v3351_v8 = vpop.f32.mrf.mxu0 }
 0xc89   :  { %v4300_v22 = vadd.f32 %v7732_v1, %v4280_v34  ;;  %v8076_v34 = vld [vmem:[#allocation29_spill] sm:$0xff] }
 0xc8b   :  { %4316 = vst.msk [vmem:[%s7864_s12 + $0x20] sm:$0xff] %vm57_vm0, %v4300_v22  ;;  %v2452_v22 = vadd.f32 %v8076_v34, %v7717_v10 }
 0xc8d   :  { %v3373_v32 = vadd.f32 %v3351_v8, %v2452_v22 }
 0xc8e   :  { %v4243_v61 = vpop.f32.mrf.mxu2 }
 0xc8f   :  { %v4281_v24 = vadd.f32 %v4243_v61, %v3365_v44  ;;  %v3354_v42 = vpop.f32.mrf.mxu0 }
 0xc91   :  { %v4301_v31 = vadd.f32 %v7732_v1, %v4281_v24  ;;  %v8077_v24 = vld [vmem:[#allocation30_spill] sm:$0xff] }
 0xc93   :  { %4317 = vst.msk [vmem:[%s7864_s12 + $0x28] sm:$0xff] %vm57_vm0, %v4301_v31  ;;  %v2455_v31 = vadd.f32 %v8077_v24, %v7719_v38 }
 0xc95   :  { %v3374_v10 = vadd.f32 %v3354_v42, %v2455_v31 }
 0xc97   :  { %v3357_v62 = vpop.f32.mrf.mxu0 }
 0xca2   :  { %v4246_v11 = vpop.f32.mrf.mxu2 }
 0xca3   :  { %v4282_v27 = vadd.f32 %v4246_v11, %v3366_v59  ;;  %v8078_v59 = vld [vmem:[#allocation26_spill] sm:$0xff] }
 0xca4   :  { %v2458_v11 = vadd.f32 %v8078_v59, %v7722_v28 }
 0xca5   :  { %v4302_v54 = vadd.f32 %v7732_v1, %v4282_v27 }
 0xca6   :  { %v3375_v38 = vadd.f32 %v3357_v62, %v2458_v11 }
 0xca7   :  { %4318 = vst.msk [vmem:[%s7864_s12 + $0x30] sm:$0xff] %vm57_vm0, %v4302_v54 }
 0xcaa   :  { %v4249_v0 = vpop.f32.mrf.mxu2 }
 0xcab   :  { %v4283_v2 = vadd.f32 %v4249_v0, %v3367_v12 }
 0xcad   :  { %v4303_v15 = vadd.f32 %v7732_v1, %v4283_v2 }
 0xcaf   :  { %4319 = vst.msk [vmem:[%s7864_s12 + $0x38] sm:$0xff] %vm57_vm0, %v4303_v15 }
 0xcb2   :  { %v4252_v33 = vpop.f32.mrf.mxu2 }
 0xcb3   :  { %v4284_v39 = vadd.f32 %v4252_v33, %v3368_v14 }
 0xcb5   :  { %v4304_v6 = vadd.f32 %v7732_v1, %v4284_v39 }
 0xcb7   :  { %4320 = vst.msk [vmem:[%s7864_s12 + $0x40] sm:$0xff] %vm57_vm0, %v4304_v6 }
 0xcba   :  { %v4255_v57 = vpop.f32.mrf.mxu2 }
 0xcbb   :  { %v4285_v53 = vadd.f32 %v4255_v57, %v3369_v21 }
 0xcbd   :  { %v4305_v51 = vadd.f32 %v7732_v1, %v4285_v53 }
 0xcbf   :  { %4321 = vst.msk [vmem:[%s7864_s12 + $0x48] sm:$0xff] %vm57_vm0, %v4305_v51 }
 0xcc2   :  { %v4258_v20 = vpop.f32.mrf.mxu2 }
 0xcc3   :  { %v4286_v56 = vadd.f32 %v4258_v20, %v3370_v48 }
 0xcc5   :  { %v4306_v4 = vadd.f32 %v7732_v1, %v4286_v56 }
 0xcc7   :  { %4322 = vst.msk [vmem:[%s7864_s12 + $0x50] sm:$0xff] %vm57_vm0, %v4306_v4  ;;  %v4158_v47 = vpop.f32.mrf.mxu1 }
 0xcc8   :  { %4686 = vmatmul.msk.f32.gmra.mxu2 %vm740_vm2, %v4158_v47 }
 0xcca   :  { %v4261_v29 = vpop.f32.mrf.mxu2 }
 0xccb   :  { %v4287_v19 = vadd.f32 %v4261_v29, %v3371_v37 }
 0xccd   :  { %v4307_v35 = vadd.f32 %v7732_v1, %v4287_v19 }
 0xccf   :  { %4323 = vst.msk [vmem:[%s7864_s12 + $0x58] sm:$0xff] %vm57_vm0, %v4307_v35 }
 0xcdc   :  { %v4264_v3 = vpop.f32.mrf.mxu2 }
 0xcdd   :  { %v4288_v40 = vadd.f32 %v4264_v3, %v3372_v41 }
 0xcdf   :  { %v4308_v30 = vadd.f32 %v7732_v1, %v4288_v40 }
 0xce1   :  { %4324 = vst.msk [vmem:[%s7864_s12 + $0x60] sm:$0xff] %vm57_vm0, %v4308_v30 }
 0xce4   :  { %v4267_v52 = vpop.f32.mrf.mxu2 }
 0xce5   :  { %v4289_v44 = vadd.f32 %v4267_v52, %v3373_v32 }
 0xce7   :  { %v4309_v61 = vadd.f32 %v7732_v1, %v4289_v44 }
 0xce9   :  { %4325 = vst.msk [vmem:[%s7864_s12 + $0x68] sm:$0xff] %vm57_vm0, %v4309_v61 }
 0xcec   :  { %v4270_v63 = vpop.f32.mrf.mxu2 }
 0xced   :  { %v4290_v5 = vadd.f32 %v4270_v63, %v3374_v10 }
 0xcef   :  { %v4310_v9 = vadd.f32 %v7732_v1, %v4290_v5 }
 0xcf1   :  { %4326 = vst.msk [vmem:[%s7864_s12 + $0x70] sm:$0xff] %vm57_vm0, %v4310_v9 }
 0xd4b   :  { %v4273_v27 = vpop.f32.mrf.mxu2 }
 0xd4c   :  { %v4291_v54 = vadd.f32 %v4273_v27, %v3375_v38 }
 0xd4e   :  { %v4311_v23 = vadd.f32 %v7732_v1, %v4291_v54 }
 0xd50   :  { %4327 = vst.msk [vmem:[%s7864_s12 + $0x78] sm:$0xff] %vm57_vm0, %v4311_v23 }

</bundles_post_ra>
